<compile_context>
chip_gen: v6e
topology: v6e:2x2x1
jax: 0.10.0
libtpu: 0.0.40
codegen_flags: <defaults>
</compile_context>

<pallas_src>
import functools

import jax
import jax.numpy as jnp
from jax import lax
from jax.experimental import pallas as pl
from jax.experimental.pallas import tpu as pltpu

EPS = 1e-5  # nn.GroupNorm default
VMEM_LIMIT = 32 * 1024 * 1024


def _tile(n, target):
    """Largest multiple-of-8 divisor of n that is <= target (else n itself)."""
    if n <= target:
        return n
    t = (min(target, n) // 8) * 8
    while t >= 8:
        if n % t == 0:
            return t
        t -= 8
    return n


# --------------------------- Pallas kernels ---------------------------------

def _conv3x3_kernel(xp_ref, w_ref, b_ref, o_ref, *, H, W):
    # xp_ref: (1, H+2, W+2, Cin) zero-padded f32 input
    # w_ref : (3, 3*Cin, Cout) bf16 ; b_ref: (1, Cout) f32 ; o_ref: (1, H*W, Cout)
    Cin = xp_ref.shape[-1]
    Cout = o_ref.shape[-1]
    acc = jnp.zeros((H * W, Cout), jnp.float32)
    for dy in range(3):
        slab = xp_ref[0, dy:dy + H, :, :].astype(jnp.bfloat16)      # (H, W+2, Cin)
        row = jnp.concatenate(
            [slab[:, dx:dx + W, :].reshape(H * W, Cin) for dx in range(3)],
            axis=-1)                                                 # (H*W, 3*Cin)
        acc = acc + jnp.dot(row, w_ref[dy], preferred_element_type=jnp.float32)
    o_ref[0] = acc + b_ref[...]


def _gn_stats_kernel(x_ref, gmat_ref, o_ref):
    # x_ref: (1, rt, C) f32 ; gmat: (C, G) one-hot ; o_ref: (1, 2, G) accumulator
    @pl.when(pl.program_id(1) == 0)
    def _():
        o_ref[...] = jnp.zeros_like(o_ref)

    x = x_ref[0]
    s = jnp.sum(x, axis=0, keepdims=True)            # (1, C)
    ss = jnp.sum(x * x, axis=0, keepdims=True)       # (1, C)
    both = jnp.concatenate([s, ss], axis=0)          # (2, C) -> single matmul
    o_ref[0] += jnp.dot(both, gmat_ref[...], preferred_element_type=jnp.float32)


def _gn_apply_kernel(x_ref, stats_ref, gamma_ref, beta_ref, gmat_t_ref, *rest,
                     denom, silu, res_mode):
    # x_ref: (1, rt, C); stats_ref: (1, 2, G) = per-group [sum, sumsq]
    # res_mode: 0 = none, 1 = identity residual, 2 = 1x1-projected residual
    stats = stats_ref[0]                                              # (2, G)
    mv = jnp.dot(stats, gmat_t_ref[...],
                 preferred_element_type=jnp.float32) / denom          # (2, C)
    mean_c = mv[0:1, :]
    var_c = mv[1:2, :] - mean_c * mean_c
    inv = lax.rsqrt(var_c + EPS)
    x = x_ref[0]
    y = (x - mean_c) * (inv * gamma_ref[...]) + beta_ref[...]
    if silu:
        y = y * jax.nn.sigmoid(y)
    if res_mode == 0:
        (o_ref,) = rest
        o_ref[0] = y
    elif res_mode == 1:
        res_ref, o_ref = rest
        o_ref[0] = y + res_ref[0]
    else:
        res_ref, pw_ref, pb_ref, o_ref = rest
        sc = jnp.dot(res_ref[0].astype(jnp.bfloat16), pw_ref[...],
                     preferred_element_type=jnp.float32) + pb_ref[...]
        o_ref[0] = y + sc


def _qkv_kernel(xn_ref, wq_ref, bq_ref, wk_ref, bk_ref, wv_ref, bv_ref,
                q_ref, k_ref, v_ref, *, scale):
    # xn_ref: (1, rt, C) group-normalized input (f32); outputs bf16, q pre-scaled.
    x = xn_ref[0].astype(jnp.bfloat16)
    q = jnp.dot(x, wq_ref[...], preferred_element_type=jnp.float32) + bq_ref[...]
    k = jnp.dot(x, wk_ref[...], preferred_element_type=jnp.float32) + bk_ref[...]
    v = jnp.dot(x, wv_ref[...], preferred_element_type=jnp.float32) + bv_ref[...]
    q_ref[0] = (q * scale).astype(jnp.bfloat16)
    k_ref[0] = k.astype(jnp.bfloat16)
    v_ref[0] = v.astype(jnp.bfloat16)


def _flash_attn_kernel(q_ref, k_ref, v_ref, xn_ref, wp_ref, bp_ref, o_ref,
                       m_sc, l_sc, acc_sc):
    # Online-softmax attention over kv tiles; finalize fuses proj + residual.
    kv = pl.program_id(2)

    @pl.when(kv == 0)
    def _():
        m_sc[...] = jnp.full_like(m_sc, -jnp.inf)
        l_sc[...] = jnp.zeros_like(l_sc)
        acc_sc[...] = jnp.zeros_like(acc_sc)

    s = lax.dot_general(q_ref[0], k_ref[0], (((1,), (1,)), ((), ())),
                        preferred_element_type=jnp.float32)           # (tq, tk)
    m_prev = m_sc[...]
    m_new = jnp.maximum(m_prev, jnp.max(s, axis=-1, keepdims=True))
    alpha = jnp.exp(m_prev - m_new)
    p = jnp.exp(s - m_new)
    l_sc[...] = alpha * l_sc[...] + jnp.sum(p, axis=-1, keepdims=True)
    acc_sc[...] = alpha * acc_sc[...] + jnp.dot(
        p.astype(v_ref.dtype), v_ref[0], preferred_element_type=jnp.float32)
    m_sc[...] = m_new

    @pl.when(kv == pl.num_programs(2) - 1)
    def _():
        h = acc_sc[...] * pl.reciprocal(l_sc[...], approx=True)
        proj = jnp.dot(h.astype(jnp.bfloat16), wp_ref[...],
                       preferred_element_type=jnp.float32) + bp_ref[...]
        o_ref[0] = xn_ref[0] + proj


# --------------------------- wrappers (glue) ---------------------------------

def conv3x3(x_nhwc, w, b):
    """3x3 SAME conv; returns flattened (B, H*W, Cout) f32."""
    B, H, W, Cin = x_nhwc.shape
    Cout = w.shape[-1]
    # TODO(synk): replace HBM jnp.pad + full-image blocks with halo-row DMA and
    # spatial row tiling for large images.
    xp = jnp.pad(x_nhwc, ((0, 0), (1, 1), (1, 1), (0, 0)))
    w_r = w.reshape(3, 3 * Cin, Cout).astype(jnp.bfloat16)
    return pl.pallas_call(
        functools.partial(_conv3x3_kernel, H=H, W=W),
        out_shape=jax.ShapeDtypeStruct((B, H * W, Cout), jnp.float32),
        grid=(B,),
        in_specs=[
            pl.BlockSpec((1, H + 2, W + 2, Cin), lambda b_: (b_, 0, 0, 0)),
            pl.BlockSpec((3, 3 * Cin, Cout), lambda b_: (0, 0, 0)),
            pl.BlockSpec((1, Cout), lambda b_: (0, 0)),
        ],
        out_specs=pl.BlockSpec((1, H * W, Cout), lambda b_: (b_, 0, 0)),
        compiler_params=pltpu.CompilerParams(
            dimension_semantics=("parallel",), vmem_limit_bytes=VMEM_LIMIT),
    )(xp, w_r, b.reshape(1, Cout))


def group_norm_stats(x_flat, num_groups, row_tile):
    B, HW, C = x_flat.shape
    G = num_groups
    T = HW // row_tile
    gmat = (jnp.arange(C)[:, None] // (C // G)
            == jnp.arange(G)[None, :]).astype(jnp.float32)            # (C, G)
    return pl.pallas_call(
        _gn_stats_kernel,
        out_shape=jax.ShapeDtypeStruct((B, 2, G), jnp.float32),
        grid=(B, T),
        in_specs=[
            pl.BlockSpec((1, row_tile, C), lambda b_, t: (b_, t, 0)),
            pl.BlockSpec((C, G), lambda b_, t: (0, 0)),
        ],
        out_specs=pl.BlockSpec((1, 2, G), lambda b_, t: (b_, 0, 0)),
        compiler_params=pltpu.CompilerParams(
            dimension_semantics=("parallel", "arbitrary"),
            vmem_limit_bytes=VMEM_LIMIT),
    )(x_flat, gmat)


def group_norm_apply(x_flat, stats, gamma, beta, num_groups, row_tile, *,
                     silu, residual=None, proj_w=None, proj_b=None):
    B, HW, C = x_flat.shape
    G = num_groups
    cpg = C // G
    T = HW // row_tile
    gmat_t = (jnp.arange(G)[:, None]
              == jnp.arange(C)[None, :] // cpg).astype(jnp.float32)   # (G, C)
    denom = float(HW * cpg)

    if residual is None:
        res_mode, extra_in, extra_specs = 0, [], []
    elif proj_w is None:
        Cr = residual.shape[-1]
        res_mode = 1
        extra_in = [residual]
        extra_specs = [pl.BlockSpec((1, row_tile, Cr), lambda b_, t: (b_, t, 0))]
    else:
        Cr = residual.shape[-1]
        res_mode = 2
        extra_in = [residual, proj_w.astype(jnp.bfloat16), proj_b.reshape(1, C)]
        extra_specs = [
            pl.BlockSpec((1, row_tile, Cr), lambda b_, t: (b_, t, 0)),
            pl.BlockSpec((Cr, C), lambda b_, t: (0, 0)),
            pl.BlockSpec((1, C), lambda b_, t: (0, 0)),
        ]

    return pl.pallas_call(
        functools.partial(_gn_apply_kernel, denom=denom, silu=silu,
                          res_mode=res_mode),
        out_shape=jax.ShapeDtypeStruct((B, HW, C), jnp.float32),
        grid=(B, T),
        in_specs=[
            pl.BlockSpec((1, row_tile, C), lambda b_, t: (b_, t, 0)),
            pl.BlockSpec((1, 2, G), lambda b_, t: (b_, 0, 0)),
            pl.BlockSpec((1, C), lambda b_, t: (0, 0)),
            pl.BlockSpec((1, C), lambda b_, t: (0, 0)),
            pl.BlockSpec((G, C), lambda b_, t: (0, 0)),
        ] + extra_specs,
        out_specs=pl.BlockSpec((1, row_tile, C), lambda b_, t: (b_, t, 0)),
        compiler_params=pltpu.CompilerParams(
            dimension_semantics=("parallel", "parallel"),
            vmem_limit_bytes=VMEM_LIMIT),
    )(x_flat, stats, gamma.reshape(1, C), beta.reshape(1, C), gmat_t, *extra_in)


def qkv_proj(xn, p, row_tile):
    B, HW, C = xn.shape
    T = HW // row_tile
    scale = float(C) ** -0.5
    xspec = pl.BlockSpec((1, row_tile, C), lambda b_, t: (b_, t, 0))
    wspec = pl.BlockSpec((C, C), lambda b_, t: (0, 0))
    bspec = pl.BlockSpec((1, C), lambda b_, t: (0, 0))
    return pl.pallas_call(
        functools.partial(_qkv_kernel, scale=scale),
        out_shape=tuple(jax.ShapeDtypeStruct((B, HW, C), jnp.bfloat16)
                        for _ in range(3)),
        grid=(B, T),
        in_specs=[xspec, wspec, bspec, wspec, bspec, wspec, bspec],
        out_specs=(xspec, xspec, xspec),
        compiler_params=pltpu.CompilerParams(
            dimension_semantics=("parallel", "parallel"),
            vmem_limit_bytes=VMEM_LIMIT),
    )(xn, p["q_w"].astype(jnp.bfloat16), p["q_b"].reshape(1, C),
      p["k_w"].astype(jnp.bfloat16), p["k_b"].reshape(1, C),
      p["v_w"].astype(jnp.bfloat16), p["v_b"].reshape(1, C))


def flash_attention(q, k, v, xn, wp, bp, tile):
    B, HW, C = xn.shape
    Tq = HW // tile
    Tk = HW // tile
    return pl.pallas_call(
        _flash_attn_kernel,
        out_shape=jax.ShapeDtypeStruct((B, HW, C), jnp.float32),
        grid=(B, Tq, Tk),
        in_specs=[
            pl.BlockSpec((1, tile, C), lambda b_, qi, ki: (b_, qi, 0)),
            pl.BlockSpec((1, tile, C), lambda b_, qi, ki: (b_, ki, 0)),
            pl.BlockSpec((1, tile, C), lambda b_, qi, ki: (b_, ki, 0)),
            pl.BlockSpec((1, tile, C), lambda b_, qi, ki: (b_, qi, 0)),
            pl.BlockSpec((C, C), lambda b_, qi, ki: (0, 0)),
            pl.BlockSpec((1, C), lambda b_, qi, ki: (0, 0)),
        ],
        out_specs=pl.BlockSpec((1, tile, C), lambda b_, qi, ki: (b_, qi, 0)),
        scratch_shapes=[
            pltpu.VMEM((tile, 1), jnp.float32),
            pltpu.VMEM((tile, 1), jnp.float32),
            pltpu.VMEM((tile, C), jnp.float32),
        ],
        compiler_params=pltpu.CompilerParams(
            dimension_semantics=("parallel", "parallel", "arbitrary"),
            vmem_limit_bytes=VMEM_LIMIT),
    )(q, k, v, xn, wp.astype(jnp.bfloat16), bp.reshape(1, C))


# --------------------------- blocks -------------------------------------------

def resnet_block(x_nhwc, p, num_groups, row_tile):
    B, H, W, Cin = x_nhwc.shape
    HW = H * W
    Cout = p["conv1_b"].shape[0]
    rt = _tile(HW, row_tile)

    h = conv3x3(x_nhwc, p["conv1_w"], p["conv1_b"])                  # (B,HW,Cout)
    st = group_norm_stats(h, num_groups, rt)
    h = group_norm_apply(h, st, p["norm1_g"], p["norm1_b"], num_groups, rt,
                         silu=True)

    h = conv3x3(h.reshape(B, H, W, Cout), p["conv2_w"], p["conv2_b"])
    st = group_norm_stats(h, num_groups, rt)
    x_flat = x_nhwc.reshape(B, HW, Cin)
    if "proj_w" in p:   # shortcut 1x1 proj fused into the norm2 epilogue
        out = group_norm_apply(h, st, p["norm2_g"], p["norm2_b"], num_groups, rt,
                               silu=True, residual=x_flat,
                               proj_w=p["proj_w"], proj_b=p["proj_b"])
    else:               # identity shortcut fused into the norm2 epilogue
        out = group_norm_apply(h, st, p["norm2_g"], p["norm2_b"], num_groups, rt,
                               silu=True, residual=x_flat)
    return out.reshape(B, H, W, Cout)


def attention_block(x_nhwc, p, num_groups, row_tile, attn_tile):
    B, H, W, C = x_nhwc.shape
    HW = H * W
    rt = _tile(HW, row_tile)
    at = _tile(HW, attn_tile)
    x_flat = x_nhwc.reshape(B, HW, C)
    # NOTE: PyTorch AttentionBlock overwrites x with norm(x); residual is the
    # normalized tensor, reproduced here exactly.
    st = group_norm_stats(x_flat, num_groups, rt)
    xn = group_norm_apply(x_flat, st, p["norm_g"], p["norm_b"], num_groups, rt,
                          silu=False)
    q, k, v = qkv_proj(xn, p, rt)
    out = flash_attention(q, k, v, xn, p["proj_w"], p["proj_b"], at)
    return out.reshape(B, H, W, C)


def mid_block_forward(x_nchw, params, num_groups, *, row_tile=512, attn_tile=512):
    x = jnp.transpose(x_nchw, (0, 2, 3, 1)).astype(jnp.float32)      # NCHW->NHWC
    x = resnet_block(x, params["res1"], num_groups, row_tile)
    x = attention_block(x, params["att"], num_groups, row_tile, attn_tile)
    x = resnet_block(x, params["res2"], num_groups, row_tile)
    return jnp.transpose(x, (0, 3, 1, 2))                            # NHWC->NCHW


# --------------------------- parameter init ----------------------------------

def init_params(key, in_ch, out_ch):
    keys = iter(jax.random.split(key, 32))

    def nrm(shape, scale=0.1):
        return scale * jax.random.normal(next(keys), shape, jnp.float32)

    def resnet_params(cin, cout):
        p = {
            "conv1_w": nrm((3, 3, cin, cout)), "conv1_b": nrm((cout,)),
            "norm1_g": 1.0 + nrm((cout,), 0.05), "norm1_b": nrm((cout,), 0.05),
            "conv2_w": nrm((3, 3, cout, cout)), "conv2_b": nrm((cout,)),
            "norm2_g": 1.0 + nrm((cout,), 0.05), "norm2_b": nrm((cout,), 0.05),
        }
        if cin != cout:
            p["proj_w"] = nrm((cin, cout))
            p["proj_b"] = nrm((cout,))
        return p

    def attn_params(c):
        return {
            "norm_g": 1.0 + nrm((c,), 0.05), "norm_b": nrm((c,), 0.05),
            "q_w": nrm((c, c)), "q_b": nrm((c,)),
            "k_w": nrm((c, c)), "k_b": nrm((c,)),
            "v_w": nrm((c, c)), "v_b": nrm((c,)),
            "proj_w": nrm((c, c)), "proj_b": nrm((c,)),
        }

    return {"res1": resnet_params(in_ch, out_ch),
            "att": attn_params(out_ch),
            "res2": resnet_params(out_ch, out_ch)}


# --------------------------- pure-JAX reference -------------------------------
# Mirrors the kernels' bf16-operand / f32-accumulate matmul precision so the
# comparison isolates structural correctness (conv/GN/flash-attention/fusions).

def _bf(x):
    return x.astype(jnp.bfloat16)


def _ref_gn(x_flat, g, b, G, silu=False):
    B, HW, C = x_flat.shape
    xg = x_flat.reshape(B, HW, G, C // G)
    mean = xg.mean(axis=(1, 3), keepdims=True)
    var = xg.var(axis=(1, 3), keepdims=True)
    y = ((xg - mean) / jnp.sqrt(var + EPS)).reshape(B, HW, C) * g + b
    return y * jax.nn.sigmoid(y) if silu else y


def _ref_conv3(x_nhwc, w, b):
    return lax.conv_general_dilated(
        _bf(x_nhwc), _bf(w), (1, 1), "SAME",
        dimension_numbers=("NHWC", "HWIO", "NHWC"),
        preferred_element_type=jnp.float32) + b


def _ref_resnet(x_nhwc, p, G):
    B, H, W, Cin = x_nhwc.shape
    Cout = p["conv1_b"].shape[0]
    h = _ref_conv3(x_nhwc, p["conv1_w"], p["conv1_b"]).reshape(B, H * W, Cout)
    h = _ref_gn(h, p["norm1_g"], p["norm1_b"], G, silu=True)
    h = _ref_conv3(h.reshape(B, H, W, Cout), p["conv2_w"],
                   p["conv2_b"]).reshape(B, H * W, Cout)
    h = _ref_gn(h, p["norm2_g"], p["norm2_b"], G, silu=True)
    xf = x_nhwc.reshape(B, H * W, Cin)
    if "proj_w" in p:
        sc = jnp.einsum("bic,cd->bid", _bf(xf), _bf(p["proj_w"]),
                        preferred_element_type=jnp.float32) + p["proj_b"]
    else:
        sc = xf
    return (h + sc).reshape(B, H, W, Cout)


def _ref_attn(x_nhwc, p, G):
    B, H, W, C = x_nhwc.shape
    xf = x_nhwc.reshape(B, H * W, C)
    xn = _ref_gn(xf, p["norm_g"], p["norm_b"], G, silu=False)
    xb = _bf(xn)
    q = jnp.einsum("bic,cd->bid", xb, _bf(p["q_w"]),
                   preferred_element_type=jnp.float32) + p["q_b"]
    k = jnp.einsum("bic,cd->bid", xb, _bf(p["k_w"]),
                   preferred_element_type=jnp.float32) + p["k_b"]
    v = jnp.einsum("bic,cd->bid", xb, _bf(p["v_w"]),
                   preferred_element_type=jnp.float32) + p["v_b"]
    q = _bf(q * (float(C) ** -0.5))
    k = _bf(k)
    v = _bf(v)
    s = jnp.einsum("bic,bjc->bij", q, k, preferred_element_type=jnp.float32)
    a = jax.nn.softmax(s, axis=-1)
    h = jnp.einsum("bij,bjc->bic", _bf(a), v, preferred_element_type=jnp.float32)
    out = xn + jnp.einsum("bic,cd->bid", _bf(h), _bf(p["proj_w"]),
                          preferred_element_type=jnp.float32) + p["proj_b"]
    return out.reshape(B, H, W, C)


def _ref_mid(x_nchw, params, G):
    x = jnp.transpose(x_nchw, (0, 2, 3, 1)).astype(jnp.float32)
    x = _ref_resnet(x, params["res1"], G)
    x = _ref_attn(x, params["att"], G)
    x = _ref_resnet(x, params["res2"], G)
    return jnp.transpose(x, (0, 3, 1, 2))


# --------------------------------- main ---------------------------------------

if __name__ == "__main__":
    B, in_ch, out_ch, num_groups, H, W = 2, 4, 8, 4, 16, 16
    key = jax.random.PRNGKey(0)
    kx, kp = jax.random.split(key)
    x = jax.random.normal(kx, (B, in_ch, H, W), jnp.float32)  # NCHW, like PyTorch
    params = init_params(kp, in_ch, out_ch)

    # Small tiles so the multi-tile GN-stats and flash kv-loop paths are exercised
    # even at these tiny demo shapes (HW = 256 -> 2 row tiles, 2 kv tiles).
    fwd = jax.jit(functools.partial(mid_block_forward, num_groups=num_groups,
                                    row_tile=128, attn_tile=128))
    y = jax.block_until_ready(fwd(x, params))
    y_ref = jax.block_until_ready(_ref_mid(x, params, num_groups))

    assert y.shape == (B, out_ch, H, W), y.shape
    assert bool(jnp.all(jnp.isfinite(y)))
    err = float(jnp.max(jnp.abs(y - y_ref)))
    assert err < 1e-2, f"mismatch vs reference: {err}"
    print("KERNEL_OK")
</pallas_src>

<mosaic_0001>
module attributes {stable_mosaic.version = 11 : i64} {
  func.func @_gn_stats_kernel(%arg0: i32, %arg1: i32, %arg2: memref<1x128x8xf32, #tpu.memory_space<vmem>>, %arg3: memref<8x4xf32, #tpu.memory_space<vmem>>, %arg4: memref<1x2x4xf32, #tpu.memory_space<vmem>>) attributes {dimension_semantics = [#tpu.dimension_semantics<parallel>, #tpu.dimension_semantics<arbitrary>], iteration_bounds = array<i64: 2, 2>, scalar_prefetch = 0 : i64, scratch_operands = 0 : i64, tpu.core_type = #tpu.core_type<tc>, window_params = [{transform_indices = @transform_0, window_bounds = array<i64: 1, 128, 8>}, {pipeline_mode = #tpu.pipeline_mode<synchronous>, transform_indices = @transform_1, window_bounds = array<i64: 8, 4>}, {transform_indices = @transform_2, window_bounds = array<i64: 1, 2, 4>}]} {
    %c0_i32 = arith.constant 0 : i32
    %0 = arith.cmpi eq, %arg1, %c0_i32 : i32
    %1 = arith.extui %0 : i1 to i32
    %c0_i32_0 = arith.constant 0 : i32
    %2 = arith.cmpi ne, %1, %c0_i32_0 : i32
    scf.if %2 {
      %cst_13 = arith.constant 0.000000e+00 : f32
      %19 = vector.broadcast %cst_13 : f32 to vector<1x2x4xf32>
      %c0_14 = arith.constant 0 : index
      %c0_15 = arith.constant 0 : index
      %c0_16 = arith.constant 0 : index
      %20 = vector.load %arg4[%c0_14, %c0_15, %c0_16] : memref<1x2x4xf32, #tpu.memory_space<vmem>>, vector<1x2x4xf32>
      tpu.vector_store %arg4[%c0_14, %c0_15, %c0_16], %19 {strides = array<i32>} : memref<1x2x4xf32, #tpu.memory_space<vmem>>, vector<1x2x4xf32>,
    } else {
    }
    %c0 = arith.constant 0 : index
    %c0_1 = arith.constant 0 : index
    %c0_2 = arith.constant 0 : index
    %3 = vector.load %arg2[%c0, %c0_1, %c0_2] : memref<1x128x8xf32, #tpu.memory_space<vmem>>, vector<1x128x8xf32>
    %4 = vector.shape_cast %3 : vector<1x128x8xf32> to vector<128x8xf32>
    %cst = arith.constant dense<0.000000e+00> : vector<8xf32>
    %5 = vector.multi_reduction <add>, %4, %cst [0] : vector<128x8xf32> to vector<8xf32>
    %6 = vector.shape_cast %5 : vector<8xf32> to vector<1x8xf32>
    %7 = arith.mulf %4, %4 : vector<128x8xf32>
    %cst_3 = arith.constant dense<0.000000e+00> : vector<8xf32>
    %8 = vector.multi_reduction <add>, %7, %cst_3 [0] : vector<128x8xf32> to vector<8xf32>
    %9 = vector.shape_cast %8 : vector<8xf32> to vector<1x8xf32>
    %10 = tpu.concatenate %6, %9 in 0 : vector<1x8xf32>, vector<1x8xf32> -> vector<2x8xf32>
    %c0_4 = arith.constant 0 : index
    %c0_5 = arith.constant 0 : index
    %c0_6 = arith.constant 0 : index
    %11 = vector.load %arg4[%c0_4, %c0_5, %c0_6] : memref<1x2x4xf32, #tpu.memory_space<vmem>>, vector<1x2x4xf32>
    %12 = vector.shape_cast %11 : vector<1x2x4xf32> to vector<2x4xf32>
    %c0_7 = arith.constant 0 : index
    %c0_8 = arith.constant 0 : index
    %13 = vector.load %arg3[%c0_7, %c0_8] : memref<8x4xf32, #tpu.memory_space<vmem>>, vector<8x4xf32>
    %cst_9 = arith.constant dense<0.000000e+00> : vector<2x4xf32>
    %14 = tpu.matmul %10, %13, %cst_9 {dimension_numbers = #tpu.dot_dimension_numbers<[1], [0], [0], [1], [0, 0, 1, 1], [], []>} : vector<2x8xf32>, vector<8x4xf32>, vector<2x4xf32> -> vector<2x4xf32>
    %15 = arith.addf %12, %14 : vector<2x4xf32>
    %c0_10 = arith.constant 0 : index
    %c0_11 = arith.constant 0 : index
    %c0_12 = arith.constant 0 : index
    %16 = vector.load %arg4[%c0_10, %c0_11, %c0_12] : memref<1x2x4xf32, #tpu.memory_space<vmem>>, vector<1x2x4xf32>
    %17 = vector.shape_cast %16 : vector<1x2x4xf32> to vector<2x4xf32>
    %18 = vector.shape_cast %15 : vector<2x4xf32> to vector<1x2x4xf32>
    tpu.vector_store %arg4[%c0_10, %c0_11, %c0_12], %18 {strides = array<i32>} : memref<1x2x4xf32, #tpu.memory_space<vmem>>, vector<1x2x4xf32>,
    return
  }
  func.func @transform_0(%arg0: i32, %arg1: i32) -> (i32, i32, i32) {
    %c0_i32 = arith.constant 0 : i32
    %c0_i32_0 = arith.constant 0 : i32
    return %arg0, %arg1, %c0_i32 : i32, i32, i32
  }
  func.func @transform_1(%arg0: i32, %arg1: i32) -> (i32, i32) {
    %c0_i32 = arith.constant 0 : i32
    %c0_i32_0 = arith.constant 0 : i32
    %c0_i32_1 = arith.constant 0 : i32
    return %c0_i32, %c0_i32_0 : i32, i32
  }
  func.func @transform_2(%arg0: i32, %arg1: i32) -> (i32, i32, i32) {
    %c0_i32 = arith.constant 0 : i32
    %c0_i32_0 = arith.constant 0 : i32
    %c0_i32_1 = arith.constant 0 : i32
    return %arg0, %c0_i32, %c0_i32_0 : i32, i32, i32
  }
}

module attributes {stable_mosaic.version = 11 : i64} {
  func.func @_conv3x3_kernel(%arg0: i32, %arg1: memref<1x18x18x4xf32, #tpu.memory_space<vmem>>, %arg2: memref<3x12x8xbf16, #tpu.memory_space<vmem>>, %arg3: memref<1x8xf32, #tpu.memory_space<vmem>>, %arg4: memref<1x256x8xf32, #tpu.memory_space<vmem>>) attributes {dimension_semantics = [#tpu.dimension_semantics<parallel>], iteration_bounds = array<i64: 2>, scalar_prefetch = 0 : i64, scratch_operands = 0 : i64, tpu.core_type = #tpu.core_type<tc>, window_params = [{transform_indices = @transform_0, window_bounds = array<i64: 1, 18, 18, 4>}, {pipeline_mode = #tpu.pipeline_mode<synchronous>, transform_indices = @transform_1, window_bounds = array<i64: 3, 12, 8>}, {pipeline_mode = #tpu.pipeline_mode<synchronous>, transform_indices = @transform_2, window_bounds = array<i64: 1, 8>}, {transform_indices = @transform_3, window_bounds = array<i64: 1, 256, 8>}]} {
    %cst = arith.constant 0.000000e+00 : f32
    %0 = vector.broadcast %cst : f32 to vector<256x8xf32>
    %c0 = arith.constant 0 : index
    %c0_0 = arith.constant 0 : index
    %c0_1 = arith.constant 0 : index
    %c0_2 = arith.constant 0 : index
    %1 = vector.load %arg1[%c0, %c0_0, %c0_1, %c0_2] : memref<1x18x18x4xf32, #tpu.memory_space<vmem>>, vector<1x16x18x4xf32>
    %2 = vector.shape_cast %1 : vector<1x16x18x4xf32> to vector<16x18x4xf32>
    %3 = arith.truncf %2 : vector<16x18x4xf32> to vector<16x18x4xbf16>
    %4 = vector.extract_strided_slice %3 {offsets = [0, 0, 0], sizes = [16, 16, 4], strides = [1, 1, 1]} : vector<16x18x4xbf16> to vector<16x16x4xbf16>
    %5 = vector.shape_cast %4 : vector<16x16x4xbf16> to vector<256x4xbf16>
    %6 = vector.extract_strided_slice %3 {offsets = [0, 1, 0], sizes = [16, 16, 4], strides = [1, 1, 1]} : vector<16x18x4xbf16> to vector<16x16x4xbf16>
    %7 = vector.shape_cast %6 : vector<16x16x4xbf16> to vector<256x4xbf16>
    %8 = vector.extract_strided_slice %3 {offsets = [0, 2, 0], sizes = [16, 16, 4], strides = [1, 1, 1]} : vector<16x18x4xbf16> to vector<16x16x4xbf16>
    %9 = vector.shape_cast %8 : vector<16x16x4xbf16> to vector<256x4xbf16>
    %10 = tpu.concatenate %5, %7, %9 in 1 : vector<256x4xbf16>, vector<256x4xbf16>, vector<256x4xbf16> -> vector<256x12xbf16>
    %c0_3 = arith.constant 0 : index
    %c0_4 = arith.constant 0 : index
    %c0_5 = arith.constant 0 : index
    %11 = vector.load %arg2[%c0_3, %c0_4, %c0_5] : memref<3x12x8xbf16, #tpu.memory_space<vmem>>, vector<1x12x8xbf16>
    %12 = vector.shape_cast %11 : vector<1x12x8xbf16> to vector<12x8xbf16>
    %cst_6 = arith.constant dense<0.000000e+00> : vector<256x8xf32>
    %13 = tpu.matmul %10, %12, %cst_6 {dimension_numbers = #tpu.dot_dimension_numbers<[1], [0], [0], [1], [0, 0, 1, 1], [], []>} : vector<256x12xbf16>, vector<12x8xbf16>, vector<256x8xf32> -> vector<256x8xf32>
    %14 = arith.addf %0, %13 : vector<256x8xf32>
    %c0_7 = arith.constant 0 : index
    %c1 = arith.constant 1 : index
    %c0_8 = arith.constant 0 : index
    %c0_9 = arith.constant 0 : index
    %15 = vector.load %arg1[%c0_7, %c1, %c0_8, %c0_9] : memref<1x18x18x4xf32, #tpu.memory_space<vmem>>, vector<1x16x18x4xf32>
    %16 = vector.shape_cast %15 : vector<1x16x18x4xf32> to vector<16x18x4xf32>
    %17 = arith.truncf %16 : vector<16x18x4xf32> to vector<16x18x4xbf16>
    %18 = vector.extract_strided_slice %17 {offsets = [0, 0, 0], sizes = [16, 16, 4], strides = [1, 1, 1]} : vector<16x18x4xbf16> to vector<16x16x4xbf16>
    %19 = vector.shape_cast %18 : vector<16x16x4xbf16> to vector<256x4xbf16>
    %20 = vector.extract_strided_slice %17 {offsets = [0, 1, 0], sizes = [16, 16, 4], strides = [1, 1, 1]} : vector<16x18x4xbf16> to vector<16x16x4xbf16>
    %21 = vector.shape_cast %20 : vector<16x16x4xbf16> to vector<256x4xbf16>
    %22 = vector.extract_strided_slice %17 {offsets = [0, 2, 0], sizes = [16, 16, 4], strides = [1, 1, 1]} : vector<16x18x4xbf16> to vector<16x16x4xbf16>
    %23 = vector.shape_cast %22 : vector<16x16x4xbf16> to vector<256x4xbf16>
    %24 = tpu.concatenate %19, %21, %23 in 1 : vector<256x4xbf16>, vector<256x4xbf16>, vector<256x4xbf16> -> vector<256x12xbf16>
    %c1_10 = arith.constant 1 : index
    %c0_11 = arith.constant 0 : index
    %c0_12 = arith.constant 0 : index
    %25 = vector.load %arg2[%c1_10, %c0_11, %c0_12] : memref<3x12x8xbf16, #tpu.memory_space<vmem>>, vector<1x12x8xbf16>
    %26 = vector.shape_cast %25 : vector<1x12x8xbf16> to vector<12x8xbf16>
    %cst_13 = arith.constant dense<0.000000e+00> : vector<256x8xf32>
    %27 = tpu.matmul %24, %26, %cst_13 {dimension_numbers = #tpu.dot_dimension_numbers<[1], [0], [0], [1], [0, 0, 1, 1], [], []>} : vector<256x12xbf16>, vector<12x8xbf16>, vector<256x8xf32> -> vector<256x8xf32>
    %28 = arith.addf %14, %27 : vector<256x8xf32>
    %c0_14 = arith.constant 0 : index
    %c2 = arith.constant 2 : index
    %c0_15 = arith.constant 0 : index
    %c0_16 = arith.constant 0 : index
    %29 = vector.load %arg1[%c0_14, %c2, %c0_15, %c0_16] : memref<1x18x18x4xf32, #tpu.memory_space<vmem>>, vector<1x16x18x4xf32>
    %30 = vector.shape_cast %29 : vector<1x16x18x4xf32> to vector<16x18x4xf32>
    %31 = arith.truncf %30 : vector<16x18x4xf32> to vector<16x18x4xbf16>
    %32 = vector.extract_strided_slice %31 {offsets = [0, 0, 0], sizes = [16, 16, 4], strides = [1, 1, 1]} : vector<16x18x4xbf16> to vector<16x16x4xbf16>
    %33 = vector.shape_cast %32 : vector<16x16x4xbf16> to vector<256x4xbf16>
    %34 = vector.extract_strided_slice %31 {offsets = [0, 1, 0], sizes = [16, 16, 4], strides = [1, 1, 1]} : vector<16x18x4xbf16> to vector<16x16x4xbf16>
    %35 = vector.shape_cast %34 : vector<16x16x4xbf16> to vector<256x4xbf16>
    %36 = vector.extract_strided_slice %31 {offsets = [0, 2, 0], sizes = [16, 16, 4], strides = [1, 1, 1]} : vector<16x18x4xbf16> to vector<16x16x4xbf16>
    %37 = vector.shape_cast %36 : vector<16x16x4xbf16> to vector<256x4xbf16>
    %38 = tpu.concatenate %33, %35, %37 in 1 : vector<256x4xbf16>, vector<256x4xbf16>, vector<256x4xbf16> -> vector<256x12xbf16>
    %c2_17 = arith.constant 2 : index
    %c0_18 = arith.constant 0 : index
    %c0_19 = arith.constant 0 : index
    %39 = vector.load %arg2[%c2_17, %c0_18, %c0_19] : memref<3x12x8xbf16, #tpu.memory_space<vmem>>, vector<1x12x8xbf16>
    %40 = vector.shape_cast %39 : vector<1x12x8xbf16> to vector<12x8xbf16>
    %cst_20 = arith.constant dense<0.000000e+00> : vector<256x8xf32>
    %41 = tpu.matmul %38, %40, %cst_20 {dimension_numbers = #tpu.dot_dimension_numbers<[1], [0], [0], [1], [0, 0, 1, 1], [], []>} : vector<256x12xbf16>, vector<12x8xbf16>, vector<256x8xf32> -> vector<256x8xf32>
    %42 = arith.addf %28, %41 : vector<256x8xf32>
    %c0_21 = arith.constant 0 : index
    %c0_22 = arith.constant 0 : index
    %43 = vector.load %arg3[%c0_21, %c0_22] : memref<1x8xf32, #tpu.memory_space<vmem>>, vector<1x8xf32>
    %44 = vector.broadcast %43 : vector<1x8xf32> to vector<256x8xf32>
    %45 = arith.addf %42, %44 : vector<256x8xf32>
    %c0_23 = arith.constant 0 : index
    %c0_24 = arith.constant 0 : index
    %c0_25 = arith.constant 0 : index
    %46 = vector.load %arg4[%c0_23, %c0_24, %c0_25] : memref<1x256x8xf32, #tpu.memory_space<vmem>>, vector<1x256x8xf32>
    %47 = vector.shape_cast %46 : vector<1x256x8xf32> to vector<256x8xf32>
    %48 = vector.shape_cast %45 : vector<256x8xf32> to vector<1x256x8xf32>
    tpu.vector_store %arg4[%c0_23, %c0_24, %c0_25], %48 {strides = array<i32>} : memref<1x256x8xf32, #tpu.memory_space<vmem>>, vector<1x256x8xf32>,
    return
  }
  func.func @transform_0(%arg0: i32) -> (i32, i32, i32, i32) {
    %c0_i32 = arith.constant 0 : i32
    %c0_i32_0 = arith.constant 0 : i32
    %c0_i32_1 = arith.constant 0 : i32
    %c0_i32_2 = arith.constant 0 : i32
    return %arg0, %c0_i32, %c0_i32_0, %c0_i32_1 : i32, i32, i32, i32
  }
  func.func @transform_1(%arg0: i32) -> (i32, i32, i32) {
    %c0_i32 = arith.constant 0 : i32
    %c0_i32_0 = arith.constant 0 : i32
    %c0_i32_1 = arith.constant 0 : i32
    %c0_i32_2 = arith.constant 0 : i32
    return %c0_i32, %c0_i32_0, %c0_i32_1 : i32, i32, i32
  }
  func.func @transform_2(%arg0: i32) -> (i32, i32) {
    %c0_i32 = arith.constant 0 : i32
    %c0_i32_0 = arith.constant 0 : i32
    %c0_i32_1 = arith.constant 0 : i32
    return %c0_i32, %c0_i32_0 : i32, i32
  }
  func.func @transform_3(%arg0: i32) -> (i32, i32, i32) {
    %c0_i32 = arith.constant 0 : i32
    %c0_i32_0 = arith.constant 0 : i32
    %c0_i32_1 = arith.constant 0 : i32
    return %arg0, %c0_i32, %c0_i32_0 : i32, i32, i32
  }
}

module attributes {stable_mosaic.version = 11 : i64} {
  func.func @_gn_apply_kernel(%arg0: i32, %arg1: i32, %arg2: memref<1x128x8xf32, #tpu.memory_space<vmem>>, %arg3: memref<1x2x4xf32, #tpu.memory_space<vmem>>, %arg4: memref<1x8xf32, #tpu.memory_space<vmem>>, %arg5: memref<1x8xf32, #tpu.memory_space<vmem>>, %arg6: memref<4x8xf32, #tpu.memory_space<vmem>>, %arg7: memref<1x128x8xf32, #tpu.memory_space<vmem>>) attributes {dimension_semantics = [#tpu.dimension_semantics<parallel>, #tpu.dimension_semantics<parallel>], iteration_bounds = array<i64: 2, 2>, scalar_prefetch = 0 : i64, scratch_operands = 0 : i64, tpu.core_type = #tpu.core_type<tc>, window_params = [{transform_indices = @transform_0, window_bounds = array<i64: 1, 128, 8>}, {transform_indices = @transform_1, window_bounds = array<i64: 1, 2, 4>}, {pipeline_mode = #tpu.pipeline_mode<synchronous>, transform_indices = @transform_2, window_bounds = array<i64: 1, 8>}, {pipeline_mode = #tpu.pipeline_mode<synchronous>, transform_indices = @transform_3, window_bounds = array<i64: 1, 8>}, {pipeline_mode = #tpu.pipeline_mode<synchronous>, transform_indices = @transform_4, window_bounds = array<i64: 4, 8>}, {transform_indices = @transform_5, window_bounds = array<i64: 1, 128, 8>}]} {
    %c0 = arith.constant 0 : index
    %c0_0 = arith.constant 0 : index
    %c0_1 = arith.constant 0 : index
    %0 = vector.load %arg3[%c0, %c0_0, %c0_1] : memref<1x2x4xf32, #tpu.memory_space<vmem>>, vector<1x2x4xf32>
    %1 = vector.shape_cast %0 : vector<1x2x4xf32> to vector<2x4xf32>
    %c0_2 = arith.constant 0 : index
    %c0_3 = arith.constant 0 : index
    %2 = vector.load %arg6[%c0_2, %c0_3] : memref<4x8xf32, #tpu.memory_space<vmem>>, vector<4x8xf32>
    %cst = arith.constant dense<0.000000e+00> : vector<2x8xf32>
    %3 = tpu.matmul %1, %2, %cst {dimension_numbers = #tpu.dot_dimension_numbers<[1], [0], [0], [1], [0, 0, 1, 1], [], []>} : vector<2x4xf32>, vector<4x8xf32>, vector<2x8xf32> -> vector<2x8xf32>
    %cst_4 = arith.constant 5.120000e+02 : f32
    %4 = vector.broadcast %cst_4 : f32 to vector<2x8xf32>
    %5 = arith.divf %3, %4 : vector<2x8xf32>
    %6 = vector.extract_strided_slice %5 {offsets = [0, 0], sizes = [1, 8], strides = [1, 1]} : vector<2x8xf32> to vector<1x8xf32>
    %7 = vector.extract_strided_slice %5 {offsets = [1, 0], sizes = [1, 8], strides = [1, 1]} : vector<2x8xf32> to vector<1x8xf32>
    %8 = arith.mulf %6, %6 : vector<1x8xf32>
    %9 = arith.subf %7, %8 : vector<1x8xf32>
    %cst_5 = arith.constant 9.99999974E-6 : f32
    %10 = vector.broadcast %cst_5 : f32 to vector<1x8xf32>
    %11 = arith.addf %9, %10 : vector<1x8xf32>
    %12 = math.rsqrt %11 : vector<1x8xf32>
    %c0_6 = arith.constant 0 : index
    %c0_7 = arith.constant 0 : index
    %c0_8 = arith.constant 0 : index
    %13 = vector.load %arg2[%c0_6, %c0_7, %c0_8] : memref<1x128x8xf32, #tpu.memory_space<vmem>>, vector<1x128x8xf32>
    %14 = vector.shape_cast %13 : vector<1x128x8xf32> to vector<128x8xf32>
    %15 = vector.broadcast %6 : vector<1x8xf32> to vector<128x8xf32>
    %16 = arith.subf %14, %15 : vector<128x8xf32>
    %c0_9 = arith.constant 0 : index
    %c0_10 = arith.constant 0 : index
    %17 = vector.load %arg4[%c0_9, %c0_10] : memref<1x8xf32, #tpu.memory_space<vmem>>, vector<1x8xf32>
    %18 = arith.mulf %12, %17 : vector<1x8xf32>
    %19 = vector.broadcast %18 : vector<1x8xf32> to vector<128x8xf32>
    %20 = arith.mulf %16, %19 : vector<128x8xf32>
    %c0_11 = arith.constant 0 : index
    %c0_12 = arith.constant 0 : index
    %21 = vector.load %arg5[%c0_11, %c0_12] : memref<1x8xf32, #tpu.memory_space<vmem>>, vector<1x8xf32>
    %22 = vector.broadcast %21 : vector<1x8xf32> to vector<128x8xf32>
    %23 = arith.addf %20, %22 : vector<128x8xf32>
    %24 = arith.negf %23 : vector<128x8xf32>
    %25 = math.exp %24 : vector<128x8xf32>
    %cst_13 = arith.constant 1.000000e+00 : f32
    %26 = vector.broadcast %cst_13 : f32 to vector<128x8xf32>
    %27 = arith.addf %26, %25 : vector<128x8xf32>
    %28 = arith.divf %26, %27 : vector<128x8xf32>
    %29 = arith.mulf %23, %28 : vector<128x8xf32>
    %c0_14 = arith.constant 0 : index
    %c0_15 = arith.constant 0 : index
    %c0_16 = arith.constant 0 : index
    %30 = vector.load %arg7[%c0_14, %c0_15, %c0_16] : memref<1x128x8xf32, #tpu.memory_space<vmem>>, vector<1x128x8xf32>
    %31 = vector.shape_cast %30 : vector<1x128x8xf32> to vector<128x8xf32>
    %32 = vector.shape_cast %29 : vector<128x8xf32> to vector<1x128x8xf32>
    tpu.vector_store %arg7[%c0_14, %c0_15, %c0_16], %32 {strides = array<i32>} : memref<1x128x8xf32, #tpu.memory_space<vmem>>, vector<1x128x8xf32>,
    return
  }
  func.func @transform_0(%arg0: i32, %arg1: i32) -> (i32, i32, i32) {
    %c0_i32 = arith.constant 0 : i32
    %c0_i32_0 = arith.constant 0 : i32
    return %arg0, %arg1, %c0_i32 : i32, i32, i32
  }
  func.func @transform_1(%arg0: i32, %arg1: i32) -> (i32, i32, i32) {
    %c0_i32 = arith.constant 0 : i32
    %c0_i32_0 = arith.constant 0 : i32
    %c0_i32_1 = arith.constant 0 : i32
    return %arg0, %c0_i32, %c0_i32_0 : i32, i32, i32
  }
  func.func @transform_2(%arg0: i32, %arg1: i32) -> (i32, i32) {
    %c0_i32 = arith.constant 0 : i32
    %c0_i32_0 = arith.constant 0 : i32
    %c0_i32_1 = arith.constant 0 : i32
    return %c0_i32, %c0_i32_0 : i32, i32
  }
  func.func @transform_3(%arg0: i32, %arg1: i32) -> (i32, i32) {
    %c0_i32 = arith.constant 0 : i32
    %c0_i32_0 = arith.constant 0 : i32
    %c0_i32_1 = arith.constant 0 : i32
    return %c0_i32, %c0_i32_0 : i32, i32
  }
  func.func @transform_4(%arg0: i32, %arg1: i32) -> (i32, i32) {
    %c0_i32 = arith.constant 0 : i32
    %c0_i32_0 = arith.constant 0 : i32
    %c0_i32_1 = arith.constant 0 : i32
    return %c0_i32, %c0_i32_0 : i32, i32
  }
  func.func @transform_5(%arg0: i32, %arg1: i32) -> (i32, i32, i32) {
    %c0_i32 = arith.constant 0 : i32
    %c0_i32_0 = arith.constant 0 : i32
    return %arg0, %arg1, %c0_i32 : i32, i32, i32
  }
}

module attributes {stable_mosaic.version = 11 : i64} {
  func.func @_conv3x3_kernel(%arg0: i32, %arg1: memref<1x18x18x8xf32, #tpu.memory_space<vmem>>, %arg2: memref<3x24x8xbf16, #tpu.memory_space<vmem>>, %arg3: memref<1x8xf32, #tpu.memory_space<vmem>>, %arg4: memref<1x256x8xf32, #tpu.memory_space<vmem>>) attributes {dimension_semantics = [#tpu.dimension_semantics<parallel>], iteration_bounds = array<i64: 2>, scalar_prefetch = 0 : i64, scratch_operands = 0 : i64, tpu.core_type = #tpu.core_type<tc>, window_params = [{transform_indices = @transform_0, window_bounds = array<i64: 1, 18, 18, 8>}, {pipeline_mode = #tpu.pipeline_mode<synchronous>, transform_indices = @transform_1, window_bounds = array<i64: 3, 24, 8>}, {pipeline_mode = #tpu.pipeline_mode<synchronous>, transform_indices = @transform_2, window_bounds = array<i64: 1, 8>}, {transform_indices = @transform_3, window_bounds = array<i64: 1, 256, 8>}]} {
    %cst = arith.constant 0.000000e+00 : f32
    %0 = vector.broadcast %cst : f32 to vector<256x8xf32>
    %c0 = arith.constant 0 : index
    %c0_0 = arith.constant 0 : index
    %c0_1 = arith.constant 0 : index
    %c0_2 = arith.constant 0 : index
    %1 = vector.load %arg1[%c0, %c0_0, %c0_1, %c0_2] : memref<1x18x18x8xf32, #tpu.memory_space<vmem>>, vector<1x16x18x8xf32>
    %2 = vector.shape_cast %1 : vector<1x16x18x8xf32> to vector<16x18x8xf32>
    %3 = arith.truncf %2 : vector<16x18x8xf32> to vector<16x18x8xbf16>
    %4 = vector.extract_strided_slice %3 {offsets = [0, 0, 0], sizes = [16, 16, 8], strides = [1, 1, 1]} : vector<16x18x8xbf16> to vector<16x16x8xbf16>
    %5 = vector.shape_cast %4 : vector<16x16x8xbf16> to vector<256x8xbf16>
    %6 = vector.extract_strided_slice %3 {offsets = [0, 1, 0], sizes = [16, 16, 8], strides = [1, 1, 1]} : vector<16x18x8xbf16> to vector<16x16x8xbf16>
    %7 = vector.shape_cast %6 : vector<16x16x8xbf16> to vector<256x8xbf16>
    %8 = vector.extract_strided_slice %3 {offsets = [0, 2, 0], sizes = [16, 16, 8], strides = [1, 1, 1]} : vector<16x18x8xbf16> to vector<16x16x8xbf16>
    %9 = vector.shape_cast %8 : vector<16x16x8xbf16> to vector<256x8xbf16>
    %10 = tpu.concatenate %5, %7, %9 in 1 : vector<256x8xbf16>, vector<256x8xbf16>, vector<256x8xbf16> -> vector<256x24xbf16>
    %c0_3 = arith.constant 0 : index
    %c0_4 = arith.constant 0 : index
    %c0_5 = arith.constant 0 : index
    %11 = vector.load %arg2[%c0_3, %c0_4, %c0_5] : memref<3x24x8xbf16, #tpu.memory_space<vmem>>, vector<1x24x8xbf16>
    %12 = vector.shape_cast %11 : vector<1x24x8xbf16> to vector<24x8xbf16>
    %cst_6 = arith.constant dense<0.000000e+00> : vector<256x8xf32>
    %13 = tpu.matmul %10, %12, %cst_6 {dimension_numbers = #tpu.dot_dimension_numbers<[1], [0], [0], [1], [0, 0, 1, 1], [], []>} : vector<256x24xbf16>, vector<24x8xbf16>, vector<256x8xf32> -> vector<256x8xf32>
    %14 = arith.addf %0, %13 : vector<256x8xf32>
    %c0_7 = arith.constant 0 : index
    %c1 = arith.constant 1 : index
    %c0_8 = arith.constant 0 : index
    %c0_9 = arith.constant 0 : index
    %15 = vector.load %arg1[%c0_7, %c1, %c0_8, %c0_9] : memref<1x18x18x8xf32, #tpu.memory_space<vmem>>, vector<1x16x18x8xf32>
    %16 = vector.shape_cast %15 : vector<1x16x18x8xf32> to vector<16x18x8xf32>
    %17 = arith.truncf %16 : vector<16x18x8xf32> to vector<16x18x8xbf16>
    %18 = vector.extract_strided_slice %17 {offsets = [0, 0, 0], sizes = [16, 16, 8], strides = [1, 1, 1]} : vector<16x18x8xbf16> to vector<16x16x8xbf16>
    %19 = vector.shape_cast %18 : vector<16x16x8xbf16> to vector<256x8xbf16>
    %20 = vector.extract_strided_slice %17 {offsets = [0, 1, 0], sizes = [16, 16, 8], strides = [1, 1, 1]} : vector<16x18x8xbf16> to vector<16x16x8xbf16>
    %21 = vector.shape_cast %20 : vector<16x16x8xbf16> to vector<256x8xbf16>
    %22 = vector.extract_strided_slice %17 {offsets = [0, 2, 0], sizes = [16, 16, 8], strides = [1, 1, 1]} : vector<16x18x8xbf16> to vector<16x16x8xbf16>
    %23 = vector.shape_cast %22 : vector<16x16x8xbf16> to vector<256x8xbf16>
    %24 = tpu.concatenate %19, %21, %23 in 1 : vector<256x8xbf16>, vector<256x8xbf16>, vector<256x8xbf16> -> vector<256x24xbf16>
    %c1_10 = arith.constant 1 : index
    %c0_11 = arith.constant 0 : index
    %c0_12 = arith.constant 0 : index
    %25 = vector.load %arg2[%c1_10, %c0_11, %c0_12] : memref<3x24x8xbf16, #tpu.memory_space<vmem>>, vector<1x24x8xbf16>
    %26 = vector.shape_cast %25 : vector<1x24x8xbf16> to vector<24x8xbf16>
    %cst_13 = arith.constant dense<0.000000e+00> : vector<256x8xf32>
    %27 = tpu.matmul %24, %26, %cst_13 {dimension_numbers = #tpu.dot_dimension_numbers<[1], [0], [0], [1], [0, 0, 1, 1], [], []>} : vector<256x24xbf16>, vector<24x8xbf16>, vector<256x8xf32> -> vector<256x8xf32>
    %28 = arith.addf %14, %27 : vector<256x8xf32>
    %c0_14 = arith.constant 0 : index
    %c2 = arith.constant 2 : index
    %c0_15 = arith.constant 0 : index
    %c0_16 = arith.constant 0 : index
    %29 = vector.load %arg1[%c0_14, %c2, %c0_15, %c0_16] : memref<1x18x18x8xf32, #tpu.memory_space<vmem>>, vector<1x16x18x8xf32>
    %30 = vector.shape_cast %29 : vector<1x16x18x8xf32> to vector<16x18x8xf32>
    %31 = arith.truncf %30 : vector<16x18x8xf32> to vector<16x18x8xbf16>
    %32 = vector.extract_strided_slice %31 {offsets = [0, 0, 0], sizes = [16, 16, 8], strides = [1, 1, 1]} : vector<16x18x8xbf16> to vector<16x16x8xbf16>
    %33 = vector.shape_cast %32 : vector<16x16x8xbf16> to vector<256x8xbf16>
    %34 = vector.extract_strided_slice %31 {offsets = [0, 1, 0], sizes = [16, 16, 8], strides = [1, 1, 1]} : vector<16x18x8xbf16> to vector<16x16x8xbf16>
    %35 = vector.shape_cast %34 : vector<16x16x8xbf16> to vector<256x8xbf16>
    %36 = vector.extract_strided_slice %31 {offsets = [0, 2, 0], sizes = [16, 16, 8], strides = [1, 1, 1]} : vector<16x18x8xbf16> to vector<16x16x8xbf16>
    %37 = vector.shape_cast %36 : vector<16x16x8xbf16> to vector<256x8xbf16>
    %38 = tpu.concatenate %33, %35, %37 in 1 : vector<256x8xbf16>, vector<256x8xbf16>, vector<256x8xbf16> -> vector<256x24xbf16>
    %c2_17 = arith.constant 2 : index
    %c0_18 = arith.constant 0 : index
    %c0_19 = arith.constant 0 : index
    %39 = vector.load %arg2[%c2_17, %c0_18, %c0_19] : memref<3x24x8xbf16, #tpu.memory_space<vmem>>, vector<1x24x8xbf16>
    %40 = vector.shape_cast %39 : vector<1x24x8xbf16> to vector<24x8xbf16>
    %cst_20 = arith.constant dense<0.000000e+00> : vector<256x8xf32>
    %41 = tpu.matmul %38, %40, %cst_20 {dimension_numbers = #tpu.dot_dimension_numbers<[1], [0], [0], [1], [0, 0, 1, 1], [], []>} : vector<256x24xbf16>, vector<24x8xbf16>, vector<256x8xf32> -> vector<256x8xf32>
    %42 = arith.addf %28, %41 : vector<256x8xf32>
    %c0_21 = arith.constant 0 : index
    %c0_22 = arith.constant 0 : index
    %43 = vector.load %arg3[%c0_21, %c0_22] : memref<1x8xf32, #tpu.memory_space<vmem>>, vector<1x8xf32>
    %44 = vector.broadcast %43 : vector<1x8xf32> to vector<256x8xf32>
    %45 = arith.addf %42, %44 : vector<256x8xf32>
    %c0_23 = arith.constant 0 : index
    %c0_24 = arith.constant 0 : index
    %c0_25 = arith.constant 0 : index
    %46 = vector.load %arg4[%c0_23, %c0_24, %c0_25] : memref<1x256x8xf32, #tpu.memory_space<vmem>>, vector<1x256x8xf32>
    %47 = vector.shape_cast %46 : vector<1x256x8xf32> to vector<256x8xf32>
    %48 = vector.shape_cast %45 : vector<256x8xf32> to vector<1x256x8xf32>
    tpu.vector_store %arg4[%c0_23, %c0_24, %c0_25], %48 {strides = array<i32>} : memref<1x256x8xf32, #tpu.memory_space<vmem>>, vector<1x256x8xf32>,
    return
  }
  func.func @transform_0(%arg0: i32) -> (i32, i32, i32, i32) {
    %c0_i32 = arith.constant 0 : i32
    %c0_i32_0 = arith.constant 0 : i32
    %c0_i32_1 = arith.constant 0 : i32
    %c0_i32_2 = arith.constant 0 : i32
    return %arg0, %c0_i32, %c0_i32_0, %c0_i32_1 : i32, i32, i32, i32
  }
  func.func @transform_1(%arg0: i32) -> (i32, i32, i32) {
    %c0_i32 = arith.constant 0 : i32
    %c0_i32_0 = arith.constant 0 : i32
    %c0_i32_1 = arith.constant 0 : i32
    %c0_i32_2 = arith.constant 0 : i32
    return %c0_i32, %c0_i32_0, %c0_i32_1 : i32, i32, i32
  }
  func.func @transform_2(%arg0: i32) -> (i32, i32) {
    %c0_i32 = arith.constant 0 : i32
    %c0_i32_0 = arith.constant 0 : i32
    %c0_i32_1 = arith.constant 0 : i32
    return %c0_i32, %c0_i32_0 : i32, i32
  }
  func.func @transform_3(%arg0: i32) -> (i32, i32, i32) {
    %c0_i32 = arith.constant 0 : i32
    %c0_i32_0 = arith.constant 0 : i32
    %c0_i32_1 = arith.constant 0 : i32
    return %arg0, %c0_i32, %c0_i32_0 : i32, i32, i32
  }
}

module attributes {stable_mosaic.version = 11 : i64} {
  func.func @_gn_apply_kernel(%arg0: i32, %arg1: i32, %arg2: memref<1x128x8xf32, #tpu.memory_space<vmem>>, %arg3: memref<1x2x4xf32, #tpu.memory_space<vmem>>, %arg4: memref<1x8xf32, #tpu.memory_space<vmem>>, %arg5: memref<1x8xf32, #tpu.memory_space<vmem>>, %arg6: memref<4x8xf32, #tpu.memory_space<vmem>>, %arg7: memref<1x128x4xf32, #tpu.memory_space<vmem>>, %arg8: memref<4x8xbf16, #tpu.memory_space<vmem>>, %arg9: memref<1x8xf32, #tpu.memory_space<vmem>>, %arg10: memref<1x128x8xf32, #tpu.memory_space<vmem>>) attributes {dimension_semantics = [#tpu.dimension_semantics<parallel>, #tpu.dimension_semantics<parallel>], iteration_bounds = array<i64: 2, 2>, scalar_prefetch = 0 : i64, scratch_operands = 0 : i64, tpu.core_type = #tpu.core_type<tc>, window_params = [{transform_indices = @transform_0, window_bounds = array<i64: 1, 128, 8>}, {transform_indices = @transform_1, window_bounds = array<i64: 1, 2, 4>}, {pipeline_mode = #tpu.pipeline_mode<synchronous>, transform_indices = @transform_2, window_bounds = array<i64: 1, 8>}, {pipeline_mode = #tpu.pipeline_mode<synchronous>, transform_indices = @transform_3, window_bounds = array<i64: 1, 8>}, {pipeline_mode = #tpu.pipeline_mode<synchronous>, transform_indices = @transform_4, window_bounds = array<i64: 4, 8>}, {transform_indices = @transform_5, window_bounds = array<i64: 1, 128, 4>}, {pipeline_mode = #tpu.pipeline_mode<synchronous>, transform_indices = @transform_6, window_bounds = array<i64: 4, 8>}, {pipeline_mode = #tpu.pipeline_mode<synchronous>, transform_indices = @transform_7, window_bounds = array<i64: 1, 8>}, {transform_indices = @transform_8, window_bounds = array<i64: 1, 128, 8>}]} {
    %c0 = arith.constant 0 : index
    %c0_0 = arith.constant 0 : index
    %c0_1 = arith.constant 0 : index
    %0 = vector.load %arg3[%c0, %c0_0, %c0_1] : memref<1x2x4xf32, #tpu.memory_space<vmem>>, vector<1x2x4xf32>
    %1 = vector.shape_cast %0 : vector<1x2x4xf32> to vector<2x4xf32>
    %c0_2 = arith.constant 0 : index
    %c0_3 = arith.constant 0 : index
    %2 = vector.load %arg6[%c0_2, %c0_3] : memref<4x8xf32, #tpu.memory_space<vmem>>, vector<4x8xf32>
    %cst = arith.constant dense<0.000000e+00> : vector<2x8xf32>
    %3 = tpu.matmul %1, %2, %cst {dimension_numbers = #tpu.dot_dimension_numbers<[1], [0], [0], [1], [0, 0, 1, 1], [], []>} : vector<2x4xf32>, vector<4x8xf32>, vector<2x8xf32> -> vector<2x8xf32>
    %cst_4 = arith.constant 5.120000e+02 : f32
    %4 = vector.broadcast %cst_4 : f32 to vector<2x8xf32>
    %5 = arith.divf %3, %4 : vector<2x8xf32>
    %6 = vector.extract_strided_slice %5 {offsets = [0, 0], sizes = [1, 8], strides = [1, 1]} : vector<2x8xf32> to vector<1x8xf32>
    %7 = vector.extract_strided_slice %5 {offsets = [1, 0], sizes = [1, 8], strides = [1, 1]} : vector<2x8xf32> to vector<1x8xf32>
    %8 = arith.mulf %6, %6 : vector<1x8xf32>
    %9 = arith.subf %7, %8 : vector<1x8xf32>
    %cst_5 = arith.constant 9.99999974E-6 : f32
    %10 = vector.broadcast %cst_5 : f32 to vector<1x8xf32>
    %11 = arith.addf %9, %10 : vector<1x8xf32>
    %12 = math.rsqrt %11 : vector<1x8xf32>
    %c0_6 = arith.constant 0 : index
    %c0_7 = arith.constant 0 : index
    %c0_8 = arith.constant 0 : index
    %13 = vector.load %arg2[%c0_6, %c0_7, %c0_8] : memref<1x128x8xf32, #tpu.memory_space<vmem>>, vector<1x128x8xf32>
    %14 = vector.shape_cast %13 : vector<1x128x8xf32> to vector<128x8xf32>
    %15 = vector.broadcast %6 : vector<1x8xf32> to vector<128x8xf32>
    %16 = arith.subf %14, %15 : vector<128x8xf32>
    %c0_9 = arith.constant 0 : index
    %c0_10 = arith.constant 0 : index
    %17 = vector.load %arg4[%c0_9, %c0_10] : memref<1x8xf32, #tpu.memory_space<vmem>>, vector<1x8xf32>
    %18 = arith.mulf %12, %17 : vector<1x8xf32>
    %19 = vector.broadcast %18 : vector<1x8xf32> to vector<128x8xf32>
    %20 = arith.mulf %16, %19 : vector<128x8xf32>
    %c0_11 = arith.constant 0 : index
    %c0_12 = arith.constant 0 : index
    %21 = vector.load %arg5[%c0_11, %c0_12] : memref<1x8xf32, #tpu.memory_space<vmem>>, vector<1x8xf32>
    %22 = vector.broadcast %21 : vector<1x8xf32> to vector<128x8xf32>
    %23 = arith.addf %20, %22 : vector<128x8xf32>
    %24 = arith.negf %23 : vector<128x8xf32>
    %25 = math.exp %24 : vector<128x8xf32>
    %cst_13 = arith.constant 1.000000e+00 : f32
    %26 = vector.broadcast %cst_13 : f32 to vector<128x8xf32>
    %27 = arith.addf %26, %25 : vector<128x8xf32>
    %28 = arith.divf %26, %27 : vector<128x8xf32>
    %29 = arith.mulf %23, %28 : vector<128x8xf32>
    %c0_14 = arith.constant 0 : index
    %c0_15 = arith.constant 0 : index
    %c0_16 = arith.constant 0 : index
    %30 = vector.load %arg7[%c0_14, %c0_15, %c0_16] : memref<1x128x4xf32, #tpu.memory_space<vmem>>, vector<1x128x4xf32>
    %31 = vector.shape_cast %30 : vector<1x128x4xf32> to vector<128x4xf32>
    %32 = arith.truncf %31 : vector<128x4xf32> to vector<128x4xbf16>
    %c0_17 = arith.constant 0 : index
    %c0_18 = arith.constant 0 : index
    %33 = vector.load %arg8[%c0_17, %c0_18] : memref<4x8xbf16, #tpu.memory_space<vmem>>, vector<4x8xbf16>
    %cst_19 = arith.constant dense<0.000000e+00> : vector<128x8xf32>
    %34 = tpu.matmul %32, %33, %cst_19 {dimension_numbers = #tpu.dot_dimension_numbers<[1], [0], [0], [1], [0, 0, 1, 1], [], []>} : vector<128x4xbf16>, vector<4x8xbf16>, vector<128x8xf32> -> vector<128x8xf32>
    %c0_20 = arith.constant 0 : index
    %c0_21 = arith.constant 0 : index
    %35 = vector.load %arg9[%c0_20, %c0_21] : memref<1x8xf32, #tpu.memory_space<vmem>>, vector<1x8xf32>
    %36 = vector.broadcast %35 : vector<1x8xf32> to vector<128x8xf32>
    %37 = arith.addf %34, %36 : vector<128x8xf32>
    %38 = arith.addf %29, %37 : vector<128x8xf32>
    %c0_22 = arith.constant 0 : index
    %c0_23 = arith.constant 0 : index
    %c0_24 = arith.constant 0 : index
    %39 = vector.load %arg10[%c0_22, %c0_23, %c0_24] : memref<1x128x8xf32, #tpu.memory_space<vmem>>, vector<1x128x8xf32>
    %40 = vector.shape_cast %39 : vector<1x128x8xf32> to vector<128x8xf32>
    %41 = vector.shape_cast %38 : vector<128x8xf32> to vector<1x128x8xf32>
    tpu.vector_store %arg10[%c0_22, %c0_23, %c0_24], %41 {strides = array<i32>} : memref<1x128x8xf32, #tpu.memory_space<vmem>>, vector<1x128x8xf32>,
    return
  }
  func.func @transform_0(%arg0: i32, %arg1: i32) -> (i32, i32, i32) {
    %c0_i32 = arith.constant 0 : i32
    %c0_i32_0 = arith.constant 0 : i32
    return %arg0, %arg1, %c0_i32 : i32, i32, i32
  }
  func.func @transform_1(%arg0: i32, %arg1: i32) -> (i32, i32, i32) {
    %c0_i32 = arith.constant 0 : i32
    %c0_i32_0 = arith.constant 0 : i32
    %c0_i32_1 = arith.constant 0 : i32
    return %arg0, %c0_i32, %c0_i32_0 : i32, i32, i32
  }
  func.func @transform_2(%arg0: i32, %arg1: i32) -> (i32, i32) {
    %c0_i32 = arith.constant 0 : i32
    %c0_i32_0 = arith.constant 0 : i32
    %c0_i32_1 = arith.constant 0 : i32
    return %c0_i32, %c0_i32_0 : i32, i32
  }
  func.func @transform_3(%arg0: i32, %arg1: i32) -> (i32, i32) {
    %c0_i32 = arith.constant 0 : i32
    %c0_i32_0 = arith.constant 0 : i32
    %c0_i32_1 = arith.constant 0 : i32
    return %c0_i32, %c0_i32_0 : i32, i32
  }
  func.func @transform_4(%arg0: i32, %arg1: i32) -> (i32, i32) {
    %c0_i32 = arith.constant 0 : i32
    %c0_i32_0 = arith.constant 0 : i32
    %c0_i32_1 = arith.constant 0 : i32
    return %c0_i32, %c0_i32_0 : i32, i32
  }
  func.func @transform_5(%arg0: i32, %arg1: i32) -> (i32, i32, i32) {
    %c0_i32 = arith.constant 0 : i32
    %c0_i32_0 = arith.constant 0 : i32
    return %arg0, %arg1, %c0_i32 : i32, i32, i32
  }
  func.func @transform_6(%arg0: i32, %arg1: i32) -> (i32, i32) {
    %c0_i32 = arith.constant 0 : i32
    %c0_i32_0 = arith.constant 0 : i32
    %c0_i32_1 = arith.constant 0 : i32
    return %c0_i32, %c0_i32_0 : i32, i32
  }
  func.func @transform_7(%arg0: i32, %arg1: i32) -> (i32, i32) {
    %c0_i32 = arith.constant 0 : i32
    %c0_i32_0 = arith.constant 0 : i32
    %c0_i32_1 = arith.constant 0 : i32
    return %c0_i32, %c0_i32_0 : i32, i32
  }
  func.func @transform_8(%arg0: i32, %arg1: i32) -> (i32, i32, i32) {
    %c0_i32 = arith.constant 0 : i32
    %c0_i32_0 = arith.constant 0 : i32
    return %arg0, %arg1, %c0_i32 : i32, i32, i32
  }
}

module attributes {stable_mosaic.version = 11 : i64} {
  func.func @_gn_apply_kernel(%arg0: i32, %arg1: i32, %arg2: memref<1x128x8xf32, #tpu.memory_space<vmem>>, %arg3: memref<1x2x4xf32, #tpu.memory_space<vmem>>, %arg4: memref<1x8xf32, #tpu.memory_space<vmem>>, %arg5: memref<1x8xf32, #tpu.memory_space<vmem>>, %arg6: memref<4x8xf32, #tpu.memory_space<vmem>>, %arg7: memref<1x128x8xf32, #tpu.memory_space<vmem>>) attributes {dimension_semantics = [#tpu.dimension_semantics<parallel>, #tpu.dimension_semantics<parallel>], iteration_bounds = array<i64: 2, 2>, scalar_prefetch = 0 : i64, scratch_operands = 0 : i64, tpu.core_type = #tpu.core_type<tc>, window_params = [{transform_indices = @transform_0, window_bounds = array<i64: 1, 128, 8>}, {transform_indices = @transform_1, window_bounds = array<i64: 1, 2, 4>}, {pipeline_mode = #tpu.pipeline_mode<synchronous>, transform_indices = @transform_2, window_bounds = array<i64: 1, 8>}, {pipeline_mode = #tpu.pipeline_mode<synchronous>, transform_indices = @transform_3, window_bounds = array<i64: 1, 8>}, {pipeline_mode = #tpu.pipeline_mode<synchronous>, transform_indices = @transform_4, window_bounds = array<i64: 4, 8>}, {transform_indices = @transform_5, window_bounds = array<i64: 1, 128, 8>}]} {
    %c0 = arith.constant 0 : index
    %c0_0 = arith.constant 0 : index
    %c0_1 = arith.constant 0 : index
    %0 = vector.load %arg3[%c0, %c0_0, %c0_1] : memref<1x2x4xf32, #tpu.memory_space<vmem>>, vector<1x2x4xf32>
    %1 = vector.shape_cast %0 : vector<1x2x4xf32> to vector<2x4xf32>
    %c0_2 = arith.constant 0 : index
    %c0_3 = arith.constant 0 : index
    %2 = vector.load %arg6[%c0_2, %c0_3] : memref<4x8xf32, #tpu.memory_space<vmem>>, vector<4x8xf32>
    %cst = arith.constant dense<0.000000e+00> : vector<2x8xf32>
    %3 = tpu.matmul %1, %2, %cst {dimension_numbers = #tpu.dot_dimension_numbers<[1], [0], [0], [1], [0, 0, 1, 1], [], []>} : vector<2x4xf32>, vector<4x8xf32>, vector<2x8xf32> -> vector<2x8xf32>
    %cst_4 = arith.constant 5.120000e+02 : f32
    %4 = vector.broadcast %cst_4 : f32 to vector<2x8xf32>
    %5 = arith.divf %3, %4 : vector<2x8xf32>
    %6 = vector.extract_strided_slice %5 {offsets = [0, 0], sizes = [1, 8], strides = [1, 1]} : vector<2x8xf32> to vector<1x8xf32>
    %7 = vector.extract_strided_slice %5 {offsets = [1, 0], sizes = [1, 8], strides = [1, 1]} : vector<2x8xf32> to vector<1x8xf32>
    %8 = arith.mulf %6, %6 : vector<1x8xf32>
    %9 = arith.subf %7, %8 : vector<1x8xf32>
    %cst_5 = arith.constant 9.99999974E-6 : f32
    %10 = vector.broadcast %cst_5 : f32 to vector<1x8xf32>
    %11 = arith.addf %9, %10 : vector<1x8xf32>
    %12 = math.rsqrt %11 : vector<1x8xf32>
    %c0_6 = arith.constant 0 : index
    %c0_7 = arith.constant 0 : index
    %c0_8 = arith.constant 0 : index
    %13 = vector.load %arg2[%c0_6, %c0_7, %c0_8] : memref<1x128x8xf32, #tpu.memory_space<vmem>>, vector<1x128x8xf32>
    %14 = vector.shape_cast %13 : vector<1x128x8xf32> to vector<128x8xf32>
    %15 = vector.broadcast %6 : vector<1x8xf32> to vector<128x8xf32>
    %16 = arith.subf %14, %15 : vector<128x8xf32>
    %c0_9 = arith.constant 0 : index
    %c0_10 = arith.constant 0 : index
    %17 = vector.load %arg4[%c0_9, %c0_10] : memref<1x8xf32, #tpu.memory_space<vmem>>, vector<1x8xf32>
    %18 = arith.mulf %12, %17 : vector<1x8xf32>
    %19 = vector.broadcast %18 : vector<1x8xf32> to vector<128x8xf32>
    %20 = arith.mulf %16, %19 : vector<128x8xf32>
    %c0_11 = arith.constant 0 : index
    %c0_12 = arith.constant 0 : index
    %21 = vector.load %arg5[%c0_11, %c0_12] : memref<1x8xf32, #tpu.memory_space<vmem>>, vector<1x8xf32>
    %22 = vector.broadcast %21 : vector<1x8xf32> to vector<128x8xf32>
    %23 = arith.addf %20, %22 : vector<128x8xf32>
    %c0_13 = arith.constant 0 : index
    %c0_14 = arith.constant 0 : index
    %c0_15 = arith.constant 0 : index
    %24 = vector.load %arg7[%c0_13, %c0_14, %c0_15] : memref<1x128x8xf32, #tpu.memory_space<vmem>>, vector<1x128x8xf32>
    %25 = vector.shape_cast %24 : vector<1x128x8xf32> to vector<128x8xf32>
    %26 = vector.shape_cast %23 : vector<128x8xf32> to vector<1x128x8xf32>
    tpu.vector_store %arg7[%c0_13, %c0_14, %c0_15], %26 {strides = array<i32>} : memref<1x128x8xf32, #tpu.memory_space<vmem>>, vector<1x128x8xf32>,
    return
  }
  func.func @transform_0(%arg0: i32, %arg1: i32) -> (i32, i32, i32) {
    %c0_i32 = arith.constant 0 : i32
    %c0_i32_0 = arith.constant 0 : i32
    return %arg0, %arg1, %c0_i32 : i32, i32, i32
  }
  func.func @transform_1(%arg0: i32, %arg1: i32) -> (i32, i32, i32) {
    %c0_i32 = arith.constant 0 : i32
    %c0_i32_0 = arith.constant 0 : i32
    %c0_i32_1 = arith.constant 0 : i32
    return %arg0, %c0_i32, %c0_i32_0 : i32, i32, i32
  }
  func.func @transform_2(%arg0: i32, %arg1: i32) -> (i32, i32) {
    %c0_i32 = arith.constant 0 : i32
    %c0_i32_0 = arith.constant 0 : i32
    %c0_i32_1 = arith.constant 0 : i32
    return %c0_i32, %c0_i32_0 : i32, i32
  }
  func.func @transform_3(%arg0: i32, %arg1: i32) -> (i32, i32) {
    %c0_i32 = arith.constant 0 : i32
    %c0_i32_0 = arith.constant 0 : i32
    %c0_i32_1 = arith.constant 0 : i32
    return %c0_i32, %c0_i32_0 : i32, i32
  }
  func.func @transform_4(%arg0: i32, %arg1: i32) -> (i32, i32) {
    %c0_i32 = arith.constant 0 : i32
    %c0_i32_0 = arith.constant 0 : i32
    %c0_i32_1 = arith.constant 0 : i32
    return %c0_i32, %c0_i32_0 : i32, i32
  }
  func.func @transform_5(%arg0: i32, %arg1: i32) -> (i32, i32, i32) {
    %c0_i32 = arith.constant 0 : i32
    %c0_i32_0 = arith.constant 0 : i32
    return %arg0, %arg1, %c0_i32 : i32, i32, i32
  }
}

module attributes {stable_mosaic.version = 11 : i64} {
  func.func @_flash_attn_kernel(%arg0: i32, %arg1: i32, %arg2: i32, %arg3: memref<1x128x8xbf16, #tpu.memory_space<vmem>>, %arg4: memref<1x128x8xbf16, #tpu.memory_space<vmem>>, %arg5: memref<1x128x8xbf16, #tpu.memory_space<vmem>>, %arg6: memref<1x128x8xf32, #tpu.memory_space<vmem>>, %arg7: memref<8x8xbf16, #tpu.memory_space<vmem>>, %arg8: memref<1x8xf32, #tpu.memory_space<vmem>>, %arg9: memref<1x128x8xf32, #tpu.memory_space<vmem>>, %arg10: memref<128x1xf32, #tpu.memory_space<vmem>>, %arg11: memref<128x1xf32, #tpu.memory_space<vmem>>, %arg12: memref<128x8xf32, #tpu.memory_space<vmem>>) attributes {dimension_semantics = [#tpu.dimension_semantics<parallel>, #tpu.dimension_semantics<parallel>, #tpu.dimension_semantics<arbitrary>], iteration_bounds = array<i64: 2, 2, 2>, scalar_prefetch = 0 : i64, scratch_operands = 3 : i64, tpu.core_type = #tpu.core_type<tc>, window_params = [{transform_indices = @transform_0, window_bounds = array<i64: 1, 128, 8>}, {transform_indices = @transform_1, window_bounds = array<i64: 1, 128, 8>}, {transform_indices = @transform_2, window_bounds = array<i64: 1, 128, 8>}, {transform_indices = @transform_3, window_bounds = array<i64: 1, 128, 8>}, {pipeline_mode = #tpu.pipeline_mode<synchronous>, transform_indices = @transform_4, window_bounds = array<i64: 8, 8>}, {pipeline_mode = #tpu.pipeline_mode<synchronous>, transform_indices = @transform_5, window_bounds = array<i64: 1, 8>}, {transform_indices = @transform_6, window_bounds = array<i64: 1, 128, 8>}]} {
    %c0_i32 = arith.constant 0 : i32
    %0 = arith.cmpi eq, %arg2, %c0_i32 : i32
    %1 = arith.extui %0 : i1 to i32
    %c0_i32_0 = arith.constant 0 : i32
    %2 = arith.cmpi ne, %1, %c0_i32_0 : i32
    scf.if %2 {
      %cst_25 = arith.constant 0xFF800000 : f32
      %36 = vector.broadcast %cst_25 : f32 to vector<128x1xf32>
      %c0_26 = arith.constant 0 : index
      %c0_27 = arith.constant 0 : index
      %37 = vector.load %arg10[%c0_26, %c0_27] : memref<128x1xf32, #tpu.memory_space<vmem>>, vector<128x1xf32>
      tpu.vector_store %arg10[%c0_26, %c0_27], %36 {strides = array<i32>} : memref<128x1xf32, #tpu.memory_space<vmem>>, vector<128x1xf32>,
      %cst_28 = arith.constant 0.000000e+00 : f32
      %38 = vector.broadcast %cst_28 : f32 to vector<128x1xf32>
      %c0_29 = arith.constant 0 : index
      %c0_30 = arith.constant 0 : index
      %39 = vector.load %arg11[%c0_29, %c0_30] : memref<128x1xf32, #tpu.memory_space<vmem>>, vector<128x1xf32>
      tpu.vector_store %arg11[%c0_29, %c0_30], %38 {strides = array<i32>} : memref<128x1xf32, #tpu.memory_space<vmem>>, vector<128x1xf32>,
      %cst_31 = arith.constant 0.000000e+00 : f32
      %40 = vector.broadcast %cst_31 : f32 to vector<128x8xf32>
      %c0_32 = arith.constant 0 : index
      %c0_33 = arith.constant 0 : index
      %41 = vector.load %arg12[%c0_32, %c0_33] : memref<128x8xf32, #tpu.memory_space<vmem>>, vector<128x8xf32>
      tpu.vector_store %arg12[%c0_32, %c0_33], %40 {strides = array<i32>} : memref<128x8xf32, #tpu.memory_space<vmem>>, vector<128x8xf32>,
    } else {
    }
    %c0 = arith.constant 0 : index
    %c0_1 = arith.constant 0 : index
    %c0_2 = arith.constant 0 : index
    %3 = vector.load %arg3[%c0, %c0_1, %c0_2] : memref<1x128x8xbf16, #tpu.memory_space<vmem>>, vector<1x128x8xbf16>
    %4 = vector.shape_cast %3 : vector<1x128x8xbf16> to vector<128x8xbf16>
    %c0_3 = arith.constant 0 : index
    %c0_4 = arith.constant 0 : index
    %c0_5 = arith.constant 0 : index
    %5 = vector.load %arg4[%c0_3, %c0_4, %c0_5] : memref<1x128x8xbf16, #tpu.memory_space<vmem>>, vector<1x128x8xbf16>
    %6 = vector.shape_cast %5 : vector<1x128x8xbf16> to vector<128x8xbf16>
    %cst = arith.constant dense<0.000000e+00> : vector<128x128xf32>
    %7 = tpu.matmul %4, %6, %cst {dimension_numbers = #tpu.dot_dimension_numbers<[1], [1], [0], [0], [0, 0, 1, 0], [], []>} : vector<128x8xbf16>, vector<128x8xbf16>, vector<128x128xf32> -> vector<128x128xf32>
    %c0_6 = arith.constant 0 : index
    %c0_7 = arith.constant 0 : index
    %8 = vector.load %arg10[%c0_6, %c0_7] : memref<128x1xf32, #tpu.memory_space<vmem>>, vector<128x1xf32>
    %cst_8 = arith.constant dense<0xFF800000> : vector<128xf32>
    %9 = vector.multi_reduction <maximumf>, %7, %cst_8 [1] : vector<128x128xf32> to vector<128xf32>
    %10 = vector.shape_cast %9 : vector<128xf32> to vector<128x1xf32>
    %11 = arith.maximumf %8, %10 : vector<128x1xf32>
    %12 = arith.subf %8, %11 : vector<128x1xf32>
    %13 = math.exp %12 : vector<128x1xf32>
    %14 = vector.broadcast %11 : vector<128x1xf32> to vector<128x128xf32>
    %15 = arith.subf %7, %14 : vector<128x128xf32>
    %16 = math.exp %15 : vector<128x128xf32>
    %c0_9 = arith.constant 0 : index
    %c0_10 = arith.constant 0 : index
    %17 = vector.load %arg11[%c0_9, %c0_10] : memref<128x1xf32, #tpu.memory_space<vmem>>, vector<128x1xf32>
    %18 = arith.mulf %13, %17 : vector<128x1xf32>
    %cst_11 = arith.constant dense<0.000000e+00> : vector<128xf32>
    %19 = vector.multi_reduction <add>, %16, %cst_11 [1] : vector<128x128xf32> to vector<128xf32>
    %20 = vector.shape_cast %19 : vector<128xf32> to vector<128x1xf32>
    %21 = arith.addf %18, %20 : vector<128x1xf32>
    %c0_12 = arith.constant 0 : index
    %c0_13 = arith.constant 0 : index
    %22 = vector.load %arg11[%c0_12, %c0_13] : memref<128x1xf32, #tpu.memory_space<vmem>>, vector<128x1xf32>
    tpu.vector_store %arg11[%c0_12, %c0_13], %21 {strides = array<i32>} : memref<128x1xf32, #tpu.memory_space<vmem>>, vector<128x1xf32>,
    %c0_14 = arith.constant 0 : index
    %c0_15 = arith.constant 0 : index
    %23 = vector.load %arg12[%c0_14, %c0_15] : memref<128x8xf32, #tpu.memory_space<vmem>>, vector<128x8xf32>
    %24 = vector.broadcast %13 : vector<128x1xf32> to vector<128x8xf32>
    %25 = arith.mulf %24, %23 : vector<128x8xf32>
    %26 = arith.truncf %16 : vector<128x128xf32> to vector<128x128xbf16>
    %c0_16 = arith.constant 0 : index
    %c0_17 = arith.constant 0 : index
    %c0_18 = arith.constant 0 : index
    %27 = vector.load %arg5[%c0_16, %c0_17, %c0_18] : memref<1x128x8xbf16, #tpu.memory_space<vmem>>, vector<1x128x8xbf16>
    %28 = vector.shape_cast %27 : vector<1x128x8xbf16> to vector<128x8xbf16>
    %cst_19 = arith.constant dense<0.000000e+00> : vector<128x8xf32>
    %29 = tpu.matmul %26, %28, %cst_19 {dimension_numbers = #tpu.dot_dimension_numbers<[1], [0], [0], [1], [0, 0, 1, 1], [], []>} : vector<128x128xbf16>, vector<128x8xbf16>, vector<128x8xf32> -> vector<128x8xf32>
    %30 = arith.addf %25, %29 : vector<128x8xf32>
    %c0_20 = arith.constant 0 : index
    %c0_21 = arith.constant 0 : index
    %31 = vector.load %arg12[%c0_20, %c0_21] : memref<128x8xf32, #tpu.memory_space<vmem>>, vector<128x8xf32>
    tpu.vector_store %arg12[%c0_20, %c0_21], %30 {strides = array<i32>} : memref<128x8xf32, #tpu.memory_space<vmem>>, vector<128x8xf32>,
    %c0_22 = arith.constant 0 : index
    %c0_23 = arith.constant 0 : index
    %32 = vector.load %arg10[%c0_22, %c0_23] : memref<128x1xf32, #tpu.memory_space<vmem>>, vector<128x1xf32>
    tpu.vector_store %arg10[%c0_22, %c0_23], %11 {strides = array<i32>} : memref<128x1xf32, #tpu.memory_space<vmem>>, vector<128x1xf32>,
    %c1_i32 = arith.constant 1 : i32
    %33 = arith.cmpi eq, %arg2, %c1_i32 : i32
    %34 = arith.extui %33 : i1 to i32
    %c0_i32_24 = arith.constant 0 : i32
    %35 = arith.cmpi ne, %34, %c0_i32_24 : i32
    scf.if %35 {
      %c0_25 = arith.constant 0 : index
      %c0_26 = arith.constant 0 : index
      %36 = vector.load %arg12[%c0_25, %c0_26] : memref<128x8xf32, #tpu.memory_space<vmem>>, vector<128x8xf32>
      %c0_27 = arith.constant 0 : index
      %c0_28 = arith.constant 0 : index
      %37 = vector.load %arg11[%c0_27, %c0_28] : memref<128x1xf32, #tpu.memory_space<vmem>>, vector<128x1xf32>
      %38 = tpu.reciprocal %37 {approx = true} : vector<128x1xf32> -> vector<128x1xf32>
      %39 = vector.broadcast %38 : vector<128x1xf32> to vector<128x8xf32>
      %40 = arith.mulf %36, %39 : vector<128x8xf32>
      %41 = arith.truncf %40 : vector<128x8xf32> to vector<128x8xbf16>
      %c0_29 = arith.constant 0 : index
      %c0_30 = arith.constant 0 : index
      %42 = vector.load %arg7[%c0_29, %c0_30] : memref<8x8xbf16, #tpu.memory_space<vmem>>, vector<8x8xbf16>
      %cst_31 = arith.constant dense<0.000000e+00> : vector<128x8xf32>
      %43 = tpu.matmul %41, %42, %cst_31 {dimension_numbers = #tpu.dot_dimension_numbers<[1], [0], [0], [1], [0, 0, 1, 1], [], []>} : vector<128x8xbf16>, vector<8x8xbf16>, vector<128x8xf32> -> vector<128x8xf32>
      %c0_32 = arith.constant 0 : index
      %c0_33 = arith.constant 0 : index
      %44 = vector.load %arg8[%c0_32, %c0_33] : memref<1x8xf32, #tpu.memory_space<vmem>>, vector<1x8xf32>
      %45 = vector.broadcast %44 : vector<1x8xf32> to vector<128x8xf32>
      %46 = arith.addf %43, %45 : vector<128x8xf32>
      %c0_34 = arith.constant 0 : index
      %c0_35 = arith.constant 0 : index
      %c0_36 = arith.constant 0 : index
      %47 = vector.load %arg6[%c0_34, %c0_35, %c0_36] : memref<1x128x8xf32, #tpu.memory_space<vmem>>, vector<1x128x8xf32>
      %48 = vector.shape_cast %47 : vector<1x128x8xf32> to vector<128x8xf32>
      %49 = arith.addf %48, %46 : vector<128x8xf32>
      %c0_37 = arith.constant 0 : index
      %c0_38 = arith.constant 0 : index
      %c0_39 = arith.constant 0 : index
      %50 = vector.load %arg9[%c0_37, %c0_38, %c0_39] : memref<1x128x8xf32, #tpu.memory_space<vmem>>, vector<1x128x8xf32>
      %51 = vector.shape_cast %50 : vector<1x128x8xf32> to vector<128x8xf32>
      %52 = vector.shape_cast %49 : vector<128x8xf32> to vector<1x128x8xf32>
      tpu.vector_store %arg9[%c0_37, %c0_38, %c0_39], %52 {strides = array<i32>} : memref<1x128x8xf32, #tpu.memory_space<vmem>>, vector<1x128x8xf32>,
    } else {
    }
    return
  }
  func.func @transform_0(%arg0: i32, %arg1: i32, %arg2: i32) -> (i32, i32, i32) {
    %c0_i32 = arith.constant 0 : i32
    %c0_i32_0 = arith.constant 0 : i32
    return %arg0, %arg1, %c0_i32 : i32, i32, i32
  }
  func.func @transform_1(%arg0: i32, %arg1: i32, %arg2: i32) -> (i32, i32, i32) {
    %c0_i32 = arith.constant 0 : i32
    %c0_i32_0 = arith.constant 0 : i32
    return %arg0, %arg2, %c0_i32 : i32, i32, i32
  }
  func.func @transform_2(%arg0: i32, %arg1: i32, %arg2: i32) -> (i32, i32, i32) {
    %c0_i32 = arith.constant 0 : i32
    %c0_i32_0 = arith.constant 0 : i32
    return %arg0, %arg2, %c0_i32 : i32, i32, i32
  }
  func.func @transform_3(%arg0: i32, %arg1: i32, %arg2: i32) -> (i32, i32, i32) {
    %c0_i32 = arith.constant 0 : i32
    %c0_i32_0 = arith.constant 0 : i32
    return %arg0, %arg1, %c0_i32 : i32, i32, i32
  }
  func.func @transform_4(%arg0: i32, %arg1: i32, %arg2: i32) -> (i32, i32) {
    %c0_i32 = arith.constant 0 : i32
    %c0_i32_0 = arith.constant 0 : i32
    %c0_i32_1 = arith.constant 0 : i32
    return %c0_i32, %c0_i32_0 : i32, i32
  }
  func.func @transform_5(%arg0: i32, %arg1: i32, %arg2: i32) -> (i32, i32) {
    %c0_i32 = arith.constant 0 : i32
    %c0_i32_0 = arith.constant 0 : i32
    %c0_i32_1 = arith.constant 0 : i32
    return %c0_i32, %c0_i32_0 : i32, i32
  }
  func.func @transform_6(%arg0: i32, %arg1: i32, %arg2: i32) -> (i32, i32, i32) {
    %c0_i32 = arith.constant 0 : i32
    %c0_i32_0 = arith.constant 0 : i32
    return %arg0, %arg1, %c0_i32 : i32, i32, i32
  }
}

module attributes {stable_mosaic.version = 11 : i64} {
  func.func @_qkv_kernel(%arg0: i32, %arg1: i32, %arg2: memref<1x128x8xf32, #tpu.memory_space<vmem>>, %arg3: memref<8x8xbf16, #tpu.memory_space<vmem>>, %arg4: memref<1x8xf32, #tpu.memory_space<vmem>>, %arg5: memref<8x8xbf16, #tpu.memory_space<vmem>>, %arg6: memref<1x8xf32, #tpu.memory_space<vmem>>, %arg7: memref<8x8xbf16, #tpu.memory_space<vmem>>, %arg8: memref<1x8xf32, #tpu.memory_space<vmem>>, %arg9: memref<1x128x8xbf16, #tpu.memory_space<vmem>>, %arg10: memref<1x128x8xbf16, #tpu.memory_space<vmem>>, %arg11: memref<1x128x8xbf16, #tpu.memory_space<vmem>>) attributes {dimension_semantics = [#tpu.dimension_semantics<parallel>, #tpu.dimension_semantics<parallel>], iteration_bounds = array<i64: 2, 2>, scalar_prefetch = 0 : i64, scratch_operands = 0 : i64, tpu.core_type = #tpu.core_type<tc>, window_params = [{transform_indices = @transform_0, window_bounds = array<i64: 1, 128, 8>}, {pipeline_mode = #tpu.pipeline_mode<synchronous>, transform_indices = @transform_1, window_bounds = array<i64: 8, 8>}, {pipeline_mode = #tpu.pipeline_mode<synchronous>, transform_indices = @transform_2, window_bounds = array<i64: 1, 8>}, {pipeline_mode = #tpu.pipeline_mode<synchronous>, transform_indices = @transform_3, window_bounds = array<i64: 8, 8>}, {pipeline_mode = #tpu.pipeline_mode<synchronous>, transform_indices = @transform_4, window_bounds = array<i64: 1, 8>}, {pipeline_mode = #tpu.pipeline_mode<synchronous>, transform_indices = @transform_5, window_bounds = array<i64: 8, 8>}, {pipeline_mode = #tpu.pipeline_mode<synchronous>, transform_indices = @transform_6, window_bounds = array<i64: 1, 8>}, {transform_indices = @transform_7, window_bounds = array<i64: 1, 128, 8>}, {transform_indices = @transform_8, window_bounds = array<i64: 1, 128, 8>}, {transform_indices = @transform_9, window_bounds = array<i64: 1, 128, 8>}]} {
    %c0 = arith.constant 0 : index
    %c0_0 = arith.constant 0 : index
    %c0_1 = arith.constant 0 : index
    %0 = vector.load %arg2[%c0, %c0_0, %c0_1] : memref<1x128x8xf32, #tpu.memory_space<vmem>>, vector<1x128x8xf32>
    %1 = vector.shape_cast %0 : vector<1x128x8xf32> to vector<128x8xf32>
    %2 = arith.truncf %1 : vector<128x8xf32> to vector<128x8xbf16>
    %c0_2 = arith.constant 0 : index
    %c0_3 = arith.constant 0 : index
    %3 = vector.load %arg3[%c0_2, %c0_3] : memref<8x8xbf16, #tpu.memory_space<vmem>>, vector<8x8xbf16>
    %cst = arith.constant dense<0.000000e+00> : vector<128x8xf32>
    %4 = tpu.matmul %2, %3, %cst {dimension_numbers = #tpu.dot_dimension_numbers<[1], [0], [0], [1], [0, 0, 1, 1], [], []>} : vector<128x8xbf16>, vector<8x8xbf16>, vector<128x8xf32> -> vector<128x8xf32>
    %c0_4 = arith.constant 0 : index
    %c0_5 = arith.constant 0 : index
    %5 = vector.load %arg4[%c0_4, %c0_5] : memref<1x8xf32, #tpu.memory_space<vmem>>, vector<1x8xf32>
    %6 = vector.broadcast %5 : vector<1x8xf32> to vector<128x8xf32>
    %7 = arith.addf %4, %6 : vector<128x8xf32>
    %c0_6 = arith.constant 0 : index
    %c0_7 = arith.constant 0 : index
    %8 = vector.load %arg5[%c0_6, %c0_7] : memref<8x8xbf16, #tpu.memory_space<vmem>>, vector<8x8xbf16>
    %cst_8 = arith.constant dense<0.000000e+00> : vector<128x8xf32>
    %9 = tpu.matmul %2, %8, %cst_8 {dimension_numbers = #tpu.dot_dimension_numbers<[1], [0], [0], [1], [0, 0, 1, 1], [], []>} : vector<128x8xbf16>, vector<8x8xbf16>, vector<128x8xf32> -> vector<128x8xf32>
    %c0_9 = arith.constant 0 : index
    %c0_10 = arith.constant 0 : index
    %10 = vector.load %arg6[%c0_9, %c0_10] : memref<1x8xf32, #tpu.memory_space<vmem>>, vector<1x8xf32>
    %11 = vector.broadcast %10 : vector<1x8xf32> to vector<128x8xf32>
    %12 = arith.addf %9, %11 : vector<128x8xf32>
    %c0_11 = arith.constant 0 : index
    %c0_12 = arith.constant 0 : index
    %13 = vector.load %arg7[%c0_11, %c0_12] : memref<8x8xbf16, #tpu.memory_space<vmem>>, vector<8x8xbf16>
    %cst_13 = arith.constant dense<0.000000e+00> : vector<128x8xf32>
    %14 = tpu.matmul %2, %13, %cst_13 {dimension_numbers = #tpu.dot_dimension_numbers<[1], [0], [0], [1], [0, 0, 1, 1], [], []>} : vector<128x8xbf16>, vector<8x8xbf16>, vector<128x8xf32> -> vector<128x8xf32>
    %c0_14 = arith.constant 0 : index
    %c0_15 = arith.constant 0 : index
    %15 = vector.load %arg8[%c0_14, %c0_15] : memref<1x8xf32, #tpu.memory_space<vmem>>, vector<1x8xf32>
    %16 = vector.broadcast %15 : vector<1x8xf32> to vector<128x8xf32>
    %17 = arith.addf %14, %16 : vector<128x8xf32>
    %cst_16 = arith.constant 0.353553385 : f32
    %18 = vector.broadcast %cst_16 : f32 to vector<128x8xf32>
    %19 = arith.mulf %7, %18 : vector<128x8xf32>
    %20 = arith.truncf %19 : vector<128x8xf32> to vector<128x8xbf16>
    %c0_17 = arith.constant 0 : index
    %c0_18 = arith.constant 0 : index
    %c0_19 = arith.constant 0 : index
    %21 = vector.load %arg9[%c0_17, %c0_18, %c0_19] : memref<1x128x8xbf16, #tpu.memory_space<vmem>>, vector<1x128x8xbf16>
    %22 = vector.shape_cast %21 : vector<1x128x8xbf16> to vector<128x8xbf16>
    %23 = vector.shape_cast %20 : vector<128x8xbf16> to vector<1x128x8xbf16>
    tpu.vector_store %arg9[%c0_17, %c0_18, %c0_19], %23 {strides = array<i32>} : memref<1x128x8xbf16, #tpu.memory_space<vmem>>, vector<1x128x8xbf16>,
    %24 = arith.truncf %12 : vector<128x8xf32> to vector<128x8xbf16>
    %c0_20 = arith.constant 0 : index
    %c0_21 = arith.constant 0 : index
    %c0_22 = arith.constant 0 : index
    %25 = vector.load %arg10[%c0_20, %c0_21, %c0_22] : memref<1x128x8xbf16, #tpu.memory_space<vmem>>, vector<1x128x8xbf16>
    %26 = vector.shape_cast %25 : vector<1x128x8xbf16> to vector<128x8xbf16>
    %27 = vector.shape_cast %24 : vector<128x8xbf16> to vector<1x128x8xbf16>
    tpu.vector_store %arg10[%c0_20, %c0_21, %c0_22], %27 {strides = array<i32>} : memref<1x128x8xbf16, #tpu.memory_space<vmem>>, vector<1x128x8xbf16>,
    %28 = arith.truncf %17 : vector<128x8xf32> to vector<128x8xbf16>
    %c0_23 = arith.constant 0 : index
    %c0_24 = arith.constant 0 : index
    %c0_25 = arith.constant 0 : index
    %29 = vector.load %arg11[%c0_23, %c0_24, %c0_25] : memref<1x128x8xbf16, #tpu.memory_space<vmem>>, vector<1x128x8xbf16>
    %30 = vector.shape_cast %29 : vector<1x128x8xbf16> to vector<128x8xbf16>
    %31 = vector.shape_cast %28 : vector<128x8xbf16> to vector<1x128x8xbf16>
    tpu.vector_store %arg11[%c0_23, %c0_24, %c0_25], %31 {strides = array<i32>} : memref<1x128x8xbf16, #tpu.memory_space<vmem>>, vector<1x128x8xbf16>,
    return
  }
  func.func @transform_0(%arg0: i32, %arg1: i32) -> (i32, i32, i32) {
    %c0_i32 = arith.constant 0 : i32
    %c0_i32_0 = arith.constant 0 : i32
    return %arg0, %arg1, %c0_i32 : i32, i32, i32
  }
  func.func @transform_1(%arg0: i32, %arg1: i32) -> (i32, i32) {
    %c0_i32 = arith.constant 0 : i32
    %c0_i32_0 = arith.constant 0 : i32
    %c0_i32_1 = arith.constant 0 : i32
    return %c0_i32, %c0_i32_0 : i32, i32
  }
  func.func @transform_2(%arg0: i32, %arg1: i32) -> (i32, i32) {
    %c0_i32 = arith.constant 0 : i32
    %c0_i32_0 = arith.constant 0 : i32
    %c0_i32_1 = arith.constant 0 : i32
    return %c0_i32, %c0_i32_0 : i32, i32
  }
  func.func @transform_3(%arg0: i32, %arg1: i32) -> (i32, i32) {
    %c0_i32 = arith.constant 0 : i32
    %c0_i32_0 = arith.constant 0 : i32
    %c0_i32_1 = arith.constant 0 : i32
    return %c0_i32, %c0_i32_0 : i32, i32
  }
  func.func @transform_4(%arg0: i32, %arg1: i32) -> (i32, i32) {
    %c0_i32 = arith.constant 0 : i32
    %c0_i32_0 = arith.constant 0 : i32
    %c0_i32_1 = arith.constant 0 : i32
    return %c0_i32, %c0_i32_0 : i32, i32
  }
  func.func @transform_5(%arg0: i32, %arg1: i32) -> (i32, i32) {
    %c0_i32 = arith.constant 0 : i32
    %c0_i32_0 = arith.constant 0 : i32
    %c0_i32_1 = arith.constant 0 : i32
    return %c0_i32, %c0_i32_0 : i32, i32
  }
  func.func @transform_6(%arg0: i32, %arg1: i32) -> (i32, i32) {
    %c0_i32 = arith.constant 0 : i32
    %c0_i32_0 = arith.constant 0 : i32
    %c0_i32_1 = arith.constant 0 : i32
    return %c0_i32, %c0_i32_0 : i32, i32
  }
  func.func @transform_7(%arg0: i32, %arg1: i32) -> (i32, i32, i32) {
    %c0_i32 = arith.constant 0 : i32
    %c0_i32_0 = arith.constant 0 : i32
    return %arg0, %arg1, %c0_i32 : i32, i32, i32
  }
  func.func @transform_8(%arg0: i32, %arg1: i32) -> (i32, i32, i32) {
    %c0_i32 = arith.constant 0 : i32
    %c0_i32_0 = arith.constant 0 : i32
    return %arg0, %arg1, %c0_i32 : i32, i32, i32
  }
  func.func @transform_9(%arg0: i32, %arg1: i32) -> (i32, i32, i32) {
    %c0_i32 = arith.constant 0 : i32
    %c0_i32_0 = arith.constant 0 : i32
    return %arg0, %arg1, %c0_i32 : i32, i32, i32
  }
}

module attributes {stable_mosaic.version = 11 : i64} {
  func.func @_gn_apply_kernel(%arg0: i32, %arg1: i32, %arg2: memref<1x128x8xf32, #tpu.memory_space<vmem>>, %arg3: memref<1x2x4xf32, #tpu.memory_space<vmem>>, %arg4: memref<1x8xf32, #tpu.memory_space<vmem>>, %arg5: memref<1x8xf32, #tpu.memory_space<vmem>>, %arg6: memref<4x8xf32, #tpu.memory_space<vmem>>, %arg7: memref<1x128x8xf32, #tpu.memory_space<vmem>>, %arg8: memref<1x128x8xf32, #tpu.memory_space<vmem>>) attributes {dimension_semantics = [#tpu.dimension_semantics<parallel>, #tpu.dimension_semantics<parallel>], iteration_bounds = array<i64: 2, 2>, scalar_prefetch = 0 : i64, scratch_operands = 0 : i64, tpu.core_type = #tpu.core_type<tc>, window_params = [{transform_indices = @transform_0, window_bounds = array<i64: 1, 128, 8>}, {transform_indices = @transform_1, window_bounds = array<i64: 1, 2, 4>}, {pipeline_mode = #tpu.pipeline_mode<synchronous>, transform_indices = @transform_2, window_bounds = array<i64: 1, 8>}, {pipeline_mode = #tpu.pipeline_mode<synchronous>, transform_indices = @transform_3, window_bounds = array<i64: 1, 8>}, {pipeline_mode = #tpu.pipeline_mode<synchronous>, transform_indices = @transform_4, window_bounds = array<i64: 4, 8>}, {transform_indices = @transform_5, window_bounds = array<i64: 1, 128, 8>}, {transform_indices = @transform_6, window_bounds = array<i64: 1, 128, 8>}]} {
    %c0 = arith.constant 0 : index
    %c0_0 = arith.constant 0 : index
    %c0_1 = arith.constant 0 : index
    %0 = vector.load %arg3[%c0, %c0_0, %c0_1] : memref<1x2x4xf32, #tpu.memory_space<vmem>>, vector<1x2x4xf32>
    %1 = vector.shape_cast %0 : vector<1x2x4xf32> to vector<2x4xf32>
    %c0_2 = arith.constant 0 : index
    %c0_3 = arith.constant 0 : index
    %2 = vector.load %arg6[%c0_2, %c0_3] : memref<4x8xf32, #tpu.memory_space<vmem>>, vector<4x8xf32>
    %cst = arith.constant dense<0.000000e+00> : vector<2x8xf32>
    %3 = tpu.matmul %1, %2, %cst {dimension_numbers = #tpu.dot_dimension_numbers<[1], [0], [0], [1], [0, 0, 1, 1], [], []>} : vector<2x4xf32>, vector<4x8xf32>, vector<2x8xf32> -> vector<2x8xf32>
    %cst_4 = arith.constant 5.120000e+02 : f32
    %4 = vector.broadcast %cst_4 : f32 to vector<2x8xf32>
    %5 = arith.divf %3, %4 : vector<2x8xf32>
    %6 = vector.extract_strided_slice %5 {offsets = [0, 0], sizes = [1, 8], strides = [1, 1]} : vector<2x8xf32> to vector<1x8xf32>
    %7 = vector.extract_strided_slice %5 {offsets = [1, 0], sizes = [1, 8], strides = [1, 1]} : vector<2x8xf32> to vector<1x8xf32>
    %8 = arith.mulf %6, %6 : vector<1x8xf32>
    %9 = arith.subf %7, %8 : vector<1x8xf32>
    %cst_5 = arith.constant 9.99999974E-6 : f32
    %10 = vector.broadcast %cst_5 : f32 to vector<1x8xf32>
    %11 = arith.addf %9, %10 : vector<1x8xf32>
    %12 = math.rsqrt %11 : vector<1x8xf32>
    %c0_6 = arith.constant 0 : index
    %c0_7 = arith.constant 0 : index
    %c0_8 = arith.constant 0 : index
    %13 = vector.load %arg2[%c0_6, %c0_7, %c0_8] : memref<1x128x8xf32, #tpu.memory_space<vmem>>, vector<1x128x8xf32>
    %14 = vector.shape_cast %13 : vector<1x128x8xf32> to vector<128x8xf32>
    %15 = vector.broadcast %6 : vector<1x8xf32> to vector<128x8xf32>
    %16 = arith.subf %14, %15 : vector<128x8xf32>
    %c0_9 = arith.constant 0 : index
    %c0_10 = arith.constant 0 : index
    %17 = vector.load %arg4[%c0_9, %c0_10] : memref<1x8xf32, #tpu.memory_space<vmem>>, vector<1x8xf32>
    %18 = arith.mulf %12, %17 : vector<1x8xf32>
    %19 = vector.broadcast %18 : vector<1x8xf32> to vector<128x8xf32>
    %20 = arith.mulf %16, %19 : vector<128x8xf32>
    %c0_11 = arith.constant 0 : index
    %c0_12 = arith.constant 0 : index
    %21 = vector.load %arg5[%c0_11, %c0_12] : memref<1x8xf32, #tpu.memory_space<vmem>>, vector<1x8xf32>
    %22 = vector.broadcast %21 : vector<1x8xf32> to vector<128x8xf32>
    %23 = arith.addf %20, %22 : vector<128x8xf32>
    %24 = arith.negf %23 : vector<128x8xf32>
    %25 = math.exp %24 : vector<128x8xf32>
    %cst_13 = arith.constant 1.000000e+00 : f32
    %26 = vector.broadcast %cst_13 : f32 to vector<128x8xf32>
    %27 = arith.addf %26, %25 : vector<128x8xf32>
    %28 = arith.divf %26, %27 : vector<128x8xf32>
    %29 = arith.mulf %23, %28 : vector<128x8xf32>
    %c0_14 = arith.constant 0 : index
    %c0_15 = arith.constant 0 : index
    %c0_16 = arith.constant 0 : index
    %30 = vector.load %arg7[%c0_14, %c0_15, %c0_16] : memref<1x128x8xf32, #tpu.memory_space<vmem>>, vector<1x128x8xf32>
    %31 = vector.shape_cast %30 : vector<1x128x8xf32> to vector<128x8xf32>
    %32 = arith.addf %29, %31 : vector<128x8xf32>
    %c0_17 = arith.constant 0 : index
    %c0_18 = arith.constant 0 : index
    %c0_19 = arith.constant 0 : index
    %33 = vector.load %arg8[%c0_17, %c0_18, %c0_19] : memref<1x128x8xf32, #tpu.memory_space<vmem>>, vector<1x128x8xf32>
    %34 = vector.shape_cast %33 : vector<1x128x8xf32> to vector<128x8xf32>
    %35 = vector.shape_cast %32 : vector<128x8xf32> to vector<1x128x8xf32>
    tpu.vector_store %arg8[%c0_17, %c0_18, %c0_19], %35 {strides = array<i32>} : memref<1x128x8xf32, #tpu.memory_space<vmem>>, vector<1x128x8xf32>,
    return
  }
  func.func @transform_0(%arg0: i32, %arg1: i32) -> (i32, i32, i32) {
    %c0_i32 = arith.constant 0 : i32
    %c0_i32_0 = arith.constant 0 : i32
    return %arg0, %arg1, %c0_i32 : i32, i32, i32
  }
  func.func @transform_1(%arg0: i32, %arg1: i32) -> (i32, i32, i32) {
    %c0_i32 = arith.constant 0 : i32
    %c0_i32_0 = arith.constant 0 : i32
    %c0_i32_1 = arith.constant 0 : i32
    return %arg0, %c0_i32, %c0_i32_0 : i32, i32, i32
  }
  func.func @transform_2(%arg0: i32, %arg1: i32) -> (i32, i32) {
    %c0_i32 = arith.constant 0 : i32
    %c0_i32_0 = arith.constant 0 : i32
    %c0_i32_1 = arith.constant 0 : i32
    return %c0_i32, %c0_i32_0 : i32, i32
  }
  func.func @transform_3(%arg0: i32, %arg1: i32) -> (i32, i32) {
    %c0_i32 = arith.constant 0 : i32
    %c0_i32_0 = arith.constant 0 : i32
    %c0_i32_1 = arith.constant 0 : i32
    return %c0_i32, %c0_i32_0 : i32, i32
  }
  func.func @transform_4(%arg0: i32, %arg1: i32) -> (i32, i32) {
    %c0_i32 = arith.constant 0 : i32
    %c0_i32_0 = arith.constant 0 : i32
    %c0_i32_1 = arith.constant 0 : i32
    return %c0_i32, %c0_i32_0 : i32, i32
  }
  func.func @transform_5(%arg0: i32, %arg1: i32) -> (i32, i32, i32) {
    %c0_i32 = arith.constant 0 : i32
    %c0_i32_0 = arith.constant 0 : i32
    return %arg0, %arg1, %c0_i32 : i32, i32, i32
  }
  func.func @transform_6(%arg0: i32, %arg1: i32) -> (i32, i32, i32) {
    %c0_i32 = arith.constant 0 : i32
    %c0_i32_0 = arith.constant 0 : i32
    return %arg0, %arg1, %c0_i32 : i32, i32, i32
  }
}

</mosaic_0001>

<bundles_post_ra>
// kernel: mid_block_forward.18
= control target key start
LH: loop header
LB: loop body
LE: loop exit
PB: predicated region body
PF: predicated region fallthrough
CT: control target
= control target key end

     0   :  { %s909_s18 = smov 0   ;;  %s911_s19 = smov 0   ;;  %s1116_s0 = inlined_call_operand.vmem [shape: f32[2,256,8], index: 0, kind: input, shape index: {}]   ;;  %s1117_s1 = inlined_call_operand.vmem [shape: f32[2,2,4], index: 1, kind: input, shape index: {}]   ;;  %s1118_s2 = inlined_call_operand.vmem [shape: f32[1,8], index: 2, kind: input, shape index: {}]   ;;  %s1119_s3 = inlined_call_operand.vmem [shape: f32[1,8], index: 3, kind: input, shape index: {}]   ;;  %s1120_s4 = inlined_call_operand.vmem [shape: f32[4,8], index: 4, kind: input, shape index: {}]   ;;  %s1121_s5 = inlined_call_operand.vmem [shape: f32[2,256,8], index: 5, kind: output, shape index: {}]  }
   0x1   :  { %s913_s20 = smov 0   ;;  %s915_s21 = smov 0  }
   0x2   :  { %s917_s22 = smov 0  }
   0x3 LB: > { %s24_s23 = sadd.s32 1, %s867_s20  ;;  %s27_s24 = sadd.s32 1, %s871_s21  ;;  %s875_s22 = sphi %s917_s22, %s15_s22   ;;  %s871_s21 = sphi %s915_s21, %s1125_s21   ;;  %s867_s20 = sphi %s913_s20, %s1124_s20   ;;  %s863_s19 = sphi %s911_s19, %s1123_s19   ;;  %s859_s18 = sphi %s909_s18, %s1122_s18  }
   0x4   : > { %p25_p0 = scmp.ge.s32.totalorder %s24_s23, 2  ;;  %p692_p1 = scmp.ge.s32.totalorder %s875_s22, 1 }
   0x5   : > { %p217_p2 = scmp.lt.s32.totalorder %s875_s22, 5 }
   0x6   : > { %s1127_s23 = smov (%p25_p0, %s24_s23), 0  ;;  %s1129_s24 = smov (!%p25_p0, %s27_s24), %s871_s21 }
   0x7   : > { %p218_p3 = pnand %p692_p1, %p217_p2  ;;  %p29_p4 = scmp.ge.s32.totalorder %s1129_s24, 2 }
   0x8   : > { %p258_p5 = scmp.lt.s32.totalorder (!%p218_p3), %s863_s19, 1  ;;  %s693_s6 = sshll.u32 (!%p218_p3), %s859_s18, 4 }
   0x9   : > { %s1131_s24 = smov (%p29_p4, %s1129_s24), 0  ;;  %221 = sbr.rel (%p218_p3) target bundleno = 293 (0x125), region = 40 }
   0xa   : > { %p260_p6 = scmp.lt.s32.totalorder (!%p218_p3), %s693_s6, 31 }
   0xe   : > { %v282_v0 = vld [vmem:[%s1120_s4] sm:$0xf]  ;;  %vm287_vm0 = vcmask 1043456   ;;  %v877_v1 = vmov 0.0   ;;  %vm878_vm1 = vmmov 0   ;;  %s1133_s19 = smov (!%p258_p5, %s863_s19), 1  ;;  %v386_v10 = vlaneseq }
   0xf   : > { %724 = vmatprep.subr.mxu0 %v877_v1  ;;  %726 = vmatprep.mubr.msk.f32.mxu0 %vm878_vm1, %v877_v1  ;;  %s696_s27 = sshll.u32 %s1133_s19, 1  ;;  %vm283_vm2 = vcmask 31744   ;;  %s1135_s6 = smov (!%p260_p6, %s693_s6), 31  ;;  %v702_v13 = vld [vmem:[%s1118_s2] ss:$0 sm:$0xff]  ;;  %vm569_vm3 = vcmask 64512  }
  0x10   : > { %725 = vmatpush3.msk.msra.mxu0 %vm287_vm0, %v282_v0  ;;  %s270_s30 = scalar_lea.vmem %s1117_s1, %s696_s27  ;;  %s694_s7 = sshll.u32 %s1133_s19, 5  ;;  %v387_v11 = vshrl.u32 %v386_v10, 7  ;;  %v703_v39 = vld [vmem:[%s1119_s3] ss:$0 sm:$0xff] }
  0x11   : > { %v281_v2 = vld [vmem:[%s270_s30] sm:$0x3]  ;;  %s948_s8 = sadd.s32 %s694_s7, %s1135_s6 }
  0x12   : > { %727 = vmatmul.mubr.msk.f32.vlgmr.msra.gmra.mxu0 %vm283_vm2, %v281_v2  ;;  %s695_s9 = sshll.u32 %s948_s8, 3  ;;  %v388_v12 = vsub.s32 0, %v387_v11  ;;  %v416_v15 = vsub.s32 1, %v387_v11 }
  0x13   : > { %s956_s12 = scalar_lea.vmem %s1116_s0, %s695_s9  ;;  %s1051_s19 = scalar_lea.vmem %s1121_s5, %s695_s9 }
  0x14   : > { %v370_v17 = vld [vmem:[%s956_s12] sm:$0xff]  ;;  %v371_v18 = vld [vmem:[%s956_s12 + $0x8] sm:$0xff]  ;;  %v372_v19 = vld [vmem:[%s956_s12 + $0x10] sm:$0xff] }
  0x15   : > { %v373_v20 = vld [vmem:[%s956_s12 + $0x18] sm:$0xff]  ;;  %v374_v22 = vld [vmem:[%s956_s12 + $0x20] sm:$0xff]  ;;  %v375_v23 = vld [vmem:[%s956_s12 + $0x28] sm:$0xff] }
  0x16   : > { %v376_v28 = vld [vmem:[%s956_s12 + $0x30] sm:$0xff]  ;;  %v377_v30 = vld [vmem:[%s956_s12 + $0x38] sm:$0xff]  ;;  %v378_v31 = vld [vmem:[%s956_s12 + $0x40] sm:$0xff] }
  0x17   : > { %v379_v32 = vld [vmem:[%s956_s12 + $0x48] sm:$0xff]  ;;  %v380_v40 = vld [vmem:[%s956_s12 + $0x50] sm:$0xff]  ;;  %v381_v41 = vld [vmem:[%s956_s12 + $0x58] sm:$0xff] }
  0x18   : > { %v382_v44 = vld [vmem:[%s956_s12 + $0x60] sm:$0xff]  ;;  %v383_v45 = vld [vmem:[%s956_s12 + $0x68] sm:$0xff]  ;;  %v384_v50 = vld [vmem:[%s956_s12 + $0x70] sm:$0xff] }
  0x19   : > { %v385_v59 = vld [vmem:[%s956_s12 + $0x78] sm:$0xff] }
  0xd2   : > { %v357_v3 = vpop.f32.mrf.mxu0 }
  0xd3   : > { %v362_v4 = vmul.f32 0.001953125, %v357_v3 }
  0xd4   : > { %v728_v5 = vpop.f32.mrf.mxu0 }
  0xd5   : > { %v363_v6 = vmul.f32 %v362_v4, %v362_v4  ;;  %v961_v14 = vrot.slane %v362_v4, %v388_v12 }
  0xd7   : > { %v365_v7 = vrot.slane %v363_v6, 7  ;;  %v390_v24 = vsub.f32 %v370_v17, %v961_v14  ;;  %v391_v25 = vsub.f32 %v371_v18, %v961_v14  ;;  %v392_v26 = vsub.f32 %v372_v19, %v961_v14 }
  0xd8   : > { %v393_v29 = vsub.f32 %v373_v20, %v961_v14  ;;  %v394_v33 = vsub.f32 %v374_v22, %v961_v14  ;;  %v395_v37 = vsub.f32 %v375_v23, %v961_v14  ;;  %v396_v42 = vsub.f32 %v376_v28, %v961_v14 }
  0xd9   : > { %v367_v8 = vsub.f32 %v362_v4, %v365_v7  ;;  %v397_v46 = vsub.f32 %v377_v30, %v961_v14  ;;  %v398_v47 = vsub.f32 %v378_v31, %v961_v14  ;;  %v399_v48 = vsub.f32 %v379_v32, %v961_v14 }
  0xda   : > { %v400_v55 = vsub.f32 %v380_v40, %v961_v14  ;;  %v401_v56 = vsub.f32 %v381_v41, %v961_v14  ;;  %v402_v60 = vsub.f32 %v382_v44, %v961_v14  ;;  %v403_v61 = vsub.f32 %v383_v45, %v961_v14 }
  0xdb   : > { %v368_v9 = vadd.f32 1e-05, %v367_v8  ;;  %v404_v0 = vsub.f32 %v384_v50, %v961_v14  ;;  %v405_v8 = vsub.f32 %v385_v59, %v961_v14 }
  0xdd   : > { %771 = vrsqrt.f32 %v368_v9 }
  0xea   : > { %v772_v16 = vpop.eup %771 }
  0xeb   : > { %v413_v21 = vmul.f32 %v772_v16, %v702_v13 }
  0xed   : > { %v417_v27 = vrot.slane %v413_v21, %v416_v15 }
  0xef   : > { %v418_v34 = vmul.f32 %v417_v27, %v390_v24  ;;  %v419_v35 = vmul.f32 %v417_v27, %v391_v25  ;;  %v420_v36 = vmul.f32 %v417_v27, %v392_v26  ;;  %v421_v38 = vmul.f32 %v417_v27, %v393_v29 }
  0xf0   : > { %v422_v43 = vmul.f32 %v417_v27, %v394_v33  ;;  %v423_v49 = vmul.f32 %v417_v27, %v395_v37  ;;  %v424_v51 = vmul.f32 %v417_v27, %v396_v42  ;;  %v425_v57 = vmul.f32 %v417_v27, %v397_v46 }
  0xf1   : > { %v991_v52 = vadd.f32 %v703_v39, %v418_v34  ;;  %v993_v53 = vadd.f32 %v703_v39, %v419_v35  ;;  %v995_v54 = vadd.f32 %v703_v39, %v420_v36  ;;  %v999_v58 = vadd.f32 %v703_v39, %v421_v38 }
  0xf2   : > { %v426_v62 = vmul.f32 %v417_v27, %v398_v47  ;;  %v1004_v63 = vadd.f32 %v703_v39, %v422_v43  ;;  %v427_v1 = vmul.f32 %v417_v27, %v399_v48  ;;  %v428_v2 = vmul.f32 %v417_v27, %v400_v55 }
  0xf3   : > { %v1007_v3 = vadd.f32 %v703_v39, %v423_v49  ;;  %v1009_v4 = vadd.f32 %v703_v39, %v424_v51  ;;  %v704_v5 = vmul.f32 -1.442695, %v991_v52  ;;  %v705_v6 = vmul.f32 -1.442695, %v993_v53 }
  0xf4   : > { %v706_v7 = vmul.f32 -1.442695, %v995_v54  ;;  %v429_v9 = vmul.f32 %v417_v27, %v401_v56  ;;  %v1015_v10 = vadd.f32 %v703_v39, %v425_v57  ;;  %v707_v11 = vmul.f32 -1.442695, %v999_v58 }
  0xf5   : > { %v430_v12 = vmul.f32 %v417_v27, %v402_v60  ;;  %v1018_v13 = vadd.f32 %v703_v39, %v426_v62  ;;  %773 = vpow2.f32 %v704_v5  ;;  %v708_v15 = vmul.f32 -1.442695, %v1004_v63 }
  0xf6   : > { %v431_v16 = vmul.f32 %v417_v27, %v403_v61  ;;  %v1021_v17 = vadd.f32 %v703_v39, %v427_v1  ;;  %775 = vpow2.f32 %v705_v6  ;;  %v709_v18 = vmul.f32 -1.442695, %v1007_v3 }
  0xf7   : > { %v432_v19 = vmul.f32 %v417_v27, %v404_v0  ;;  %v1024_v20 = vadd.f32 %v703_v39, %v428_v2  ;;  %777 = vpow2.f32 %v706_v7  ;;  %v710_v14 = vmul.f32 -1.442695, %v1009_v4 }
  0xf8   : > { %v433_v21 = vmul.f32 %v417_v27, %v405_v8  ;;  %v1027_v22 = vadd.f32 %v703_v39, %v429_v9  ;;  %779 = vpow2.f32 %v707_v11  ;;  %v711_v23 = vmul.f32 -1.442695, %v1015_v10 }
  0xf9   : > { %v1030_v24 = vadd.f32 %v703_v39, %v430_v12  ;;  %781 = vpow2.f32 %v708_v15  ;;  %v712_v25 = vmul.f32 -1.442695, %v1018_v13  ;;  %v1033_v26 = vadd.f32 %v703_v39, %v431_v16 }
  0xfa   : > { %783 = vpow2.f32 %v709_v18  ;;  %v713_v28 = vmul.f32 -1.442695, %v1021_v17  ;;  %v1036_v29 = vadd.f32 %v703_v39, %v432_v19  ;;  %v714_v27 = vmul.f32 -1.442695, %v1024_v20 }
  0xfb   : > { %785 = vpow2.f32 %v710_v14  ;;  %v1039_v30 = vadd.f32 %v703_v39, %v433_v21  ;;  %v715_v31 = vmul.f32 -1.442695, %v1027_v22  ;;  %v716_v32 = vmul.f32 -1.442695, %v1030_v24 }
  0xfc   : > { %787 = vpow2.f32 %v711_v23  ;;  %v717_v33 = vmul.f32 -1.442695, %v1033_v26  ;;  %v718_v34 = vmul.f32 -1.442695, %v1036_v29 }
  0xfd   : > { %789 = vpow2.f32 %v712_v25  ;;  %v719_v35 = vmul.f32 -1.442695, %v1039_v30 }
  0xfe   : > { %791 = vpow2.f32 %v713_v28 }
  0xff   : > { %793 = vpow2.f32 %v714_v27 }
 0x100   : > { %795 = vpow2.f32 %v715_v31 }
 0x101   : > { %797 = vpow2.f32 %v716_v32 }
 0x102   : > { %v774_v36 = vpop.eup %773  ;;  %799 = vpow2.f32 %v717_v33 }
 0x103   : > { %v776_v37 = vpop.eup %775  ;;  %801 = vpow2.f32 %v718_v34  ;;  %v505_v38 = vadd.f32 1.0, %v774_v36 }
 0x104   : > { %v778_v39 = vpop.eup %777  ;;  %803 = vpow2.f32 %v719_v35  ;;  %v506_v40 = vadd.f32 1.0, %v776_v37 }
 0x105   : > { %v780_v41 = vpop.eup %779  ;;  %v507_v42 = vadd.f32 1.0, %v778_v39  ;;  %805 = vrcp.f32 %v505_v38 }
 0x106   : > { %v782_v43 = vpop.eup %781  ;;  %v508_v44 = vadd.f32 1.0, %v780_v41  ;;  %807 = vrcp.f32 %v506_v40 }
 0x107   : > { %v784_v45 = vpop.eup %783  ;;  %v509_v46 = vadd.f32 1.0, %v782_v43  ;;  %809 = vrcp.f32 %v507_v42 }
 0x108   : > { %v786_v47 = vpop.eup %785  ;;  %v510_v48 = vadd.f32 1.0, %v784_v45  ;;  %811 = vrcp.f32 %v508_v44 }
 0x109   : > { %v788_v49 = vpop.eup %787  ;;  %v511_v50 = vadd.f32 1.0, %v786_v47  ;;  %813 = vrcp.f32 %v509_v46 }
 0x10a   : > { %v790_v51 = vpop.eup %789  ;;  %v512_v55 = vadd.f32 1.0, %v788_v49  ;;  %815 = vrcp.f32 %v510_v48 }
 0x10b   : > { %v792_v56 = vpop.eup %791  ;;  %v513_v57 = vadd.f32 1.0, %v790_v51  ;;  %817 = vrcp.f32 %v511_v50 }
 0x10c   : > { %v794_v59 = vpop.eup %793  ;;  %v514_v60 = vadd.f32 1.0, %v792_v56  ;;  %819 = vrcp.f32 %v512_v55 }
 0x10d   : > { %v796_v61 = vpop.eup %795  ;;  %v515_v62 = vadd.f32 1.0, %v794_v59  ;;  %821 = vrcp.f32 %v513_v57 }
 0x10e   : > { %v798_v0 = vpop.eup %797  ;;  %v516_v1 = vadd.f32 1.0, %v796_v61  ;;  %823 = vrcp.f32 %v514_v60 }
 0x10f   : > { %v800_v2 = vpop.eup %799  ;;  %v517_v5 = vadd.f32 1.0, %v798_v0  ;;  %825 = vrcp.f32 %v515_v62 }
 0x110   : > { %v802_v6 = vpop.eup %801  ;;  %v518_v7 = vadd.f32 1.0, %v800_v2  ;;  %827 = vrcp.f32 %v516_v1 }
 0x111   : > { %v804_v8 = vpop.eup %803  ;;  %v519_v9 = vadd.f32 1.0, %v802_v6  ;;  %829 = vrcp.f32 %v517_v5 }
 0x112   : > { %v806_v11 = vpop.eup %805  ;;  %v520_v12 = vadd.f32 1.0, %v804_v8  ;;  %831 = vrcp.f32 %v518_v7 }
 0x113   : > { %v808_v15 = vpop.eup %807  ;;  %833 = vrcp.f32 %v519_v9  ;;  %v553_v16 = vmul.f32 %v806_v11, %v991_v52 }
 0x114   : > { %v810_v18 = vpop.eup %809  ;;  %835 = vrcp.f32 %v520_v12  ;;  %v554_v19 = vmul.f32 %v808_v15, %v993_v53 }
 0x115   : > { %v812_v14 = vpop.eup %811  ;;  %v555_v21 = vmul.f32 %v810_v18, %v995_v54  ;;  %570 = vst.msk [vmem:[%s1051_s19] sm:$0xff] %vm569_vm3, %v553_v16 }
 0x116   : > { %v814_v23 = vpop.eup %813  ;;  %v556_v25 = vmul.f32 %v812_v14, %v999_v58  ;;  %571 = vst.msk [vmem:[%s1051_s19 + $0x8] sm:$0xff] %vm569_vm3, %v554_v19 }
 0x117   : > { %v816_v28 = vpop.eup %815  ;;  %v557_v52 = vmul.f32 %v814_v23, %v1004_v63  ;;  %572 = vst.msk [vmem:[%s1051_s19 + $0x10] sm:$0xff] %vm569_vm3, %v555_v21 }
 0x118   : > { %v818_v27 = vpop.eup %817  ;;  %v558_v53 = vmul.f32 %v816_v28, %v1007_v3  ;;  %573 = vst.msk [vmem:[%s1051_s19 + $0x18] sm:$0xff] %vm569_vm3, %v556_v25 }
 0x119   : > { %v820_v54 = vpop.eup %819  ;;  %v559_v31 = vmul.f32 %v818_v27, %v1009_v4  ;;  %574 = vst.msk [vmem:[%s1051_s19 + $0x20] sm:$0xff] %vm569_vm3, %v557_v52 }
 0x11a   : > { %v822_v58 = vpop.eup %821  ;;  %v560_v32 = vmul.f32 %v820_v54, %v1015_v10  ;;  %575 = vst.msk [vmem:[%s1051_s19 + $0x28] sm:$0xff] %vm569_vm3, %v558_v53 }
 0x11b   : > { %v824_v63 = vpop.eup %823  ;;  %v561_v33 = vmul.f32 %v822_v58, %v1018_v13  ;;  %576 = vst.msk [vmem:[%s1051_s19 + $0x30] sm:$0xff] %vm569_vm3, %v559_v31 }
 0x11c   : > { %v826_v3 = vpop.eup %825  ;;  %v562_v34 = vmul.f32 %v824_v63, %v1021_v17  ;;  %577 = vst.msk [vmem:[%s1051_s19 + $0x38] sm:$0xff] %vm569_vm3, %v560_v32 }
 0x11d   : > { %v828_v4 = vpop.eup %827  ;;  %v563_v35 = vmul.f32 %v826_v3, %v1024_v20  ;;  %578 = vst.msk [vmem:[%s1051_s19 + $0x40] sm:$0xff] %vm569_vm3, %v561_v33 }
 0x11e   : > { %v830_v10 = vpop.eup %829  ;;  %v564_v13 = vmul.f32 %v828_v4, %v1027_v22  ;;  %579 = vst.msk [vmem:[%s1051_s19 + $0x48] sm:$0xff] %vm569_vm3, %v562_v34 }
 0x11f   : > { %v832_v36 = vpop.eup %831  ;;  %v565_v37 = vmul.f32 %v830_v10, %v1030_v24  ;;  %580 = vst.msk [vmem:[%s1051_s19 + $0x50] sm:$0xff] %vm569_vm3, %v563_v35 }
 0x120   : > { %v834_v17 = vpop.eup %833  ;;  %v566_v38 = vmul.f32 %v832_v36, %v1033_v26  ;;  %581 = vst.msk [vmem:[%s1051_s19 + $0x58] sm:$0xff] %vm569_vm3, %v564_v13 }
 0x121   : > { %v836_v20 = vpop.eup %835  ;;  %v567_v39 = vmul.f32 %v834_v17, %v1036_v29  ;;  %582 = vst.msk [vmem:[%s1051_s19 + $0x60] sm:$0xff] %vm569_vm3, %v565_v37 }
 0x122   : > { %v568_v40 = vmul.f32 %v836_v20, %v1039_v30  ;;  %583 = vst.msk [vmem:[%s1051_s19 + $0x68] sm:$0xff] %vm569_vm3, %v566_v38 }
 0x123   : > { %584 = vst.msk [vmem:[%s1051_s19 + $0x70] sm:$0xff] %vm569_vm3, %v567_v39 }
 0x124   : > { %585 = vst.msk [vmem:[%s1051_s19 + $0x78] sm:$0xff] %vm569_vm3, %v568_v40 }
 0x125 PF: > { %s15_s22 = sadd.s32 1, %s875_s22   ;;  %s1122_s18 = smov %s867_s20 }
 0x126   : > { %p12_p7 = scmp.ge.s32.totalorder %s15_s22, 6   ;;  %s1123_s19 = smov %s871_s21 }
 0x127   : > { %s1124_s20 = smov %s1127_s23  ;;  %s1125_s21 = smov %s1131_s24 }
 0x128   :  { %14 = sbr.rel (!%p12_p7) target bundleno = 3 (0x3), region = 73 }

// kernel: mid_block_forward.17
= control target key start
LH: loop header
LB: loop body
LE: loop exit
PB: predicated region body
PF: predicated region fallthrough
CT: control target
= control target key end

     0   :  { %s554_s9 = smov 0   ;;  %s556_s10 = smov 0   ;;  %s664_s0 = inlined_call_operand.vmem [shape: f32[2,256,8], index: 0, kind: input, shape index: {}]   ;;  %s665_s1 = inlined_call_operand.vmem [shape: f32[8,4], index: 1, kind: input, shape index: {}]   ;;  %s666_s2 = inlined_call_operand.vmem [shape: f32[2,2,4], index: 2, kind: output, shape index: {}]  }
   0x1   :  { %s558_s11 = smov 0   ;;  %s560_s12 = smov 0  }
   0x2   :  { %s562_s13 = smov 0  }
   0x3 LB: > { %s21_s14 = sadd.s32 1, %s526_s11  ;;  %s24_s15 = sadd.s32 1, %s530_s12  ;;  %s534_s13 = sphi %s562_s13, %s12_s13   ;;  %s530_s12 = sphi %s560_s12, %s670_s12   ;;  %s526_s11 = sphi %s558_s11, %s669_s11   ;;  %s522_s10 = sphi %s556_s10, %s668_s10   ;;  %s518_s9 = sphi %s554_s9, %s667_s9  }
   0x4   : > { %p22_p0 = scmp.ge.s32.totalorder %s21_s14, 2  ;;  %p437_p1 = scmp.ge.s32.totalorder %s534_s13, 1 }
   0x5   : > { %p131_p2 = scmp.lt.s32.totalorder %s534_s13, 5 }
   0x6   : > { %s672_s14 = smov (%p22_p0, %s21_s14), 0  ;;  %s674_s15 = smov (!%p22_p0, %s24_s15), %s530_s12 }
   0x7   : > { %p132_p3 = pnand %p437_p1, %p131_p2  ;;  %p26_p4 = scmp.ge.s32.totalorder %s674_s15, 2 }
   0x8   : > { %s438_s16 = sshll.u32 (!%p132_p3), %s518_s9, 4  ;;  %p157_p5 = scmp.lt.s32.totalorder (!%p132_p3), %s522_s10, 1 }
   0x9   : > { %s676_s15 = smov (%p26_p4, %s674_s15), 0  ;;  %135 = sbr.rel (%p132_p3) target bundleno = 268 (0x10c), region = 28 }
   0xa   : > { %p159_p6 = scmp.lt.s32.totalorder (!%p132_p3), %s438_s16, 31  ;;  %p442_p7 = scmp.ne.s32.totalorder (!%p132_p3), %s518_s9, 0 }
   0xe   : > { %s678_s10 = smov (!%p157_p5, %s522_s10), 1  ;;  %s680_s16 = smov (!%p159_p6, %s438_s16), 31 }
   0xf   : > { %s439_s17 = sshll.u32 %s678_s10, 5  ;;  %s441_s18 = sshll.u32 %s678_s10, 1 }
  0x10   : > { %s162_s19 = sadd.s32 %s439_s17, %s680_s16  ;;  %s587_s22 = scalar_lea.vmem %s666_s2, %s441_s18 }
  0x11   : > { %s440_s23 = sshll.u32 %s162_s19, 3  ;;  %173 = sbr.rel (%p442_p7) target bundleno = 24 (0x18), region = 32 }
  0x12   : > { %s592_s26 = scalar_lea.vmem %s664_s0, %s440_s23 }
  0x16   : > { %vm174_vm0 = vcmask 25600   ;;  %v536_v0 = vmov 0.0  }
  0x17   : > { %175 = vst.msk [vmem:[%s587_s22] sm:$0x3] %vm174_vm0, %v536_v0 }
  0x18 PF: > { %v286_v1 = vld [vmem:[%s665_s1] sm:$0xff]  ;;  %v177_v3 = vld [vmem:[%s592_s26 + $0x8] sm:$0xff]  ;;  %vm192_vm1 = vcmask 64512   ;;  %v537_v4 = vmov 0.0   ;;  %vm538_vm2 = vmmov 0   ;;  %v178_v5 = vld [vmem:[%s592_s26 + $0x10] sm:$0xff] }
  0x19   : > { %v176_v2 = vld [vmem:[%s592_s26] sm:$0xff]  ;;  %448 = vmatprep.subr.mxu0 %v537_v4  ;;  %450 = vmatprep.mubr.msk.f32.mxu0 %vm538_vm2, %v537_v4  ;;  %v194_v7 = vsel %vm192_vm1, %v177_v3, 0.0  ;;  %v179_v8 = vld [vmem:[%s592_s26 + $0x18] sm:$0xff]  ;;  %v196_v10 = vsel %vm192_vm1, %v178_v5, 0.0  ;;  %v181_v15 = vld [vmem:[%s592_s26 + $0x28] sm:$0xff]  ;;  %v231_v18 = vmul.f32 %v177_v3, %v177_v3  ;;  %v232_v19 = vmul.f32 %v178_v5, %v178_v5 }
  0x1a   : > { %v193_v6 = vsel %vm192_vm1, %v176_v2, 0.0  ;;  %449 = vmatpush3.msra.mxu0 %v286_v1  ;;  %v198_v11 = vsel %vm192_vm1, %v179_v8, 0.0  ;;  %v180_v12 = vld [vmem:[%s592_s26 + $0x20] sm:$0xff]  ;;  %v230_v17 = vmul.f32 %v176_v2, %v176_v2  ;;  %v202_v20 = vsel %vm192_vm1, %v181_v15, 0.0  ;;  %v182_v21 = vld [vmem:[%s592_s26 + $0x30] sm:$0xff]  ;;  %v183_v26 = vld [vmem:[%s592_s26 + $0x38] sm:$0xff] }
  0x1b   : > { %v195_v9 = vadd.f32 %v194_v7, %v193_v6  ;;  %v200_v14 = vsel %vm192_vm1, %v180_v12, 0.0  ;;  %v233_v23 = vmul.f32 %v179_v8, %v179_v8  ;;  %v204_v24 = vsel %vm192_vm1, %v182_v21, 0.0  ;;  %v184_v33 = vld [vmem:[%s592_s26 + $0x40] sm:$0xff]  ;;  %v185_v39 = vld [vmem:[%s592_s26 + $0x48] sm:$0xff]  ;;  %v186_v45 = vld [vmem:[%s592_s26 + $0x50] sm:$0xff] }
  0x1c   : > { %v234_v25 = vmul.f32 %v180_v12, %v180_v12  ;;  %v246_v28 = vsel %vm192_vm1, %v230_v17, 0.0  ;;  %v247_v29 = vsel %vm192_vm1, %v231_v18, 0.0  ;;  %v249_v30 = vsel %vm192_vm1, %v232_v19, 0.0  ;;  %v187_v51 = vld [vmem:[%s592_s26 + $0x58] sm:$0xff]  ;;  %v188_v57 = vld [vmem:[%s592_s26 + $0x60] sm:$0xff]  ;;  %v189_v63 = vld [vmem:[%s592_s26 + $0x68] sm:$0xff] }
  0x1d   : > { %v197_v13 = vadd.f32 %v196_v10, %v195_v9  ;;  %v206_v31 = vsel %vm192_vm1, %v183_v26, 0.0  ;;  %v248_v32 = vadd.f32 %v247_v29, %v246_v28  ;;  %v235_v35 = vmul.f32 %v181_v15, %v181_v15  ;;  %v190_v5 = vld [vmem:[%s592_s26 + $0x70] sm:$0xff] }
  0x1e   : > { %v251_v36 = vsel %vm192_vm1, %v233_v23, 0.0  ;;  %v208_v37 = vsel %vm192_vm1, %v184_v33, 0.0  ;;  %v236_v41 = vmul.f32 %v182_v21, %v182_v21  ;;  %v253_v42 = vsel %vm192_vm1, %v234_v25, 0.0 }
  0x1f   : > { %v199_v16 = vadd.f32 %v198_v11, %v197_v13  ;;  %v250_v38 = vadd.f32 %v249_v30, %v248_v32  ;;  %v210_v43 = vsel %vm192_vm1, %v185_v39, 0.0  ;;  %v237_v47 = vmul.f32 %v183_v26, %v183_v26  ;;  %v191_v11 = vld [vmem:[%s592_s26 + $0x78] sm:$0xff] }
  0x20   : > { %v255_v48 = vsel %vm192_vm1, %v235_v35, 0.0  ;;  %v212_v49 = vsel %vm192_vm1, %v186_v45, 0.0  ;;  %v238_v53 = vmul.f32 %v184_v33, %v184_v33  ;;  %v257_v54 = vsel %vm192_vm1, %v236_v41, 0.0 }
  0x21   : > { %v201_v22 = vadd.f32 %v200_v14, %v199_v16  ;;  %v252_v44 = vadd.f32 %v251_v36, %v250_v38  ;;  %v214_v55 = vsel %vm192_vm1, %v187_v51, 0.0  ;;  %v239_v59 = vmul.f32 %v185_v39, %v185_v39 }
  0x22   : > { %v259_v60 = vsel %vm192_vm1, %v237_v47, 0.0  ;;  %v216_v61 = vsel %vm192_vm1, %v188_v57, 0.0  ;;  %v240_v1 = vmul.f32 %v186_v45, %v186_v45  ;;  %v261_v2 = vsel %vm192_vm1, %v238_v53, 0.0 }
  0x23   : > { %v203_v27 = vadd.f32 %v202_v20, %v201_v22  ;;  %v254_v50 = vadd.f32 %v253_v42, %v252_v44  ;;  %v218_v3 = vsel %vm192_vm1, %v189_v63, 0.0  ;;  %v241_v7 = vmul.f32 %v187_v51, %v187_v51 }
  0x24   : > { %v263_v8 = vsel %vm192_vm1, %v239_v59, 0.0  ;;  %v220_v9 = vsel %vm192_vm1, %v190_v5, 0.0  ;;  %v242_v13 = vmul.f32 %v188_v57, %v188_v57  ;;  %v265_v14 = vsel %vm192_vm1, %v240_v1, 0.0 }
  0x25   : > { %v205_v34 = vadd.f32 %v204_v24, %v203_v27  ;;  %v256_v56 = vadd.f32 %v255_v48, %v254_v50  ;;  %v222_v15 = vsel %vm192_vm1, %v191_v11, 0.0  ;;  %v243_v18 = vmul.f32 %v189_v63, %v189_v63 }
  0x26   : > { %v267_v19 = vsel %vm192_vm1, %v241_v7, 0.0  ;;  %v244_v22 = vmul.f32 %v190_v5, %v190_v5  ;;  %v269_v23 = vsel %vm192_vm1, %v242_v13, 0.0  ;;  %v245_v26 = vmul.f32 %v191_v11, %v191_v11 }
  0x27   : > { %v207_v40 = vadd.f32 %v206_v31, %v205_v34  ;;  %v258_v62 = vadd.f32 %v257_v54, %v256_v56  ;;  %v271_v27 = vsel %vm192_vm1, %v243_v18, 0.0  ;;  %vm283_vm3 = vcmask 1040384  }
  0x28   : > { %v273_v30 = vsel %vm192_vm1, %v244_v22, 0.0  ;;  %v275_v32 = vsel %vm192_vm1, %v245_v26, 0.0  ;;  %vm361_vm4 = vcmask 25600  }
  0x29   : > { %v209_v46 = vadd.f32 %v208_v37, %v207_v40  ;;  %v260_v4 = vadd.f32 %v259_v60, %v258_v62 }
  0x2b   : > { %v211_v52 = vadd.f32 %v210_v43, %v209_v46  ;;  %v262_v10 = vadd.f32 %v261_v2, %v260_v4  ;;  %v285_v46 = vld [vmem:[%s587_s22] sm:$0x3] }
  0x2d   : > { %v213_v58 = vadd.f32 %v212_v49, %v211_v52  ;;  %v264_v16 = vadd.f32 %v263_v8, %v262_v10 }
  0x2f   : > { %v215_v0 = vadd.f32 %v214_v55, %v213_v58  ;;  %v266_v20 = vadd.f32 %v265_v14, %v264_v16 }
  0x31   : > { %v217_v6 = vadd.f32 %v216_v61, %v215_v0  ;;  %v268_v24 = vadd.f32 %v267_v19, %v266_v20 }
  0x33   : > { %v219_v12 = vadd.f32 %v218_v3, %v217_v6  ;;  %v270_v28 = vadd.f32 %v269_v23, %v268_v24 }
  0x35   : > { %v221_v17 = vadd.f32 %v220_v9, %v219_v12  ;;  %v272_v31 = vadd.f32 %v271_v27, %v270_v28 }
  0x37   : > { %v223_v21 = vadd.f32 %v222_v15, %v221_v17  ;;  %v274_v34 = vadd.f32 %v273_v30, %v272_v31 }
  0x39   : > { %v224_v25 = vrot.slane %v223_v21, 4  ;;  %v276_v35 = vadd.f32 %v275_v32, %v274_v34 }
  0x3b   : > { %v225_v29 = vadd.f32 %v224_v25, %v223_v21  ;;  %v277_v37 = vrot.slane %v276_v35, 4 }
  0x3d   : > { %v226_v33 = vrot.slane %v225_v29, 2  ;;  %v278_v38 = vadd.f32 %v277_v37, %v276_v35 }
  0x3f   : > { %v227_v36 = vadd.f32 %v226_v33, %v225_v29  ;;  %v279_v40 = vrot.slane %v278_v38, 2 }
  0x41   : > { %v228_v39 = vrot.slane %v227_v36, 1  ;;  %v280_v41 = vadd.f32 %v279_v40, %v278_v38 }
  0x43   : > { %v229_v42 = vadd.f32 %v228_v39, %v227_v36  ;;  %v281_v43 = vrot.slane %v280_v41, 1 }
  0x45   : > { %v282_v44 = vadd.f32 %v281_v43, %v280_v41 }
  0x47   : > { %v284_v45 = vsel %vm283_vm3, %v229_v42, %v282_v44 }
  0x48   : > { %451 = vmatmul.mubr.msk.f32.vlgmr.msra.gmra.mxu0 %vm192_vm1, %v284_v45 }
 0x108   : > { %v356_v47 = vpop.f32.mrf.mxu0 }
 0x109   : > { %v360_v48 = vadd.f32 %v356_v47, %v285_v46 }
 0x10a   : > { %v452_v49 = vpop.f32.mrf.mxu0 }
 0x10b   : > { %362 = vst.msk [vmem:[%s587_s22] sm:$0x3] %vm361_vm4, %v360_v48 }
 0x10c PF: > { %s12_s13 = sadd.s32 1, %s534_s13   ;;  %s667_s9 = smov %s526_s11 }
 0x10d   : > { %p9_p8 = scmp.ge.s32.totalorder %s12_s13, 6   ;;  %s668_s10 = smov %s530_s12 }
 0x10e   : > { %s669_s11 = smov %s672_s14  ;;  %s670_s12 = smov %s676_s15 }
 0x10f   :  { %11 = sbr.rel (!%p9_p8) target bundleno = 3 (0x3), region = 62 }

// kernel: mid_block_forward.23
= control target key start
LH: loop header
LB: loop body
LE: loop exit
PB: predicated region body
PF: predicated region fallthrough
CT: control target
= control target key end

     0   :  { %s717_s18 = smov 0   ;;  %s719_s19 = smov 0   ;;  %s824_s0 = inlined_call_operand.vmem [shape: f32[2,256,8], index: 0, kind: input, shape index: {}]   ;;  %s825_s1 = inlined_call_operand.vmem [shape: f32[2,2,4], index: 1, kind: input, shape index: {}]   ;;  %s826_s2 = inlined_call_operand.vmem [shape: f32[1,8], index: 2, kind: input, shape index: {}]   ;;  %s827_s3 = inlined_call_operand.vmem [shape: f32[1,8], index: 3, kind: input, shape index: {}]   ;;  %s828_s4 = inlined_call_operand.vmem [shape: f32[4,8], index: 4, kind: input, shape index: {}]   ;;  %s829_s5 = inlined_call_operand.vmem [shape: f32[2,256,8], index: 5, kind: output, shape index: {}]  }
   0x1   :  { %s721_s20 = smov 0   ;;  %s723_s21 = smov 0  }
   0x2   :  { %s725_s22 = smov 0  }
   0x3 LB: > { %s24_s23 = sadd.s32 1, %s675_s20  ;;  %s27_s24 = sadd.s32 1, %s679_s21  ;;  %s683_s22 = sphi %s725_s22, %s15_s22   ;;  %s679_s21 = sphi %s723_s21, %s833_s21   ;;  %s675_s20 = sphi %s721_s20, %s832_s20   ;;  %s671_s19 = sphi %s719_s19, %s831_s19   ;;  %s667_s18 = sphi %s717_s18, %s830_s18  }
   0x4   : > { %p25_p0 = scmp.ge.s32.totalorder %s24_s23, 2  ;;  %p580_p1 = scmp.ge.s32.totalorder %s683_s22, 1 }
   0x5   : > { %p217_p2 = scmp.lt.s32.totalorder %s683_s22, 5 }
   0x6   : > { %s835_s23 = smov (%p25_p0, %s24_s23), 0  ;;  %s837_s24 = smov (!%p25_p0, %s27_s24), %s679_s21 }
   0x7   : > { %p218_p3 = pnand %p580_p1, %p217_p2  ;;  %p29_p4 = scmp.ge.s32.totalorder %s837_s24, 2 }
   0x8   : > { %p258_p5 = scmp.lt.s32.totalorder (!%p218_p3), %s671_s19, 1  ;;  %s581_s6 = sshll.u32 (!%p218_p3), %s667_s18, 4 }
   0x9   : > { %s839_s24 = smov (%p29_p4, %s837_s24), 0  ;;  %221 = sbr.rel (%p218_p3) target bundleno = 254 (0xfe), region = 40 }
   0xa   : > { %p260_p6 = scmp.lt.s32.totalorder (!%p218_p3), %s581_s6, 31 }
   0xe   : > { %v282_v0 = vld [vmem:[%s828_s4] sm:$0xf]  ;;  %vm287_vm0 = vcmask 1043456   ;;  %v685_v1 = vmov 0.0   ;;  %vm686_vm1 = vmmov 0   ;;  %s841_s19 = smov (!%p258_p5, %s671_s19), 1  ;;  %v386_v9 = vlaneseq }
   0xf   : > { %596 = vmatprep.subr.mxu0 %v685_v1  ;;  %598 = vmatprep.mubr.msk.f32.mxu0 %vm686_vm1, %v685_v1  ;;  %s584_s27 = sshll.u32 %s841_s19, 1  ;;  %vm283_vm2 = vcmask 31744   ;;  %s843_s6 = smov (!%p260_p6, %s581_s6), 31  ;;  %v590_v21 = vld [vmem:[%s826_s2] ss:$0 sm:$0xff]  ;;  %vm457_vm3 = vcmask 64512  }
  0x10   : > { %597 = vmatpush3.msk.msra.mxu0 %vm287_vm0, %v282_v0  ;;  %s270_s30 = scalar_lea.vmem %s825_s1, %s584_s27  ;;  %s582_s7 = sshll.u32 %s841_s19, 5  ;;  %v387_v11 = vshrl.u32 %v386_v9, 7  ;;  %v591_v59 = vld [vmem:[%s827_s3] ss:$0 sm:$0xff] }
  0x11   : > { %v281_v2 = vld [vmem:[%s270_s30] sm:$0x3]  ;;  %s756_s8 = sadd.s32 %s582_s7, %s843_s6 }
  0x12   : > { %599 = vmatmul.mubr.msk.f32.vlgmr.msra.gmra.mxu0 %vm283_vm2, %v281_v2  ;;  %s583_s9 = sshll.u32 %s756_s8, 3  ;;  %v388_v12 = vsub.s32 0, %v387_v11  ;;  %v416_v25 = vsub.s32 1, %v387_v11 }
  0x13   : > { %s265_s12 = scalar_lea.vmem %s824_s0, %s583_s9  ;;  %s775_s19 = scalar_lea.vmem %s829_s5, %s583_s9 }
  0x14   : > { %v370_v13 = vld [vmem:[%s265_s12] sm:$0xff]  ;;  %v371_v14 = vld [vmem:[%s265_s12 + $0x8] sm:$0xff]  ;;  %v372_v16 = vld [vmem:[%s265_s12 + $0x10] sm:$0xff] }
  0x15   : > { %v373_v17 = vld [vmem:[%s265_s12 + $0x18] sm:$0xff]  ;;  %v374_v18 = vld [vmem:[%s265_s12 + $0x20] sm:$0xff]  ;;  %v375_v19 = vld [vmem:[%s265_s12 + $0x28] sm:$0xff] }
  0x16   : > { %v376_v20 = vld [vmem:[%s265_s12 + $0x30] sm:$0xff]  ;;  %v377_v22 = vld [vmem:[%s265_s12 + $0x38] sm:$0xff]  ;;  %v378_v23 = vld [vmem:[%s265_s12 + $0x40] sm:$0xff] }
  0x17   : > { %v379_v24 = vld [vmem:[%s265_s12 + $0x48] sm:$0xff]  ;;  %v380_v27 = vld [vmem:[%s265_s12 + $0x50] sm:$0xff]  ;;  %v381_v28 = vld [vmem:[%s265_s12 + $0x58] sm:$0xff] }
  0x18   : > { %v382_v29 = vld [vmem:[%s265_s12 + $0x60] sm:$0xff]  ;;  %v383_v32 = vld [vmem:[%s265_s12 + $0x68] sm:$0xff]  ;;  %v384_v33 = vld [vmem:[%s265_s12 + $0x70] sm:$0xff] }
  0x19   : > { %v385_v34 = vld [vmem:[%s265_s12 + $0x78] sm:$0xff] }
  0xd2   : > { %v357_v3 = vpop.f32.mrf.mxu0 }
  0xd3   : > { %v362_v4 = vmul.f32 0.001953125, %v357_v3 }
  0xd4   : > { %v600_v5 = vpop.f32.mrf.mxu0 }
  0xd5   : > { %v363_v6 = vmul.f32 %v362_v4, %v362_v4  ;;  %v389_v15 = vrot.slane %v362_v4, %v388_v12 }
  0xd7   : > { %v365_v7 = vrot.slane %v363_v6, 7  ;;  %v390_v30 = vsub.f32 %v370_v13, %v389_v15  ;;  %v391_v31 = vsub.f32 %v371_v14, %v389_v15  ;;  %v392_v35 = vsub.f32 %v372_v16, %v389_v15 }
  0xd8   : > { %v393_v36 = vsub.f32 %v373_v17, %v389_v15  ;;  %v394_v37 = vsub.f32 %v374_v18, %v389_v15  ;;  %v395_v39 = vsub.f32 %v375_v19, %v389_v15  ;;  %v396_v40 = vsub.f32 %v376_v20, %v389_v15 }
  0xd9   : > { %v367_v8 = vsub.f32 %v362_v4, %v365_v7  ;;  %v397_v41 = vsub.f32 %v377_v22, %v389_v15  ;;  %v398_v42 = vsub.f32 %v378_v23, %v389_v15  ;;  %v399_v43 = vsub.f32 %v379_v24, %v389_v15 }
  0xda   : > { %v400_v44 = vsub.f32 %v380_v27, %v389_v15  ;;  %v401_v45 = vsub.f32 %v381_v28, %v389_v15  ;;  %v402_v47 = vsub.f32 %v382_v29, %v389_v15  ;;  %v403_v48 = vsub.f32 %v383_v32, %v389_v15 }
  0xdb   : > { %v368_v10 = vadd.f32 1e-05, %v367_v8  ;;  %v404_v49 = vsub.f32 %v384_v33, %v389_v15  ;;  %v405_v50 = vsub.f32 %v385_v34, %v389_v15 }
  0xdd   : > { %643 = vrsqrt.f32 %v368_v10 }
  0xea   : > { %v644_v26 = vpop.eup %643 }
  0xeb   : > { %v413_v38 = vmul.f32 %v644_v26, %v590_v21 }
  0xed   : > { %v417_v46 = vrot.slane %v413_v38, %v416_v25 }
  0xef   : > { %v418_v51 = vmul.f32 %v417_v46, %v390_v30  ;;  %v419_v52 = vmul.f32 %v417_v46, %v391_v31  ;;  %v420_v53 = vmul.f32 %v417_v46, %v392_v35  ;;  %v421_v54 = vmul.f32 %v417_v46, %v393_v36 }
  0xf0   : > { %v422_v55 = vmul.f32 %v417_v46, %v394_v37  ;;  %v423_v56 = vmul.f32 %v417_v46, %v395_v39  ;;  %v424_v57 = vmul.f32 %v417_v46, %v396_v40  ;;  %v425_v58 = vmul.f32 %v417_v46, %v397_v41 }
  0xf1   : > { %v426_v60 = vmul.f32 %v417_v46, %v398_v42  ;;  %v427_v61 = vmul.f32 %v417_v46, %v399_v43  ;;  %v428_v62 = vmul.f32 %v417_v46, %v400_v44  ;;  %v429_v63 = vmul.f32 %v417_v46, %v401_v45 }
  0xf2   : > { %v430_v0 = vmul.f32 %v417_v46, %v402_v47  ;;  %v431_v1 = vmul.f32 %v417_v46, %v403_v48  ;;  %v432_v2 = vmul.f32 %v417_v46, %v404_v49  ;;  %v433_v3 = vmul.f32 %v417_v46, %v405_v50 }
  0xf3   : > { %v441_v4 = vadd.f32 %v591_v59, %v418_v51  ;;  %v442_v5 = vadd.f32 %v591_v59, %v419_v52  ;;  %v443_v6 = vadd.f32 %v591_v59, %v420_v53  ;;  %v444_v7 = vadd.f32 %v591_v59, %v421_v54 }
  0xf4   : > { %v445_v8 = vadd.f32 %v591_v59, %v422_v55  ;;  %v446_v9 = vadd.f32 %v591_v59, %v423_v56  ;;  %v447_v10 = vadd.f32 %v591_v59, %v424_v57  ;;  %v448_v11 = vadd.f32 %v591_v59, %v425_v58 }
  0xf5   : > { %v449_v12 = vadd.f32 %v591_v59, %v426_v60  ;;  %v450_v13 = vadd.f32 %v591_v59, %v427_v61  ;;  %v451_v14 = vadd.f32 %v591_v59, %v428_v62  ;;  %v452_v15 = vadd.f32 %v591_v59, %v429_v63  ;;  %458 = vst.msk [vmem:[%s775_s19] sm:$0xff] %vm457_vm3, %v441_v4 }
  0xf6   : > { %459 = vst.msk [vmem:[%s775_s19 + $0x8] sm:$0xff] %vm457_vm3, %v442_v5  ;;  %460 = vst.msk [vmem:[%s775_s19 + $0x10] sm:$0xff] %vm457_vm3, %v443_v6  ;;  %v453_v16 = vadd.f32 %v591_v59, %v430_v0  ;;  %v454_v17 = vadd.f32 %v591_v59, %v431_v1  ;;  %v455_v18 = vadd.f32 %v591_v59, %v432_v2 }
  0xf7   : > { %461 = vst.msk [vmem:[%s775_s19 + $0x18] sm:$0xff] %vm457_vm3, %v444_v7  ;;  %v456_v19 = vadd.f32 %v591_v59, %v433_v3  ;;  %462 = vst.msk [vmem:[%s775_s19 + $0x20] sm:$0xff] %vm457_vm3, %v445_v8 }
  0xf8   : > { %463 = vst.msk [vmem:[%s775_s19 + $0x28] sm:$0xff] %vm457_vm3, %v446_v9  ;;  %464 = vst.msk [vmem:[%s775_s19 + $0x30] sm:$0xff] %vm457_vm3, %v447_v10 }
  0xf9   : > { %465 = vst.msk [vmem:[%s775_s19 + $0x38] sm:$0xff] %vm457_vm3, %v448_v11  ;;  %466 = vst.msk [vmem:[%s775_s19 + $0x40] sm:$0xff] %vm457_vm3, %v449_v12 }
  0xfa   : > { %467 = vst.msk [vmem:[%s775_s19 + $0x48] sm:$0xff] %vm457_vm3, %v450_v13  ;;  %468 = vst.msk [vmem:[%s775_s19 + $0x50] sm:$0xff] %vm457_vm3, %v451_v14 }
  0xfb   : > { %469 = vst.msk [vmem:[%s775_s19 + $0x58] sm:$0xff] %vm457_vm3, %v452_v15  ;;  %470 = vst.msk [vmem:[%s775_s19 + $0x60] sm:$0xff] %vm457_vm3, %v453_v16 }
  0xfc   : > { %471 = vst.msk [vmem:[%s775_s19 + $0x68] sm:$0xff] %vm457_vm3, %v454_v17  ;;  %472 = vst.msk [vmem:[%s775_s19 + $0x70] sm:$0xff] %vm457_vm3, %v455_v18 }
  0xfd   : > { %473 = vst.msk [vmem:[%s775_s19 + $0x78] sm:$0xff] %vm457_vm3, %v456_v19 }
  0xfe PF: > { %s15_s22 = sadd.s32 1, %s683_s22   ;;  %s830_s18 = smov %s675_s20 }
  0xff   : > { %p12_p7 = scmp.ge.s32.totalorder %s15_s22, 6   ;;  %s831_s19 = smov %s679_s21 }
 0x100   : > { %s832_s20 = smov %s835_s23  ;;  %s833_s21 = smov %s839_s24 }
 0x101   :  { %14 = sbr.rel (!%p12_p7) target bundleno = 3 (0x3), region = 73 }

// kernel: mid_block_forward.21
= control target key start
LH: loop header
LB: loop body
LE: loop exit
PB: predicated region body
PF: predicated region fallthrough
CT: control target
= control target key end

     0   :  { %s1276_s27 = smov 0   ;;  %s1278_s28 = smov 0   ;;  %s1571_s0 = inlined_call_operand.vmem [shape: f32[2,256,8], index: 0, kind: input, shape index: {}]   ;;  %s1572_s1 = inlined_call_operand.vmem [shape: f32[2,2,4], index: 1, kind: input, shape index: {}]   ;;  %s1573_s2 = inlined_call_operand.vmem [shape: f32[1,8], index: 2, kind: input, shape index: {}]   ;;  %s1574_s3 = inlined_call_operand.vmem [shape: f32[1,8], index: 3, kind: input, shape index: {}]   ;;  %s1575_s4 = inlined_call_operand.vmem [shape: f32[4,8], index: 4, kind: input, shape index: {}]   ;;  %s1576_s5 = inlined_call_operand.vmem [shape: f32[2,256,4], index: 5, kind: input, shape index: {}]   ;;  %s1577_s6 = inlined_call_operand.vmem [shape: bf16[4,8], index: 6, kind: input, shape index: {}]   ;;  %s1578_s7 = inlined_call_operand.vmem [shape: f32[1,8], index: 7, kind: input, shape index: {}]   ;;  %s1579_s8 = inlined_call_operand.vmem [shape: f32[2,256,8], index: 8, kind: output, shape index: {}]  }
   0x1   :  { %s1280_s29 = smov 0   ;;  %s1282_s30 = smov 0  }
   0x2   :  { %s1284_s9 = smov 0  }
   0x3 LB: > { %s27_s10 = sadd.s32 1, %s1219_s29  ;;  %s30_s11 = sadd.s32 1, %s1223_s30  ;;  %s1227_s9 = sphi %s1284_s9, %s18_s9   ;;  %s1223_s30 = sphi %s1282_s30, %s1583_s30   ;;  %s1219_s29 = sphi %s1280_s29, %s1582_s29   ;;  %s1215_s28 = sphi %s1278_s28, %s1581_s28   ;;  %s1211_s27 = sphi %s1276_s27, %s1580_s27  }
   0x4   : > { %p28_p0 = scmp.ge.s32.totalorder %s27_s10, 2  ;;  %p1001_p1 = scmp.ge.s32.totalorder %s1227_s9, 1 }
   0x5   : > { %p309_p2 = scmp.lt.s32.totalorder %s1227_s9, 5 }
   0x6   : > { %s1585_s10 = smov (%p28_p0, %s27_s10), 0  ;;  %s1587_s11 = smov (!%p28_p0, %s30_s11), %s1223_s30 }
   0x7   : > { %p310_p3 = pnand %p1001_p1, %p309_p2  ;;  %p32_p4 = scmp.ge.s32.totalorder %s1587_s11, 2 }
   0x8   : > { %s1002_s14 = sshll.u32 (!%p310_p3), %s1211_s27, 4  ;;  %p365_p5 = scmp.lt.s32.totalorder (!%p310_p3), %s1215_s28, 1 }
   0x9   : > { %s1589_s11 = smov (%p32_p4, %s1587_s11), 0  ;;  %313 = sbr.rel (%p310_p3) target bundleno = 296 (0x128), region = 52 }
   0xa   : > { %p367_p6 = scmp.lt.s32.totalorder (!%p310_p3), %s1002_s14, 31 }
   0xe   : > { %v400_v0 = vld [vmem:[%s1575_s4] sm:$0xf]  ;;  %vm405_vm0 = vcmask 1043456   ;;  %v1229_v1 = vmov 0.0   ;;  %vm1230_vm1 = vmmov 0   ;;  %vm743_vm2 = vcmask 1041408  }
   0xf   : > { %1054 = vmatprep.subr.mxu0 %v1229_v1  ;;  %1056 = vmatprep.mubr.msk.f32.mxu0 %vm1230_vm1, %v1229_v1  ;;  %v711_v2 = vld [vmem:[%s1577_s6] sm:$0x3]  ;;  %s1591_s28 = smov (!%p365_p5, %s1215_s28), 1  ;;  %s1593_s14 = smov (!%p367_p6, %s1002_s14), 31  ;;  %vm401_vm3 = vcmask 31744   ;;  %v504_v36 = vlaneseq  ;;  %vm860_vm4 = vcmask 64512  }
  0x10   : > { %1055 = vmatpush3.msk.msra.mxu0 %vm405_vm0, %v400_v0  ;;  %1080 = vmatprep.subr.msk.bf16.mxu1 %vm743_vm2, %v711_v2  ;;  %v745_v3 = vsel %vm743_vm2, %v711_v2, 0  ;;  %s1003_s17 = sshll.u32 %s1591_s28, 5  ;;  %s1005_s18 = sshll.u32 %s1591_s28, 1  ;;  %v1014_v43 = vld [vmem:[%s1573_s2] ss:$0 sm:$0xff] }
  0x11   : > { %1078 = vmatpush3.bf16.msra.mxu1 %v745_v3  ;;  %1079 = vmatprep.subr.msk.bf16.mxu0 %vm743_vm2, %v711_v2  ;;  %s370_s19 = sadd.s32 %s1003_s17, %s1593_s14  ;;  %s377_s22 = scalar_lea.vmem %s1572_s1, %s1005_s18  ;;  %v505_v37 = vshrl.u32 %v504_v36, 7 }
  0x12   : > { %s1318_s23 = sshll.u32 %s370_s19, 3  ;;  %v399_v4 = vld [vmem:[%s377_s22] sm:$0x3] }
  0x13   : > { %s1324_s26 = scalar_lea.vmem %s1576_s5, %s1318_s23  ;;  %1057 = vmatmul.mubr.msk.f32.vlgmr.msra.gmra.mxu0 %vm401_vm3, %v399_v4  ;;  %v506_v38 = vsub.s32 0, %v505_v37  ;;  %s1355_s12 = scalar_lea.vmem %s1571_s0, %s1318_s23  ;;  %v534_v46 = vsub.s32 1, %v505_v37 }
  0x14   : > { %v691_v5 = vld [vmem:[%s1324_s26 + $0x20] sm:$0xff]  ;;  %v692_v6 = vld [vmem:[%s1324_s26 + $0x28] sm:$0xff]  ;;  %v693_v7 = vld [vmem:[%s1324_s26 + $0x30] sm:$0xff]  ;;  %1060 = vmatpush3.bf16.msra.mxu0 %v745_v3  ;;  %s1487_s21 = scalar_lea.vmem %s1579_s8, %s1318_s23 }
  0x15   : > { %v705_v8 = vpack.c.bf16 %v692_v6, %v691_v5  ;;  %v694_v9 = vld [vmem:[%s1324_s26 + $0x38] sm:$0xff]  ;;  %v695_v10 = vld [vmem:[%s1324_s26 + $0x40] sm:$0xff]  ;;  %v696_v11 = vld [vmem:[%s1324_s26 + $0x48] sm:$0xff] }
  0x16   : > { %v706_v12 = vpack.c.bf16 %v694_v9, %v693_v7  ;;  %v707_v13 = vpack.c.bf16 %v696_v11, %v695_v10  ;;  %v687_v14 = vld [vmem:[%s1324_s26] sm:$0xff]  ;;  %v688_v15 = vld [vmem:[%s1324_s26 + $0x8] sm:$0xff]  ;;  %v689_v17 = vld [vmem:[%s1324_s26 + $0x10] sm:$0xff] }
  0x17   : > { %1065 = vmatprep.mubr.msk.bf16.mxu1 %vm401_vm3, %v705_v8  ;;  %v703_v16 = vpack.c.bf16 %v688_v15, %v687_v14  ;;  %v690_v18 = vld [vmem:[%s1324_s26 + $0x18] sm:$0xff]  ;;  %v697_v19 = vld [vmem:[%s1324_s26 + $0x50] sm:$0xff]  ;;  %v699_v22 = vld [vmem:[%s1324_s26 + $0x60] sm:$0xff] }
  0x18   : > { %1066 = vmatmul.mubr.msk.bf16.vlgmr.msra.gmra.mxu1 %vm401_vm3, %v706_v12  ;;  %v698_v20 = vld [vmem:[%s1324_s26 + $0x58] sm:$0xff]  ;;  %v704_v21 = vpack.c.bf16 %v690_v18, %v689_v17  ;;  %v700_v23 = vld [vmem:[%s1324_s26 + $0x68] sm:$0xff]  ;;  %v701_v26 = vld [vmem:[%s1324_s26 + $0x70] sm:$0xff] }
  0x19   : > { %1069 = vmatprep.mubr.msk.bf16.mxu1 %vm401_vm3, %v707_v13  ;;  %1061 = vmatprep.mubr.msk.bf16.mxu0 %vm401_vm3, %v703_v16  ;;  %v708_v24 = vpack.c.bf16 %v698_v20, %v697_v19  ;;  %v709_v25 = vpack.c.bf16 %v700_v23, %v699_v22  ;;  %v702_v27 = vld [vmem:[%s1324_s26 + $0x78] sm:$0xff]  ;;  %v494_v40 = vld [vmem:[%s1355_s12 + $0x30] sm:$0xff]  ;;  %v492_v41 = vld [vmem:[%s1355_s12 + $0x20] sm:$0xff] }
  0x1a   : > { %1062 = vmatmul.mubr.msk.bf16.vlgmr.msra.gmra.mxu0 %vm401_vm3, %v704_v21  ;;  %v710_v28 = vpack.c.bf16 %v702_v27, %v701_v26  ;;  %v495_v42 = vld [vmem:[%s1355_s12 + $0x38] sm:$0xff]  ;;  %v493_v44 = vld [vmem:[%s1355_s12 + $0x28] sm:$0xff]  ;;  %v498_v45 = vld [vmem:[%s1355_s12 + $0x50] sm:$0xff] }
  0x1b   : > { %v496_v47 = vld [vmem:[%s1355_s12 + $0x40] sm:$0xff]  ;;  %v499_v48 = vld [vmem:[%s1355_s12 + $0x58] sm:$0xff]  ;;  %v497_v49 = vld [vmem:[%s1355_s12 + $0x48] sm:$0xff] }
  0x1c   : > { %v490_v51 = vld [vmem:[%s1355_s12 + $0x10] sm:$0xff]  ;;  %v488_v53 = vld [vmem:[%s1355_s12] sm:$0xff]  ;;  %v491_v59 = vld [vmem:[%s1355_s12 + $0x18] sm:$0xff] }
  0x1d   : > { %v502_v52 = vld [vmem:[%s1355_s12 + $0x70] sm:$0xff]  ;;  %v500_v58 = vld [vmem:[%s1355_s12 + $0x60] sm:$0xff]  ;;  %v503_v60 = vld [vmem:[%s1355_s12 + $0x78] sm:$0xff] }
  0x1e   : > { %v1389_v5 = vld [vmem:[%s1574_s3] ss:$0 sm:$0xff]  ;;  %v489_v14 = vld [vmem:[%s1355_s12 + $0x8] sm:$0xff] }
  0x1f   : > { %v501_v23 = vld [vmem:[%s1355_s12 + $0x68] sm:$0xff] }
  0x20   : > { %1070 = vmatmul.mubr.msk.bf16.gmra.mxu1 %vm401_vm3, %v708_v24 }
  0x21   : > { %1073 = vmatprep.mubr.msk.bf16.mxu1 %vm401_vm3, %v709_v25 }
  0x28   : > { %1074 = vmatmul.mubr.msk.bf16.gmra.mxu1 %vm401_vm3, %v710_v28 }
  0xd3   : > { %v475_v29 = vpop.f32.mrf.mxu0 }
  0xd4   : > { %v480_v30 = vmul.f32 0.001953125, %v475_v29 }
  0xd5   : > { %v1058_v31 = vpop.f32.mrf.mxu0 }
  0xd6   : > { %v481_v32 = vmul.f32 %v480_v30, %v480_v30  ;;  %v1357_v39 = vrot.slane %v480_v30, %v506_v38 }
  0xd8   : > { %v483_v33 = vrot.slane %v481_v32, 7  ;;  %v514_v55 = vsub.f32 %v494_v40, %v1357_v39  ;;  %v512_v56 = vsub.f32 %v492_v41, %v1357_v39  ;;  %v515_v57 = vsub.f32 %v495_v42, %v1357_v39  ;;  %v1420_v29 = vpop.f32.mrf.mxu1 }
  0xd9   : > { %v513_v61 = vsub.f32 %v493_v44, %v1357_v39  ;;  %v518_v62 = vsub.f32 %v498_v45, %v1357_v39  ;;  %v516_v63 = vsub.f32 %v496_v47, %v1357_v39  ;;  %v519_v0 = vsub.f32 %v499_v48, %v1357_v39 }
  0xda   : > { %v485_v34 = vsub.f32 %v480_v30, %v483_v33  ;;  %v517_v2 = vsub.f32 %v497_v49, %v1357_v39  ;;  %v510_v3 = vsub.f32 %v490_v51, %v1357_v39  ;;  %v522_v4 = vsub.f32 %v502_v52, %v1357_v39  ;;  %v1437_v44 = vpop.f32.mrf.mxu1 }
  0xdb   : > { %v508_v6 = vsub.f32 %v488_v53, %v1357_v39  ;;  %v520_v7 = vsub.f32 %v500_v58, %v1357_v39  ;;  %v511_v8 = vsub.f32 %v491_v59, %v1357_v39  ;;  %v523_v9 = vsub.f32 %v503_v60, %v1357_v39 }
  0xdc   : > { %v486_v35 = vadd.f32 1e-05, %v485_v34  ;;  %v509_v27 = vsub.f32 %v489_v14, %v1357_v39  ;;  %v521_v36 = vsub.f32 %v501_v23, %v1357_v39 }
  0xde   : > { %1123 = vrsqrt.f32 %v486_v35 }
  0xeb   : > { %v1124_v50 = vpop.eup %1123 }
  0xec   : > { %v531_v54 = vmul.f32 %v1124_v50, %v1014_v43 }
  0xee   : > { %v535_v1 = vrot.slane %v531_v54, %v534_v46 }
  0xf0   : > { %v542_v10 = vmul.f32 %v535_v1, %v514_v55  ;;  %v540_v11 = vmul.f32 %v535_v1, %v512_v56  ;;  %v543_v12 = vmul.f32 %v535_v1, %v515_v57  ;;  %v541_v13 = vmul.f32 %v535_v1, %v513_v61  ;;  %v1455_v56 = vpop.f32.mrf.mxu1 }
  0xf1   : > { %v546_v15 = vmul.f32 %v535_v1, %v518_v62  ;;  %v544_v16 = vmul.f32 %v535_v1, %v516_v63  ;;  %v547_v17 = vmul.f32 %v535_v1, %v519_v0  ;;  %v545_v18 = vmul.f32 %v535_v1, %v517_v2 }
  0xf2   : > { %v1397_v19 = vadd.f32 %v1389_v5, %v542_v10  ;;  %v1400_v20 = vadd.f32 %v1389_v5, %v540_v11  ;;  %v1403_v21 = vadd.f32 %v1389_v5, %v543_v12  ;;  %v1406_v22 = vadd.f32 %v1389_v5, %v541_v13  ;;  %v1467_v63 = vpop.f32.mrf.mxu1 }
  0xf3   : > { %v1410_v24 = vadd.f32 %v1389_v5, %v546_v15  ;;  %v1413_v25 = vadd.f32 %v1389_v5, %v544_v16  ;;  %v1416_v26 = vadd.f32 %v1389_v5, %v547_v17  ;;  %v538_v32 = vmul.f32 %v535_v1, %v510_v3 }
  0xf4   : > { %v1022_v28 = vmul.f32 -1.442695, %v1397_v19  ;;  %v1020_v30 = vmul.f32 -1.442695, %v1400_v20  ;;  %v1023_v31 = vmul.f32 -1.442695, %v1403_v21  ;;  %v1426_v34 = vadd.f32 %v1389_v5, %v545_v18 }
  0xf5   : > { %v1021_v33 = vmul.f32 -1.442695, %v1406_v22  ;;  %v550_v35 = vmul.f32 %v535_v1, %v522_v4  ;;  %v1026_v37 = vmul.f32 -1.442695, %v1410_v24  ;;  %v1024_v38 = vmul.f32 -1.442695, %v1413_v25 }
  0xf6   : > { %1125 = vpow2.f32 %v1022_v28  ;;  %v1432_v40 = vadd.f32 %v1389_v5, %v538_v32  ;;  %v536_v42 = vmul.f32 %v535_v1, %v508_v6  ;;  %v548_v43 = vmul.f32 %v535_v1, %v520_v7 }
  0xf7   : > { %1127 = vpow2.f32 %v1020_v30  ;;  %v1435_v41 = vadd.f32 %v1389_v5, %v550_v35  ;;  %v1027_v45 = vmul.f32 -1.442695, %v1416_v26  ;;  %v539_v39 = vmul.f32 %v535_v1, %v511_v8 }
  0xf8   : > { %1129 = vpow2.f32 %v1023_v31  ;;  %v551_v46 = vmul.f32 %v535_v1, %v523_v9  ;;  %v1025_v47 = vmul.f32 -1.442695, %v1426_v34  ;;  %v1442_v48 = vadd.f32 %v1389_v5, %v536_v42 }
  0xf9   : > { %1131 = vpow2.f32 %v1021_v33  ;;  %v1445_v49 = vadd.f32 %v1389_v5, %v548_v43  ;;  %v1018_v50 = vmul.f32 -1.442695, %v1432_v40  ;;  %v1449_v51 = vadd.f32 %v1389_v5, %v539_v39 }
  0xfa   : > { %1133 = vpow2.f32 %v1026_v37  ;;  %v537_v52 = vmul.f32 %v535_v1, %v509_v27  ;;  %v1030_v53 = vmul.f32 -1.442695, %v1435_v41  ;;  %v1453_v54 = vadd.f32 %v1389_v5, %v551_v46  ;;  %v1478_v46 = vld [vmem:[%s1578_s7] ss:$0 sm:$0xff] }
  0xfb   : > { %1135 = vpow2.f32 %v1024_v38  ;;  %v549_v55 = vmul.f32 %v535_v1, %v521_v36  ;;  %v1016_v57 = vmul.f32 -1.442695, %v1442_v48  ;;  %v1028_v59 = vmul.f32 -1.442695, %v1445_v49 }
  0xfc   : > { %1137 = vpow2.f32 %v1027_v45  ;;  %v1459_v58 = vadd.f32 %v1389_v5, %v537_v52  ;;  %v1019_v61 = vmul.f32 -1.442695, %v1449_v51  ;;  %v1031_v62 = vmul.f32 -1.442695, %v1453_v54 }
  0xfd   : > { %1139 = vpow2.f32 %v1025_v47  ;;  %v1463_v60 = vadd.f32 %v1389_v5, %v549_v55  ;;  %v1471_v5 = vpop.f32.mrf.mxu1  ;;  %v1063_v55 = vpop.f32.mrf.mxu0 }
  0xfe   : > { %1141 = vpow2.f32 %v1018_v50  ;;  %v1017_v0 = vmul.f32 -1.442695, %v1459_v58 }
  0xff   : > { %1143 = vpow2.f32 %v1030_v53  ;;  %v1029_v1 = vmul.f32 -1.442695, %v1463_v60  ;;  %v1473_v14 = vpop.f32.mrf.mxu1 }
 0x100   : > { %1145 = vpow2.f32 %v1016_v57 }
 0x101   : > { %1147 = vpow2.f32 %v1028_v59  ;;  %v1072_v30 = vpop.f32.mrf.mxu1 }
 0x102   : > { %1149 = vpow2.f32 %v1019_v61 }
 0x103   : > { %v1126_v2 = vpop.eup %1125  ;;  %1151 = vpow2.f32 %v1031_v62  ;;  %v816_v43 = vpop.f32.mrf.mxu1  ;;  %v806_v62 = vadd.f32 %v1420_v29, %v1478_v46 }
 0x104   : > { %v1128_v3 = vpop.eup %1127  ;;  %v629_v4 = vadd.f32 1.0, %v1126_v2  ;;  %1153 = vpow2.f32 %v1017_v0 }
 0x105   : > { %v1130_v6 = vpop.eup %1129  ;;  %v627_v7 = vadd.f32 1.0, %v1128_v3  ;;  %1155 = vpow2.f32 %v1029_v1  ;;  %v1075_v0 = vpop.f32.mrf.mxu1  ;;  %v798_v3 = vadd.f32 %v1478_v46, %v1437_v44 }
 0x106   : > { %v1132_v8 = vpop.eup %1131  ;;  %1157 = vrcp.f32 %v629_v4  ;;  %v630_v9 = vadd.f32 1.0, %v1130_v6  ;;  %v809_v6 = vadd.f32 %v1455_v56, %v1478_v46 }
 0x107   : > { %v1134_v10 = vpop.eup %1133  ;;  %1159 = vrcp.f32 %v627_v7  ;;  %v628_v11 = vadd.f32 1.0, %v1132_v8  ;;  %v829_v56 = vpop.f32.mrf.mxu1 }
 0x108   : > { %v1136_v12 = vpop.eup %1135  ;;  %1161 = vrcp.f32 %v630_v9  ;;  %v633_v13 = vadd.f32 1.0, %v1134_v10  ;;  %v781_v10 = vpop.f32.mrf.mxu0 }
 0x109   : > { %v1138_v15 = vpop.eup %1137  ;;  %1163 = vrcp.f32 %v628_v11  ;;  %v631_v16 = vadd.f32 1.0, %v1136_v12 }
 0x10a   : > { %v1140_v17 = vpop.eup %1139  ;;  %1165 = vrcp.f32 %v633_v13  ;;  %v634_v18 = vadd.f32 1.0, %v1138_v15 }
 0x10b   : > { %v1142_v23 = vpop.eup %1141  ;;  %1167 = vrcp.f32 %v631_v16  ;;  %v632_v27 = vadd.f32 1.0, %v1140_v17 }
 0x10c   : > { %v1144_v28 = vpop.eup %1143  ;;  %1169 = vrcp.f32 %v634_v18  ;;  %v625_v31 = vadd.f32 1.0, %v1142_v23 }
 0x10d   : > { %v1146_v32 = vpop.eup %1145  ;;  %1171 = vrcp.f32 %v632_v27  ;;  %v637_v33 = vadd.f32 1.0, %v1144_v28  ;;  %v1064_v28 = vpop.f32.mrf.mxu0 }
 0x10e   : > { %v1148_v35 = vpop.eup %1147  ;;  %1173 = vrcp.f32 %v625_v31  ;;  %v623_v36 = vadd.f32 1.0, %v1146_v32 }
 0x10f   : > { %v1150_v37 = vpop.eup %1149  ;;  %1175 = vrcp.f32 %v637_v33  ;;  %v635_v38 = vadd.f32 1.0, %v1148_v35 }
 0x110   : > { %v1152_v42 = vpop.eup %1151  ;;  %1177 = vrcp.f32 %v623_v36  ;;  %v626_v45 = vadd.f32 1.0, %v1150_v37  ;;  %v838_v36 = vadd.f32 %v1075_v0, %v1478_v46 }
 0x111   : > { %v1154_v39 = vpop.eup %1153  ;;  %1179 = vrcp.f32 %v635_v38  ;;  %v638_v47 = vadd.f32 1.0, %v1152_v42 }
 0x112   : > { %v1156_v50 = vpop.eup %1155  ;;  %1181 = vrcp.f32 %v626_v45  ;;  %v624_v52 = vadd.f32 1.0, %v1154_v39 }
 0x113   : > { %v1158_v53 = vpop.eup %1157  ;;  %1183 = vrcp.f32 %v638_v47  ;;  %v636_v57 = vadd.f32 1.0, %v1156_v50  ;;  %v784_v47 = vpop.f32.mrf.mxu0 }
 0x114   : > { %v1160_v59 = vpop.eup %1159  ;;  %v677_v61 = vmul.f32 %v1158_v53, %v1397_v19  ;;  %1185 = vrcp.f32 %v624_v52 }
 0x115   : > { %v1162_v1 = vpop.eup %1161  ;;  %v675_v2 = vmul.f32 %v1160_v59, %v1400_v20  ;;  %1187 = vrcp.f32 %v636_v57  ;;  %v801_v20 = vadd.f32 %v1478_v46, %v1467_v63  ;;  %v814_v63 = vadd.f32 %v1478_v46, %v1473_v14 }
 0x116   : > { %v1164_v19 = vpop.eup %1163  ;;  %v850_v4 = vadd.f32 %v806_v62, %v677_v61  ;;  %v678_v29 = vmul.f32 %v1162_v1, %v1403_v21  ;;  %v822_v21 = vadd.f32 %v1471_v5, %v1478_v46  ;;  %v825_v5 = vadd.f32 %v1072_v30, %v1478_v46  ;;  %v1076_v30 = vpop.f32.mrf.mxu1 }
 0x117   : > { %v1166_v7 = vpop.eup %1165  ;;  %v848_v8 = vadd.f32 %v798_v3, %v675_v2  ;;  %v676_v9 = vmul.f32 %v1164_v19, %v1406_v22  ;;  %v841_v61 = vadd.f32 %v1076_v30, %v1478_v46  ;;  %v785_v1 = vadd.f32 %v1478_v46, %v784_v47 }
 0x118   : > { %v1168_v11 = vpop.eup %1167  ;;  %867 = vst.msk [vmem:[%s1487_s21 + $0x30] sm:$0xff] %vm860_vm4, %v850_v4  ;;  %v851_v44 = vadd.f32 %v809_v6, %v678_v29  ;;  %v681_v12 = vmul.f32 %v1166_v7, %v1410_v24 }
 0x119   : > { %v1170_v13 = vpop.eup %1169  ;;  %865 = vst.msk [vmem:[%s1487_s21 + $0x20] sm:$0xff] %vm860_vm4, %v848_v8  ;;  %v849_v22 = vadd.f32 %v801_v20, %v676_v9  ;;  %v679_v15 = vmul.f32 %v1168_v11, %v1413_v25  ;;  %v817_v25 = vadd.f32 %v1478_v46, %v816_v43 }
 0x11a   : > { %v1172_v16 = vpop.eup %1171  ;;  %868 = vst.msk [vmem:[%s1487_s21 + $0x38] sm:$0xff] %vm860_vm4, %v851_v44  ;;  %v854_v17 = vadd.f32 %v822_v21, %v681_v12  ;;  %v682_v24 = vmul.f32 %v1170_v13, %v1416_v26  ;;  %v790_v26 = vadd.f32 %v1063_v55, %v1478_v46  ;;  %v832_v55 = vpop.f32.mrf.mxu1 }
 0x11b   : > { %v1174_v18 = vpop.eup %1173  ;;  %866 = vst.msk [vmem:[%s1487_s21 + $0x28] sm:$0xff] %vm860_vm4, %v849_v22  ;;  %v852_v23 = vadd.f32 %v814_v63, %v679_v15  ;;  %v680_v27 = vmul.f32 %v1172_v16, %v1426_v34  ;;  %v833_v19 = vadd.f32 %v1478_v46, %v832_v55 }
 0x11c   : > { %v1176_v14 = vpop.eup %1175  ;;  %871 = vst.msk [vmem:[%s1487_s21 + $0x50] sm:$0xff] %vm860_vm4, %v854_v17  ;;  %v855_v31 = vadd.f32 %v825_v5, %v682_v24  ;;  %v673_v32 = vmul.f32 %v1174_v18, %v1432_v40  ;;  %v782_v40 = vadd.f32 %v1478_v46, %v781_v10 }
 0x11d   : > { %v1178_v33 = vpop.eup %1177  ;;  %869 = vst.msk [vmem:[%s1487_s21 + $0x40] sm:$0xff] %vm860_vm4, %v852_v23  ;;  %v853_v35 = vadd.f32 %v817_v25, %v680_v27  ;;  %v685_v34 = vmul.f32 %v1176_v14, %v1435_v41  ;;  %v830_v41 = vadd.f32 %v1478_v46, %v829_v56 }
 0x11e   : > { %v1180_v37 = vpop.eup %1179  ;;  %872 = vst.msk [vmem:[%s1487_s21 + $0x58] sm:$0xff] %vm860_vm4, %v855_v31  ;;  %v846_v38 = vadd.f32 %v790_v26, %v673_v32  ;;  %v671_v42 = vmul.f32 %v1178_v33, %v1442_v48  ;;  %v793_v48 = vadd.f32 %v1064_v28, %v1478_v46 }
 0x11f   : > { %v1182_v43 = vpop.eup %1181  ;;  %870 = vst.msk [vmem:[%s1487_s21 + $0x48] sm:$0xff] %vm860_vm4, %v853_v35  ;;  %v858_v45 = vadd.f32 %v838_v36, %v685_v34  ;;  %v683_v39 = vmul.f32 %v1180_v37, %v1445_v49 }
 0x120   : > { %v1184_v50 = vpop.eup %1183  ;;  %863 = vst.msk [vmem:[%s1487_s21 + $0x10] sm:$0xff] %vm860_vm4, %v846_v38  ;;  %v844_v52 = vadd.f32 %v782_v40, %v671_v42  ;;  %v674_v53 = vmul.f32 %v1182_v43, %v1449_v51 }
 0x121   : > { %v1186_v57 = vpop.eup %1185  ;;  %875 = vst.msk [vmem:[%s1487_s21 + $0x70] sm:$0xff] %vm860_vm4, %v858_v45  ;;  %v856_v59 = vadd.f32 %v830_v41, %v683_v39  ;;  %v686_v49 = vmul.f32 %v1184_v50, %v1453_v54 }
 0x122   : > { %v1188_v62 = vpop.eup %1187  ;;  %861 = vst.msk [vmem:[%s1487_s21] sm:$0xff] %vm860_vm4, %v844_v52  ;;  %v847_v0 = vadd.f32 %v793_v48, %v674_v53  ;;  %v672_v51 = vmul.f32 %v1186_v57, %v1459_v58 }
 0x123   : > { %873 = vst.msk [vmem:[%s1487_s21 + $0x60] sm:$0xff] %vm860_vm4, %v856_v59  ;;  %v859_v2 = vadd.f32 %v841_v61, %v686_v49  ;;  %v684_v3 = vmul.f32 %v1188_v62, %v1463_v60 }
 0x124   : > { %864 = vst.msk [vmem:[%s1487_s21 + $0x18] sm:$0xff] %vm860_vm4, %v847_v0  ;;  %v845_v54 = vadd.f32 %v785_v1, %v672_v51 }
 0x125   : > { %876 = vst.msk [vmem:[%s1487_s21 + $0x78] sm:$0xff] %vm860_vm4, %v859_v2  ;;  %v857_v4 = vadd.f32 %v833_v19, %v684_v3 }
 0x126   : > { %862 = vst.msk [vmem:[%s1487_s21 + $0x8] sm:$0xff] %vm860_vm4, %v845_v54 }
 0x127   : > { %874 = vst.msk [vmem:[%s1487_s21 + $0x68] sm:$0xff] %vm860_vm4, %v857_v4 }
 0x128 PF: > { %s18_s9 = sadd.s32 1, %s1227_s9   ;;  %s1580_s27 = smov %s1219_s29 }
 0x129   : > { %p15_p7 = scmp.ge.s32.totalorder %s18_s9, 6   ;;  %s1581_s28 = smov %s1223_s30 }
 0x12a   : > { %s1582_s29 = smov %s1585_s10  ;;  %s1583_s30 = smov %s1589_s11 }
 0x12b   :  { %17 = sbr.rel (!%p15_p7) target bundleno = 3 (0x3), region = 88 }

// kernel: mid_block_forward.16
= control target key start
LH: loop header
LB: loop body
LE: loop exit
PB: predicated region body
PF: predicated region fallthrough
CT: control target
= control target key end

     0   :  { %s2755_s12 = smov 0   ;;  %s3833_s0 = inlined_call_operand.vmem [shape: f32[2,18,18,4], index: 0, kind: input, shape index: {}]   ;;  %s3834_s1 = inlined_call_operand.vmem [shape: bf16[3,12,8], index: 1, kind: input, shape index: {}]   ;;  %s3835_s2 = inlined_call_operand.vmem [shape: f32[1,8], index: 2, kind: input, shape index: {}]   ;;  %s3836_s3 = inlined_call_operand.vmem [shape: f32[2,256,8], index: 3, kind: output, shape index: {}]  }
   0x1 LB: > { %s2389_s13 = sadd.s32 4294967295, %s2731_s12   ;;  %p2393_p0 = scmp.ge.s32.totalorder %s2731_s12, 1  ;;  %s2731_s12 = sphi %s2755_s12, %s13_s12  }
   0x2   : > { %p137_p1 = scmp.lt.s32.totalorder %s2731_s12, 3 }
   0x4   : > { %p138_p2 = pnand %p2393_p0, %p137_p1 }
   0x5   : > { %p161_p3 = scmp.lt.s32.totalorder (!%p138_p2), %s2389_s13, 1  ;;  %s2733_s18 = smov (!%p138_p2), 8  }
   0x6   : > { %141 = sbr.rel (%p138_p2) target bundleno = 530 (0x212), region = 32  ;;  %s2734_s19 = smov (!%p138_p2), 4  }
   0xb   : > { %s3838_s13 = smov (!%p161_p3, %s2389_s13), 1  ;;  %vm477_vm0 = vcmask 1046528   ;;  %vm252_vm1 = vsmask.f32 7424  ;;  %vm1180_vm2 = vcmask 1045504   ;;  %vm590_vm3 = vcmask 31744  }
   0xc   : > { %s2711_s14 = smul.u32 432, %s3838_s13  ;;  %vm623_vm4 = vcmask 64512   ;;  %vm1147_vm5 = vcmask 97280   ;;  %s2551_s26 = sshll.u32 %s3838_s13, 8 }
   0xd   : > { %s3708_s4 = scalar_lea.vmem %s3836_s3, %s2551_s26 }
   0xe   : > { %s2769_s17 = scalar_lea.vmem %s3833_s0, %s2711_s14 }
   0xf   : > { %v2424_v0 = vld [vmem:[%s2769_s17 + $0xf0] sm:$0xff]  ;;  %v2425_v1 = vld [vmem:[%s2769_s17 + $0xf8] sm:$0xff]  ;;  %v2426_v2 = vld [vmem:[%s2769_s17 + $0x100] sm:$0x3] }
  0x10   : > { %v2774_v3 = vpack.c.bf16 %v2425_v1, %v2424_v0  ;;  %v726_v4 = vpack.c.bf16 %v2426_v2, %v2426_v2  ;;  %v2421_v5 = vld [vmem:[%s2769_s17 + $0xd8] sm:$0xff]  ;;  %v2422_v6 = vld [vmem:[%s2769_s17 + $0xe0] sm:$0xff]  ;;  %v2423_v7 = vld [vmem:[%s2769_s17 + $0xe8] sm:$0x3] }
  0x11   : > { %v2779_v8 = vpack.c.bf16 %v2422_v6, %v2421_v5  ;;  %v724_v9 = vpack.c.bf16 %v2423_v7, %v2423_v7  ;;  %v2400_v10 = vld [vmem:[%s2769_s17 + $0x30] sm:$0xff]  ;;  %v2401_v11 = vld [vmem:[%s2769_s17 + $0x38] sm:$0xff]  ;;  %v2402_v12 = vld [vmem:[%s2769_s17 + $0x40] sm:$0x3] }
  0x12   : > { %v990_v13 = vrot.slane %v2774_v3, 1  ;;  %v991_v14 = vrot.slane %v726_v4, 1  ;;  %v2785_v15 = vpack.c.bf16 %v2401_v11, %v2400_v10  ;;  %v710_v16 = vpack.c.bf16 %v2402_v12, %v2402_v12  ;;  %v2397_v17 = vld [vmem:[%s2769_s17 + $0x18] sm:$0xff]  ;;  %v2398_v18 = vld [vmem:[%s2769_s17 + $0x20] sm:$0xff]  ;;  %v2399_v19 = vld [vmem:[%s2769_s17 + $0x28] sm:$0x3] }
  0x13   : > { %v987_v20 = vrot.slane %v2779_v8, 1  ;;  %v988_v21 = vrot.slane %v724_v9, 1  ;;  %v2791_v22 = vpack.c.bf16 %v2398_v18, %v2397_v17  ;;  %v708_v23 = vpack.c.bf16 %v2399_v19, %v2399_v19  ;;  %v2427_v40 = vld [vmem:[%s2769_s17 + $0x108] sm:$0xff]  ;;  %v2428_v41 = vld [vmem:[%s2769_s17 + $0x110] sm:$0xff]  ;;  %v2429_v46 = vld [vmem:[%s2769_s17 + $0x118] sm:$0x3] }
  0x14   : > { %v992_v24 = vsel %vm477_vm0, %v990_v13, %v991_v14  ;;  %v2795_v25 = vrot.slane %v2785_v15, 1  ;;  %v967_v26 = vrot.slane %v710_v16, 1  ;;  %v836_v27 = vshrl.u32 %v2779_v8, 16  ;;  %v2430_v51 = vld [vmem:[%s2769_s17 + $0x120] sm:$0xff]  ;;  %v2431_v52 = vld [vmem:[%s2769_s17 + $0x128] sm:$0xff] }
  0x15   : > { %1061 = vrot.lane.b32.xlu0 %v992_v24, %s2733_s18  ;;  %v989_v28 = vsel %vm477_vm0, %v987_v20, %v988_v21  ;;  %v963_v29 = vrot.slane %v2791_v22, 1  ;;  %v964_v30 = vrot.slane %v708_v23, 1  ;;  %v838_v31 = vshll.u32 %v2779_v8, 16  ;;  %v2432_v61 = vld [vmem:[%s2769_s17 + $0x130] sm:$0x3]  ;;  %v2403_v7 = vld [vmem:[%s2769_s17 + $0x48] sm:$0xff] }
  0x16   : > { %1059 = vrot.lane.b32.xlu1 %v989_v28, %s2733_s18  ;;  %v968_v32 = vsel %vm477_vm0, %v2795_v25, %v967_v26  ;;  %v843_v33 = vshll.u32 %v724_v9, 16  ;;  %v740_v34 = vshrl.u32 %v2791_v22, 16  ;;  %v742_v35 = vshll.u32 %v2791_v22, 16  ;;  %v2404_v9 = vld [vmem:[%s2769_s17 + $0x50] sm:$0xff]  ;;  %v2405_v14 = vld [vmem:[%s2769_s17 + $0x58] sm:$0x3] }
  0x17   : > { %v965_v36 = vsel %vm477_vm0, %v963_v29, %v964_v30  ;;  %v840_v37 = vrot.slane %v838_v31, 1  ;;  %v747_v38 = vshll.u32 %v708_v23, 16  ;;  %v848_v39 = vshrl.u32 %v2774_v3, 16  ;;  %v2406_v30 = vld [vmem:[%s2769_s17 + $0x60] sm:$0xff]  ;;  %v2407_v31 = vld [vmem:[%s2769_s17 + $0x68] sm:$0xff] }
  0x18   : > { %v845_v42 = vrot.slane %v843_v33, 1  ;;  %v744_v43 = vrot.slane %v742_v35, 1  ;;  %v850_v44 = vshll.u32 %v2774_v3, 16  ;;  %v855_v45 = vshll.u32 %v726_v4, 16 }
  0x19   : > { %1043 = vrot.lane.b32.xlu0 %v965_v36, %s2733_s18  ;;  %v2818_v47 = vor.u32 %v840_v37, %v836_v27  ;;  %v749_v48 = vrot.slane %v747_v38, 1  ;;  %v752_v49 = vshrl.u32 %v2785_v15, 16  ;;  %v754_v50 = vshll.u32 %v2785_v15, 16  ;;  %v2433_v37 = vld [vmem:[%s2769_s17 + $0x138] sm:$0xff]  ;;  %v2434_v38 = vld [vmem:[%s2769_s17 + $0x140] sm:$0xff] }
  0x1a   : > { %1045 = vrot.lane.b32.xlu1 %v968_v32, %s2733_s18  ;;  %v2825_v53 = vor.u32 %v744_v43, %v740_v34  ;;  %v852_v54 = vrot.slane %v850_v44, 1  ;;  %v857_v55 = vrot.slane %v855_v45, 1  ;;  %v759_v56 = vshll.u32 %v710_v16, 16  ;;  %v2408_v32 = vld [vmem:[%s2769_s17 + $0x70] sm:$0x3] }
  0x1b   : > { %v846_v57 = vsel %vm252_vm1, %v2818_v47, %v845_v42  ;;  %v756_v58 = vrot.slane %v754_v50, 1  ;;  %v2829_v59 = vpack.c.bf16 %v2428_v41, %v2427_v40  ;;  %v728_v60 = vpack.c.bf16 %v2429_v46, %v2429_v46  ;;  %v2435_v46 = vld [vmem:[%s2769_s17 + $0x148] sm:$0x3] }
  0x1c   : > { %v750_v62 = vsel %vm252_vm1, %v2825_v53, %v749_v48  ;;  %v853_v63 = vor.u32 %v852_v54, %v848_v39  ;;  %v761_v0 = vrot.slane %v759_v56, 1  ;;  %v2834_v1 = vpack.c.bf16 %v2431_v52, %v2430_v51 }
  0x1d   : > { %1027 = vrot.lane.b32.xlu0 %v846_v57, %s2734_s19  ;;  %v2837_v2 = vor.u32 %v756_v58, %v752_v49  ;;  %v860_v4 = vshrl.u32 %v2829_v59, 16  ;;  %v862_v5 = vshll.u32 %v2829_v59, 16  ;;  %v867_v6 = vshll.u32 %v728_v60, 16  ;;  %v2436_v57 = vld [vmem:[%s2769_s17 + $0x150] sm:$0xff]  ;;  %v2437_v58 = vld [vmem:[%s2769_s17 + $0x158] sm:$0xff] }
  0x1e   : > { %1011 = vrot.lane.b32.xlu1 %v750_v62, %s2734_s19  ;;  %v858_v10 = vsel %vm252_vm1, %v853_v63, %v857_v55  ;;  %v730_v11 = vpack.c.bf16 %v2432_v61, %v2432_v61  ;;  %v872_v12 = vshrl.u32 %v2834_v1, 16  ;;  %v874_v13 = vshll.u32 %v2834_v1, 16 }
  0x1f   : > { %v762_v16 = vsel %vm252_vm1, %v2837_v2, %v761_v0  ;;  %v864_v17 = vrot.slane %v862_v5, 1  ;;  %v869_v18 = vrot.slane %v867_v6, 1  ;;  %v2850_v23 = vpack.c.bf16 %v2404_v9, %v2403_v7  ;;  %v2438_v0 = vld [vmem:[%s2769_s17 + $0x160] sm:$0x3] }
  0x20   : > { %v876_v19 = vrot.slane %v874_v13, 1  ;;  %v879_v21 = vshll.u32 %v730_v11, 16  ;;  %v993_v26 = vrot.slane %v2829_v59, 1  ;;  %v994_v27 = vrot.slane %v728_v60, 1  ;;  %v2409_v13 = vld [vmem:[%s2769_s17 + $0x78] sm:$0xff] }
  0x21   : > { %1029 = vrot.lane.b32.xlu0 %v858_v10, %s2734_s19  ;;  %v865_v24 = vor.u32 %v864_v17, %v860_v4  ;;  %v2854_v28 = vpack.c.bf16 %v2405_v14, %v2405_v14  ;;  %v996_v35 = vrot.slane %v2834_v1, 1  ;;  %v997_v36 = vrot.slane %v730_v11, 1  ;;  %v2410_v14 = vld [vmem:[%s2769_s17 + $0x80] sm:$0xff] }
  0x22   : > { %1013 = vrot.lane.b32.xlu1 %v762_v16, %s2734_s19  ;;  %v877_v33 = vor.u32 %v876_v19, %v872_v12  ;;  %v881_v34 = vrot.slane %v879_v21, 1  ;;  %v764_v40 = vshrl.u32 %v2850_v23, 16  ;;  %v766_v41 = vshll.u32 %v2850_v23, 16  ;;  %v2411_v21 = vld [vmem:[%s2769_s17 + $0x88] sm:$0x3] }
  0x23   : > { %v870_v39 = vsel %vm252_vm1, %v865_v24, %v869_v18  ;;  %v771_v42 = vshll.u32 %v2854_v28, 16  ;;  %v2868_v44 = vpack.c.bf16 %v2407_v31, %v2406_v30  ;;  %v714_v45 = vpack.c.bf16 %v2408_v32, %v2408_v32  ;;  %v2412_v31 = vld [vmem:[%s2769_s17 + $0x90] sm:$0xff]  ;;  %v2413_v32 = vld [vmem:[%s2769_s17 + $0x98] sm:$0xff] }
  0x24   : > { %v882_v43 = vsel %vm252_vm1, %v877_v33, %v881_v34  ;;  %v995_v48 = vsel %vm477_vm0, %v993_v26, %v994_v27  ;;  %v768_v49 = vrot.slane %v766_v41, 1  ;;  %v2873_v51 = vpack.c.bf16 %v2434_v38, %v2433_v37  ;;  %v2414_v37 = vld [vmem:[%s2769_s17 + $0xa0] sm:$0x3] }
  0x25   : > { %1031 = vrot.lane.b32.xlu0 %v870_v39, %s2734_s19  ;;  %v773_v50 = vrot.slane %v771_v42, 1  ;;  %v998_v52 = vsel %vm477_vm0, %v996_v35, %v997_v36  ;;  %v776_v54 = vshrl.u32 %v2868_v44, 16  ;;  %v778_v55 = vshll.u32 %v2868_v44, 16 }
  0x26   : > { %1033 = vrot.lane.b32.xlu1 %v882_v43, %s2734_s19  ;;  %v783_v56 = vshll.u32 %v714_v45, 16  ;;  %v2881_v60 = vor.u32 %v768_v49, %v764_v40  ;;  %v2884_v61 = vrot.slane %v2850_v23, 1  ;;  %v970_v62 = vrot.slane %v2854_v28, 1 }
  0x27   : > { %v2887_v63 = vpack.c.bf16 %v2435_v46, %v2435_v46  ;;  %v780_v4 = vrot.slane %v778_v55, 1  ;;  %v2891_v6 = vrot.slane %v2868_v44, 1  ;;  %v886_v7 = vshll.u32 %v2873_v51, 16 }
  0x28   : > { %v785_v5 = vrot.slane %v783_v56, 1  ;;  %v774_v9 = vsel %vm252_vm1, %v2881_v60, %v773_v50  ;;  %v973_v10 = vrot.slane %v714_v45, 1  ;;  %v884_v11 = vshrl.u32 %v2873_v51, 16  ;;  %v2439_v50 = vld [vmem:[%s2769_s17 + $0x168] sm:$0xff]  ;;  %v2442_v56 = vld [vmem:[%s2769_s17 + $0x180] sm:$0xff] }
  0x29   : > { %1063 = vrot.lane.b32.xlu0 %v995_v48, %s2733_s18  ;;  %v2898_v12 = vpack.c.bf16 %v2437_v58, %v2436_v57  ;;  %v2903_v16 = vor.u32 %v780_v4, %v776_v54  ;;  %v888_v17 = vrot.slane %v886_v7, 1  ;;  %v891_v18 = vshll.u32 %v2887_v63, 16  ;;  %v2443_v57 = vld [vmem:[%s2769_s17 + $0x188] sm:$0xff] }
  0x2a   : > { %1015 = vrot.lane.b32.xlu1 %v774_v9, %s2734_s19  ;;  %v2906_v19 = vpack.c.bf16 %v2438_v0, %v2438_v0  ;;  %v2914_v30 = vpack.c.bf16 %v2410_v14, %v2409_v13  ;;  %v971_v33 = vsel %vm477_vm0, %v2884_v61, %v970_v62  ;;  %v974_v34 = vsel %vm477_vm0, %v2891_v6, %v973_v10 }
  0x2b   : > { %v896_v24 = vshrl.u32 %v2898_v12, 16  ;;  %v898_v26 = vshll.u32 %v2898_v12, 16  ;;  %v786_v27 = vsel %vm252_vm1, %v2903_v16, %v785_v5  ;;  %v2923_v36 = vpack.c.bf16 %v2411_v21, %v2411_v21  ;;  %v2441_v5 = vld [vmem:[%s2769_s17 + $0x178] sm:$0x3] }
  0x2c   : > { %v903_v28 = vshll.u32 %v2906_v19, 16  ;;  %v889_v38 = vor.u32 %v888_v17, %v884_v11  ;;  %v893_v39 = vrot.slane %v891_v18, 1  ;;  %v790_v41 = vshll.u32 %v2914_v30, 16  ;;  %v2444_v11 = vld [vmem:[%s2769_s17 + $0x190] sm:$0x3] }
  0x2d   : > { %1065 = vrot.lane.b32.xlu0 %v998_v52, %s2733_s18  ;;  %v900_v35 = vrot.slane %v898_v26, 1  ;;  %v788_v43 = vshrl.u32 %v2914_v30, 16  ;;  %v795_v45 = vshll.u32 %v2923_v36, 16  ;;  %v2930_v46 = vpack.c.bf16 %v2413_v32, %v2412_v31  ;;  %v2440_v52 = vld [vmem:[%s2769_s17 + $0x170] sm:$0xff] }
  0x2e   : > { %1017 = vrot.lane.b32.xlu1 %v786_v27, %s2734_s19  ;;  %v905_v40 = vrot.slane %v903_v28, 1  ;;  %v792_v48 = vrot.slane %v790_v41, 1  ;;  %v718_v49 = vpack.c.bf16 %v2414_v37, %v2414_v37  ;;  %v999_v54 = vrot.slane %v2873_v51, 1  ;;  %v2416_v26 = vld [vmem:[%s2769_s17 + $0xb0] sm:$0xff]  ;;  %v2417_v37 = vld [vmem:[%s2769_s17 + $0xb8] sm:$0x3] }
  0x2f   : > { %v901_v42 = vor.u32 %v900_v35, %v896_v24  ;;  %v1000_v55 = vrot.slane %v2887_v63, 1  ;;  %v894_v58 = vsel %vm252_vm1, %v889_v38, %v893_v39  ;;  %v797_v0 = vrot.slane %v795_v45, 1  ;;  %v2415_v24 = vld [vmem:[%s2769_s17 + $0xa8] sm:$0xff] }
  0x30   : > { %v802_v4 = vshll.u32 %v2930_v46, 16  ;;  %v2944_v7 = vor.u32 %v792_v48, %v788_v43  ;;  %v800_v9 = vshrl.u32 %v2930_v46, 16  ;;  %v807_v10 = vshll.u32 %v718_v49, 16  ;;  %v2419_v43 = vld [vmem:[%s2769_s17 + $0xc8] sm:$0xff] }
  0x31   : > { %1047 = vrot.lane.b32.xlu0 %v971_v33, %s2733_s18  ;;  %v906_v62 = vsel %vm252_vm1, %v901_v42, %v905_v40  ;;  %v2947_v63 = vpack.c.bf16 %v2440_v52, %v2439_v50  ;;  %v1002_v13 = vrot.slane %v2898_v12, 1  ;;  %v1003_v14 = vrot.slane %v2906_v19, 1  ;;  %v2418_v42 = vld [vmem:[%s2769_s17 + $0xc0] sm:$0xff] }
  0x32   : > { %1049 = vrot.lane.b32.xlu1 %v974_v34, %s2733_s18  ;;  %v804_v17 = vrot.slane %v802_v4, 1  ;;  %v2952_v18 = vpack.c.bf16 %v2443_v57, %v2442_v56  ;;  %v2955_v21 = vpack.c.bf16 %v2441_v5, %v2441_v5  ;;  %v1001_v27 = vsel %vm477_vm0, %v999_v54, %v1000_v55 }
  0x33   : > { %v910_v28 = vshll.u32 %v2947_v63, 16  ;;  %v2962_v31 = vpack.c.bf16 %v2444_v11, %v2444_v11  ;;  %v798_v32 = vsel %vm252_vm1, %v2944_v7, %v797_v0  ;;  %v809_v34 = vrot.slane %v807_v10, 1 }
  0x34   : > { %v922_v19 = vshll.u32 %v2952_v18, 16  ;;  %v2967_v33 = vor.u32 %v804_v17, %v800_v9  ;;  %v2970_v35 = vrot.slane %v2914_v30, 1  ;;  %v1004_v38 = vsel %vm477_vm0, %v1002_v13, %v1003_v14 }
  0x35   : > { %1035 = vrot.lane.b32.xlu0 %v894_v58, %s2734_s19  ;;  %v976_v39 = vrot.slane %v2923_v36, 1  ;;  %v2976_v40 = vrot.slane %v2930_v46, 1  ;;  %v2978_v41 = vpack.c.bf16 %v2416_v26, %v2415_v24  ;;  %v979_v45 = vrot.slane %v718_v49, 1 }
  0x36   : > { %1037 = vrot.lane.b32.xlu1 %v906_v62, %s2734_s19  ;;  %v908_v48 = vshrl.u32 %v2947_v63, 16  ;;  %v915_v50 = vshll.u32 %v2955_v21, 16  ;;  %v920_v52 = vshrl.u32 %v2952_v18, 16  ;;  %v912_v36 = vrot.slane %v910_v28, 1  ;;  %v2420_v62 = vld [vmem:[%s2769_s17 + $0xd0] sm:$0x3] }
  0x37   : > { %v924_v54 = vrot.slane %v922_v19, 1  ;;  %v927_v55 = vshll.u32 %v2962_v31, 16  ;;  %v2988_v56 = vpack.c.bf16 %v2417_v37, %v2417_v37  ;;  %v810_v57 = vsel %vm252_vm1, %v2967_v33, %v809_v34  ;;  %v173_v28 = vld [vmem:[%s2769_s17 + $0x8] sm:$0xff]  ;;  %v2483_v34 = vld [vmem:[%s2769_s17 + $0x40] sm:$0x3] }
  0x38   : > { %v814_v58 = vshll.u32 %v2978_v41, 16  ;;  %v2993_v49 = vpack.c.bf16 %v2419_v43, %v2418_v42  ;;  %v977_v0 = vsel %vm477_vm0, %v2970_v35, %v976_v39  ;;  %v980_v4 = vsel %vm477_vm0, %v2976_v40, %v979_v45  ;;  %v177_v42 = vld [vmem:[%s2769_s17 + $0x28] sm:$0x3] }
  0x39   : > { %1067 = vrot.lane.b32.xlu0 %v1001_v27, %s2733_s18  ;;  %v917_v5 = vrot.slane %v915_v50, 1  ;;  %v913_v9 = vor.u32 %v912_v36, %v908_v48  ;;  %v925_v10 = vor.u32 %v924_v54, %v920_v52  ;;  %v929_v11 = vrot.slane %v927_v55, 1  ;;  %v172_v27 = vld [vmem:[%s2769_s17] sm:$0xff]  ;;  %v174_v36 = vld [vmem:[%s2769_s17 + $0x10] sm:$0x3] }
  0x3a   : > { %1019 = vrot.lane.b32.xlu1 %v798_v32, %s2734_s19  ;;  %v819_v13 = vshll.u32 %v2988_v56, 16  ;;  %v812_v14 = vshrl.u32 %v2978_v41, 16  ;;  %v816_v17 = vrot.slane %v814_v58, 1  ;;  %v722_v24 = vpack.c.bf16 %v2420_v62, %v2420_v62 }
  0x3b   : > { %v826_v26 = vshll.u32 %v2993_v49, 16  ;;  %v1005_v19 = vrot.slane %v2947_v63, 1  ;;  %v1006_v32 = vrot.slane %v2955_v21, 1  ;;  %v918_v37 = vsel %vm252_vm1, %v913_v9, %v917_v5 }
  0x3c   : > { %v821_v39 = vrot.slane %v819_v13, 1  ;;  %v3015_v43 = vpack.c.bf16 %v173_v28, %v172_v27  ;;  %v3017_v45 = vor.u32 %v816_v17, %v812_v14  ;;  %v824_v48 = vshrl.u32 %v2993_v49, 16  ;;  %v2489_v13 = vld [vmem:[%s2769_s17 + $0x70] sm:$0x3] }
  0x3d   : > { %1069 = vrot.lane.b32.xlu0 %v1004_v38, %s2733_s18  ;;  %v930_v38 = vsel %vm252_vm1, %v925_v10, %v929_v11  ;;  %v828_v50 = vrot.slane %v826_v26, 1  ;;  %v831_v52 = vshll.u32 %v722_v24, 16  ;;  %v1008_v21 = vrot.slane %v2952_v18, 1 }
  0x3e   : > { %1021 = vrot.lane.b32.xlu1 %v810_v57, %s2734_s19  ;;  %v1009_v54 = vrot.slane %v2962_v31, 1  ;;  %v3023_v55 = vpack.c.bf16 %v2483_v34, %v2483_v34  ;;  %v180_v57 = vld [vmem:[%s2769_s17 + $0x40] sm:$0x3]  ;;  %v1007_v58 = vsel %vm477_vm0, %v1005_v19, %v1006_v32  ;;  %v3029_v62 = vpack.c.bf16 %v177_v42, %v177_v42  ;;  %v186_v42 = vld [vmem:[%s2769_s17 + $0x70] sm:$0x3] }
  0x3f   : > { %v822_v31 = vsel %vm252_vm1, %v3017_v45, %v821_v39  ;;  %v3037_v9 = vor.u32 %v828_v50, %v824_v48  ;;  %v833_v10 = vrot.slane %v831_v52, 1  ;;  %v225_v11 = vpack.c.bf16 %v180_v57, %v180_v57 }
  0x40   : > { %v1852_v5 = vrot.slane %v3023_v55, 1  ;;  %v1010_v14 = vsel %vm477_vm0, %v1008_v21, %v1009_v54  ;;  %v3042_v17 = vrot.slane %v2978_v41, 1  ;;  %v982_v26 = vrot.slane %v2988_v56, 1 }
  0x41   : > { %1051 = vrot.lane.b32.xlu0 %v977_v0, %s2733_s18  ;;  %v3031_v0 = vpack.c.bf16 %v174_v36, %v174_v36  ;;  %v3051_v28 = vrot.slane %v2993_v49, 1  ;;  %v985_v19 = vrot.slane %v722_v24, 1  ;;  %v285_v32 = vshll.u32 %v225_v11, 16  ;;  %v2486_v36 = vld [vmem:[%s2769_s17 + $0x58] sm:$0x3] }
  0x42   : > { %1053 = vrot.lane.b32.xlu1 %v980_v4, %s2733_s18  ;;  %v256_v4 = vshll.u32 %v3015_v43, 16  ;;  %v3047_v27 = vsel %vm477_vm0, %v2795_v25, %v1852_v5  ;;  %v485_v34 = vrot.slane %v225_v11, 1  ;;  %v1600_v39 = vpack.c.bf16 %v2489_v13, %v2489_v13 }
  0x43   : > { %v261_v56 = vshll.u32 %v3031_v0, 16  ;;  %v834_v48 = vsel %vm252_vm1, %v3037_v9, %v833_v10  ;;  %v273_v50 = vshll.u32 %v3029_v62, 16  ;;  %v287_v52 = vrot.slane %v285_v32, 1 }
  0x44   : > { %v3062_v24 = vsel %vm477_vm0, %v2795_v25, %v485_v34  ;;  %v1659_v21 = vshll.u32 %v1600_v39, 16  ;;  %v1858_v54 = vrot.slane %v1600_v39, 1  ;;  %v983_v57 = vsel %vm477_vm0, %v3042_v17, %v982_v26 }
  0x45   : > { %1039 = vrot.lane.b32.xlu0 %v918_v37, %s2734_s19  ;;  %v254_v37 = vshrl.u32 %v3015_v43, 16  ;;  %v229_v5 = vpack.c.bf16 %v186_v42, %v186_v42  ;;  %v263_v10 = vrot.slane %v261_v56, 1  ;;  %v3080_v26 = vpack.c.bf16 %v2486_v36, %v2486_v36 }
  0x46   : > { %1041 = vrot.lane.b32.xlu1 %v930_v38, %s2734_s19  ;;  %v258_v38 = vrot.slane %v256_v4, 1  ;;  %v3072_v4 = vsel %vm252_vm1, %v2837_v2, %v287_v52  ;;  %v1661_v11 = vrot.slane %v1659_v21, 1  ;;  %v3078_v13 = vsel %vm477_vm0, %v2891_v6, %v1858_v54 }
  0x47   : > { %v491_v32 = vrot.slane %v229_v5, 1  ;;  %v482_v34 = vrot.slane %v3029_v62, 1  ;;  %v479_v56 = vrot.slane %v3031_v0, 1  ;;  %v2504_v62 = vld [vmem:[%s2769_s17 + $0xe8] sm:$0x3]  ;;  %v1635_v36 = vshll.u32 %v3023_v55, 16 }
  0x48   : > { %v259_v25 = vor.u32 %v258_v38, %v254_v37  ;;  %v3085_v39 = vsel %vm252_vm1, %v2903_v16, %v1661_v11  ;;  %v192_v37 = vld [vmem:[%s2769_s17 + $0xa0] sm:$0x3]  ;;  %v478_v38 = vrot.slane %v3015_v43, 1  ;;  %v183_v11 = vld [vmem:[%s2769_s17 + $0x58] sm:$0x3]  ;;  %v3112_v55 = vpack.c.bf16 %v2504_v62, %v2504_v62 }
  0x49   : > { %1071 = vrot.lane.b32.xlu0 %v1007_v58, %s2733_s18  ;;  %v986_v58 = vsel %vm477_vm0, %v3051_v28, %v985_v19  ;;  %v309_v19 = vshll.u32 %v229_v5, 16  ;;  %v1647_v5 = vshll.u32 %v3080_v26, 16 }
  0x4a   : > { %1023 = vrot.lane.b32.xlu1 %v822_v31, %s2734_s19  ;;  %v2495_v31 = vld [vmem:[%s2769_s17 + $0xa0] sm:$0x3]  ;;  %v264_v52 = vsel %vm252_vm1, %v259_v25, %v263_v10  ;;  %v480_v25 = vsel %vm477_vm0, %v478_v38, %v479_v56 }
  0x4b   : > { %v1604_v42 = vpack.c.bf16 %v2495_v31, %v2495_v31  ;;  %v2501_v31 = vld [vmem:[%s2769_s17 + $0xd0] sm:$0x3] }
  0x4d   : > { %1073 = vrot.lane.b32.xlu0 %v1010_v14, %s2733_s18  ;;  %v275_v14 = vrot.slane %v273_v50, 1  ;;  %v3093_v50 = vsel %vm477_vm0, %v2891_v6, %v491_v32  ;;  %v1683_v21 = vshll.u32 %v1604_v42, 16  ;;  %v1864_v54 = vrot.slane %v1604_v42, 1 }
  0x4e   : > { %1025 = vrot.lane.b32.xlu1 %v834_v48, %s2734_s19  ;;  %v311_v48 = vrot.slane %v309_v19, 1  ;;  %v233_v6 = vpack.c.bf16 %v192_v37, %v192_v37  ;;  %v1719_v42 = vshll.u32 %v3112_v55, 16  ;;  %v1608_v37 = vpack.c.bf16 %v2501_v31, %v2501_v31  ;;  %v3159_v31 = vld [vmem:[%s3834_s1 + $0x10] sm:$0x3f]  }
  0x4f   : > { %v1685_v19 = vrot.slane %v1683_v21, 1  ;;  %v198_v21 = vld [vmem:[%s2769_s17 + $0xd0] sm:$0x3] }
  0x50   : > { %v3104_v0 = vsel %vm252_vm1, %v2903_v16, %v311_v48  ;;  %v333_v16 = vshll.u32 %v233_v6, 16  ;;  %v497_v10 = vrot.slane %v233_v6, 1  ;;  %v2722_v48 = vld [vmem:[%s3834_s1 + $0x8] sm:$0x3f]   ;;  %v1721_v62 = vrot.slane %v1719_v42, 1 }
  0x51   : > { %1055 = vrot.lane.b32.xlu0 %v983_v57, %s2733_s18  ;;  %v276_v57 = vsel %vm252_vm1, %v2825_v53, %v275_v14  ;;  %v483_v53 = vsel %vm477_vm0, %v963_v29, %v482_v34  ;;  %v1637_v14 = vrot.slane %v1635_v36, 1  ;;  %v3122_v32 = vsel %vm252_vm1, %v2967_v33, %v1685_v19  ;;  %2707 = vmatprep.subr.msk.bf16.mxu0 %vm1180_vm2, %v2722_v48 }
  0x52   : > { %1057 = vrot.lane.b32.xlu1 %v986_v58, %s2733_s18  ;;  %v3110_v58 = vsel %vm477_vm0, %v2976_v40, %v1864_v54  ;;  %v1649_v29 = vrot.slane %v1647_v5, 1  ;;  %v227_v34 = vpack.c.bf16 %v183_v11, %v183_v11  ;;  %v335_v38 = vrot.slane %v333_v16, 1  ;;  %v3142_v5 = vld [vmem:[%s3834_s1] sm:$0x3f]   ;;  %2708 = vmatprep.subr.msk.bf16.mxu1 %vm1180_vm2, %v2722_v48 }
  0x53   : > { %v3130_v56 = vsel %vm477_vm0, %v2976_v40, %v497_v10  ;;  %v1870_v36 = vrot.slane %v1608_v37, 1  ;;  %v1855_v54 = vrot.slane %v3080_v26, 1  ;;  %v1638_v40 = vsel %vm252_vm1, %v2837_v2, %v1637_v14 }
  0x54   : > { %v3149_v6 = vsel %vm252_vm1, %v2818_v47, %v1721_v62  ;;  %v1650_v11 = vsel %vm252_vm1, %v2881_v60, %v1649_v29  ;;  %v297_v2 = vshll.u32 %v227_v34, 16  ;;  %v1182_v47 = vsel %vm1180_vm2, %v2722_v48, 0 }
  0x55   : > { %526 = vrot.lane.b32.xlu0 %v264_v52, %s2734_s19  ;;  %v1707_v52 = vshll.u32 %v1608_v37, 16  ;;  %v237_v19 = vpack.c.bf16 %v198_v21, %v198_v21  ;;  %2604 = vmatpush3.bf16.msra.mxu0 %v1182_v47  ;;  %v1856_v14 = vsel %vm477_vm0, %v2884_v61, %v1855_v54  ;;  %v189_v21 = vld [vmem:[%s2769_s17 + $0x88] sm:$0x3] }
  0x56   : > { %528 = vrot.lane.b32.xlu1 %v276_v57, %s2734_s19  ;;  %v3137_v57 = vsel %vm252_vm1, %v2967_v33, %v335_v38  ;;  %v3153_v33 = vsel %vm477_vm0, %v3051_v28, %v1870_v36  ;;  %2706 = vmatpush3.bf16.msra.mxu1 %v1182_v47  ;;  %v299_v42 = vrot.slane %v297_v2, 1  ;;  %v195_v47 = vld [vmem:[%s2769_s17 + $0xb8] sm:$0x3] }
  0x57   : > { %v1709_v26 = vrot.slane %v1707_v52, 1  ;;  %v357_v16 = vshll.u32 %v237_v19, 16  ;;  %2709 = vmatprep.subr.msk.bf16.mxu1 %vm1180_vm2, %v3142_v5  ;;  %v503_v10 = vrot.slane %v237_v19, 1  ;;  %2710 = vmatprep.subr.msk.bf16.mxu0 %vm1180_vm2, %v3159_v31  ;;  %v488_v52 = vrot.slane %v227_v34, 1 }
  0x58   : > { %v300_v62 = vsel %vm252_vm1, %v2881_v60, %v299_v42 }
  0x59   : > { %558 = vrot.lane.b32.xlu0 %v480_v25, %s2733_s18  ;;  %v3168_v25 = vsel %vm252_vm1, %v3037_v9, %v1709_v26  ;;  %v359_v48 = vrot.slane %v357_v16, 1  ;;  %v3180_v29 = vsel %vm477_vm0, %v3051_v28, %v503_v10  ;;  %v200_v10 = vld [vmem:[%s2769_s17 + $0xe0] sm:$0xff] }
  0x5a   : > { %560 = vrot.lane.b32.xlu1 %v483_v53, %s2733_s18  ;;  %v2492_v53 = vld [vmem:[%s2769_s17 + $0x88] sm:$0x3] }
  0x5b   : > { %v1602_v37 = vpack.c.bf16 %v2492_v53, %v2492_v53  ;;  %v3186_v38 = vsel %vm252_vm1, %v3037_v9, %v359_v48  ;;  %v231_v9 = vpack.c.bf16 %v189_v21, %v189_v21 }
  0x5d   : > { %1899 = vrot.lane.b32.xlu0 %v1638_v40, %s2734_s19  ;;  %v1671_v36 = vshll.u32 %v1602_v37, 16  ;;  %v1861_v34 = vrot.slane %v1602_v37, 1  ;;  %v321_v54 = vshll.u32 %v231_v9, 16  ;;  %v2498_v40 = vld [vmem:[%s2769_s17 + $0xb8] sm:$0x3] }
  0x5e   : > { %1901 = vrot.lane.b32.xlu1 %v1650_v11, %s2734_s19  ;;  %v1606_v26 = vpack.c.bf16 %v2498_v40, %v2498_v40  ;;  %v494_v11 = vrot.slane %v231_v9, 1  ;;  %v201_v37 = vld [vmem:[%s2769_s17 + $0xe8] sm:$0x3] }
  0x5f   : > { %v1673_v28 = vrot.slane %v1671_v36, 1  ;;  %v2505_v36 = vld [vmem:[%s2769_s17 + $0xf0] sm:$0xff] }
  0x60   : > { %v1695_v2 = vshll.u32 %v1606_v26, 16  ;;  %v1867_v53 = vrot.slane %v1606_v26, 1  ;;  %v2510_v26 = vld [vmem:[%s2769_s17 + $0x118] sm:$0x3] }
  0x61   : > { %1931 = vrot.lane.b32.xlu0 %v3047_v27, %s2733_s18  ;;  %v489_v27 = vsel %vm477_vm0, %v2884_v61, %v488_v52  ;;  %v1674_v60 = vsel %vm252_vm1, %v2944_v7, %v1673_v28  ;;  %v1862_v61 = vsel %vm477_vm0, %v2970_v35, %v1861_v34  ;;  %v2509_v28 = vld [vmem:[%s2769_s17 + $0x110] sm:$0xff] }
  0x62   : > { %1933 = vrot.lane.b32.xlu1 %v1856_v14, %s2733_s18  ;;  %v1697_v19 = vrot.slane %v1695_v2, 1 }
  0x65   : > { %530 = vrot.lane.b32.xlu0 %v3072_v4, %s2734_s19  ;;  %v323_v4 = vrot.slane %v321_v54, 1 }
  0x66   : > { %532 = vrot.lane.b32.xlu1 %v300_v62, %s2734_s19 }
  0x69   : > { %562 = vrot.lane.b32.xlu0 %v3062_v24, %s2733_s18  ;;  %v324_v24 = vsel %vm252_vm1, %v2944_v7, %v323_v4  ;;  %v1698_v7 = vsel %vm252_vm1, %v3017_v45, %v1697_v19 }
  0x6a   : > { %564 = vrot.lane.b32.xlu1 %v489_v27, %s2733_s18  ;;  %v2508_v27 = vld [vmem:[%s2769_s17 + $0x108] sm:$0xff] }
  0x6b   : > { %v3259_v40 = vpack.c.bf16 %v2509_v28, %v2508_v27  ;;  %v2068_v28 = vsel %vm1180_vm2, %v3159_v31, 0 }
  0x6d   : > { %1903 = vrot.lane.b32.xlu0 %v3085_v39, %s2734_s19  ;;  %v495_v39 = vsel %vm477_vm0, %v2970_v35, %v494_v11  ;;  %v1868_v35 = vsel %vm477_vm0, %v3042_v17, %v1867_v53 }
  0x6e   : > { %1905 = vrot.lane.b32.xlu1 %v1674_v60, %s2734_s19 }
  0x71   : > { %1935 = vrot.lane.b32.xlu0 %v3078_v13, %s2733_s18  ;;  %v235_v13 = vpack.c.bf16 %v195_v47, %v195_v47 }
  0x72   : > { %1937 = vrot.lane.b32.xlu1 %v1862_v61, %s2733_s18  ;;  %v2507_v61 = vld [vmem:[%s2769_s17 + $0x100] sm:$0x3] }
  0x73   : > { %v345_v16 = vshll.u32 %v235_v13, 16  ;;  %v500_v14 = vrot.slane %v235_v13, 1 }
  0x75   : > { %534 = vrot.lane.b32.xlu0 %v3104_v0, %s2734_s19  ;;  %v347_v0 = vrot.slane %v345_v16, 1  ;;  %v501_v62 = vsel %vm477_vm0, %v3042_v17, %v500_v14 }
  0x76   : > { %536 = vrot.lane.b32.xlu1 %v324_v24, %s2734_s19 }
  0x79   : > { %566 = vrot.lane.b32.xlu0 %v3093_v50, %s2733_s18  ;;  %v199_v50 = vld [vmem:[%s2769_s17 + $0xd8] sm:$0xff] }
  0x7a   : > { %568 = vrot.lane.b32.xlu1 %v495_v39, %s2733_s18  ;;  %v3236_v42 = vpack.c.bf16 %v200_v10, %v199_v50  ;;  %v3273_v39 = vpack.c.bf16 %v2510_v26, %v2510_v26  ;;  %v2514_v26 = vld [vmem:[%s2769_s17 + $0x138] sm:$0xff] }
  0x7c   : > { %v364_v52 = vshll.u32 %v3236_v42, 16  ;;  %v362_v60 = vshrl.u32 %v3236_v42, 16 }
  0x7d   : > { %1907 = vrot.lane.b32.xlu0 %v3122_v32, %s2734_s19  ;;  %v348_v32 = vsel %vm252_vm1, %v3017_v45, %v347_v0  ;;  %v2506_v45 = vld [vmem:[%s2769_s17 + $0xf8] sm:$0xff] }
  0x7e   : > { %1909 = vrot.lane.b32.xlu1 %v1698_v7, %s2734_s19  ;;  %v3255_v9 = vpack.c.bf16 %v2506_v45, %v2505_v36  ;;  %v366_v34 = vrot.slane %v364_v52, 1  ;;  %v505_v7 = vrot.slane %v3236_v42, 1  ;;  %v207_v36 = vld [vmem:[%s2769_s17 + $0x118] sm:$0x3]  ;;  %v1383_v45 = vsel %vm1180_vm2, %v3142_v5, 0 }
  0x7f   : > { %v3314_v31 = vpack.c.bf16 %v207_v36, %v207_v36 }
  0x80   : > { %v1726_v24 = vshll.u32 %v3255_v9, 16  ;;  %v367_v2 = vor.u32 %v366_v34, %v362_v60 }
  0x81   : > { %1939 = vrot.lane.b32.xlu0 %v3110_v58, %s2733_s18  ;;  %v3244_v58 = vpack.c.bf16 %v201_v37, %v201_v37  ;;  %v1743_v37 = vshll.u32 %v3273_v39, 16 }
  0x82   : > { %1941 = vrot.lane.b32.xlu1 %v1868_v35, %s2733_s18  ;;  %v1724_v35 = vshrl.u32 %v3255_v9, 16  ;;  %v1728_v0 = vrot.slane %v1726_v24, 1  ;;  %v1878_v24 = vrot.slane %v3259_v40, 1 }
  0x83   : > { %v369_v54 = vshll.u32 %v3244_v58, 16  ;;  %v506_v53 = vrot.slane %v3244_v58, 1  ;;  %v1745_v34 = vrot.slane %v1743_v37, 1 }
  0x84   : > { %v1729_v5 = vor.u32 %v1728_v0, %v1724_v35  ;;  %v2516_v0 = vld [vmem:[%s2769_s17 + $0x148] sm:$0x3] }
  0x85   : > { %538 = vrot.lane.b32.xlu0 %v3137_v57, %s2734_s19  ;;  %v1873_v57 = vrot.slane %v3112_v55, 1  ;;  %v371_v47 = vrot.slane %v369_v54, 1  ;;  %v2511_v54 = vld [vmem:[%s2769_s17 + $0x120] sm:$0xff] }
  0x86   : > { %540 = vrot.lane.b32.xlu1 %v348_v32, %s2734_s19  ;;  %v1736_v32 = vshrl.u32 %v3259_v40, 16 }
  0x87   : > { %v1062_v48 = vpop.permute.xlu0 %1061  ;;  %v1874_v55 = vsel %vm477_vm0, %v987_v20, %v1873_v57  ;;  %v372_v10 = vsel %vm252_vm1, %v367_v2, %v371_v47  ;;  %v1875_v2 = vrot.slane %v3255_v9, 1 }
  0x88   : > { %v1060_v21 = vpop.permute.xlu1 %1059 }
  0x89   : > { %570 = vrot.lane.b32.xlu0 %v3130_v56, %s2733_s18  ;;  %v3270_v56 = vpack.c.bf16 %v2507_v61, %v2507_v61  ;;  %v2512_v61 = vld [vmem:[%s2769_s17 + $0x128] sm:$0xff] }
  0x8a   : > { %572 = vrot.lane.b32.xlu1 %v501_v62, %s2733_s18  ;;  %v204_v62 = vld [vmem:[%s2769_s17 + $0x100] sm:$0x3] }
  0x8b   : > { %v1044_v17 = vpop.permute.xlu0 %1043  ;;  %v1731_v50 = vshll.u32 %v3270_v56, 16 }
  0x8c   : > { %v1046_v4 = vpop.permute.xlu1 %1045 }
  0x8d   : > { %1911 = vrot.lane.b32.xlu0 %v3168_v25, %s2734_s19  ;;  %v1738_v25 = vshll.u32 %v3259_v40, 16  ;;  %v1733_v57 = vrot.slane %v1731_v50, 1 }
  0x8e   : > { %1913 = vrot.lane.b32.xlu1 %v3149_v6, %s2734_s19 }
  0x8f   : > { %v1028_v11 = vpop.permute.xlu0 %1027  ;;  %v1740_v14 = vrot.slane %v1738_v25, 1  ;;  %v1734_v47 = vsel %vm252_vm1, %v1729_v5, %v1733_v57  ;;  %v1876_v25 = vrot.slane %v3270_v56, 1 }
  0x90   : > { %v1092_v19 = vsel %vm590_vm3, %v2779_v8, %v1028_v11  ;;  %v1012_v6 = vpop.permute.xlu1 %1011  ;;  %v1879_v11 = vrot.slane %v3273_v39, 1  ;;  %v393_v39 = vshll.u32 %v3314_v31, 16 }
  0x91   : > { %v1076_v13 = vsel %vm590_vm3, %v2791_v22, %v1012_v6  ;;  %1943 = vrot.lane.b32.xlu0 %v3153_v33, %s2733_s18  ;;  %v1124_v20 = vsel %vm623_vm4, %v1092_v19, %v1060_v21  ;;  %v1741_v60 = vor.u32 %v1740_v14, %v1736_v32  ;;  %v3329_v6 = vpack.c.bf16 %v2512_v61, %v2511_v54  ;;  %v210_v54 = vld [vmem:[%s2769_s17 + $0x130] sm:$0x3] }
  0x92   : > { %1945 = vrot.lane.b32.xlu1 %v1874_v55, %s2733_s18  ;;  %v1108_v16 = vsel %vm623_vm4, %v1076_v13, %v1044_v17  ;;  %2621 = vmatprep.mubr.msk.bf16.mxu1 %vm1147_vm5, %v1124_v20  ;;  %v3310_v17 = vpack.c.bf16 %v204_v62, %v204_v62  ;;  %v2515_v55 = vld [vmem:[%s2769_s17 + $0x140] sm:$0xff]  ;;  %v1877_v56 = vsel %vm477_vm0, %v1875_v2, %v1876_v25  ;;  %v395_v37 = vrot.slane %v393_v39, 1 }
  0x93   : > { %2605 = vmatprep.mubr.msk.bf16.mxu0 %vm1147_vm5, %v1108_v16  ;;  %v1030_v33 = vpop.permute.xlu0 %1029  ;;  %v1746_v20 = vsel %vm252_vm1, %v1741_v60, %v1745_v34  ;;  %v3352_v62 = vpack.c.bf16 %v2516_v0, %v2516_v0  ;;  %v3380_v25 = vpack.c.bf16 %v210_v54, %v210_v54  ;;  %v2520_v0 = vld [vmem:[%s2769_s17 + $0x168] sm:$0xff] }
  0x94   : > { %v1094_v58 = vsel %vm590_vm3, %v2774_v3, %v1030_v33  ;;  %v1014_v52 = vpop.permute.xlu1 %1013  ;;  %v381_v19 = vshll.u32 %v3310_v17, 16  ;;  %v396_v34 = vsel %vm252_vm1, %v1741_v60, %v395_v37 }
  0x95   : > { %v1078_v21 = vsel %vm590_vm3, %v2785_v15, %v1014_v52  ;;  %542 = vrot.lane.b32.xlu0 %v3186_v38, %s2734_s19  ;;  %v1126_v27 = vsel %vm623_vm4, %v1094_v58, %v1062_v48  ;;  %v507_v48 = vsel %vm477_vm0, %v505_v7, %v506_v53  ;;  %v3335_v7 = vpack.c.bf16 %v2515_v55, %v2514_v26  ;;  %v2513_v53 = vld [vmem:[%s2769_s17 + $0x130] sm:$0x3]  ;;  %v213_v26 = vld [vmem:[%s2769_s17 + $0x148] sm:$0x3] }
  0x96   : > { %544 = vrot.lane.b32.xlu1 %v372_v10, %s2734_s19  ;;  %v1110_v3 = vsel %vm623_vm4, %v1078_v21, %v1046_v4  ;;  %2622 = vmatmul.mubr.msk.bf16.vlgmr.msra.gmra.mxu1 %vm1147_vm5, %v1126_v27  ;;  %v383_v50 = vrot.slane %v381_v19, 1  ;;  %v3347_v33 = vpack.c.bf16 %v2513_v53, %v2513_v53  ;;  %v1750_v10 = vshll.u32 %v3329_v6, 16  ;;  %v2517_v53 = vld [vmem:[%s2769_s17 + $0x150] sm:$0xff] }
  0x97   : > { %2606 = vmatmul.mubr.msk.bf16.vlgmr.msra.gmra.mxu0 %vm1147_vm5, %v1110_v3  ;;  %v1032_v38 = vpop.permute.xlu0 %1031  ;;  %2638 = vmatpush3.bf16.msra.mxu1 %v1383_v45  ;;  %v1762_v58 = vshll.u32 %v3335_v7, 16  ;;  %v512_v45 = vrot.slane %v3314_v31, 1  ;;  %v509_v21 = vrot.slane %v3310_v17, 1  ;;  %v1767_v17 = vshll.u32 %v3352_v62, 16 }
  0x98   : > { %v1034_v4 = vpop.permute.xlu1 %1033  ;;  %2672 = vmatpush3.bf16.msra.mxu0 %v2068_v28  ;;  %v384_v27 = vsel %vm252_vm1, %v1729_v5, %v383_v50  ;;  %v1748_v28 = vshrl.u32 %v3329_v6, 16  ;;  %v1752_v3 = vrot.slane %v1750_v10, 1  ;;  %v1755_v57 = vshll.u32 %v3347_v33, 16 }
  0x99   : > { %574 = vrot.lane.b32.xlu0 %v3180_v29, %s2733_s18  ;;  %v1096_v29 = vsel %vm590_vm3, %v2829_v59, %v1032_v38  ;;  %v1880_v59 = vsel %vm477_vm0, %v1878_v24, %v1879_v11  ;;  %v1098_v32 = vsel %vm590_vm3, %v2834_v1, %v1034_v4  ;;  %v1760_v1 = vshrl.u32 %v3335_v7, 16 }
  0x9a   : > { %576 = vrot.lane.b32.xlu1 %v507_v48, %s2733_s18  ;;  %v1764_v31 = vrot.slane %v1762_v58, 1  ;;  %v510_v60 = vsel %vm477_vm0, %v1875_v2, %v509_v21  ;;  %v1753_v11 = vor.u32 %v1752_v3, %v1748_v28  ;;  %v3385_v39 = vpack.c.bf16 %v213_v26, %v213_v26 }
  0x9b   : > { %v1064_v13 = vpop.permute.xlu0 %1063  ;;  %v1884_v2 = vrot.slane %v3335_v7, 1  ;;  %v1881_v50 = vrot.slane %v3329_v6, 1  ;;  %v1882_v10 = vrot.slane %v3347_v33, 1 }
  0x9c   : > { %v1128_v16 = vsel %vm623_vm4, %v1096_v29, %v1064_v13  ;;  %v1016_v35 = vpop.permute.xlu1 %1015  ;;  %v513_v29 = vsel %vm477_vm0, %v1878_v24, %v512_v45  ;;  %v1765_v13 = vor.u32 %v1764_v31, %v1760_v1  ;;  %v2519_v45 = vld [vmem:[%s2769_s17 + $0x160] sm:$0x3] }
  0x9d   : > { %2625 = vmatprep.mubr.msk.bf16.mxu1 %vm1147_vm5, %v1128_v16  ;;  %1915 = vrot.lane.b32.xlu0 %v1734_v47, %s2734_s19  ;;  %v1080_v38 = vsel %vm590_vm3, %v2850_v23, %v1016_v35  ;;  %v1757_v47 = vrot.slane %v1755_v57, 1  ;;  %v2518_v16 = vld [vmem:[%s2769_s17 + $0x158] sm:$0xff]  ;;  %v1883_v33 = vsel %vm477_vm0, %v1881_v50, %v1882_v10  ;;  %v3417_v3 = vpack.c.bf16 %v2519_v45, %v2519_v45  ;;  %v2523_v45 = vld [vmem:[%s2769_s17 + $0x180] sm:$0xff] }
  0x9e   : > { %1917 = vrot.lane.b32.xlu1 %v1746_v20, %s2734_s19  ;;  %v1769_v20 = vrot.slane %v1767_v17, 1 }
  0x9f   : > { %v1066_v14 = vpop.permute.xlu0 %1065  ;;  %v1758_v24 = vsel %vm252_vm1, %v1753_v11, %v1757_v47  ;;  %v1779_v47 = vshll.u32 %v3417_v3, 16 }
  0xa0   : > { %v1130_v52 = vsel %vm623_vm4, %v1098_v32, %v1066_v14  ;;  %v1018_v36 = vpop.permute.xlu1 %1017  ;;  %v405_v32 = vshll.u32 %v3380_v25, 16  ;;  %v3399_v14 = vpack.c.bf16 %v2518_v16, %v2517_v53  ;;  %v216_v53 = vld [vmem:[%s2769_s17 + $0x160] sm:$0x3] }
  0xa1   : > { %2626 = vmatmul.mubr.msk.bf16.gmra.mxu1 %vm1147_vm5, %v1130_v52  ;;  %1947 = vrot.lane.b32.xlu0 %v1877_v56, %s2733_s18  ;;  %v1082_v61 = vsel %vm590_vm3, %v2868_v44, %v1018_v36  ;;  %v1885_v56 = vrot.slane %v3352_v62, 1  ;;  %v1770_v52 = vsel %vm252_vm1, %v1765_v13, %v1769_v20  ;;  %v417_v62 = vshll.u32 %v3385_v39, 16 }
  0xa2   : > { %1949 = vrot.lane.b32.xlu1 %v1880_v59, %s2733_s18  ;;  %v2521_v59 = vld [vmem:[%s2769_s17 + $0x170] sm:$0xff]  ;;  %v407_v28 = vrot.slane %v405_v32, 1  ;;  %v1774_v57 = vshll.u32 %v3399_v14, 16  ;;  %v3450_v10 = vpack.c.bf16 %v216_v53, %v216_v53 }
  0xa3   : > { %v1048_v48 = vpop.permute.xlu0 %1047  ;;  %v3405_v36 = vpack.c.bf16 %v2521_v59, %v2520_v0  ;;  %v219_v0 = vld [vmem:[%s2769_s17 + $0x178] sm:$0x3] }
  0xa4   : > { %v1112_v5 = vsel %vm623_vm4, %v1080_v38, %v1048_v48  ;;  %v1050_v4 = vpop.permute.xlu1 %1049  ;;  %v408_v26 = vsel %vm252_vm1, %v1753_v11, %v407_v28  ;;  %v1887_v28 = vrot.slane %v3399_v14, 1 }
  0xa5   : > { %v1114_v55 = vsel %vm623_vm4, %v1082_v61, %v1050_v4  ;;  %2609 = vmatprep.mubr.msk.bf16.mxu0 %vm1147_vm5, %v1112_v5  ;;  %546 = vrot.lane.b32.xlu0 %v384_v27, %s2734_s19  ;;  %v2522_v27 = vld [vmem:[%s2769_s17 + $0x178] sm:$0x3]  ;;  %v1786_v17 = vshll.u32 %v3405_v36, 16  ;;  %v518_v5 = vrot.slane %v3385_v39, 1  ;;  %v515_v4 = vrot.slane %v3380_v25, 1 }
  0xa6   : > { %548 = vrot.lane.b32.xlu1 %v396_v34, %s2734_s19  ;;  %2610 = vmatmul.mubr.msk.bf16.gmra.mxu0 %vm1147_vm5, %v1114_v55  ;;  %v419_v34 = vrot.slane %v417_v62, 1  ;;  %v3422_v31 = vpack.c.bf16 %v2522_v27, %v2522_v27  ;;  %v1772_v55 = vshrl.u32 %v3399_v14, 16  ;;  %v3455_v62 = vpack.c.bf16 %v219_v0, %v219_v0  ;;  %v2526_v27 = vld [vmem:[%s2769_s17 + $0x198] sm:$0xff] }
  0xa7   : > { %v1036_v19 = vpop.permute.xlu0 %1035  ;;  %v1788_v39 = vrot.slane %v1786_v17, 1 }
  0xa8   : > { %v1038_v35 = vpop.permute.xlu1 %1037  ;;  %v1100_v37 = vsel %vm590_vm3, %v2873_v51, %v1036_v19  ;;  %v1886_v51 = vsel %vm477_vm0, %v1884_v2, %v1885_v56  ;;  %v420_v20 = vsel %vm252_vm1, %v1765_v13, %v419_v34  ;;  %v1791_v25 = vshll.u32 %v3422_v31, 16 }
  0xa9   : > { %578 = vrot.lane.b32.xlu0 %v510_v60, %s2733_s18  ;;  %v1102_v38 = vsel %vm590_vm3, %v2898_v12, %v1038_v35  ;;  %v1784_v12 = vshrl.u32 %v3405_v36, 16  ;;  %v1776_v60 = vrot.slane %v1774_v57, 1  ;;  %v516_v13 = vsel %vm477_vm0, %v1881_v50, %v515_v4 }
  0xaa   : > { %580 = vrot.lane.b32.xlu1 %v513_v29, %s2733_s18  ;;  %v1890_v50 = vrot.slane %v3405_v36, 1  ;;  %v1888_v57 = vrot.slane %v3417_v3, 1 }
  0xab   : > { %v1068_v58 = vpop.permute.xlu0 %1067  ;;  %v1777_v56 = vor.u32 %v1776_v60, %v1772_v55 }
  0xac   : > { %v1132_v21 = vsel %vm623_vm4, %v1100_v37, %v1068_v58  ;;  %v1020_v1 = vpop.permute.xlu1 %1019  ;;  %v519_v37 = vsel %vm477_vm0, %v1884_v2, %v518_v5  ;;  %v1789_v58 = vor.u32 %v1788_v39, %v1784_v12  ;;  %v2525_v5 = vld [vmem:[%s2769_s17 + $0x190] sm:$0x3] }
  0xad   : > { %2629 = vmatprep.mubr.msk.bf16.mxu1 %vm1147_vm5, %v1132_v21  ;;  %1919 = vrot.lane.b32.xlu0 %v1758_v24, %s2734_s19  ;;  %v1084_v19 = vsel %vm590_vm3, %v2914_v30, %v1020_v1  ;;  %v1781_v24 = vrot.slane %v1779_v47, 1  ;;  %v2524_v21 = vld [vmem:[%s2769_s17 + $0x188] sm:$0xff]  ;;  %v1624_v60 = vpack.c.bf16 %v2525_v5, %v2525_v5 }
  0xae   : > { %1921 = vrot.lane.b32.xlu1 %v1770_v52, %s2734_s19  ;;  %v1793_v52 = vrot.slane %v1791_v25, 1 }
  0xaf   : > { %v1070_v48 = vpop.permute.xlu0 %1069  ;;  %v1782_v2 = vsel %vm252_vm1, %v1777_v56, %v1781_v24  ;;  %v1803_v24 = vshll.u32 %v1624_v60, 16 }
  0xb0   : > { %v1134_v54 = vsel %vm623_vm4, %v1102_v38, %v1070_v48  ;;  %v1022_v61 = vpop.permute.xlu1 %1021  ;;  %v429_v38 = vshll.u32 %v3450_v10, 16  ;;  %v3469_v48 = vpack.c.bf16 %v2524_v21, %v2523_v45 }
  0xb1   : > { %2630 = vmatmul.mubr.msk.bf16.gmra.mxu1 %vm1147_vm5, %v1134_v54  ;;  %1951 = vrot.lane.b32.xlu0 %v1883_v33, %s2733_s18  ;;  %v1086_v16 = vsel %vm590_vm3, %v2930_v46, %v1022_v61  ;;  %v1891_v33 = vrot.slane %v3422_v31, 1  ;;  %v1794_v54 = vsel %vm252_vm1, %v1789_v58, %v1793_v52  ;;  %v441_v31 = vshll.u32 %v3455_v62, 16 }
  0xb2   : > { %1953 = vrot.lane.b32.xlu1 %v1886_v51, %s2733_s18  ;;  %v2527_v51 = vld [vmem:[%s2769_s17 + $0x1a0] sm:$0xff]  ;;  %v431_v55 = vrot.slane %v429_v38, 1  ;;  %v1798_v47 = vshll.u32 %v3469_v48, 16 }
  0xb3   : > { %v1052_v29 = vpop.permute.xlu0 %1051  ;;  %v3475_v61 = vpack.c.bf16 %v2527_v51, %v2526_v27  ;;  %v1892_v3 = vsel %vm477_vm0, %v1890_v50, %v1891_v33  ;;  %v1805_v51 = vrot.slane %v1803_v24, 1 }
  0xb4   : > { %v1116_v11 = vsel %vm623_vm4, %v1084_v19, %v1052_v29  ;;  %v1054_v35 = vpop.permute.xlu1 %1053 }
  0xb5   : > { %v1118_v59 = vsel %vm623_vm4, %v1086_v16, %v1054_v35  ;;  %2613 = vmatprep.mubr.msk.bf16.mxu0 %vm1147_vm5, %v1116_v11  ;;  %550 = vrot.lane.b32.xlu0 %v408_v26, %s2734_s19  ;;  %v2528_v26 = vld [vmem:[%s2769_s17 + $0x1a8] sm:$0x3]  ;;  %v1810_v25 = vshll.u32 %v3475_v61, 16  ;;  %v524_v11 = vrot.slane %v3455_v62, 1  ;;  %v521_v35 = vrot.slane %v3450_v10, 1 }
  0xb6   : > { %552 = vrot.lane.b32.xlu1 %v420_v20, %s2734_s19  ;;  %2614 = vmatmul.mubr.msk.bf16.gmra.mxu0 %vm1147_vm5, %v1118_v59  ;;  %v443_v20 = vrot.slane %v441_v31, 1  ;;  %v1626_v39 = vpack.c.bf16 %v2528_v26, %v2528_v26  ;;  %v1808_v0 = vshrl.u32 %v3475_v61, 16  ;;  %v1796_v59 = vshrl.u32 %v3469_v48, 16 }
  0xb7   : > { %v1040_v32 = vpop.permute.xlu0 %1039  ;;  %v1812_v45 = vrot.slane %v1810_v25, 1  ;;  %v1894_v31 = vrot.slane %v1624_v60, 1 }
  0xb8   : > { %v1042_v1 = vpop.permute.xlu1 %1041  ;;  %v1104_v34 = vsel %vm590_vm3, %v2947_v63, %v1040_v32  ;;  %v1889_v63 = vsel %vm477_vm0, %v1887_v28, %v1888_v57  ;;  %v444_v52 = vsel %vm252_vm1, %v1789_v58, %v443_v20  ;;  %v1815_v62 = vshll.u32 %v1626_v39, 16 }
  0xb9   : > { %582 = vrot.lane.b32.xlu0 %v516_v13, %s2733_s18  ;;  %v1106_v19 = vsel %vm590_vm3, %v2952_v18, %v1042_v1  ;;  %v432_v18 = vsel %vm252_vm1, %v1777_v56, %v431_v55  ;;  %v1800_v13 = vrot.slane %v1798_v47, 1  ;;  %v522_v58 = vsel %vm477_vm0, %v1887_v28, %v521_v35 }
  0xba   : > { %584 = vrot.lane.b32.xlu1 %v519_v37, %s2733_s18  ;;  %v1813_v57 = vor.u32 %v1812_v45, %v1808_v0  ;;  %v1817_v38 = vrot.slane %v1815_v62, 1 }
  0xbb   : > { %v1072_v17 = vpop.permute.xlu0 %1071  ;;  %v1801_v27 = vor.u32 %v1800_v13, %v1796_v59 }
  0xbc   : > { %v1136_v4 = vsel %vm623_vm4, %v1104_v34, %v1072_v17  ;;  %v1024_v12 = vpop.permute.xlu1 %1023 }
  0xbd   : > { %2633 = vmatprep.mubr.msk.bf16.mxu1 %vm1147_vm5, %v1136_v4  ;;  %1923 = vrot.lane.b32.xlu0 %v1782_v2, %s2734_s19  ;;  %v1088_v32 = vsel %vm590_vm3, %v2978_v41, %v1024_v12  ;;  %v525_v2 = vsel %vm477_vm0, %v1890_v50, %v524_v11  ;;  %v1806_v17 = vsel %vm252_vm1, %v1801_v27, %v1805_v51  ;;  %v1896_v50 = vrot.slane %v3475_v61, 1 }
  0xbe   : > { %1925 = vrot.lane.b32.xlu1 %v1794_v54, %s2734_s19  ;;  %v1893_v54 = vrot.slane %v3469_v48, 1  ;;  %v1818_v4 = vsel %vm252_vm1, %v1813_v57, %v1817_v38  ;;  %v1897_v12 = vrot.slane %v1626_v39, 1 }
  0xbf   : > { %v1074_v29 = vpop.permute.xlu0 %1073 }
  0xc0   : > { %v1138_v53 = vsel %vm623_vm4, %v1106_v19, %v1074_v29  ;;  %v1026_v16 = vpop.permute.xlu1 %1025  ;;  %v1898_v47 = vsel %vm477_vm0, %v1896_v50, %v1897_v12 }
  0xc1   : > { %2634 = vmatmul.mubr.msk.bf16.gmra.mxu1 %vm1147_vm5, %v1138_v53  ;;  %1955 = vrot.lane.b32.xlu0 %v1889_v63, %s2733_s18  ;;  %v1090_v10 = vsel %vm590_vm3, %v2993_v49, %v1026_v16 }
  0xc2   : > { %1957 = vrot.lane.b32.xlu1 %v1892_v3, %s2733_s18 }
  0xc3   : > { %v1056_v37 = vpop.permute.xlu0 %1055 }
  0xc4   : > { %v1120_v21 = vsel %vm623_vm4, %v1088_v32, %v1056_v37  ;;  %v1058_v1 = vpop.permute.xlu1 %1057 }
  0xc5   : > { %v1122_v56 = vsel %vm623_vm4, %v1090_v10, %v1058_v1  ;;  %2617 = vmatprep.mubr.msk.bf16.mxu0 %vm1147_vm5, %v1120_v21  ;;  %554 = vrot.lane.b32.xlu0 %v432_v18, %s2734_s19 }
  0xc6   : > { %556 = vrot.lane.b32.xlu1 %v444_v52, %s2734_s19  ;;  %2618 = vmatmul.mubr.msk.bf16.gmra.mxu0 %vm1147_vm5, %v1122_v56 }
  0xc7   : > { %v527_v33 = vpop.permute.xlu0 %526 }
  0xc8   : > { %v529_v34 = vpop.permute.xlu1 %528  ;;  %v592_v28 = vsel %vm590_vm3, %v3015_v43, %v527_v33  ;;  %v1895_v43 = vsel %vm477_vm0, %v1893_v54, %v1894_v31 }
  0xc9   : > { %586 = vrot.lane.b32.xlu0 %v522_v58, %s2733_s18  ;;  %v594_v26 = vsel %vm590_vm3, %v2791_v22, %v529_v34 }
  0xca   : > { %588 = vrot.lane.b32.xlu1 %v525_v2, %s2733_s18 }
  0xcb   : > { %v559_v5 = vpop.permute.xlu0 %558 }
  0xcc   : > { %v561_v3 = vpop.permute.xlu1 %560  ;;  %v625_v63 = vsel %vm623_vm4, %v592_v28, %v559_v5 }
  0xcd   : > { %v627_v55 = vsel %vm623_vm4, %v594_v26, %v561_v3  ;;  %1927 = vrot.lane.b32.xlu0 %v1806_v17, %s2734_s19  ;;  %2639 = vmatprep.mubr.msk.bf16.mxu1 %vm1147_vm5, %v625_v63 }
  0xce   : > { %1929 = vrot.lane.b32.xlu1 %v1818_v4, %s2734_s19  ;;  %2640 = vmatmul.mubr.msk.bf16.vlgmr.msra.gmra.mxu1 %vm1147_vm5, %v627_v55 }
  0xcf   : > { %v1900_v60 = vpop.permute.xlu0 %1899 }
  0xd0   : > { %v1902_v19 = vpop.permute.xlu1 %1901  ;;  %v1964_v22 = vsel %vm590_vm3, %v2785_v15, %v1900_v60 }
  0xd1   : > { %1959 = vrot.lane.b32.xlu0 %v1895_v43, %s2733_s18  ;;  %v1966_v20 = vsel %vm590_vm3, %v2850_v23, %v1902_v19 }
  0xd2   : > { %1961 = vrot.lane.b32.xlu1 %v1898_v47, %s2733_s18 }
  0xd3   : > { %v1932_v29 = vpop.permute.xlu0 %1931 }
  0xd4   : > { %v1934_v39 = vpop.permute.xlu1 %1933  ;;  %v1996_v25 = vsel %vm623_vm4, %v1964_v22, %v1932_v29 }
  0xd5   : > { %v1998_v53 = vsel %vm623_vm4, %v1966_v20, %v1934_v39  ;;  %2673 = vmatprep.mubr.msk.bf16.mxu0 %vm1147_vm5, %v1996_v25 }
  0xd6   : > { %2674 = vmatmul.mubr.msk.bf16.vlgmr.msra.gmra.mxu0 %vm1147_vm5, %v1998_v53 }
  0xd7   : > { %v531_v16 = vpop.permute.xlu0 %530 }
  0xd8   : > { %v533_v11 = vpop.permute.xlu1 %532  ;;  %v596_v35 = vsel %vm590_vm3, %v2785_v15, %v531_v16 }
  0xd9   : > { %v598_v18 = vsel %vm590_vm3, %v2850_v23, %v533_v11 }
  0xdb   : > { %v563_v0 = vpop.permute.xlu0 %562 }
  0xdc   : > { %v565_v59 = vpop.permute.xlu1 %564  ;;  %v629_v13 = vsel %vm623_vm4, %v596_v35, %v563_v0 }
  0xdd   : > { %v631_v24 = vsel %vm623_vm4, %v598_v18, %v565_v59  ;;  %2643 = vmatprep.mubr.msk.bf16.mxu1 %vm1147_vm5, %v629_v13 }
  0xde   : > { %2644 = vmatmul.mubr.msk.bf16.gmra.mxu1 %vm1147_vm5, %v631_v24 }
  0xdf   : > { %v1904_v32 = vpop.permute.xlu0 %1903 }
  0xe0   : > { %v1906_v37 = vpop.permute.xlu1 %1905  ;;  %v1968_v52 = vsel %vm590_vm3, %v2868_v44, %v1904_v32 }
  0xe1   : > { %v1970_v15 = vsel %vm590_vm3, %v2914_v30, %v1906_v37 }
  0xe3   : > { %v1936_v45 = vpop.permute.xlu0 %1935 }
  0xe4   : > { %v1938_v62 = vpop.permute.xlu1 %1937  ;;  %v2000_v23 = vsel %vm623_vm4, %v1968_v52, %v1936_v45 }
  0xe5   : > { %v2002_v10 = vsel %vm623_vm4, %v1970_v15, %v1938_v62  ;;  %2677 = vmatprep.mubr.msk.bf16.mxu0 %vm1147_vm5, %v2000_v23 }
  0xe6   : > { %2678 = vmatmul.mubr.msk.bf16.gmra.mxu0 %vm1147_vm5, %v2002_v10 }
  0xe7   : > { %v535_v21 = vpop.permute.xlu0 %534 }
  0xe8   : > { %v537_v1 = vpop.permute.xlu1 %536  ;;  %v600_v56 = vsel %vm590_vm3, %v2868_v44, %v535_v21 }
  0xe9   : > { %v602_v27 = vsel %vm590_vm3, %v2914_v30, %v537_v1 }
  0xeb   : > { %v567_v58 = vpop.permute.xlu0 %566 }
  0xec   : > { %v569_v51 = vpop.permute.xlu1 %568  ;;  %v633_v33 = vsel %vm623_vm4, %v600_v56, %v567_v58 }
  0xed   : > { %v635_v2 = vsel %vm623_vm4, %v602_v27, %v569_v51  ;;  %2647 = vmatprep.mubr.msk.bf16.mxu1 %vm1147_vm5, %v633_v33 }
  0xee   : > { %2648 = vmatmul.mubr.msk.bf16.gmra.mxu1 %vm1147_vm5, %v635_v2 }
  0xef   : > { %v1908_v57 = vpop.permute.xlu0 %1907 }
  0xf0   : > { %v1910_v38 = vpop.permute.xlu1 %1909  ;;  %v1972_v34 = vsel %vm590_vm3, %v2930_v46, %v1908_v57 }
  0xf1   : > { %v1974_v44 = vsel %vm590_vm3, %v2978_v41, %v1910_v38 }
  0xf3   : > { %v1940_v17 = vpop.permute.xlu0 %1939 }
  0xf4   : > { %v1942_v54 = vpop.permute.xlu1 %1941  ;;  %v2004_v30 = vsel %vm623_vm4, %v1972_v34, %v1940_v17 }
  0xf5   : > { %v2006_v31 = vsel %vm623_vm4, %v1974_v44, %v1942_v54  ;;  %2681 = vmatprep.mubr.msk.bf16.mxu0 %vm1147_vm5, %v2004_v30 }
  0xf6   : > { %2682 = vmatmul.mubr.msk.bf16.gmra.mxu0 %vm1147_vm5, %v2006_v31 }
  0xf7   : > { %v539_v28 = vpop.permute.xlu0 %538 }
  0xf8   : > { %v541_v5 = vpop.permute.xlu1 %540  ;;  %v604_v4 = vsel %vm590_vm3, %v2930_v46, %v539_v28 }
  0xf9   : > { %v606_v12 = vsel %vm590_vm3, %v2978_v41, %v541_v5 }
  0xfb   : > { %v571_v50 = vpop.permute.xlu0 %570 }
  0xfc   : > { %v573_v26 = vpop.permute.xlu1 %572  ;;  %v637_v3 = vsel %vm623_vm4, %v604_v4, %v571_v50 }
  0xfd   : > { %v639_v63 = vsel %vm623_vm4, %v606_v12, %v573_v26  ;;  %2651 = vmatprep.mubr.msk.bf16.mxu1 %vm1147_vm5, %v637_v3 }
  0xfe   : > { %2652 = vmatmul.mubr.msk.bf16.gmra.mxu1 %vm1147_vm5, %v639_v63 }
  0xff   : > { %v1912_v55 = vpop.permute.xlu0 %1911 }
 0x100   : > { %v1914_v43 = vpop.permute.xlu1 %1913  ;;  %v1976_v60 = vsel %vm590_vm3, %v2993_v49, %v1912_v55 }
 0x101   : > { %v1978_v46 = vsel %vm590_vm3, %v2779_v8, %v1914_v43 }
 0x103   : > { %v1944_v47 = vpop.permute.xlu0 %1943 }
 0x104   : > { %v1946_v19 = vpop.permute.xlu1 %1945  ;;  %v2008_v41 = vsel %vm623_vm4, %v1976_v60, %v1944_v47 }
 0x105   : > { %v2010_v22 = vsel %vm623_vm4, %v1978_v46, %v1946_v19  ;;  %2685 = vmatprep.mubr.msk.bf16.mxu0 %vm1147_vm5, %v2008_v41 }
 0x106   : > { %2686 = vmatmul.mubr.msk.bf16.gmra.mxu0 %vm1147_vm5, %v2010_v22 }
 0x107   : > { %v543_v29 = vpop.permute.xlu0 %542 }
 0x108   : > { %v545_v20 = vpop.permute.xlu1 %544  ;;  %v608_v39 = vsel %vm590_vm3, %v2993_v49, %v543_v29 }
 0x109   : > { %v610_v53 = vsel %vm590_vm3, %v3236_v42, %v545_v20 }
 0x10b   : > { %v575_v25 = vpop.permute.xlu0 %574 }
 0x10c   : > { %v577_v16 = vpop.permute.xlu1 %576  ;;  %v641_v8 = vsel %vm623_vm4, %v608_v39, %v575_v25 }
 0x10d   : > { %v643_v11 = vsel %vm623_vm4, %v610_v53, %v577_v16  ;;  %2655 = vmatprep.mubr.msk.bf16.mxu1 %vm1147_vm5, %v641_v8 }
 0x10e   : > { %2656 = vmatmul.mubr.msk.bf16.gmra.mxu1 %vm1147_vm5, %v643_v11 }
 0x10f   : > { %v1916_v35 = vpop.permute.xlu0 %1915 }
 0x110   : > { %v1918_v0 = vpop.permute.xlu1 %1917  ;;  %v1980_v18 = vsel %vm590_vm3, %v3255_v9, %v1916_v35 }
 0x111   : > { %v1982_v49 = vsel %vm590_vm3, %v3259_v40, %v1918_v0 }
 0x113   : > { %v1948_v59 = vpop.permute.xlu0 %1947 }
 0x114   : > { %v1950_v13 = vpop.permute.xlu1 %1949  ;;  %v2012_v42 = vsel %vm623_vm4, %v1980_v18, %v1948_v59 }
 0x115   : > { %v2014_v24 = vsel %vm623_vm4, %v1982_v49, %v1950_v13  ;;  %2689 = vmatprep.mubr.msk.bf16.mxu0 %vm1147_vm5, %v2012_v42 }
 0x116   : > { %2690 = vmatmul.mubr.msk.bf16.gmra.mxu0 %vm1147_vm5, %v2014_v24 }
 0x117   : > { %v547_v32 = vpop.permute.xlu0 %546 }
 0x118   : > { %v549_v37 = vpop.permute.xlu1 %548  ;;  %v612_v52 = vsel %vm590_vm3, %v3255_v9, %v547_v32 }
 0x119   : > { %v614_v15 = vsel %vm590_vm3, %v3259_v40, %v549_v37 }
 0x11b   : > { %v579_v45 = vpop.permute.xlu0 %578 }
 0x11c   : > { %v581_v62 = vpop.permute.xlu1 %580  ;;  %v645_v23 = vsel %vm623_vm4, %v612_v52, %v579_v45 }
 0x11d   : > { %v647_v10 = vsel %vm623_vm4, %v614_v15, %v581_v62  ;;  %2659 = vmatprep.mubr.msk.bf16.mxu1 %vm1147_vm5, %v645_v23 }
 0x11e   : > { %2660 = vmatmul.mubr.msk.bf16.gmra.mxu1 %vm1147_vm5, %v647_v10 }
 0x11f   : > { %v1920_v21 = vpop.permute.xlu0 %1919 }
 0x120   : > { %v1922_v1 = vpop.permute.xlu1 %1921  ;;  %v1984_v56 = vsel %vm590_vm3, %v3329_v6, %v1920_v21 }
 0x121   : > { %v1986_v9 = vsel %vm590_vm3, %v3335_v7, %v1922_v1 }
 0x123   : > { %v1952_v58 = vpop.permute.xlu0 %1951 }
 0x124   : > { %v1954_v27 = vpop.permute.xlu1 %1953  ;;  %v2016_v40 = vsel %vm623_vm4, %v1984_v56, %v1952_v58 }
 0x125   : > { %v2018_v51 = vsel %vm623_vm4, %v1986_v9, %v1954_v27  ;;  %2693 = vmatprep.mubr.msk.bf16.mxu0 %vm1147_vm5, %v2016_v40 }
 0x126   : > { %2694 = vmatmul.mubr.msk.bf16.gmra.mxu0 %vm1147_vm5, %v2018_v51 }
 0x127   : > { %v551_v33 = vpop.permute.xlu0 %550 }
 0x128   : > { %v553_v2 = vpop.permute.xlu1 %552  ;;  %v616_v57 = vsel %vm590_vm3, %v3329_v6, %v551_v33 }
 0x129   : > { %v618_v34 = vsel %vm590_vm3, %v3335_v7, %v553_v2 }
 0x12b   : > { %v583_v38 = vpop.permute.xlu0 %582 }
 0x12c   : > { %v585_v17 = vpop.permute.xlu1 %584  ;;  %v649_v44 = vsel %vm623_vm4, %v616_v57, %v583_v38 }
 0x12d   : > { %v651_v54 = vsel %vm623_vm4, %v618_v34, %v585_v17  ;;  %2663 = vmatprep.mubr.msk.bf16.mxu1 %vm1147_vm5, %v649_v44  ;;  %v3703_v17 = vld [vmem:[%s3835_s2] ss:$0 sm:$0xff] }
 0x12e   : > { %2664 = vmatmul.mubr.msk.bf16.gmra.mxu1 %vm1147_vm5, %v651_v54 }
 0x12f   : > { %v1924_v30 = vpop.permute.xlu0 %1923 }
 0x130   : > { %v1926_v31 = vpop.permute.xlu1 %1925  ;;  %v1988_v28 = vsel %vm590_vm3, %v3399_v14, %v1924_v30 }
 0x131   : > { %v1990_v6 = vsel %vm590_vm3, %v3405_v36, %v1926_v31 }
 0x133   : > { %v1956_v5 = vpop.permute.xlu0 %1955 }
 0x134   : > { %v1958_v4 = vpop.permute.xlu1 %1957  ;;  %v2020_v7 = vsel %vm623_vm4, %v1988_v28, %v1956_v5 }
 0x135   : > { %v2022_v50 = vsel %vm623_vm4, %v1990_v6, %v1958_v4  ;;  %2697 = vmatprep.mubr.msk.bf16.mxu0 %vm1147_vm5, %v2020_v7 }
 0x136   : > { %2698 = vmatmul.mubr.msk.bf16.gmra.mxu0 %vm1147_vm5, %v2022_v50 }
 0x137   : > { %v555_v12 = vpop.permute.xlu0 %554 }
 0x138   : > { %v557_v26 = vpop.permute.xlu1 %556  ;;  %v620_v3 = vsel %vm590_vm3, %v3399_v14, %v555_v12 }
 0x139   : > { %v622_v55 = vsel %vm590_vm3, %v3405_v36, %v557_v26 }
 0x13b   : > { %v587_v63 = vpop.permute.xlu0 %586 }
 0x13c   : > { %v589_v43 = vpop.permute.xlu1 %588  ;;  %v653_v60 = vsel %vm623_vm4, %v620_v3, %v587_v63 }
 0x13d   : > { %v655_v47 = vsel %vm623_vm4, %v622_v55, %v589_v43  ;;  %2667 = vmatprep.mubr.msk.bf16.mxu1 %vm1147_vm5, %v653_v60 }
 0x13e   : > { %2668 = vmatmul.mubr.msk.bf16.gmra.mxu1 %vm1147_vm5, %v655_v47 }
 0x13f   : > { %v1928_v46 = vpop.permute.xlu0 %1927 }
 0x140   : > { %v1930_v19 = vpop.permute.xlu1 %1929  ;;  %v1992_v41 = vsel %vm590_vm3, %v3469_v48, %v1928_v46 }
 0x141   : > { %v1994_v14 = vsel %vm590_vm3, %v3475_v61, %v1930_v19 }
 0x143   : > { %v1960_v22 = vpop.permute.xlu0 %1959 }
 0x144   : > { %v1962_v29 = vpop.permute.xlu1 %1961  ;;  %v2024_v36 = vsel %vm623_vm4, %v1992_v41, %v1960_v22 }
 0x145   : > { %v2026_v20 = vsel %vm623_vm4, %v1994_v14, %v1962_v29  ;;  %2701 = vmatprep.mubr.msk.bf16.mxu0 %vm1147_vm5, %v2024_v36 }
 0x146   : > { %2702 = vmatmul.mubr.msk.bf16.gmra.mxu0 %vm1147_vm5, %v2026_v20 }
 0x156   : > { %v3651_v39 = vpop.f32.mrf.mxu1 }
 0x157   : > { %v2607_v53 = vpop.f32.mrf.mxu0 }
 0x158   : > { %v3653_v25 = vpop.f32.mrf.mxu1 }
 0x159   : > { %v1218_v48 = vpop.f32.mrf.mxu0 }
 0x15a   : > { %v3655_v16 = vpop.f32.mrf.mxu1 }
 0x15b   : > { %v2608_v11 = vpop.f32.mrf.mxu0 }
 0x15c   : > { %v3657_v8 = vpop.f32.mrf.mxu1 }
 0x15d   : > { %v1221_v0 = vpop.f32.mrf.mxu0 }
 0x161   : > { %v3659_v61 = vpop.f32.mrf.mxu1 }
 0x163   : > { %v3661_v35 = vpop.f32.mrf.mxu1 }
 0x165   : > { %v3663_v59 = vpop.f32.mrf.mxu1 }
 0x166   : > { %v2611_v18 = vpop.f32.mrf.mxu0 }
 0x167   : > { %v3665_v13 = vpop.f32.mrf.mxu1 }
 0x168   : > { %v1234_v49 = vpop.f32.mrf.mxu0 }
 0x16a   : > { %v2612_v24 = vpop.f32.mrf.mxu0 }
 0x16c   : > { %v1237_v37 = vpop.f32.mrf.mxu0 }
 0x171   : > { %v3667_v42 = vpop.f32.mrf.mxu1 }
 0x173   : > { %v3669_v32 = vpop.f32.mrf.mxu1 }
 0x175   : > { %v3673_v45 = vpop.f32.mrf.mxu1 }
 0x176   : > { %v3671_v52 = vpop.f32.mrf.mxu0 }
 0x177   : > { %v3677_v62 = vpop.f32.mrf.mxu1 }
 0x178   : > { %v3675_v15 = vpop.f32.mrf.mxu0 }
 0x17a   : > { %v3681_v10 = vpop.f32.mrf.mxu0 }
 0x17c   : > { %v3685_v1 = vpop.f32.mrf.mxu0 }
 0x181   : > { %v3679_v23 = vpop.f32.mrf.mxu1 }
 0x183   : > { %v3683_v21 = vpop.f32.mrf.mxu1 }
 0x185   : > { %v3687_v56 = vpop.f32.mrf.mxu1 }
 0x186   : > { %v3689_v58 = vpop.f32.mrf.mxu0 }
 0x187   : > { %v3691_v9 = vpop.f32.mrf.mxu1 }
 0x188   : > { %v3693_v27 = vpop.f32.mrf.mxu0 }
 0x18a   : > { %v3695_v51 = vpop.f32.mrf.mxu0 }
 0x18c   : > { %v3697_v2 = vpop.f32.mrf.mxu0 }
 0x18e   : > { %v2641_v40 = vpop.f32.mrf.mxu1 }
 0x18f   : > { %v1428_v38 = vadd.f32 %v2641_v40, %v2607_v53 }
 0x190   : > { %v1419_v33 = vpop.f32.mrf.mxu1 }
 0x191   : > { %v1420_v44 = vadd.f32 %v1419_v33, %v1218_v48 }
 0x192   : > { %v2642_v57 = vpop.f32.mrf.mxu1 }
 0x193   : > { %v1431_v28 = vadd.f32 %v2642_v57, %v2608_v11 }
 0x194   : > { %v1422_v30 = vpop.f32.mrf.mxu1 }
 0x195   : > { %v1423_v7 = vadd.f32 %v1422_v30, %v1221_v0 }
 0x196   : > { %v2675_v34 = vpop.f32.mrf.mxu0 }
 0x197   : > { %v2233_v54 = vadd.f32 %v2675_v34, %v1428_v38 }
 0x198   : > { %v2104_v31 = vpop.f32.mrf.mxu0 }
 0x199   : > { %v2272_v5 = vadd.f32 %v3703_v17, %v2233_v54  ;;  %v2231_v6 = vadd.f32 %v2104_v31, %v1420_v44 }
 0x19a   : > { %v2676_v4 = vpop.f32.mrf.mxu0 }
 0x19b   : > { %2304 = vst.msk [vmem:[%s3708_s4 + $0x10] sm:$0xff] %vm623_vm4, %v2272_v5  ;;  %v2270_v50 = vadd.f32 %v3703_v17, %v2231_v6  ;;  %v2234_v12 = vadd.f32 %v2676_v4, %v1431_v28 }
 0x19c   : > { %v2107_v26 = vpop.f32.mrf.mxu0 }
 0x19d   : > { %2302 = vst.msk [vmem:[%s3708_s4] sm:$0xff] %vm623_vm4, %v2270_v50  ;;  %v2273_v3 = vadd.f32 %v3703_v17, %v2234_v12  ;;  %v2232_v63 = vadd.f32 %v2107_v26, %v1423_v7 }
 0x19e   : > { %v2645_v55 = vpop.f32.mrf.mxu1 }
 0x19f   : > { %2305 = vst.msk [vmem:[%s3708_s4 + $0x18] sm:$0xff] %vm623_vm4, %v2273_v3  ;;  %v2271_v43 = vadd.f32 %v3703_v17, %v2232_v63  ;;  %v1444_v46 = vadd.f32 %v2645_v55, %v2611_v18 }
 0x1a0   : > { %v1435_v60 = vpop.f32.mrf.mxu1 }
 0x1a1   : > { %2303 = vst.msk [vmem:[%s3708_s4 + $0x8] sm:$0xff] %vm623_vm4, %v2271_v43  ;;  %v1436_v41 = vadd.f32 %v1435_v60, %v1234_v49 }
 0x1a2   : > { %v2646_v47 = vpop.f32.mrf.mxu1 }
 0x1a3   : > { %v1447_v36 = vadd.f32 %v2646_v47, %v2612_v24 }
 0x1a4   : > { %v1438_v14 = vpop.f32.mrf.mxu1 }
 0x1a5   : > { %v1439_v11 = vadd.f32 %v1438_v14, %v1237_v37 }
 0x1a6   : > { %v2679_v19 = vpop.f32.mrf.mxu0 }
 0x1a7   : > { %v2237_v22 = vadd.f32 %v2679_v19, %v1444_v46 }
 0x1a8   : > { %v2120_v29 = vpop.f32.mrf.mxu0 }
 0x1a9   : > { %v2276_v20 = vadd.f32 %v3703_v17, %v2237_v22  ;;  %v2235_v53 = vadd.f32 %v2120_v29, %v1436_v41 }
 0x1aa   : > { %v2680_v48 = vpop.f32.mrf.mxu0 }
 0x1ab   : > { %2308 = vst.msk [vmem:[%s3708_s4 + $0x30] sm:$0xff] %vm623_vm4, %v2276_v20  ;;  %v2274_v0 = vadd.f32 %v3703_v17, %v2235_v53  ;;  %v2238_v40 = vadd.f32 %v2680_v48, %v1447_v36 }
 0x1ac   : > { %v2123_v33 = vpop.f32.mrf.mxu0 }
 0x1ad   : > { %2306 = vst.msk [vmem:[%s3708_s4 + $0x20] sm:$0xff] %vm623_vm4, %v2274_v0  ;;  %v2277_v18 = vadd.f32 %v3703_v17, %v2238_v40  ;;  %v2236_v49 = vadd.f32 %v2123_v33, %v1439_v11 }
 0x1ae   : > { %v2649_v57 = vpop.f32.mrf.mxu1 }
 0x1af   : > { %2309 = vst.msk [vmem:[%s3708_s4 + $0x38] sm:$0xff] %vm623_vm4, %v2277_v18  ;;  %v2275_v24 = vadd.f32 %v3703_v17, %v2236_v49  ;;  %v1460_v34 = vadd.f32 %v2649_v57, %v3671_v52 }
 0x1b0   : > { %v1451_v38 = vpop.f32.mrf.mxu1 }
 0x1b1   : > { %2307 = vst.msk [vmem:[%s3708_s4 + $0x28] sm:$0xff] %vm623_vm4, %v2275_v24  ;;  %v1452_v54 = vadd.f32 %v1451_v38, %v3675_v15 }
 0x1b2   : > { %v2650_v37 = vpop.f32.mrf.mxu1 }
 0x1b3   : > { %v1463_v5 = vadd.f32 %v2650_v37, %v3681_v10 }
 0x1b4   : > { %v1454_v31 = vpop.f32.mrf.mxu1 }
 0x1b5   : > { %v1455_v50 = vadd.f32 %v1454_v31, %v3685_v1 }
 0x1b6   : > { %v2683_v44 = vpop.f32.mrf.mxu0 }
 0x1b7   : > { %v2241_v30 = vadd.f32 %v2683_v44, %v1460_v34 }
 0x1b8   : > { %v2136_v28 = vpop.f32.mrf.mxu0 }
 0x1b9   : > { %v2280_v6 = vadd.f32 %v3703_v17, %v2241_v30  ;;  %v2239_v4 = vadd.f32 %v2136_v28, %v1452_v54 }
 0x1ba   : > { %v2684_v7 = vpop.f32.mrf.mxu0 }
 0x1bb   : > { %2312 = vst.msk [vmem:[%s3708_s4 + $0x50] sm:$0xff] %vm623_vm4, %v2280_v6  ;;  %v2278_v52 = vadd.f32 %v3703_v17, %v2239_v4  ;;  %v2242_v12 = vadd.f32 %v2684_v7, %v1463_v5 }
 0x1bc   : > { %v2139_v26 = vpop.f32.mrf.mxu0 }
 0x1bd   : > { %2310 = vst.msk [vmem:[%s3708_s4 + $0x40] sm:$0xff] %vm623_vm4, %v2278_v52  ;;  %v2281_v15 = vadd.f32 %v3703_v17, %v2242_v12  ;;  %v2240_v3 = vadd.f32 %v2139_v26, %v1455_v50 }
 0x1be   : > { %v2653_v63 = vpop.f32.mrf.mxu1 }
 0x1bf   : > { %2313 = vst.msk [vmem:[%s3708_s4 + $0x58] sm:$0xff] %vm623_vm4, %v2281_v15  ;;  %v2279_v10 = vadd.f32 %v3703_v17, %v2240_v3  ;;  %v1476_v43 = vadd.f32 %v2653_v63, %v3689_v58 }
 0x1c0   : > { %v1467_v55 = vpop.f32.mrf.mxu1 }
 0x1c1   : > { %2311 = vst.msk [vmem:[%s3708_s4 + $0x48] sm:$0xff] %vm623_vm4, %v2279_v10  ;;  %v1468_v47 = vadd.f32 %v1467_v55, %v3693_v27 }
 0x1c2   : > { %v2654_v1 = vpop.f32.mrf.mxu1 }
 0x1c3   : > { %v1479_v22 = vadd.f32 %v2654_v1, %v3695_v51 }
 0x1c4   : > { %v1470_v19 = vpop.f32.mrf.mxu1 }
 0x1c5   : > { %v1471_v20 = vadd.f32 %v1470_v19, %v3697_v2 }
 0x1c6   : > { %v2687_v60 = vpop.f32.mrf.mxu0 }
 0x1c7   : > { %v2245_v46 = vadd.f32 %v2687_v60, %v1476_v43 }
 0x1c8   : > { %v2152_v41 = vpop.f32.mrf.mxu0 }
 0x1c9   : > { %v2284_v14 = vadd.f32 %v3703_v17, %v2245_v46  ;;  %v2243_v29 = vadd.f32 %v2152_v41, %v1468_v47 }
 0x1ca   : > { %v2688_v36 = vpop.f32.mrf.mxu0 }
 0x1cb   : > { %2316 = vst.msk [vmem:[%s3708_s4 + $0x70] sm:$0xff] %vm623_vm4, %v2284_v14  ;;  %v2282_v58 = vadd.f32 %v3703_v17, %v2243_v29  ;;  %v2246_v53 = vadd.f32 %v2688_v36, %v1479_v22 }
 0x1cc   : > { %v2155_v48 = vpop.f32.mrf.mxu0 }
 0x1cd   : > { %2314 = vst.msk [vmem:[%s3708_s4 + $0x60] sm:$0xff] %vm623_vm4, %v2282_v58  ;;  %v2285_v27 = vadd.f32 %v3703_v17, %v2246_v53  ;;  %v2244_v11 = vadd.f32 %v2155_v48, %v1471_v20 }
 0x1ce   : > { %v2657_v0 = vpop.f32.mrf.mxu1 }
 0x1cf   : > { %2317 = vst.msk [vmem:[%s3708_s4 + $0x78] sm:$0xff] %vm623_vm4, %v2285_v27  ;;  %v2283_v51 = vadd.f32 %v3703_v17, %v2244_v11  ;;  %v1492_v33 = vadd.f32 %v2657_v0, %v3651_v39 }
 0x1d0   : > { %v1483_v40 = vpop.f32.mrf.mxu1 }
 0x1d1   : > { %2315 = vst.msk [vmem:[%s3708_s4 + $0x68] sm:$0xff] %vm623_vm4, %v2283_v51  ;;  %v1484_v49 = vadd.f32 %v1483_v40, %v3653_v25 }
 0x1d2   : > { %v2658_v2 = vpop.f32.mrf.mxu1 }
 0x1d3   : > { %v1495_v37 = vadd.f32 %v2658_v2, %v3655_v16 }
 0x1d4   : > { %v1486_v24 = vpop.f32.mrf.mxu1 }
 0x1d5   : > { %v1487_v30 = vadd.f32 %v1486_v24, %v3657_v8 }
 0x1d6   : > { %v2691_v18 = vpop.f32.mrf.mxu0 }
 0x1d7   : > { %v2249_v57 = vadd.f32 %v2691_v18, %v1492_v33 }
 0x1d8   : > { %v2168_v38 = vpop.f32.mrf.mxu0 }
 0x1d9   : > { %v2288_v34 = vadd.f32 %v3703_v17, %v2249_v57  ;;  %v2247_v44 = vadd.f32 %v2168_v38, %v1484_v49 }
 0x1da   : > { %v2692_v54 = vpop.f32.mrf.mxu0 }
 0x1db   : > { %2320 = vst.msk [vmem:[%s3708_s4 + $0x90] sm:$0xff] %vm623_vm4, %v2288_v34  ;;  %v2286_v39 = vadd.f32 %v3703_v17, %v2247_v44  ;;  %v2250_v31 = vadd.f32 %v2692_v54, %v1495_v37 }
 0x1dc   : > { %v2171_v28 = vpop.f32.mrf.mxu0 }
 0x1dd   : > { %2318 = vst.msk [vmem:[%s3708_s4 + $0x80] sm:$0xff] %vm623_vm4, %v2286_v39  ;;  %v2289_v25 = vadd.f32 %v3703_v17, %v2250_v31  ;;  %v2248_v5 = vadd.f32 %v2171_v28, %v1487_v30 }
 0x1de   : > { %v2661_v6 = vpop.f32.mrf.mxu1 }
 0x1df   : > { %2321 = vst.msk [vmem:[%s3708_s4 + $0x98] sm:$0xff] %vm623_vm4, %v2289_v25  ;;  %v2287_v16 = vadd.f32 %v3703_v17, %v2248_v5  ;;  %v1508_v7 = vadd.f32 %v2661_v6, %v3659_v61 }
 0x1e0   : > { %v1499_v4 = vpop.f32.mrf.mxu1 }
 0x1e1   : > { %2319 = vst.msk [vmem:[%s3708_s4 + $0x88] sm:$0xff] %vm623_vm4, %v2287_v16  ;;  %v1500_v52 = vadd.f32 %v1499_v4, %v3661_v35 }
 0x1e2   : > { %v2662_v8 = vpop.f32.mrf.mxu1 }
 0x1e3   : > { %v1511_v3 = vadd.f32 %v2662_v8, %v3663_v59 }
 0x1e4   : > { %v1502_v26 = vpop.f32.mrf.mxu1 }
 0x1e5   : > { %v1503_v1 = vadd.f32 %v1502_v26, %v3665_v13 }
 0x1e6   : > { %v2695_v50 = vpop.f32.mrf.mxu0 }
 0x1e7   : > { %v2253_v12 = vadd.f32 %v2695_v50, %v1508_v7 }
 0x1e8   : > { %v2184_v15 = vpop.f32.mrf.mxu0 }
 0x1e9   : > { %v2292_v63 = vadd.f32 %v3703_v17, %v2253_v12  ;;  %v2251_v10 = vadd.f32 %v2184_v15, %v1500_v52 }
 0x1ea   : > { %v2696_v55 = vpop.f32.mrf.mxu0 }
 0x1eb   : > { %2324 = vst.msk [vmem:[%s3708_s4 + $0xb0] sm:$0xff] %vm623_vm4, %v2292_v63  ;;  %v2290_v61 = vadd.f32 %v3703_v17, %v2251_v10  ;;  %v2254_v43 = vadd.f32 %v2696_v55, %v1511_v3 }
 0x1ec   : > { %v2187_v60 = vpop.f32.mrf.mxu0 }
 0x1ed   : > { %2322 = vst.msk [vmem:[%s3708_s4 + $0xa0] sm:$0xff] %vm623_vm4, %v2290_v61  ;;  %v2293_v35 = vadd.f32 %v3703_v17, %v2254_v43  ;;  %v2252_v47 = vadd.f32 %v2187_v60, %v1503_v1 }
 0x1ee   : > { %v2665_v46 = vpop.f32.mrf.mxu1 }
 0x1ef   : > { %2325 = vst.msk [vmem:[%s3708_s4 + $0xb8] sm:$0xff] %vm623_vm4, %v2293_v35  ;;  %v2291_v59 = vadd.f32 %v3703_v17, %v2252_v47  ;;  %v1524_v41 = vadd.f32 %v2665_v46, %v3667_v42 }
 0x1f0   : > { %v1515_v19 = vpop.f32.mrf.mxu1 }
 0x1f1   : > { %2323 = vst.msk [vmem:[%s3708_s4 + $0xa8] sm:$0xff] %vm623_vm4, %v2291_v59  ;;  %v1516_v14 = vadd.f32 %v1515_v19, %v3669_v32 }
 0x1f2   : > { %v2666_v13 = vpop.f32.mrf.mxu1 }
 0x1f3   : > { %v1527_v58 = vadd.f32 %v2666_v13, %v3673_v45 }
 0x1f4   : > { %v1518_v36 = vpop.f32.mrf.mxu1 }
 0x1f5   : > { %v1519_v11 = vadd.f32 %v1518_v36, %v3677_v62 }
 0x1f6   : > { %v2699_v22 = vpop.f32.mrf.mxu0 }
 0x1f7   : > { %v2257_v29 = vadd.f32 %v2699_v22, %v1524_v41 }
 0x1f8   : > { %v2200_v20 = vpop.f32.mrf.mxu0 }
 0x1f9   : > { %v2296_v53 = vadd.f32 %v3703_v17, %v2257_v29  ;;  %v2255_v48 = vadd.f32 %v2200_v20, %v1516_v14 }
 0x1fa   : > { %v2700_v27 = vpop.f32.mrf.mxu0 }
 0x1fb   : > { %2328 = vst.msk [vmem:[%s3708_s4 + $0xd0] sm:$0xff] %vm623_vm4, %v2296_v53  ;;  %v2294_v42 = vadd.f32 %v3703_v17, %v2255_v48  ;;  %v2258_v0 = vadd.f32 %v2700_v27, %v1527_v58 }
 0x1fc   : > { %v2203_v51 = vpop.f32.mrf.mxu0 }
 0x1fd   : > { %2326 = vst.msk [vmem:[%s3708_s4 + $0xc0] sm:$0xff] %vm623_vm4, %v2294_v42  ;;  %v2297_v32 = vadd.f32 %v3703_v17, %v2258_v0  ;;  %v2256_v40 = vadd.f32 %v2203_v51, %v1519_v11 }
 0x1fe   : > { %v2669_v2 = vpop.f32.mrf.mxu1 }
 0x1ff   : > { %2329 = vst.msk [vmem:[%s3708_s4 + $0xd8] sm:$0xff] %vm623_vm4, %v2297_v32  ;;  %v2295_v45 = vadd.f32 %v3703_v17, %v2256_v40  ;;  %v1540_v18 = vadd.f32 %v2669_v2, %v3679_v23 }
 0x200   : > { %v1531_v33 = vpop.f32.mrf.mxu1 }
 0x201   : > { %2327 = vst.msk [vmem:[%s3708_s4 + $0xc8] sm:$0xff] %vm623_vm4, %v2295_v45  ;;  %v1532_v57 = vadd.f32 %v1531_v33, %v3683_v21 }
 0x202   : > { %v2670_v62 = vpop.f32.mrf.mxu1 }
 0x203   : > { %v1543_v34 = vadd.f32 %v2670_v62, %v3687_v56 }
 0x204   : > { %v1534_v38 = vpop.f32.mrf.mxu1 }
 0x205   : > { %v1535_v39 = vadd.f32 %v1534_v38, %v3691_v9 }
 0x206   : > { %v2703_v49 = vpop.f32.mrf.mxu0 }
 0x207   : > { %v2261_v24 = vadd.f32 %v2703_v49, %v1540_v18 }
 0x208   : > { %v2216_v37 = vpop.f32.mrf.mxu0 }
 0x209   : > { %v2300_v44 = vadd.f32 %v3703_v17, %v2261_v24  ;;  %v2259_v54 = vadd.f32 %v2216_v37, %v1532_v57 }
 0x20a   : > { %v2704_v30 = vpop.f32.mrf.mxu0 }
 0x20b   : > { %2332 = vst.msk [vmem:[%s3708_s4 + $0xf0] sm:$0xff] %vm623_vm4, %v2300_v44  ;;  %v2298_v23 = vadd.f32 %v3703_v17, %v2259_v54  ;;  %v2262_v31 = vadd.f32 %v2704_v30, %v1543_v34 }
 0x20c   : > { %v2219_v28 = vpop.f32.mrf.mxu0 }
 0x20d   : > { %2330 = vst.msk [vmem:[%s3708_s4 + $0xe0] sm:$0xff] %vm623_vm4, %v2298_v23  ;;  %v2301_v21 = vadd.f32 %v3703_v17, %v2262_v31  ;;  %v2260_v25 = vadd.f32 %v2219_v28, %v1535_v39 }
 0x20f   : > { %2333 = vst.msk [vmem:[%s3708_s4 + $0xf8] sm:$0xff] %vm623_vm4, %v2301_v21  ;;  %v2299_v56 = vadd.f32 %v3703_v17, %v2260_v25 }
 0x211   : > { %2331 = vst.msk [vmem:[%s3708_s4 + $0xe8] sm:$0xff] %vm623_vm4, %v2299_v56 }
 0x212 PF: > { %s13_s12 = sadd.s32 1, %s2731_s12  }
 0x213   : > { %p10_p4 = scmp.ge.s32.totalorder %s13_s12, 4  }
 0x215   :  { %12 = sbr.rel (!%p10_p4) target bundleno = 1 (0x1), region = 66 }

// kernel: mid_block_forward.19
= control target key start
LH: loop header
LB: loop body
LE: loop exit
PB: predicated region body
PF: predicated region fallthrough
CT: control target
= control target key end

     0   :  { %s2789_s12 = smov 0   ;;  %s3880_s0 = inlined_call_operand.vmem [shape: f32[2,18,18,8], index: 0, kind: input, shape index: {}]   ;;  %s3881_s1 = inlined_call_operand.vmem [shape: bf16[3,24,8], index: 1, kind: input, shape index: {}]   ;;  %s3882_s2 = inlined_call_operand.vmem [shape: f32[1,8], index: 2, kind: input, shape index: {}]   ;;  %s3883_s3 = inlined_call_operand.vmem [shape: f32[2,256,8], index: 3, kind: output, shape index: {}]  }
   0x1 LB: > { %s2404_s13 = sadd.s32 4294967295, %s2765_s12   ;;  %p2408_p0 = scmp.ge.s32.totalorder %s2765_s12, 1  ;;  %s2765_s12 = sphi %s2789_s12, %s13_s12  }
   0x2   : > { %p137_p1 = scmp.lt.s32.totalorder %s2765_s12, 3 }
   0x4   : > { %p138_p2 = pnand %p2408_p0, %p137_p1 }
   0x5   : > { %p161_p3 = scmp.lt.s32.totalorder (!%p138_p2), %s2404_s13, 1  ;;  %s2767_s20 = smov (!%p138_p2), 16  }
   0x6   : > { %141 = sbr.rel (%p138_p2) target bundleno = 530 (0x212), region = 32  ;;  %s2768_s21 = smov (!%p138_p2), 8  }
   0xb   : > { %s3887_s13 = smov (!%p161_p3, %s2404_s13), 1  ;;  %v2753_v0 = vld [vmem:[%s3881_s1 + $0x14] ss:$0 sps:$4 sm:$0xff]   ;;  %vm1186_vm0 = vcmask 1043456   ;;  %vm477_vm1 = vcmask 1046528   ;;  %vm590_vm3 = vcmask 64512  }
   0xc   : > { %s2742_s14 = smul.u32 432, %s3887_s13  ;;  %2738 = vmatprep.subr.msk.bf16.mxu0 %vm1186_vm0, %v2753_v0  ;;  %2739 = vmatprep.subr.msk.bf16.mxu1 %vm1186_vm0, %v2753_v0  ;;  %v1188_v4 = vsel %vm1186_vm0, %v2753_v0, 0  ;;  %vm252_vm2 = vsmask.f32 7424  ;;  %vm623_vm4 = vcmask 130048   ;;  %vm1153_vm5 = vcmask 195584  }
   0xd   : > { %2627 = vmatpush3.bf16.msra.mxu0 %v1188_v4  ;;  %2736 = vmatpush3.bf16.msra.mxu1 %v1188_v4  ;;  %s2571_s5 = sshll.u32 %s3887_s13, 8 }
   0xe   : > { %s2806_s19 = scalar_lea.vmem %s3880_s0, %s2742_s14  ;;  %s3755_s10 = scalar_lea.vmem %s3883_s3, %s2571_s5 }
   0xf   : > { %v2439_v1 = vld [vmem:[%s2806_s19 + $0xf0] sm:$0xff]  ;;  %v2440_v2 = vld [vmem:[%s2806_s19 + $0xf8] sm:$0xff]  ;;  %v2441_v3 = vld [vmem:[%s2806_s19 + $0x100] sm:$0x3] }
  0x10   : > { %v2814_v5 = vpack.c.bf16 %v2440_v2, %v2439_v1  ;;  %v727_v6 = vpack.c.bf16 %v2441_v3, %v2441_v3  ;;  %v2436_v7 = vld [vmem:[%s2806_s19 + $0xd8] sm:$0xff]  ;;  %v2437_v8 = vld [vmem:[%s2806_s19 + $0xe0] sm:$0xff]  ;;  %v2438_v9 = vld [vmem:[%s2806_s19 + $0xe8] sm:$0x3] }
  0x11   : > { %v2819_v10 = vpack.c.bf16 %v2437_v8, %v2436_v7  ;;  %v725_v11 = vpack.c.bf16 %v2438_v9, %v2438_v9  ;;  %v2415_v12 = vld [vmem:[%s2806_s19 + $0x30] sm:$0xff]  ;;  %v2416_v13 = vld [vmem:[%s2806_s19 + $0x38] sm:$0xff]  ;;  %v2417_v14 = vld [vmem:[%s2806_s19 + $0x40] sm:$0x3] }
  0x12   : > { %v991_v15 = vrot.slane %v2814_v5, 1  ;;  %v992_v16 = vrot.slane %v727_v6, 1  ;;  %v2825_v17 = vpack.c.bf16 %v2416_v13, %v2415_v12  ;;  %v711_v18 = vpack.c.bf16 %v2417_v14, %v2417_v14  ;;  %v2412_v19 = vld [vmem:[%s2806_s19 + $0x18] sm:$0xff]  ;;  %v2413_v20 = vld [vmem:[%s2806_s19 + $0x20] sm:$0xff]  ;;  %v2414_v21 = vld [vmem:[%s2806_s19 + $0x28] sm:$0x3] }
  0x13   : > { %v3884_v22 = vrot.slane %v2819_v10, 1  ;;  %v989_v23 = vrot.slane %v725_v11, 1  ;;  %v2831_v24 = vpack.c.bf16 %v2413_v20, %v2412_v19  ;;  %v709_v25 = vpack.c.bf16 %v2414_v21, %v2414_v21  ;;  %v2442_v42 = vld [vmem:[%s2806_s19 + $0x108] sm:$0xff]  ;;  %v2443_v43 = vld [vmem:[%s2806_s19 + $0x110] sm:$0xff]  ;;  %v2444_v48 = vld [vmem:[%s2806_s19 + $0x118] sm:$0x3] }
  0x14   : > { %v993_v26 = vsel %vm477_vm1, %v991_v15, %v992_v16  ;;  %v2835_v27 = vrot.slane %v2825_v17, 1  ;;  %v968_v28 = vrot.slane %v711_v18, 1  ;;  %v837_v29 = vshrl.u32 %v2819_v10, 16  ;;  %v2445_v53 = vld [vmem:[%s2806_s19 + $0x120] sm:$0xff]  ;;  %v2446_v54 = vld [vmem:[%s2806_s19 + $0x128] sm:$0xff] }
  0x15   : > { %1062 = vrot.lane.b32.xlu0 %v993_v26, %s2767_s20  ;;  %v990_v30 = vsel %vm477_vm1, %v3884_v22, %v989_v23  ;;  %v964_v31 = vrot.slane %v2831_v24, 1  ;;  %v965_v32 = vrot.slane %v709_v25, 1  ;;  %v839_v33 = vshll.u32 %v2819_v10, 16  ;;  %v2447_v63 = vld [vmem:[%s2806_s19 + $0x130] sm:$0x3]  ;;  %v2418_v9 = vld [vmem:[%s2806_s19 + $0x48] sm:$0xff] }
  0x16   : > { %1060 = vrot.lane.b32.xlu1 %v990_v30, %s2767_s20  ;;  %v969_v34 = vsel %vm477_vm1, %v2835_v27, %v968_v28  ;;  %v844_v35 = vshll.u32 %v725_v11, 16  ;;  %v741_v36 = vshrl.u32 %v2831_v24, 16  ;;  %v743_v37 = vshll.u32 %v2831_v24, 16  ;;  %v2419_v11 = vld [vmem:[%s2806_s19 + $0x50] sm:$0xff]  ;;  %v2420_v16 = vld [vmem:[%s2806_s19 + $0x58] sm:$0x3] }
  0x17   : > { %v966_v38 = vsel %vm477_vm1, %v964_v31, %v965_v32  ;;  %v841_v39 = vrot.slane %v839_v33, 1  ;;  %v748_v40 = vshll.u32 %v709_v25, 16  ;;  %v849_v41 = vshrl.u32 %v2814_v5, 16  ;;  %v2421_v32 = vld [vmem:[%s2806_s19 + $0x60] sm:$0xff]  ;;  %v2422_v33 = vld [vmem:[%s2806_s19 + $0x68] sm:$0xff] }
  0x18   : > { %v846_v44 = vrot.slane %v844_v35, 1  ;;  %v745_v45 = vrot.slane %v743_v37, 1  ;;  %v851_v46 = vshll.u32 %v2814_v5, 16  ;;  %v856_v47 = vshll.u32 %v727_v6, 16 }
  0x19   : > { %1044 = vrot.lane.b32.xlu0 %v966_v38, %s2767_s20  ;;  %v2858_v49 = vor.u32 %v841_v39, %v837_v29  ;;  %v750_v50 = vrot.slane %v748_v40, 1  ;;  %v753_v51 = vshrl.u32 %v2825_v17, 16  ;;  %v755_v52 = vshll.u32 %v2825_v17, 16  ;;  %v2448_v39 = vld [vmem:[%s2806_s19 + $0x138] sm:$0xff]  ;;  %v2449_v40 = vld [vmem:[%s2806_s19 + $0x140] sm:$0xff] }
  0x1a   : > { %1046 = vrot.lane.b32.xlu1 %v969_v34, %s2767_s20  ;;  %v2865_v55 = vor.u32 %v745_v45, %v741_v36  ;;  %v853_v56 = vrot.slane %v851_v46, 1  ;;  %v858_v57 = vrot.slane %v856_v47, 1  ;;  %v760_v58 = vshll.u32 %v711_v18, 16  ;;  %v2423_v34 = vld [vmem:[%s2806_s19 + $0x70] sm:$0x3] }
  0x1b   : > { %v847_v59 = vsel %vm252_vm2, %v2858_v49, %v846_v44  ;;  %v757_v60 = vrot.slane %v755_v52, 1  ;;  %v2869_v61 = vpack.c.bf16 %v2443_v43, %v2442_v42  ;;  %v729_v62 = vpack.c.bf16 %v2444_v48, %v2444_v48 }
  0x1c   : > { %v751_v0 = vsel %vm252_vm2, %v2865_v55, %v750_v50  ;;  %v854_v1 = vor.u32 %v853_v56, %v849_v41  ;;  %v762_v2 = vrot.slane %v760_v58, 1  ;;  %v2874_v3 = vpack.c.bf16 %v2446_v54, %v2445_v53  ;;  %v2754_v41 = vld [vmem:[%s3881_s1 + $0xc] sm:$0xff]   ;;  %v2450_v50 = vld [vmem:[%s2806_s19 + $0x148] sm:$0x3] }
  0x1d   : > { %1028 = vrot.lane.b32.xlu0 %v847_v59, %s2768_s21  ;;  %v2877_v4 = vor.u32 %v757_v60, %v753_v51  ;;  %v861_v6 = vshrl.u32 %v2869_v61, 16  ;;  %v863_v7 = vshll.u32 %v2869_v61, 16  ;;  %v868_v8 = vshll.u32 %v729_v62, 16  ;;  %2628 = vmatprep.subr.bf16.mxu0 %v2754_v41  ;;  %v2451_v60 = vld [vmem:[%s2806_s19 + $0x150] sm:$0xff] }
  0x1e   : > { %1012 = vrot.lane.b32.xlu1 %v751_v0, %s2768_s21  ;;  %v859_v12 = vsel %vm252_vm2, %v854_v1, %v858_v57  ;;  %v731_v13 = vpack.c.bf16 %v2447_v63, %v2447_v63  ;;  %v873_v14 = vshrl.u32 %v2874_v3, 16  ;;  %v875_v15 = vshll.u32 %v2874_v3, 16  ;;  %2735 = vmatprep.subr.bf16.mxu1 %v2754_v41 }
  0x1f   : > { %v763_v18 = vsel %vm252_vm2, %v2877_v4, %v762_v2  ;;  %v865_v19 = vrot.slane %v863_v7, 1  ;;  %v870_v20 = vrot.slane %v868_v8, 1  ;;  %v2890_v25 = vpack.c.bf16 %v2419_v11, %v2418_v9  ;;  %2629 = vmatpush3.bf16.msra.mxu0 %v2754_v41  ;;  %2737 = vmatpush3.bf16.msra.mxu1 %v2754_v41 }
  0x20   : > { %v877_v21 = vrot.slane %v875_v15, 1  ;;  %v880_v23 = vshll.u32 %v731_v13, 16  ;;  %v994_v28 = vrot.slane %v2869_v61, 1  ;;  %v995_v29 = vrot.slane %v729_v62, 1  ;;  %v2452_v62 = vld [vmem:[%s2806_s19 + $0x158] sm:$0xff] }
  0x21   : > { %1030 = vrot.lane.b32.xlu0 %v859_v12, %s2768_s21  ;;  %v866_v26 = vor.u32 %v865_v19, %v861_v6  ;;  %v2894_v30 = vpack.c.bf16 %v2420_v16, %v2420_v16  ;;  %v997_v37 = vrot.slane %v2874_v3, 1  ;;  %v998_v38 = vrot.slane %v731_v13, 1  ;;  %v2453_v6 = vld [vmem:[%s2806_s19 + $0x160] sm:$0x3]  ;;  %v2424_v16 = vld [vmem:[%s2806_s19 + $0x78] sm:$0xff] }
  0x22   : > { %1014 = vrot.lane.b32.xlu1 %v763_v18, %s2768_s21  ;;  %v878_v35 = vor.u32 %v877_v21, %v873_v14  ;;  %v882_v36 = vrot.slane %v880_v23, 1  ;;  %v765_v43 = vshrl.u32 %v2890_v25, 16  ;;  %v767_v44 = vshll.u32 %v2890_v25, 16  ;;  %v2425_v18 = vld [vmem:[%s2806_s19 + $0x80] sm:$0xff] }
  0x23   : > { %v871_v42 = vsel %vm252_vm2, %v866_v26, %v870_v20  ;;  %v772_v45 = vshll.u32 %v2894_v30, 16  ;;  %v2911_v47 = vpack.c.bf16 %v2422_v33, %v2421_v32  ;;  %v715_v48 = vpack.c.bf16 %v2423_v34, %v2423_v34  ;;  %v2426_v26 = vld [vmem:[%s2806_s19 + $0x88] sm:$0x3]  ;;  %v2427_v34 = vld [vmem:[%s2806_s19 + $0x90] sm:$0xff] }
  0x24   : > { %v883_v46 = vsel %vm252_vm2, %v878_v35, %v882_v36  ;;  %v996_v51 = vsel %vm477_vm1, %v994_v28, %v995_v29  ;;  %v769_v52 = vrot.slane %v767_v44, 1  ;;  %v2916_v54 = vpack.c.bf16 %v2449_v40, %v2448_v39  ;;  %v2428_v35 = vld [vmem:[%s2806_s19 + $0x98] sm:$0xff]  ;;  %v2429_v40 = vld [vmem:[%s2806_s19 + $0xa0] sm:$0x3] }
  0x25   : > { %1032 = vrot.lane.b32.xlu0 %v871_v42, %s2768_s21  ;;  %v774_v53 = vrot.slane %v772_v45, 1  ;;  %v999_v56 = vsel %vm477_vm1, %v997_v37, %v998_v38  ;;  %v777_v57 = vshrl.u32 %v2911_v47, 16  ;;  %v779_v58 = vshll.u32 %v2911_v47, 16 }
  0x26   : > { %1034 = vrot.lane.b32.xlu1 %v883_v46, %s2768_s21  ;;  %v784_v59 = vshll.u32 %v715_v48, 16  ;;  %v2924_v63 = vor.u32 %v769_v52, %v765_v43  ;;  %v2927_v0 = vrot.slane %v2890_v25, 1  ;;  %v971_v1 = vrot.slane %v2894_v30, 1 }
  0x27   : > { %v2930_v2 = vpack.c.bf16 %v2450_v50, %v2450_v50  ;;  %v781_v7 = vrot.slane %v779_v58, 1  ;;  %v2934_v9 = vrot.slane %v2911_v47, 1  ;;  %v887_v11 = vshll.u32 %v2916_v54, 16 }
  0x28   : > { %v786_v8 = vrot.slane %v784_v59, 1  ;;  %v775_v12 = vsel %vm252_vm2, %v2924_v63, %v774_v53  ;;  %v974_v13 = vrot.slane %v715_v48, 1  ;;  %v885_v14 = vshrl.u32 %v2916_v54, 16  ;;  %v2454_v53 = vld [vmem:[%s2806_s19 + $0x168] sm:$0xff]  ;;  %v2457_v59 = vld [vmem:[%s2806_s19 + $0x180] sm:$0xff] }
  0x29   : > { %1064 = vrot.lane.b32.xlu0 %v996_v51, %s2767_s20  ;;  %v2941_v15 = vpack.c.bf16 %v2452_v62, %v2451_v60  ;;  %v2946_v19 = vor.u32 %v781_v7, %v777_v57  ;;  %v889_v20 = vrot.slane %v887_v11, 1  ;;  %v892_v21 = vshll.u32 %v2930_v2, 16  ;;  %v2458_v60 = vld [vmem:[%s2806_s19 + $0x188] sm:$0xff] }
  0x2a   : > { %1016 = vrot.lane.b32.xlu1 %v775_v12, %s2768_s21  ;;  %v2949_v23 = vpack.c.bf16 %v2453_v6, %v2453_v6  ;;  %v2957_v33 = vpack.c.bf16 %v2425_v18, %v2424_v16  ;;  %v972_v36 = vsel %vm477_vm1, %v2927_v0, %v971_v1  ;;  %v975_v37 = vsel %vm477_vm1, %v2934_v9, %v974_v13 }
  0x2b   : > { %v897_v28 = vshrl.u32 %v2941_v15, 16  ;;  %v899_v29 = vshll.u32 %v2941_v15, 16  ;;  %v787_v30 = vsel %vm252_vm2, %v2946_v19, %v786_v8  ;;  %v2966_v39 = vpack.c.bf16 %v2426_v26, %v2426_v26  ;;  %v2456_v8 = vld [vmem:[%s2806_s19 + $0x178] sm:$0x3] }
  0x2c   : > { %v904_v32 = vshll.u32 %v2949_v23, 16  ;;  %v890_v41 = vor.u32 %v889_v20, %v885_v14  ;;  %v894_v42 = vrot.slane %v892_v21, 1  ;;  %v791_v44 = vshll.u32 %v2957_v33, 16  ;;  %v2459_v14 = vld [vmem:[%s2806_s19 + $0x190] sm:$0x3] }
  0x2d   : > { %1066 = vrot.lane.b32.xlu0 %v999_v56, %s2767_s20  ;;  %v901_v38 = vrot.slane %v899_v29, 1  ;;  %v789_v46 = vshrl.u32 %v2957_v33, 16  ;;  %v796_v48 = vshll.u32 %v2966_v39, 16  ;;  %v2973_v50 = vpack.c.bf16 %v2428_v35, %v2427_v34  ;;  %v2455_v56 = vld [vmem:[%s2806_s19 + $0x170] sm:$0xff] }
  0x2e   : > { %1018 = vrot.lane.b32.xlu1 %v787_v30, %s2768_s21  ;;  %v906_v43 = vrot.slane %v904_v32, 1  ;;  %v793_v51 = vrot.slane %v791_v44, 1  ;;  %v719_v52 = vpack.c.bf16 %v2429_v40, %v2429_v40  ;;  %v1000_v57 = vrot.slane %v2916_v54, 1  ;;  %v2431_v29 = vld [vmem:[%s2806_s19 + $0xb0] sm:$0xff]  ;;  %v2432_v40 = vld [vmem:[%s2806_s19 + $0xb8] sm:$0x3] }
  0x2f   : > { %v902_v45 = vor.u32 %v901_v38, %v897_v28  ;;  %v1001_v58 = vrot.slane %v2930_v2, 1  ;;  %v895_v62 = vsel %vm252_vm2, %v890_v41, %v894_v42  ;;  %v798_v6 = vrot.slane %v796_v48, 1  ;;  %v2430_v28 = vld [vmem:[%s2806_s19 + $0xa8] sm:$0xff] }
  0x30   : > { %v803_v7 = vshll.u32 %v2973_v50, 16  ;;  %v2987_v11 = vor.u32 %v793_v51, %v789_v46  ;;  %v801_v12 = vshrl.u32 %v2973_v50, 16  ;;  %v808_v13 = vshll.u32 %v719_v52, 16  ;;  %v2434_v46 = vld [vmem:[%s2806_s19 + $0xc8] sm:$0xff] }
  0x31   : > { %1048 = vrot.lane.b32.xlu0 %v972_v36, %s2767_s20  ;;  %v907_v1 = vsel %vm252_vm2, %v902_v45, %v906_v43  ;;  %v2990_v2 = vpack.c.bf16 %v2455_v56, %v2454_v53  ;;  %v1003_v16 = vrot.slane %v2941_v15, 1  ;;  %v1004_v18 = vrot.slane %v2949_v23, 1  ;;  %v2433_v45 = vld [vmem:[%s2806_s19 + $0xc0] sm:$0xff] }
  0x32   : > { %1050 = vrot.lane.b32.xlu1 %v975_v37, %s2767_s20  ;;  %v805_v20 = vrot.slane %v803_v7, 1  ;;  %v2995_v21 = vpack.c.bf16 %v2458_v60, %v2457_v59  ;;  %v2998_v26 = vpack.c.bf16 %v2456_v8, %v2456_v8  ;;  %v1002_v30 = vsel %vm477_vm1, %v1000_v57, %v1001_v58 }
  0x33   : > { %v911_v32 = vshll.u32 %v2990_v2, 16  ;;  %v3005_v34 = vpack.c.bf16 %v2459_v14, %v2459_v14  ;;  %v799_v35 = vsel %vm252_vm2, %v2987_v11, %v798_v6  ;;  %v810_v37 = vrot.slane %v808_v13, 1 }
  0x34   : > { %v923_v23 = vshll.u32 %v2995_v21, 16  ;;  %v3010_v36 = vor.u32 %v805_v20, %v801_v12  ;;  %v3013_v38 = vrot.slane %v2957_v33, 1  ;;  %v1005_v41 = vsel %vm477_vm1, %v1003_v16, %v1004_v18 }
  0x35   : > { %1036 = vrot.lane.b32.xlu0 %v895_v62, %s2768_s21  ;;  %v977_v42 = vrot.slane %v2966_v39, 1  ;;  %v3019_v43 = vrot.slane %v2973_v50, 1  ;;  %v3021_v44 = vpack.c.bf16 %v2431_v29, %v2430_v28  ;;  %v980_v48 = vrot.slane %v719_v52, 1 }
  0x36   : > { %1038 = vrot.lane.b32.xlu1 %v907_v1, %s2768_s21  ;;  %v909_v51 = vshrl.u32 %v2990_v2, 16  ;;  %v916_v53 = vshll.u32 %v2998_v26, 16  ;;  %v921_v56 = vshrl.u32 %v2995_v21, 16  ;;  %v913_v39 = vrot.slane %v911_v32, 1  ;;  %v2435_v1 = vld [vmem:[%s2806_s19 + $0xd0] sm:$0x3] }
  0x37   : > { %v925_v57 = vrot.slane %v923_v23, 1  ;;  %v928_v58 = vshll.u32 %v3005_v34, 16  ;;  %v3031_v59 = vpack.c.bf16 %v2432_v40, %v2432_v40  ;;  %v811_v60 = vsel %vm252_vm2, %v3010_v36, %v810_v37  ;;  %v173_v32 = vld [vmem:[%s2806_s19 + $0x8] sm:$0xff]  ;;  %v2501_v37 = vld [vmem:[%s2806_s19 + $0x40] sm:$0x3] }
  0x38   : > { %v815_v62 = vshll.u32 %v3021_v44, 16  ;;  %v3036_v52 = vpack.c.bf16 %v2434_v46, %v2433_v45  ;;  %v978_v6 = vsel %vm477_vm1, %v3013_v38, %v977_v42  ;;  %v981_v7 = vsel %vm477_vm1, %v3019_v43, %v980_v48  ;;  %v177_v45 = vld [vmem:[%s2806_s19 + $0x28] sm:$0x3] }
  0x39   : > { %1068 = vrot.lane.b32.xlu0 %v1002_v30, %s2767_s20  ;;  %v918_v8 = vrot.slane %v916_v53, 1  ;;  %v914_v12 = vor.u32 %v913_v39, %v909_v51  ;;  %v926_v13 = vor.u32 %v925_v57, %v921_v56  ;;  %v930_v14 = vrot.slane %v928_v58, 1  ;;  %v172_v30 = vld [vmem:[%s2806_s19] sm:$0xff] }
  0x3a   : > { %1020 = vrot.lane.b32.xlu1 %v799_v35, %s2768_s21  ;;  %v820_v16 = vshll.u32 %v3031_v59, 16  ;;  %v813_v18 = vshrl.u32 %v3021_v44, 16  ;;  %v817_v20 = vrot.slane %v815_v62, 1  ;;  %v3047_v28 = vpack.c.bf16 %v2435_v1, %v2435_v1  ;;  %v3077_v1 = vld [vmem:[%s3881_s1 + $0x8] ss:$0 sps:$4 sm:$0xff]  }
  0x3b   : > { %v827_v29 = vshll.u32 %v3036_v52, 16  ;;  %v1006_v23 = vrot.slane %v2990_v2, 1  ;;  %v1007_v35 = vrot.slane %v2998_v26, 1  ;;  %v919_v40 = vsel %vm252_vm2, %v914_v12, %v918_v8  ;;  %v174_v26 = vld [vmem:[%s2806_s19 + $0x10] sm:$0x3]  ;;  %2740 = vmatprep.subr.msk.bf16.mxu1 %vm1186_vm0, %v3077_v1 }
  0x3c   : > { %v822_v42 = vrot.slane %v820_v16, 1  ;;  %v3060_v46 = vpack.c.bf16 %v173_v32, %v172_v30  ;;  %v3062_v48 = vor.u32 %v817_v20, %v813_v18  ;;  %v825_v51 = vshrl.u32 %v3036_v52, 16  ;;  %v2507_v18 = vld [vmem:[%s2806_s19 + $0x70] sm:$0x3] }
  0x3d   : > { %1070 = vrot.lane.b32.xlu0 %v1005_v41, %s2767_s20  ;;  %v931_v41 = vsel %vm252_vm2, %v926_v13, %v930_v14  ;;  %v829_v53 = vrot.slane %v827_v29, 1  ;;  %v832_v56 = vshll.u32 %v3047_v28, 16  ;;  %v1009_v39 = vrot.slane %v2995_v21, 1 }
  0x3e   : > { %1022 = vrot.lane.b32.xlu1 %v811_v60, %s2768_s21  ;;  %v1010_v57 = vrot.slane %v3005_v34, 1  ;;  %v3069_v58 = vpack.c.bf16 %v2501_v37, %v2501_v37  ;;  %v180_v60 = vld [vmem:[%s2806_s19 + $0x40] sm:$0x3]  ;;  %v1008_v62 = vsel %vm477_vm1, %v1006_v23, %v1007_v35  ;;  %v256_v34 = vshll.u32 %v3060_v46, 16 }
  0x3f   : > { %v823_v12 = vsel %vm252_vm2, %v3062_v48, %v822_v42  ;;  %v3088_v13 = vor.u32 %v829_v53, %v825_v51  ;;  %v834_v14 = vrot.slane %v832_v56, 1  ;;  %v225_v16 = vpack.c.bf16 %v180_v60, %v180_v60  ;;  %v186_v51 = vld [vmem:[%s2806_s19 + $0x70] sm:$0x3] }
  0x40   : > { %v1862_v8 = vrot.slane %v3069_v58, 1  ;;  %v1011_v20 = vsel %vm477_vm1, %v1009_v39, %v1010_v57  ;;  %v3095_v29 = vrot.slane %v3021_v44, 1  ;;  %v983_v30 = vrot.slane %v3031_v59, 1  ;;  %v2504_v39 = vld [vmem:[%s2806_s19 + $0x58] sm:$0x3] }
  0x41   : > { %1052 = vrot.lane.b32.xlu0 %v978_v6, %s2767_s20  ;;  %v3080_v6 = vpack.c.bf16 %v177_v45, %v177_v45  ;;  %v3104_v23 = vrot.slane %v3036_v52, 1  ;;  %v986_v35 = vrot.slane %v3047_v28, 1  ;;  %v285_v37 = vshll.u32 %v225_v16, 16 }
  0x42   : > { %1054 = vrot.lane.b32.xlu1 %v981_v7, %s2767_s20  ;;  %v3082_v7 = vpack.c.bf16 %v174_v26, %v174_v26  ;;  %v3100_v32 = vsel %vm477_vm1, %v2835_v27, %v1862_v8  ;;  %v258_v42 = vrot.slane %v256_v34, 1  ;;  %v1610_v45 = vpack.c.bf16 %v2507_v18, %v2507_v18 }
  0x43   : > { %v835_v53 = vsel %vm252_vm2, %v3088_v13, %v834_v14  ;;  %v273_v56 = vshll.u32 %v3080_v6, 16  ;;  %v287_v26 = vrot.slane %v285_v37, 1  ;;  %v987_v34 = vsel %vm477_vm1, %v3104_v23, %v986_v35  ;;  %v2513_v14 = vld [vmem:[%s2806_s19 + $0xa0] sm:$0x3] }
  0x44   : > { %v261_v59 = vshll.u32 %v3082_v7, 16  ;;  %v1669_v57 = vshll.u32 %v1610_v45, 16  ;;  %v1868_v60 = vrot.slane %v1610_v45, 1  ;;  %v3139_v37 = vpack.c.bf16 %v2504_v39, %v2504_v39 }
  0x45   : > { %1040 = vrot.lane.b32.xlu0 %v919_v40, %s2768_s21  ;;  %v485_v40 = vrot.slane %v225_v16, 1  ;;  %v3126_v8 = vsel %vm252_vm2, %v2877_v4, %v287_v26  ;;  %v275_v35 = vrot.slane %v273_v56, 1  ;;  %v479_v56 = vrot.slane %v3082_v7, 1 }
  0x46   : > { %1042 = vrot.lane.b32.xlu1 %v931_v41, %s2768_s21  ;;  %v254_v41 = vshrl.u32 %v3060_v46, 16  ;;  %v263_v18 = vrot.slane %v261_v59, 1  ;;  %v192_v59 = vld [vmem:[%s2806_s19 + $0xa0] sm:$0x3] }
  0x47   : > { %v3116_v28 = vsel %vm477_vm1, %v2835_v27, %v485_v40  ;;  %v3132_v27 = vld [vmem:[%s3881_s1 + $0x20] ss:$0 sps:$4 sm:$0xff]  }
  0x48   : > { %v259_v16 = vor.u32 %v258_v42, %v254_v41  ;;  %2741 = vmatprep.subr.msk.bf16.mxu0 %vm1186_vm0, %v3132_v27  ;;  %v1614_v42 = vpack.c.bf16 %v2513_v14, %v2513_v14 }
  0x49   : > { %1072 = vrot.lane.b32.xlu0 %v1008_v62, %s2767_s20  ;;  %v984_v62 = vsel %vm477_vm1, %v3095_v29, %v983_v30  ;;  %v3137_v30 = vsel %vm477_vm1, %v2934_v9, %v1868_v60  ;;  %v1645_v60 = vshll.u32 %v3069_v58, 16 }
  0x4a   : > { %1024 = vrot.lane.b32.xlu1 %v823_v12, %s2768_s21  ;;  %v229_v12 = vpack.c.bf16 %v186_v51, %v186_v51  ;;  %v482_v51 = vrot.slane %v3080_v6, 1  ;;  %v2522_v6 = vld [vmem:[%s2806_s19 + $0xe8] sm:$0x3]  ;;  %v1874_v14 = vrot.slane %v1614_v42, 1 }
  0x4b   : > { %v3173_v58 = vpack.c.bf16 %v2522_v6, %v2522_v6 }
  0x4c   : > { %v309_v40 = vshll.u32 %v229_v12, 16  ;;  %v491_v45 = vrot.slane %v229_v12, 1  ;;  %v1693_v12 = vshll.u32 %v1614_v42, 16 }
  0x4d   : > { %1074 = vrot.lane.b32.xlu0 %v1011_v20, %s2767_s20  ;;  %v1671_v20 = vrot.slane %v1669_v57, 1  ;;  %v264_v57 = vsel %vm252_vm2, %v259_v16, %v263_v18 }
  0x4e   : > { %1026 = vrot.lane.b32.xlu1 %v835_v53, %s2768_s21  ;;  %v478_v53 = vrot.slane %v3060_v46, 1  ;;  %v311_v26 = vrot.slane %v309_v40, 1  ;;  %v3154_v39 = vsel %vm477_vm1, %v2934_v9, %v491_v45  ;;  %v233_v9 = vpack.c.bf16 %v192_v59, %v192_v59  ;;  %v2519_v40 = vld [vmem:[%s2806_s19 + $0xd0] sm:$0x3]  ;;  %v183_v45 = vld [vmem:[%s2806_s19 + $0x58] sm:$0x3] }
  0x4f   : > { %v3146_v41 = vsel %vm252_vm2, %v2946_v19, %v1671_v20  ;;  %v1657_v20 = vshll.u32 %v3139_v37, 16  ;;  %v1695_v22 = vrot.slane %v1693_v12, 1  ;;  %v1729_v59 = vshll.u32 %v3173_v58, 16 }
  0x50   : > { %v3165_v7 = vsel %vm252_vm2, %v2946_v19, %v311_v26  ;;  %v480_v19 = vsel %vm477_vm1, %v478_v53, %v479_v56  ;;  %v333_v16 = vshll.u32 %v233_v9, 16  ;;  %v497_v18 = vrot.slane %v233_v9, 1 }
  0x51   : > { %1056 = vrot.lane.b32.xlu0 %v984_v62, %s2767_s20  ;;  %v276_v62 = vsel %vm252_vm2, %v2865_v55, %v275_v35  ;;  %v483_v55 = vsel %vm477_vm1, %v964_v31, %v482_v51  ;;  %v1647_v35 = vrot.slane %v1645_v60, 1  ;;  %v3183_v42 = vsel %vm252_vm2, %v3010_v36, %v1695_v22 }
  0x52   : > { %1058 = vrot.lane.b32.xlu1 %v987_v34, %s2767_s20  ;;  %v3171_v34 = vsel %vm477_vm1, %v3019_v43, %v1874_v14  ;;  %v1618_v26 = vpack.c.bf16 %v2519_v40, %v2519_v40  ;;  %v1659_v6 = vrot.slane %v1657_v20, 1  ;;  %v335_v12 = vrot.slane %v333_v16, 1  ;;  %v198_v14 = vld [vmem:[%s2806_s19 + $0xd0] sm:$0x3] }
  0x53   : > { %v3188_v31 = vsel %vm477_vm1, %v3019_v43, %v497_v18  ;;  %v1731_v51 = vrot.slane %v1729_v59, 1  ;;  %v1648_v60 = vsel %vm252_vm2, %v2877_v4, %v1647_v35 }
  0x54   : > { %v1717_v53 = vshll.u32 %v1618_v26, 16  ;;  %v1880_v56 = vrot.slane %v1618_v26, 1  ;;  %v3194_v22 = vsel %vm252_vm2, %v3010_v36, %v335_v12  ;;  %v1660_v9 = vsel %vm252_vm2, %v2924_v63, %v1659_v6 }
  0x55   : > { %526 = vrot.lane.b32.xlu0 %v264_v57, %s2768_s21  ;;  %v227_v57 = vpack.c.bf16 %v183_v45, %v183_v45  ;;  %v3201_v43 = vsel %vm252_vm2, %v2858_v49, %v1731_v51  ;;  %v1865_v36 = vrot.slane %v3139_v37, 1  ;;  %v237_v45 = vpack.c.bf16 %v198_v14, %v198_v14  ;;  %v2516_v14 = vld [vmem:[%s2806_s19 + $0xb8] sm:$0x3] }
  0x56   : > { %528 = vrot.lane.b32.xlu1 %v276_v62, %s2768_s21  ;;  %v1719_v62 = vrot.slane %v1717_v53, 1  ;;  %v3205_v20 = vsel %vm477_vm1, %v3104_v23, %v1880_v56  ;;  %v189_v53 = vld [vmem:[%s2806_s19 + $0x88] sm:$0x3] }
  0x57   : > { %v297_v40 = vshll.u32 %v227_v57, 16  ;;  %v357_v49 = vshll.u32 %v237_v45, 16  ;;  %v1866_v16 = vsel %vm477_vm1, %v2927_v0, %v1865_v36  ;;  %v488_v12 = vrot.slane %v227_v57, 1  ;;  %v195_v36 = vld [vmem:[%s2806_s19 + $0xb8] sm:$0x3] }
  0x58   : > { %v3213_v4 = vsel %vm252_vm2, %v3088_v13, %v1719_v62 }
  0x59   : > { %558 = vrot.lane.b32.xlu0 %v480_v19, %s2767_s20  ;;  %v503_v19 = vrot.slane %v237_v45, 1  ;;  %v299_v18 = vrot.slane %v297_v40, 1  ;;  %v359_v37 = vrot.slane %v357_v49, 1  ;;  %v200_v49 = vld [vmem:[%s2806_s19 + $0xe0] sm:$0xff] }
  0x5a   : > { %560 = vrot.lane.b32.xlu1 %v483_v55, %s2767_s20  ;;  %v2510_v55 = vld [vmem:[%s2806_s19 + $0x88] sm:$0x3] }
  0x5b   : > { %v1612_v35 = vpack.c.bf16 %v2510_v55, %v2510_v55  ;;  %v3221_v59 = vsel %vm477_vm1, %v3104_v23, %v503_v19  ;;  %v3227_v26 = vsel %vm252_vm2, %v3088_v13, %v359_v37  ;;  %v300_v6 = vsel %vm252_vm2, %v2924_v63, %v299_v18  ;;  %v201_v18 = vld [vmem:[%s2806_s19 + $0xe8] sm:$0x3] }
  0x5c   : > { %v231_v13 = vpack.c.bf16 %v189_v53, %v189_v53  ;;  %v2526_v53 = vld [vmem:[%s2806_s19 + $0x108] sm:$0xff] }
  0x5d   : > { %1909 = vrot.lane.b32.xlu0 %v1648_v60, %s2768_s21  ;;  %v1681_v51 = vshll.u32 %v1612_v35, 16  ;;  %v1871_v57 = vrot.slane %v1612_v35, 1  ;;  %v1616_v60 = vpack.c.bf16 %v2516_v14, %v2516_v14  ;;  %v2525_v14 = vld [vmem:[%s2806_s19 + $0x100] sm:$0x3] }
  0x5e   : > { %1911 = vrot.lane.b32.xlu1 %v1660_v9, %s2768_s21  ;;  %v321_v56 = vshll.u32 %v231_v13, 16  ;;  %v494_v62 = vrot.slane %v231_v13, 1 }
  0x5f   : > { %v1683_v23 = vrot.slane %v1681_v51, 1  ;;  %v1705_v9 = vshll.u32 %v1616_v60, 16  ;;  %v1877_v45 = vrot.slane %v1616_v60, 1  ;;  %v3311_v60 = vpack.c.bf16 %v2525_v14, %v2525_v14 }
  0x61   : > { %1941 = vrot.lane.b32.xlu0 %v3100_v32, %s2767_s20  ;;  %v489_v32 = vsel %vm477_vm1, %v2927_v0, %v488_v12  ;;  %v1684_v63 = vsel %vm252_vm2, %v2987_v11, %v1683_v23  ;;  %v1872_v0 = vsel %vm477_vm1, %v3013_v38, %v1871_v57  ;;  %v1707_v40 = vrot.slane %v1705_v9, 1  ;;  %v2523_v12 = vld [vmem:[%s2806_s19 + $0xf0] sm:$0xff] }
  0x62   : > { %1943 = vrot.lane.b32.xlu1 %v1866_v16, %s2767_s20 }
  0x65   : > { %530 = vrot.lane.b32.xlu0 %v3126_v8, %s2768_s21  ;;  %v323_v8 = vrot.slane %v321_v56, 1 }
  0x66   : > { %532 = vrot.lane.b32.xlu1 %v300_v6, %s2768_s21 }
  0x69   : > { %562 = vrot.lane.b32.xlu0 %v3116_v28, %s2767_s20  ;;  %v324_v28 = vsel %vm252_vm2, %v2987_v11, %v323_v8  ;;  %v1708_v11 = vsel %vm252_vm2, %v3062_v48, %v1707_v40  ;;  %v2528_v8 = vld [vmem:[%s2806_s19 + $0x118] sm:$0x3] }
  0x6a   : > { %564 = vrot.lane.b32.xlu1 %v489_v32, %s2767_s20  ;;  %v2527_v32 = vld [vmem:[%s2806_s19 + $0x110] sm:$0xff] }
  0x6b   : > { %v3300_v56 = vpack.c.bf16 %v2527_v32, %v2526_v53  ;;  %v2756_v53 = vld [vmem:[%s3881_s1] sm:$0xff]  }
  0x6d   : > { %1913 = vrot.lane.b32.xlu0 %v3146_v41, %s2768_s21  ;;  %v495_v41 = vsel %vm477_vm1, %v3013_v38, %v494_v62  ;;  %v1878_v38 = vsel %vm477_vm1, %v3095_v29, %v1877_v45 }
  0x6e   : > { %1915 = vrot.lane.b32.xlu1 %v1684_v63, %s2768_s21 }
  0x71   : > { %1945 = vrot.lane.b32.xlu0 %v3137_v30, %s2767_s20  ;;  %v235_v30 = vpack.c.bf16 %v195_v36, %v195_v36 }
  0x72   : > { %1947 = vrot.lane.b32.xlu1 %v1872_v0, %s2767_s20 }
  0x73   : > { %v345_v55 = vshll.u32 %v235_v30, 16  ;;  %v500_v19 = vrot.slane %v235_v30, 1 }
  0x75   : > { %534 = vrot.lane.b32.xlu0 %v3165_v7, %s2768_s21  ;;  %v347_v7 = vrot.slane %v345_v55, 1  ;;  %v501_v37 = vsel %vm477_vm1, %v3095_v29, %v500_v19  ;;  %v1746_v19 = vshrl.u32 %v3300_v56, 16 }
  0x76   : > { %536 = vrot.lane.b32.xlu1 %v324_v28, %s2768_s21 }
  0x79   : > { %566 = vrot.lane.b32.xlu0 %v3154_v39, %s2767_s20  ;;  %v199_v39 = vld [vmem:[%s2806_s19 + $0xd8] sm:$0xff] }
  0x7a   : > { %568 = vrot.lane.b32.xlu1 %v495_v41, %s2767_s20  ;;  %v3277_v16 = vpack.c.bf16 %v200_v49, %v199_v39  ;;  %v3314_v41 = vpack.c.bf16 %v2528_v8, %v2528_v8  ;;  %v1741_v49 = vshll.u32 %v3311_v60, 16 }
  0x7c   : > { %v364_v6 = vshll.u32 %v3277_v16, 16  ;;  %v362_v13 = vshrl.u32 %v3277_v16, 16  ;;  %v505_v45 = vrot.slane %v3277_v16, 1 }
  0x7d   : > { %1917 = vrot.lane.b32.xlu0 %v3183_v42, %s2768_s21  ;;  %v348_v42 = vsel %vm252_vm2, %v3062_v48, %v347_v7  ;;  %v2524_v48 = vld [vmem:[%s2806_s19 + $0xf8] sm:$0xff] }
  0x7e   : > { %1919 = vrot.lane.b32.xlu1 %v1708_v11, %s2768_s21  ;;  %v3296_v23 = vpack.c.bf16 %v2524_v48, %v2523_v12  ;;  %v366_v63 = vrot.slane %v364_v6, 1  ;;  %v207_v48 = vld [vmem:[%s2806_s19 + $0x118] sm:$0x3] }
  0x7f   : > { %v3361_v8 = vpack.c.bf16 %v207_v48, %v207_v48 }
  0x80   : > { %v1736_v28 = vshll.u32 %v3296_v23, 16  ;;  %v367_v9 = vor.u32 %v366_v63, %v362_v13  ;;  %v1734_v7 = vshrl.u32 %v3296_v23, 16  ;;  %v1743_v13 = vrot.slane %v1741_v49, 1 }
  0x81   : > { %1949 = vrot.lane.b32.xlu0 %v3171_v34, %s2767_s20  ;;  %v3285_v34 = vpack.c.bf16 %v201_v18, %v201_v18 }
  0x82   : > { %1951 = vrot.lane.b32.xlu1 %v1878_v38, %s2767_s20  ;;  %v1738_v39 = vrot.slane %v1736_v28, 1  ;;  %v2532_v28 = vld [vmem:[%s2806_s19 + $0x138] sm:$0xff] }
  0x83   : > { %v369_v57 = vshll.u32 %v3285_v34, 16  ;;  %v506_v55 = vrot.slane %v3285_v34, 1  ;;  %v204_v34 = vld [vmem:[%s2806_s19 + $0x100] sm:$0x3] }
  0x84   : > { %v3357_v63 = vpack.c.bf16 %v204_v34, %v204_v34 }
  0x85   : > { %538 = vrot.lane.b32.xlu0 %v3194_v22, %s2768_s21  ;;  %v1883_v22 = vrot.slane %v3173_v58, 1  ;;  %v3885_v58 = vrot.slane %v2819_v10, 1  ;;  %v371_v36 = vrot.slane %v369_v57, 1 }
  0x86   : > { %540 = vrot.lane.b32.xlu1 %v348_v42, %s2768_s21 }
  0x87   : > { %v1063_v35 = vpop.permute.xlu0 %1062  ;;  %v372_v42 = vsel %vm252_vm2, %v367_v9, %v371_v36  ;;  %v1888_v9 = vrot.slane %v3300_v56, 1  ;;  %v1889_v36 = vrot.slane %v3314_v41, 1 }
  0x88   : > { %v1061_v51 = vpop.permute.xlu1 %1060 }
  0x89   : > { %570 = vrot.lane.b32.xlu0 %v3188_v31, %s2767_s20  ;;  %v1884_v31 = vsel %vm477_vm1, %v3885_v58, %v1883_v22  ;;  %v2529_v58 = vld [vmem:[%s2806_s19 + $0x120] sm:$0xff] }
  0x8a   : > { %572 = vrot.lane.b32.xlu1 %v501_v37, %s2767_s20  ;;  %v1753_v37 = vshll.u32 %v3314_v41, 16 }
  0x8b   : > { %v1045_v29 = vpop.permute.xlu0 %1044 }
  0x8c   : > { %v1047_v0 = vpop.permute.xlu1 %1046  ;;  %v1755_v14 = vrot.slane %v1753_v37, 1 }
  0x8d   : > { %1921 = vrot.lane.b32.xlu0 %v3213_v4, %s2768_s21  ;;  %v1748_v4 = vshll.u32 %v3300_v56, 16 }
  0x8e   : > { %1923 = vrot.lane.b32.xlu1 %v3201_v43, %s2768_s21 }
  0x8f   : > { %v1029_v62 = vpop.permute.xlu0 %1028  ;;  %v1750_v18 = vrot.slane %v1748_v4, 1  ;;  %v1885_v4 = vrot.slane %v3296_v23, 1 }
  0x90   : > { %v1093_v40 = vsel %vm590_vm3, %v2819_v10, %v1029_v62  ;;  %v1013_v43 = vpop.permute.xlu1 %1012  ;;  %v2533_v62 = vld [vmem:[%s2806_s19 + $0x140] sm:$0xff] }
  0x91   : > { %v1077_v30 = vsel %vm590_vm3, %v2831_v24, %v1013_v43  ;;  %1953 = vrot.lane.b32.xlu0 %v3205_v20, %s2767_s20  ;;  %v1125_v11 = vsel %vm623_vm4, %v1093_v40, %v1061_v51  ;;  %v1393_v51 = vsel %vm1186_vm0, %v3077_v1, 0  ;;  %v2758_v1 = vld [vmem:[%s3881_s1 + $0x18] sm:$0xff]   ;;  %v1751_v57 = vor.u32 %v1750_v18, %v1746_v19 }
  0x92   : > { %1955 = vrot.lane.b32.xlu1 %v1884_v31, %s2767_s20  ;;  %v1109_v38 = vsel %vm623_vm4, %v1077_v30, %v1045_v29  ;;  %2646 = vmatprep.mubr.msk.bf16.mxu1 %vm1153_vm5, %v1125_v11  ;;  %v2530_v31 = vld [vmem:[%s2806_s19 + $0x128] sm:$0xff]  ;;  %v1886_v43 = vrot.slane %v3311_v60, 1  ;;  %v381_v30 = vshll.u32 %v3357_v63, 16 }
  0x93   : > { %2630 = vmatprep.mubr.msk.bf16.mxu0 %vm1153_vm5, %v1109_v38  ;;  %v1031_v20 = vpop.permute.xlu0 %1030  ;;  %v3376_v11 = vpack.c.bf16 %v2530_v31, %v2529_v58  ;;  %v1756_v41 = vsel %vm252_vm2, %v1751_v57, %v1755_v14  ;;  %v3382_v38 = vpack.c.bf16 %v2533_v62, %v2532_v28  ;;  %v2534_v60 = vld [vmem:[%s2806_s19 + $0x148] sm:$0x3]  ;;  %v210_v58 = vld [vmem:[%s2806_s19 + $0x130] sm:$0x3] }
  0x94   : > { %v1095_v6 = vsel %vm590_vm3, %v2814_v5, %v1031_v20  ;;  %v1015_v12 = vpop.permute.xlu1 %1014  ;;  %v2083_v5 = vsel %vm1186_vm0, %v3132_v27, 0  ;;  %v507_v27 = vsel %vm477_vm1, %v505_v45, %v506_v55  ;;  %v393_v55 = vshll.u32 %v3361_v8, 16  ;;  %v213_v28 = vld [vmem:[%s2806_s19 + $0x148] sm:$0x3] }
  0x95   : > { %v1079_v32 = vsel %vm590_vm3, %v2825_v17, %v1015_v12  ;;  %542 = vrot.lane.b32.xlu0 %v3227_v26, %s2768_s21  ;;  %v1127_v22 = vsel %vm623_vm4, %v1095_v6, %v1063_v35  ;;  %v1739_v26 = vor.u32 %v1738_v39, %v1734_v7  ;;  %v2531_v7 = vld [vmem:[%s2806_s19 + $0x130] sm:$0x3]  ;;  %v1887_v20 = vsel %vm477_vm1, %v1885_v4, %v1886_v43 }
  0x96   : > { %544 = vrot.lane.b32.xlu1 %v372_v42, %s2768_s21  ;;  %v1111_v29 = vsel %vm623_vm4, %v1079_v32, %v1047_v0  ;;  %2647 = vmatmul.mubr.msk.bf16.vlgmr.msra.gmra.mxu1 %vm1153_vm5, %v1127_v22  ;;  %v383_v42 = vrot.slane %v381_v30, 1  ;;  %v3394_v19 = vpack.c.bf16 %v2531_v7, %v2531_v7  ;;  %v1760_v18 = vshll.u32 %v3376_v11, 16  ;;  %v2535_v7 = vld [vmem:[%s2806_s19 + $0x150] sm:$0xff] }
  0x97   : > { %2631 = vmatmul.mubr.msk.bf16.vlgmr.msra.gmra.mxu0 %vm1153_vm5, %v1111_v29  ;;  %v1033_v35 = vpop.permute.xlu0 %1032  ;;  %2663 = vmatpush3.bf16.msra.mxu1 %v1393_v51  ;;  %v1744_v40 = vsel %vm252_vm2, %v1739_v26, %v1743_v13  ;;  %v395_v6 = vrot.slane %v393_v55, 1  ;;  %v3399_v12 = vpack.c.bf16 %v2534_v60, %v2534_v60  ;;  %v1772_v48 = vshll.u32 %v3382_v38, 16  ;;  %v2538_v60 = vld [vmem:[%s2806_s19 + $0x168] sm:$0xff] }
  0x98   : > { %v1035_v0 = vpop.permute.xlu1 %1034  ;;  %2664 = vmatprep.subr.bf16.mxu1 %v2756_v53  ;;  %2699 = vmatpush3.bf16.msra.mxu0 %v2083_v5  ;;  %v512_v32 = vrot.slane %v3361_v8, 1  ;;  %v509_v22 = vrot.slane %v3357_v63, 1  ;;  %v384_v5 = vsel %vm252_vm2, %v1739_v26, %v383_v42  ;;  %v1762_v29 = vrot.slane %v1760_v18, 1 }
  0x99   : > { %574 = vrot.lane.b32.xlu0 %v3221_v59, %s2767_s20  ;;  %2700 = vmatprep.subr.bf16.mxu0 %v2758_v1  ;;  %v1097_v59 = vsel %vm590_vm3, %v2869_v61, %v1033_v35  ;;  %v1890_v61 = vsel %vm477_vm1, %v1888_v9, %v1889_v36  ;;  %v1099_v37 = vsel %vm590_vm3, %v2874_v3, %v1035_v0  ;;  %v1770_v3 = vshrl.u32 %v3382_v38, 16 }
  0x9a   : > { %576 = vrot.lane.b32.xlu1 %v507_v27, %s2767_s20  ;;  %v1765_v13 = vshll.u32 %v3394_v19, 16  ;;  %v396_v14 = vsel %vm252_vm2, %v1751_v57, %v395_v6  ;;  %v1774_v8 = vrot.slane %v1772_v48, 1  ;;  %v1777_v63 = vshll.u32 %v3399_v12, 16 }
  0x9b   : > { %v1065_v45 = vpop.permute.xlu0 %1064  ;;  %2665 = vmatpush3.bf16.msra.mxu1 %v2756_v53  ;;  %v510_v57 = vsel %vm477_vm1, %v1885_v4, %v509_v22  ;;  %v3427_v43 = vpack.c.bf16 %v210_v58, %v210_v58  ;;  %v3432_v55 = vpack.c.bf16 %v213_v28, %v213_v28  ;;  %v1894_v4 = vrot.slane %v3382_v38, 1 }
  0x9c   : > { %v1129_v39 = vsel %vm623_vm4, %v1097_v59, %v1065_v45  ;;  %v1017_v49 = vpop.permute.xlu1 %1016  ;;  %2701 = vmatpush3.bf16.msra.mxu0 %v2758_v1  ;;  %v1758_v1 = vshrl.u32 %v3376_v11, 16  ;;  %v513_v59 = vsel %vm477_vm1, %v1888_v9, %v512_v32  ;;  %v1775_v45 = vor.u32 %v1774_v8, %v1770_v3  ;;  %v2537_v32 = vld [vmem:[%s2806_s19 + $0x160] sm:$0x3] }
  0x9d   : > { %2650 = vmatprep.mubr.msk.bf16.mxu1 %vm1153_vm5, %v1129_v39  ;;  %1925 = vrot.lane.b32.xlu0 %v1744_v40, %s2768_s21  ;;  %v1081_v35 = vsel %vm590_vm3, %v2890_v25, %v1017_v49  ;;  %v1767_v40 = vrot.slane %v1765_v13, 1  ;;  %v2536_v39 = vld [vmem:[%s2806_s19 + $0x158] sm:$0xff]  ;;  %v1891_v42 = vrot.slane %v3376_v11, 1  ;;  %v1892_v18 = vrot.slane %v3394_v19, 1 }
  0x9e   : > { %1927 = vrot.lane.b32.xlu1 %v1756_v41, %s2768_s21  ;;  %v1763_v36 = vor.u32 %v1762_v29, %v1758_v1  ;;  %v1779_v41 = vrot.slane %v1777_v63, 1  ;;  %v3464_v29 = vpack.c.bf16 %v2537_v32, %v2537_v32  ;;  %v2541_v32 = vld [vmem:[%s2806_s19 + $0x180] sm:$0xff] }
  0x9f   : > { %v1067_v34 = vpop.permute.xlu0 %1066  ;;  %v1893_v19 = vsel %vm477_vm1, %v1891_v42, %v1892_v18 }
  0xa0   : > { %v1131_v51 = vsel %vm623_vm4, %v1099_v37, %v1067_v34  ;;  %v1019_v53 = vpop.permute.xlu1 %1018  ;;  %v1768_v9 = vsel %vm252_vm2, %v1763_v36, %v1767_v40  ;;  %v405_v37 = vshll.u32 %v3427_v43, 16  ;;  %v3446_v34 = vpack.c.bf16 %v2536_v39, %v2535_v7  ;;  %v216_v7 = vld [vmem:[%s2806_s19 + $0x160] sm:$0x3] }
  0xa1   : > { %2651 = vmatmul.mubr.msk.bf16.gmra.mxu1 %vm1153_vm5, %v1131_v51  ;;  %1957 = vrot.lane.b32.xlu0 %v1887_v20, %s2767_s20  ;;  %v1083_v31 = vsel %vm590_vm3, %v2911_v47, %v1019_v53  ;;  %v1895_v20 = vrot.slane %v3399_v12, 1  ;;  %v1780_v51 = vsel %vm252_vm2, %v1775_v45, %v1779_v41  ;;  %v417_v12 = vshll.u32 %v3432_v55, 16 }
  0xa2   : > { %1959 = vrot.lane.b32.xlu1 %v1890_v61, %s2767_s20  ;;  %v2539_v61 = vld [vmem:[%s2806_s19 + $0x170] sm:$0xff]  ;;  %v407_v1 = vrot.slane %v405_v37, 1  ;;  %v1784_v13 = vshll.u32 %v3446_v34, 16  ;;  %v1789_v40 = vshll.u32 %v3464_v29, 16  ;;  %v3497_v18 = vpack.c.bf16 %v216_v7, %v216_v7 }
  0xa3   : > { %v1049_v27 = vpop.permute.xlu0 %1048  ;;  %v3452_v53 = vpack.c.bf16 %v2539_v61, %v2538_v60  ;;  %v219_v60 = vld [vmem:[%s2806_s19 + $0x178] sm:$0x3] }
  0xa4   : > { %v1113_v26 = vsel %vm623_vm4, %v1081_v35, %v1049_v27  ;;  %v1051_v0 = vpop.permute.xlu1 %1050  ;;  %v408_v28 = vsel %vm252_vm2, %v1763_v36, %v407_v1  ;;  %v1897_v1 = vrot.slane %v3446_v34, 1 }
  0xa5   : > { %v1115_v62 = vsel %vm623_vm4, %v1083_v31, %v1051_v0  ;;  %2634 = vmatprep.mubr.msk.bf16.mxu0 %vm1153_vm5, %v1113_v26  ;;  %546 = vrot.lane.b32.xlu0 %v384_v5, %s2768_s21  ;;  %v2540_v5 = vld [vmem:[%s2806_s19 + $0x178] sm:$0x3]  ;;  %v1796_v63 = vshll.u32 %v3452_v53, 16  ;;  %v518_v26 = vrot.slane %v3432_v55, 1  ;;  %v515_v0 = vrot.slane %v3427_v43, 1 }
  0xa6   : > { %548 = vrot.lane.b32.xlu1 %v396_v14, %s2768_s21  ;;  %2635 = vmatmul.mubr.msk.bf16.gmra.mxu0 %vm1153_vm5, %v1115_v62  ;;  %v419_v14 = vrot.slane %v417_v12, 1  ;;  %v3469_v8 = vpack.c.bf16 %v2540_v5, %v2540_v5  ;;  %v1782_v62 = vshrl.u32 %v3446_v34, 16  ;;  %v3502_v12 = vpack.c.bf16 %v219_v60, %v219_v60  ;;  %v2544_v5 = vld [vmem:[%s2806_s19 + $0x198] sm:$0xff] }
  0xa7   : > { %v1037_v30 = vpop.permute.xlu0 %1036  ;;  %v1798_v55 = vrot.slane %v1796_v63, 1 }
  0xa8   : > { %v1039_v49 = vpop.permute.xlu1 %1038  ;;  %v1101_v6 = vsel %vm590_vm3, %v2916_v54, %v1037_v30  ;;  %v1896_v54 = vsel %vm477_vm1, %v1894_v4, %v1895_v20  ;;  %v420_v41 = vsel %vm252_vm2, %v1775_v45, %v419_v14  ;;  %v1801_v43 = vshll.u32 %v3469_v8, 16 }
  0xa9   : > { %578 = vrot.lane.b32.xlu0 %v510_v57, %s2767_s20  ;;  %v1103_v35 = vsel %vm590_vm3, %v2941_v15, %v1039_v49  ;;  %v1794_v15 = vshrl.u32 %v3452_v53, 16  ;;  %v1786_v57 = vrot.slane %v1784_v13, 1  ;;  %v516_v45 = vsel %vm477_vm1, %v1891_v42, %v515_v0 }
  0xaa   : > { %580 = vrot.lane.b32.xlu1 %v513_v59, %s2767_s20  ;;  %v1900_v42 = vrot.slane %v3452_v53, 1  ;;  %v1898_v13 = vrot.slane %v3464_v29, 1 }
  0xab   : > { %v1069_v48 = vpop.permute.xlu0 %1068  ;;  %v1787_v20 = vor.u32 %v1786_v57, %v1782_v62 }
  0xac   : > { %v1133_v22 = vsel %vm623_vm4, %v1101_v6, %v1069_v48  ;;  %v1021_v3 = vpop.permute.xlu1 %1020  ;;  %v519_v6 = vsel %vm477_vm1, %v1894_v4, %v518_v26  ;;  %v1799_v48 = vor.u32 %v1798_v55, %v1794_v15  ;;  %v2543_v26 = vld [vmem:[%s2806_s19 + $0x190] sm:$0x3] }
  0xad   : > { %2654 = vmatprep.mubr.msk.bf16.mxu1 %vm1153_vm5, %v1133_v22  ;;  %1929 = vrot.lane.b32.xlu0 %v1768_v9, %s2768_s21  ;;  %v1085_v30 = vsel %vm590_vm3, %v2957_v33, %v1021_v3  ;;  %v1791_v9 = vrot.slane %v1789_v40, 1  ;;  %v2542_v22 = vld [vmem:[%s2806_s19 + $0x188] sm:$0xff]  ;;  %v1634_v57 = vpack.c.bf16 %v2543_v26, %v2543_v26 }
  0xae   : > { %1931 = vrot.lane.b32.xlu1 %v1780_v51, %s2768_s21  ;;  %v1803_v51 = vrot.slane %v1801_v43, 1 }
  0xaf   : > { %v1071_v27 = vpop.permute.xlu0 %1070  ;;  %v1792_v4 = vsel %vm252_vm2, %v1787_v20, %v1791_v9  ;;  %v1813_v9 = vshll.u32 %v1634_v57, 16 }
  0xb0   : > { %v1135_v58 = vsel %vm623_vm4, %v1103_v35, %v1071_v27  ;;  %v1023_v31 = vpop.permute.xlu1 %1022  ;;  %v429_v35 = vshll.u32 %v3497_v18, 16  ;;  %v3516_v27 = vpack.c.bf16 %v2542_v22, %v2541_v32 }
  0xb1   : > { %2655 = vmatmul.mubr.msk.bf16.gmra.mxu1 %vm1153_vm5, %v1135_v58  ;;  %1961 = vrot.lane.b32.xlu0 %v1893_v19, %s2767_s20  ;;  %v1087_v39 = vsel %vm590_vm3, %v2973_v50, %v1023_v31  ;;  %v1901_v19 = vrot.slane %v3469_v8, 1  ;;  %v1804_v58 = vsel %vm252_vm2, %v1799_v48, %v1803_v51  ;;  %v441_v8 = vshll.u32 %v3502_v12, 16 }
  0xb2   : > { %1963 = vrot.lane.b32.xlu1 %v1896_v54, %s2767_s20  ;;  %v2545_v54 = vld [vmem:[%s2806_s19 + $0x1a0] sm:$0xff]  ;;  %v431_v62 = vrot.slane %v429_v35, 1  ;;  %v1808_v40 = vshll.u32 %v3516_v27, 16 }
  0xb3   : > { %v1053_v59 = vpop.permute.xlu0 %1052  ;;  %v3522_v31 = vpack.c.bf16 %v2545_v54, %v2544_v5  ;;  %v1902_v29 = vsel %vm477_vm1, %v1900_v42, %v1901_v19  ;;  %v1815_v54 = vrot.slane %v1813_v9, 1 }
  0xb4   : > { %v1117_v36 = vsel %vm623_vm4, %v1085_v30, %v1053_v59  ;;  %v1055_v49 = vpop.permute.xlu1 %1054 }
  0xb5   : > { %v1119_v61 = vsel %vm623_vm4, %v1087_v39, %v1055_v49  ;;  %2638 = vmatprep.mubr.msk.bf16.mxu0 %vm1153_vm5, %v1117_v36  ;;  %550 = vrot.lane.b32.xlu0 %v408_v28, %s2768_s21  ;;  %v2546_v28 = vld [vmem:[%s2806_s19 + $0x1a8] sm:$0x3]  ;;  %v1820_v43 = vshll.u32 %v3522_v31, 16  ;;  %v524_v36 = vrot.slane %v3502_v12, 1  ;;  %v521_v49 = vrot.slane %v3497_v18, 1 }
  0xb6   : > { %552 = vrot.lane.b32.xlu1 %v420_v41, %s2768_s21  ;;  %2639 = vmatmul.mubr.msk.bf16.gmra.mxu0 %vm1153_vm5, %v1119_v61  ;;  %v443_v41 = vrot.slane %v441_v8, 1  ;;  %v1636_v55 = vpack.c.bf16 %v2546_v28, %v2546_v28  ;;  %v1818_v60 = vshrl.u32 %v3522_v31, 16  ;;  %v1806_v61 = vshrl.u32 %v3516_v27, 16 }
  0xb7   : > { %v1041_v37 = vpop.permute.xlu0 %1040  ;;  %v1822_v32 = vrot.slane %v1820_v43, 1  ;;  %v1904_v8 = vrot.slane %v1634_v57, 1 }
  0xb8   : > { %v1043_v3 = vpop.permute.xlu1 %1042  ;;  %v1105_v14 = vsel %vm590_vm3, %v2990_v2, %v1041_v37  ;;  %v1899_v2 = vsel %vm477_vm1, %v1897_v1, %v1898_v13  ;;  %v444_v51 = vsel %vm252_vm2, %v1799_v48, %v443_v41  ;;  %v1825_v12 = vshll.u32 %v1636_v55, 16 }
  0xb9   : > { %582 = vrot.lane.b32.xlu0 %v516_v45, %s2767_s20  ;;  %v1107_v30 = vsel %vm590_vm3, %v2995_v21, %v1043_v3  ;;  %v432_v21 = vsel %vm252_vm2, %v1787_v20, %v431_v62  ;;  %v1810_v45 = vrot.slane %v1808_v40, 1  ;;  %v522_v48 = vsel %vm477_vm1, %v1897_v1, %v521_v49 }
  0xba   : > { %584 = vrot.lane.b32.xlu1 %v519_v6, %s2767_s20  ;;  %v1823_v13 = vor.u32 %v1822_v32, %v1818_v60  ;;  %v1827_v35 = vrot.slane %v1825_v12, 1 }
  0xbb   : > { %v1073_v63 = vpop.permute.xlu0 %1072  ;;  %v1811_v5 = vor.u32 %v1810_v45, %v1806_v61 }
  0xbc   : > { %v1137_v0 = vsel %vm623_vm4, %v1105_v14, %v1073_v63  ;;  %v1025_v15 = vpop.permute.xlu1 %1024 }
  0xbd   : > { %2658 = vmatprep.mubr.msk.bf16.mxu1 %vm1153_vm5, %v1137_v0  ;;  %1933 = vrot.lane.b32.xlu0 %v1792_v4, %s2768_s21  ;;  %v1089_v37 = vsel %vm590_vm3, %v3021_v44, %v1025_v15  ;;  %v525_v4 = vsel %vm477_vm1, %v1900_v42, %v524_v36  ;;  %v1816_v63 = vsel %vm252_vm2, %v1811_v5, %v1815_v54  ;;  %v1906_v42 = vrot.slane %v3522_v31, 1 }
  0xbe   : > { %1935 = vrot.lane.b32.xlu1 %v1804_v58, %s2768_s21  ;;  %v1903_v58 = vrot.slane %v3516_v27, 1  ;;  %v1828_v0 = vsel %vm252_vm2, %v1823_v13, %v1827_v35  ;;  %v1907_v15 = vrot.slane %v1636_v55, 1 }
  0xbf   : > { %v1075_v59 = vpop.permute.xlu0 %1074 }
  0xc0   : > { %v1139_v7 = vsel %vm623_vm4, %v1107_v30, %v1075_v59  ;;  %v1027_v39 = vpop.permute.xlu1 %1026  ;;  %v1908_v40 = vsel %vm477_vm1, %v1906_v42, %v1907_v15 }
  0xc1   : > { %2659 = vmatmul.mubr.msk.bf16.gmra.mxu1 %vm1153_vm5, %v1139_v7  ;;  %1965 = vrot.lane.b32.xlu0 %v1899_v2, %s2767_s20  ;;  %v1091_v18 = vsel %vm590_vm3, %v3036_v52, %v1027_v39 }
  0xc2   : > { %1967 = vrot.lane.b32.xlu1 %v1902_v29, %s2767_s20 }
  0xc3   : > { %v1057_v6 = vpop.permute.xlu0 %1056 }
  0xc4   : > { %v1121_v22 = vsel %vm623_vm4, %v1089_v37, %v1057_v6  ;;  %v1059_v3 = vpop.permute.xlu1 %1058 }
  0xc5   : > { %v1123_v20 = vsel %vm623_vm4, %v1091_v18, %v1059_v3  ;;  %2642 = vmatprep.mubr.msk.bf16.mxu0 %vm1153_vm5, %v1121_v22  ;;  %554 = vrot.lane.b32.xlu0 %v432_v21, %s2768_s21 }
  0xc6   : > { %556 = vrot.lane.b32.xlu1 %v444_v51, %s2768_s21  ;;  %2643 = vmatmul.mubr.msk.bf16.gmra.mxu0 %vm1153_vm5, %v1123_v20 }
  0xc7   : > { %v527_v19 = vpop.permute.xlu0 %526 }
  0xc8   : > { %v529_v14 = vpop.permute.xlu1 %528  ;;  %v592_v1 = vsel %vm590_vm3, %v3060_v46, %v527_v19  ;;  %v1905_v46 = vsel %vm477_vm1, %v1903_v58, %v1904_v8 }
  0xc9   : > { %586 = vrot.lane.b32.xlu0 %v522_v48, %s2767_s20  ;;  %v594_v28 = vsel %vm590_vm3, %v2831_v24, %v529_v14 }
  0xca   : > { %588 = vrot.lane.b32.xlu1 %v525_v4, %s2767_s20 }
  0xcb   : > { %v559_v26 = vpop.permute.xlu0 %558 }
  0xcc   : > { %v561_v29 = vpop.permute.xlu1 %560  ;;  %v625_v2 = vsel %vm623_vm4, %v592_v1, %v559_v26 }
  0xcd   : > { %v627_v62 = vsel %vm623_vm4, %v594_v28, %v561_v29  ;;  %1937 = vrot.lane.b32.xlu0 %v1816_v63, %s2768_s21  ;;  %2666 = vmatprep.mubr.msk.bf16.mxu1 %vm1153_vm5, %v625_v2 }
  0xce   : > { %1939 = vrot.lane.b32.xlu1 %v1828_v0, %s2768_s21  ;;  %2667 = vmatmul.mubr.msk.bf16.vlgmr.msra.gmra.mxu1 %vm1153_vm5, %v627_v62 }
  0xcf   : > { %v1910_v57 = vpop.permute.xlu0 %1909 }
  0xd0   : > { %v1912_v30 = vpop.permute.xlu1 %1911  ;;  %v1974_v24 = vsel %vm590_vm3, %v2825_v17, %v1910_v57 }
  0xd1   : > { %1969 = vrot.lane.b32.xlu0 %v1905_v46, %s2767_s20  ;;  %v1976_v41 = vsel %vm590_vm3, %v2890_v25, %v1912_v30 }
  0xd2   : > { %1971 = vrot.lane.b32.xlu1 %v1908_v40, %s2767_s20 }
  0xd3   : > { %v1942_v59 = vpop.permute.xlu0 %1941 }
  0xd4   : > { %v1944_v55 = vpop.permute.xlu1 %1943  ;;  %v2006_v43 = vsel %vm623_vm4, %v1974_v24, %v1942_v59 }
  0xd5   : > { %v2008_v7 = vsel %vm623_vm4, %v1976_v41, %v1944_v55  ;;  %2702 = vmatprep.mubr.msk.bf16.mxu0 %vm1153_vm5, %v2006_v43 }
  0xd6   : > { %2703 = vmatmul.mubr.msk.bf16.vlgmr.msra.gmra.mxu0 %vm1153_vm5, %v2008_v7 }
  0xd7   : > { %v531_v39 = vpop.permute.xlu0 %530 }
  0xd8   : > { %v533_v36 = vpop.permute.xlu1 %532  ;;  %v596_v49 = vsel %vm590_vm3, %v2825_v17, %v531_v39 }
  0xd9   : > { %v598_v21 = vsel %vm590_vm3, %v2890_v25, %v533_v36 }
  0xdb   : > { %v563_v60 = vpop.permute.xlu0 %562 }
  0xdc   : > { %v565_v61 = vpop.permute.xlu1 %564  ;;  %v629_v45 = vsel %vm623_vm4, %v596_v49, %v563_v60 }
  0xdd   : > { %v631_v9 = vsel %vm623_vm4, %v598_v21, %v565_v61  ;;  %2670 = vmatprep.mubr.msk.bf16.mxu1 %vm1153_vm5, %v629_v45 }
  0xde   : > { %2671 = vmatmul.mubr.msk.bf16.gmra.mxu1 %vm1153_vm5, %v631_v9 }
  0xdf   : > { %v1914_v37 = vpop.permute.xlu0 %1913 }
  0xe0   : > { %v1916_v6 = vpop.permute.xlu1 %1915  ;;  %v1978_v51 = vsel %vm590_vm3, %v2911_v47, %v1914_v37 }
  0xe1   : > { %v1980_v17 = vsel %vm590_vm3, %v2957_v33, %v1916_v6 }
  0xe3   : > { %v1946_v32 = vpop.permute.xlu0 %1945 }
  0xe4   : > { %v1948_v12 = vpop.permute.xlu1 %1947  ;;  %v2010_v25 = vsel %vm623_vm4, %v1978_v51, %v1946_v32 }
  0xe5   : > { %v2012_v18 = vsel %vm623_vm4, %v1980_v17, %v1948_v12  ;;  %2706 = vmatprep.mubr.msk.bf16.mxu0 %vm1153_vm5, %v2010_v25 }
  0xe6   : > { %2707 = vmatmul.mubr.msk.bf16.gmra.mxu0 %vm1153_vm5, %v2012_v18 }
  0xe7   : > { %v535_v22 = vpop.permute.xlu0 %534 }
  0xe8   : > { %v537_v3 = vpop.permute.xlu1 %536  ;;  %v600_v20 = vsel %vm590_vm3, %v2911_v47, %v535_v22 }
  0xe9   : > { %v602_v5 = vsel %vm590_vm3, %v2957_v33, %v537_v3 }
  0xeb   : > { %v567_v48 = vpop.permute.xlu0 %566 }
  0xec   : > { %v569_v54 = vpop.permute.xlu1 %568  ;;  %v633_v19 = vsel %vm623_vm4, %v600_v20, %v567_v48 }
  0xed   : > { %v635_v4 = vsel %vm623_vm4, %v602_v5, %v569_v54  ;;  %2674 = vmatprep.mubr.msk.bf16.mxu1 %vm1153_vm5, %v633_v19 }
  0xee   : > { %2675 = vmatmul.mubr.msk.bf16.gmra.mxu1 %vm1153_vm5, %v635_v4 }
  0xef   : > { %v1918_v13 = vpop.permute.xlu0 %1917 }
  0xf0   : > { %v1920_v35 = vpop.permute.xlu1 %1919  ;;  %v1982_v14 = vsel %vm590_vm3, %v2973_v50, %v1918_v13 }
  0xf1   : > { %v1984_v47 = vsel %vm590_vm3, %v3021_v44, %v1920_v35 }
  0xf3   : > { %v1950_v63 = vpop.permute.xlu0 %1949 }
  0xf4   : > { %v1952_v58 = vpop.permute.xlu1 %1951  ;;  %v2014_v33 = vsel %vm623_vm4, %v1982_v14, %v1950_v63 }
  0xf5   : > { %v2016_v8 = vsel %vm623_vm4, %v1984_v47, %v1952_v58  ;;  %2710 = vmatprep.mubr.msk.bf16.mxu0 %vm1153_vm5, %v2014_v33 }
  0xf6   : > { %2711 = vmatmul.mubr.msk.bf16.gmra.mxu0 %vm1153_vm5, %v2016_v8 }
  0xf7   : > { %v539_v1 = vpop.permute.xlu0 %538 }
  0xf8   : > { %v541_v26 = vpop.permute.xlu1 %540  ;;  %v604_v0 = vsel %vm590_vm3, %v2973_v50, %v539_v1 }
  0xf9   : > { %v606_v15 = vsel %vm590_vm3, %v3021_v44, %v541_v26 }
  0xfb   : > { %v571_v42 = vpop.permute.xlu0 %570 }
  0xfc   : > { %v573_v28 = vpop.permute.xlu1 %572  ;;  %v637_v29 = vsel %vm623_vm4, %v604_v0, %v571_v42 }
  0xfd   : > { %v639_v2 = vsel %vm623_vm4, %v606_v15, %v573_v28  ;;  %2678 = vmatprep.mubr.msk.bf16.mxu1 %vm1153_vm5, %v637_v29 }
  0xfe   : > { %2679 = vmatmul.mubr.msk.bf16.gmra.mxu1 %vm1153_vm5, %v639_v2 }
  0xff   : > { %v1922_v62 = vpop.permute.xlu0 %1921 }
 0x100   : > { %v1924_v46 = vpop.permute.xlu1 %1923  ;;  %v1986_v57 = vsel %vm590_vm3, %v3036_v52, %v1922_v62 }
 0x101   : > { %v1988_v50 = vsel %vm590_vm3, %v2819_v10, %v1924_v46 }
 0x103   : > { %v1954_v40 = vpop.permute.xlu0 %1953 }
 0x104   : > { %v1956_v30 = vpop.permute.xlu1 %1955  ;;  %v2018_v44 = vsel %vm623_vm4, %v1986_v57, %v1954_v40 }
 0x105   : > { %v2020_v24 = vsel %vm623_vm4, %v1988_v50, %v1956_v30  ;;  %2714 = vmatprep.mubr.msk.bf16.mxu0 %vm1153_vm5, %v2018_v44 }
 0x106   : > { %2715 = vmatmul.mubr.msk.bf16.gmra.mxu0 %vm1153_vm5, %v2020_v24 }
 0x107   : > { %v543_v59 = vpop.permute.xlu0 %542 }
 0x108   : > { %v545_v41 = vpop.permute.xlu1 %544  ;;  %v608_v55 = vsel %vm590_vm3, %v3036_v52, %v543_v59 }
 0x109   : > { %v610_v7 = vsel %vm590_vm3, %v3277_v16, %v545_v41 }
 0x10b   : > { %v575_v43 = vpop.permute.xlu0 %574 }
 0x10c   : > { %v577_v39 = vpop.permute.xlu1 %576  ;;  %v641_v10 = vsel %vm623_vm4, %v608_v55, %v575_v43 }
 0x10d   : > { %v643_v36 = vsel %vm623_vm4, %v610_v7, %v577_v39  ;;  %2682 = vmatprep.mubr.msk.bf16.mxu1 %vm1153_vm5, %v641_v10 }
 0x10e   : > { %2683 = vmatmul.mubr.msk.bf16.gmra.mxu1 %vm1153_vm5, %v643_v36 }
 0x10f   : > { %v1926_v49 = vpop.permute.xlu0 %1925 }
 0x110   : > { %v1928_v60 = vpop.permute.xlu1 %1927  ;;  %v1990_v21 = vsel %vm590_vm3, %v3296_v23, %v1926_v49 }
 0x111   : > { %v1992_v52 = vsel %vm590_vm3, %v3300_v56, %v1928_v60 }
 0x113   : > { %v1958_v61 = vpop.permute.xlu0 %1957 }
 0x114   : > { %v1960_v45 = vpop.permute.xlu1 %1959  ;;  %v2022_v16 = vsel %vm623_vm4, %v1990_v21, %v1958_v61 }
 0x115   : > { %v2024_v9 = vsel %vm623_vm4, %v1992_v52, %v1960_v45  ;;  %2718 = vmatprep.mubr.msk.bf16.mxu0 %vm1153_vm5, %v2022_v16 }
 0x116   : > { %2719 = vmatmul.mubr.msk.bf16.gmra.mxu0 %vm1153_vm5, %v2024_v9 }
 0x117   : > { %v547_v37 = vpop.permute.xlu0 %546 }
 0x118   : > { %v549_v6 = vpop.permute.xlu1 %548  ;;  %v612_v51 = vsel %vm590_vm3, %v3296_v23, %v547_v37 }
 0x119   : > { %v614_v17 = vsel %vm590_vm3, %v3300_v56, %v549_v6 }
 0x11b   : > { %v579_v32 = vpop.permute.xlu0 %578 }
 0x11c   : > { %v581_v12 = vpop.permute.xlu1 %580  ;;  %v645_v25 = vsel %vm623_vm4, %v612_v51, %v579_v32 }
 0x11d   : > { %v647_v18 = vsel %vm623_vm4, %v614_v17, %v581_v12  ;;  %2686 = vmatprep.mubr.msk.bf16.mxu1 %vm1153_vm5, %v645_v25 }
 0x11e   : > { %2687 = vmatmul.mubr.msk.bf16.gmra.mxu1 %vm1153_vm5, %v647_v18 }
 0x11f   : > { %v1930_v22 = vpop.permute.xlu0 %1929 }
 0x120   : > { %v1932_v3 = vpop.permute.xlu1 %1931  ;;  %v1994_v20 = vsel %vm590_vm3, %v3376_v11, %v1930_v22 }
 0x121   : > { %v1996_v23 = vsel %vm590_vm3, %v3382_v38, %v1932_v3 }
 0x123   : > { %v1962_v48 = vpop.permute.xlu0 %1961 }
 0x124   : > { %v1964_v5 = vpop.permute.xlu1 %1963  ;;  %v2026_v56 = vsel %vm623_vm4, %v1994_v20, %v1962_v48 }
 0x125   : > { %v2028_v54 = vsel %vm623_vm4, %v1996_v23, %v1964_v5  ;;  %2722 = vmatprep.mubr.msk.bf16.mxu0 %vm1153_vm5, %v2026_v56 }
 0x126   : > { %2723 = vmatmul.mubr.msk.bf16.gmra.mxu0 %vm1153_vm5, %v2028_v54 }
 0x127   : > { %v551_v19 = vpop.permute.xlu0 %550 }
 0x128   : > { %v553_v4 = vpop.permute.xlu1 %552  ;;  %v616_v13 = vsel %vm590_vm3, %v3376_v11, %v551_v19 }
 0x129   : > { %v618_v14 = vsel %vm590_vm3, %v3382_v38, %v553_v4 }
 0x12b   : > { %v583_v35 = vpop.permute.xlu0 %582 }
 0x12c   : > { %v585_v63 = vpop.permute.xlu1 %584  ;;  %v649_v47 = vsel %vm623_vm4, %v616_v13, %v583_v35 }
 0x12d   : > { %v651_v58 = vsel %vm623_vm4, %v618_v14, %v585_v63  ;;  %2690 = vmatprep.mubr.msk.bf16.mxu1 %vm1153_vm5, %v649_v47  ;;  %v3750_v63 = vld [vmem:[%s3882_s2] ss:$0 sm:$0xff] }
 0x12e   : > { %2691 = vmatmul.mubr.msk.bf16.gmra.mxu1 %vm1153_vm5, %v651_v58 }
 0x12f   : > { %v1934_v33 = vpop.permute.xlu0 %1933 }
 0x130   : > { %v1936_v8 = vpop.permute.xlu1 %1935  ;;  %v1998_v1 = vsel %vm590_vm3, %v3446_v34, %v1934_v33 }
 0x131   : > { %v2000_v11 = vsel %vm590_vm3, %v3452_v53, %v1936_v8 }
 0x133   : > { %v1966_v26 = vpop.permute.xlu0 %1965 }
 0x134   : > { %v1968_v0 = vpop.permute.xlu1 %1967  ;;  %v2030_v38 = vsel %vm623_vm4, %v1998_v1, %v1966_v26 }
 0x135   : > { %v2032_v42 = vsel %vm623_vm4, %v2000_v11, %v1968_v0  ;;  %2726 = vmatprep.mubr.msk.bf16.mxu0 %vm1153_vm5, %v2030_v38 }
 0x136   : > { %2727 = vmatmul.mubr.msk.bf16.gmra.mxu0 %vm1153_vm5, %v2032_v42 }
 0x137   : > { %v555_v15 = vpop.permute.xlu0 %554 }
 0x138   : > { %v557_v28 = vpop.permute.xlu1 %556  ;;  %v620_v29 = vsel %vm590_vm3, %v3446_v34, %v555_v15 }
 0x139   : > { %v622_v62 = vsel %vm590_vm3, %v3452_v53, %v557_v28 }
 0x13b   : > { %v587_v2 = vpop.permute.xlu0 %586 }
 0x13c   : > { %v589_v46 = vpop.permute.xlu1 %588  ;;  %v653_v57 = vsel %vm623_vm4, %v620_v29, %v587_v2 }
 0x13d   : > { %v655_v40 = vsel %vm623_vm4, %v622_v62, %v589_v46  ;;  %2694 = vmatprep.mubr.msk.bf16.mxu1 %vm1153_vm5, %v653_v57 }
 0x13e   : > { %2695 = vmatmul.mubr.msk.bf16.gmra.mxu1 %vm1153_vm5, %v655_v40 }
 0x13f   : > { %v1938_v50 = vpop.permute.xlu0 %1937 }
 0x140   : > { %v1940_v30 = vpop.permute.xlu1 %1939  ;;  %v2002_v44 = vsel %vm590_vm3, %v3516_v27, %v1938_v50 }
 0x141   : > { %v2004_v34 = vsel %vm590_vm3, %v3522_v31, %v1940_v30 }
 0x143   : > { %v1970_v24 = vpop.permute.xlu0 %1969 }
 0x144   : > { %v1972_v59 = vpop.permute.xlu1 %1971  ;;  %v2034_v53 = vsel %vm623_vm4, %v2002_v44, %v1970_v24 }
 0x145   : > { %v2036_v41 = vsel %vm623_vm4, %v2004_v34, %v1972_v59  ;;  %2730 = vmatprep.mubr.msk.bf16.mxu0 %vm1153_vm5, %v2034_v53 }
 0x146   : > { %2731 = vmatmul.mubr.msk.bf16.gmra.mxu0 %vm1153_vm5, %v2036_v41 }
 0x156   : > { %v3698_v55 = vpop.f32.mrf.mxu1 }
 0x157   : > { %v2632_v7 = vpop.f32.mrf.mxu0 }
 0x158   : > { %v3700_v43 = vpop.f32.mrf.mxu1 }
 0x159   : > { %v1224_v27 = vpop.f32.mrf.mxu0 }
 0x15a   : > { %v3702_v39 = vpop.f32.mrf.mxu1 }
 0x15b   : > { %v2633_v36 = vpop.f32.mrf.mxu0 }
 0x15c   : > { %v3704_v10 = vpop.f32.mrf.mxu1 }
 0x15d   : > { %v1227_v60 = vpop.f32.mrf.mxu0 }
 0x161   : > { %v3706_v31 = vpop.f32.mrf.mxu1 }
 0x163   : > { %v3708_v49 = vpop.f32.mrf.mxu1 }
 0x165   : > { %v3710_v61 = vpop.f32.mrf.mxu1 }
 0x166   : > { %v2636_v21 = vpop.f32.mrf.mxu0 }
 0x167   : > { %v3712_v45 = vpop.f32.mrf.mxu1 }
 0x168   : > { %v1240_v52 = vpop.f32.mrf.mxu0 }
 0x16a   : > { %v2637_v9 = vpop.f32.mrf.mxu0 }
 0x16c   : > { %v1243_v6 = vpop.f32.mrf.mxu0 }
 0x171   : > { %v3714_v16 = vpop.f32.mrf.mxu1 }
 0x173   : > { %v3716_v37 = vpop.f32.mrf.mxu1 }
 0x175   : > { %v3720_v32 = vpop.f32.mrf.mxu1 }
 0x176   : > { %v3718_v51 = vpop.f32.mrf.mxu0 }
 0x177   : > { %v3724_v12 = vpop.f32.mrf.mxu1 }
 0x178   : > { %v3722_v17 = vpop.f32.mrf.mxu0 }
 0x17a   : > { %v3728_v18 = vpop.f32.mrf.mxu0 }
 0x17c   : > { %v3732_v3 = vpop.f32.mrf.mxu0 }
 0x181   : > { %v3726_v25 = vpop.f32.mrf.mxu1 }
 0x183   : > { %v3730_v22 = vpop.f32.mrf.mxu1 }
 0x185   : > { %v3734_v20 = vpop.f32.mrf.mxu1 }
 0x186   : > { %v3736_v48 = vpop.f32.mrf.mxu0 }
 0x187   : > { %v3738_v23 = vpop.f32.mrf.mxu1 }
 0x188   : > { %v3740_v5 = vpop.f32.mrf.mxu0 }
 0x18a   : > { %v3742_v54 = vpop.f32.mrf.mxu0 }
 0x18c   : > { %v3744_v4 = vpop.f32.mrf.mxu0 }
 0x18e   : > { %v2668_v56 = vpop.f32.mrf.mxu1 }
 0x18f   : > { %v1438_v35 = vadd.f32 %v2668_v56, %v2632_v7 }
 0x190   : > { %v1429_v19 = vpop.f32.mrf.mxu1 }
 0x191   : > { %v1430_v47 = vadd.f32 %v1429_v19, %v1224_v27 }
 0x192   : > { %v2669_v13 = vpop.f32.mrf.mxu1 }
 0x193   : > { %v1441_v1 = vadd.f32 %v2669_v13, %v2633_v36 }
 0x194   : > { %v1432_v33 = vpop.f32.mrf.mxu1 }
 0x195   : > { %v1433_v38 = vadd.f32 %v1432_v33, %v1227_v60 }
 0x196   : > { %v2704_v14 = vpop.f32.mrf.mxu0 }
 0x197   : > { %v2248_v58 = vadd.f32 %v2704_v14, %v1438_v35 }
 0x198   : > { %v2119_v8 = vpop.f32.mrf.mxu0 }
 0x199   : > { %v2287_v26 = vadd.f32 %v3750_v63, %v2248_v58  ;;  %v2246_v11 = vadd.f32 %v2119_v8, %v1430_v47 }
 0x19a   : > { %v2705_v0 = vpop.f32.mrf.mxu0 }
 0x19b   : > { %2319 = vst.msk [vmem:[%s3755_s10 + $0x10] sm:$0xff] %vm590_vm3, %v2287_v26  ;;  %v2285_v42 = vadd.f32 %v3750_v63, %v2246_v11  ;;  %v2249_v15 = vadd.f32 %v2705_v0, %v1441_v1 }
 0x19c   : > { %v2122_v28 = vpop.f32.mrf.mxu0 }
 0x19d   : > { %2317 = vst.msk [vmem:[%s3755_s10] sm:$0xff] %vm590_vm3, %v2285_v42  ;;  %v2288_v29 = vadd.f32 %v3750_v63, %v2249_v15  ;;  %v2247_v2 = vadd.f32 %v2122_v28, %v1433_v38 }
 0x19e   : > { %v2672_v62 = vpop.f32.mrf.mxu1 }
 0x19f   : > { %2320 = vst.msk [vmem:[%s3755_s10 + $0x18] sm:$0xff] %vm590_vm3, %v2288_v29  ;;  %v2286_v46 = vadd.f32 %v3750_v63, %v2247_v2  ;;  %v1454_v50 = vadd.f32 %v2672_v62, %v2636_v21 }
 0x1a0   : > { %v1445_v57 = vpop.f32.mrf.mxu1 }
 0x1a1   : > { %2318 = vst.msk [vmem:[%s3755_s10 + $0x8] sm:$0xff] %vm590_vm3, %v2286_v46  ;;  %v1446_v44 = vadd.f32 %v1445_v57, %v1240_v52 }
 0x1a2   : > { %v2673_v40 = vpop.f32.mrf.mxu1 }
 0x1a3   : > { %v1457_v53 = vadd.f32 %v2673_v40, %v2637_v9 }
 0x1a4   : > { %v1448_v34 = vpop.f32.mrf.mxu1 }
 0x1a5   : > { %v1449_v36 = vadd.f32 %v1448_v34, %v1243_v6 }
 0x1a6   : > { %v2708_v30 = vpop.f32.mrf.mxu0 }
 0x1a7   : > { %v2252_v24 = vadd.f32 %v2708_v30, %v1454_v50 }
 0x1a8   : > { %v2135_v59 = vpop.f32.mrf.mxu0 }
 0x1a9   : > { %v2291_v41 = vadd.f32 %v3750_v63, %v2252_v24  ;;  %v2250_v7 = vadd.f32 %v2135_v59, %v1446_v44 }
 0x1aa   : > { %v2709_v27 = vpop.f32.mrf.mxu0 }
 0x1ab   : > { %2323 = vst.msk [vmem:[%s3755_s10 + $0x30] sm:$0xff] %vm590_vm3, %v2291_v41  ;;  %v2289_v60 = vadd.f32 %v3750_v63, %v2250_v7  ;;  %v2253_v56 = vadd.f32 %v2709_v27, %v1457_v53 }
 0x1ac   : > { %v2138_v19 = vpop.f32.mrf.mxu0 }
 0x1ad   : > { %2321 = vst.msk [vmem:[%s3755_s10 + $0x20] sm:$0xff] %vm590_vm3, %v2289_v60  ;;  %v2292_v21 = vadd.f32 %v3750_v63, %v2253_v56  ;;  %v2251_v52 = vadd.f32 %v2138_v19, %v1449_v36 }
 0x1ae   : > { %v2676_v13 = vpop.f32.mrf.mxu1 }
 0x1af   : > { %2324 = vst.msk [vmem:[%s3755_s10 + $0x38] sm:$0xff] %vm590_vm3, %v2292_v21  ;;  %v2290_v9 = vadd.f32 %v3750_v63, %v2251_v52  ;;  %v1470_v14 = vadd.f32 %v2676_v13, %v3718_v51 }
 0x1b0   : > { %v1461_v35 = vpop.f32.mrf.mxu1 }
 0x1b1   : > { %2322 = vst.msk [vmem:[%s3755_s10 + $0x28] sm:$0xff] %vm590_vm3, %v2290_v9  ;;  %v1462_v58 = vadd.f32 %v1461_v35, %v3722_v17 }
 0x1b2   : > { %v2677_v6 = vpop.f32.mrf.mxu1 }
 0x1b3   : > { %v1473_v26 = vadd.f32 %v2677_v6, %v3728_v18 }
 0x1b4   : > { %v1464_v8 = vpop.f32.mrf.mxu1 }
 0x1b5   : > { %v1465_v42 = vadd.f32 %v1464_v8, %v3732_v3 }
 0x1b6   : > { %v2712_v47 = vpop.f32.mrf.mxu0 }
 0x1b7   : > { %v2256_v33 = vadd.f32 %v2712_v47, %v1470_v14 }
 0x1b8   : > { %v2151_v1 = vpop.f32.mrf.mxu0 }
 0x1b9   : > { %v2295_v11 = vadd.f32 %v3750_v63, %v2256_v33  ;;  %v2254_v0 = vadd.f32 %v2151_v1, %v1462_v58 }
 0x1ba   : > { %v2713_v38 = vpop.f32.mrf.mxu0 }
 0x1bb   : > { %2327 = vst.msk [vmem:[%s3755_s10 + $0x50] sm:$0xff] %vm590_vm3, %v2295_v11  ;;  %v2293_v51 = vadd.f32 %v3750_v63, %v2254_v0  ;;  %v2257_v15 = vadd.f32 %v2713_v38, %v1473_v26 }
 0x1bc   : > { %v2154_v28 = vpop.f32.mrf.mxu0 }
 0x1bd   : > { %2325 = vst.msk [vmem:[%s3755_s10 + $0x40] sm:$0xff] %vm590_vm3, %v2293_v51  ;;  %v2296_v17 = vadd.f32 %v3750_v63, %v2257_v15  ;;  %v2255_v29 = vadd.f32 %v2154_v28, %v1465_v42 }
 0x1be   : > { %v2680_v2 = vpop.f32.mrf.mxu1 }
 0x1bf   : > { %2328 = vst.msk [vmem:[%s3755_s10 + $0x58] sm:$0xff] %vm590_vm3, %v2296_v17  ;;  %v2294_v18 = vadd.f32 %v3750_v63, %v2255_v29  ;;  %v1486_v46 = vadd.f32 %v2680_v2, %v3736_v48 }
 0x1c0   : > { %v1477_v62 = vpop.f32.mrf.mxu1 }
 0x1c1   : > { %2326 = vst.msk [vmem:[%s3755_s10 + $0x48] sm:$0xff] %vm590_vm3, %v2294_v18  ;;  %v1478_v40 = vadd.f32 %v1477_v62, %v3740_v5 }
 0x1c2   : > { %v2681_v3 = vpop.f32.mrf.mxu1 }
 0x1c3   : > { %v1489_v24 = vadd.f32 %v2681_v3, %v3742_v54 }
 0x1c4   : > { %v1480_v30 = vpop.f32.mrf.mxu1 }
 0x1c5   : > { %v1481_v41 = vadd.f32 %v1480_v30, %v3744_v4 }
 0x1c6   : > { %v2716_v57 = vpop.f32.mrf.mxu0 }
 0x1c7   : > { %v2260_v50 = vadd.f32 %v2716_v57, %v1486_v46 }
 0x1c8   : > { %v2167_v44 = vpop.f32.mrf.mxu0 }
 0x1c9   : > { %v2299_v34 = vadd.f32 %v3750_v63, %v2260_v50  ;;  %v2258_v59 = vadd.f32 %v2167_v44, %v1478_v40 }
 0x1ca   : > { %v2717_v53 = vpop.f32.mrf.mxu0 }
 0x1cb   : > { %2331 = vst.msk [vmem:[%s3755_s10 + $0x70] sm:$0xff] %vm590_vm3, %v2299_v34  ;;  %v2297_v48 = vadd.f32 %v3750_v63, %v2258_v59  ;;  %v2261_v7 = vadd.f32 %v2717_v53, %v1489_v24 }
 0x1cc   : > { %v2170_v27 = vpop.f32.mrf.mxu0 }
 0x1cd   : > { %2329 = vst.msk [vmem:[%s3755_s10 + $0x60] sm:$0xff] %vm590_vm3, %v2297_v48  ;;  %v2300_v5 = vadd.f32 %v3750_v63, %v2261_v7  ;;  %v2259_v36 = vadd.f32 %v2170_v27, %v1481_v41 }
 0x1ce   : > { %v2684_v60 = vpop.f32.mrf.mxu1 }
 0x1cf   : > { %2332 = vst.msk [vmem:[%s3755_s10 + $0x78] sm:$0xff] %vm590_vm3, %v2300_v5  ;;  %v2298_v54 = vadd.f32 %v3750_v63, %v2259_v36  ;;  %v1502_v19 = vadd.f32 %v2684_v60, %v3698_v55 }
 0x1d0   : > { %v1493_v56 = vpop.f32.mrf.mxu1 }
 0x1d1   : > { %2330 = vst.msk [vmem:[%s3755_s10 + $0x68] sm:$0xff] %vm590_vm3, %v2298_v54  ;;  %v1494_v52 = vadd.f32 %v1493_v56, %v3700_v43 }
 0x1d2   : > { %v2685_v4 = vpop.f32.mrf.mxu1 }
 0x1d3   : > { %v1505_v6 = vadd.f32 %v2685_v4, %v3702_v39 }
 0x1d4   : > { %v1496_v9 = vpop.f32.mrf.mxu1 }
 0x1d5   : > { %v1497_v33 = vadd.f32 %v1496_v9, %v3704_v10 }
 0x1d6   : > { %v2720_v21 = vpop.f32.mrf.mxu0 }
 0x1d7   : > { %v2264_v13 = vadd.f32 %v2720_v21, %v1502_v19 }
 0x1d8   : > { %v2183_v35 = vpop.f32.mrf.mxu0 }
 0x1d9   : > { %v2303_v14 = vadd.f32 %v3750_v63, %v2264_v13  ;;  %v2262_v47 = vadd.f32 %v2183_v35, %v1494_v52 }
 0x1da   : > { %v2721_v58 = vpop.f32.mrf.mxu0 }
 0x1db   : > { %2335 = vst.msk [vmem:[%s3755_s10 + $0x90] sm:$0xff] %vm590_vm3, %v2303_v14  ;;  %v2301_v55 = vadd.f32 %v3750_v63, %v2262_v47  ;;  %v2265_v8 = vadd.f32 %v2721_v58, %v1505_v6 }
 0x1dc   : > { %v2186_v1 = vpop.f32.mrf.mxu0 }
 0x1dd   : > { %2333 = vst.msk [vmem:[%s3755_s10 + $0x80] sm:$0xff] %vm590_vm3, %v2301_v55  ;;  %v2304_v43 = vadd.f32 %v3750_v63, %v2265_v8  ;;  %v2263_v26 = vadd.f32 %v2186_v1, %v1497_v33 }
 0x1de   : > { %v2688_v11 = vpop.f32.mrf.mxu1 }
 0x1df   : > { %2336 = vst.msk [vmem:[%s3755_s10 + $0x98] sm:$0xff] %vm590_vm3, %v2304_v43  ;;  %v2302_v39 = vadd.f32 %v3750_v63, %v2263_v26  ;;  %v1518_v38 = vadd.f32 %v2688_v11, %v3706_v31 }
 0x1e0   : > { %v1509_v0 = vpop.f32.mrf.mxu1 }
 0x1e1   : > { %2334 = vst.msk [vmem:[%s3755_s10 + $0x88] sm:$0xff] %vm590_vm3, %v2302_v39  ;;  %v1510_v51 = vadd.f32 %v1509_v0, %v3708_v49 }
 0x1e2   : > { %v2689_v10 = vpop.f32.mrf.mxu1 }
 0x1e3   : > { %v1521_v29 = vadd.f32 %v2689_v10, %v3710_v61 }
 0x1e4   : > { %v1512_v28 = vpop.f32.mrf.mxu1 }
 0x1e5   : > { %v1513_v3 = vadd.f32 %v1512_v28, %v3712_v45 }
 0x1e6   : > { %v2724_v42 = vpop.f32.mrf.mxu0 }
 0x1e7   : > { %v2268_v15 = vadd.f32 %v2724_v42, %v1518_v38 }
 0x1e8   : > { %v2199_v17 = vpop.f32.mrf.mxu0 }
 0x1e9   : > { %v2307_v2 = vadd.f32 %v3750_v63, %v2268_v15  ;;  %v2266_v18 = vadd.f32 %v2199_v17, %v1510_v51 }
 0x1ea   : > { %v2725_v62 = vpop.f32.mrf.mxu0 }
 0x1eb   : > { %2339 = vst.msk [vmem:[%s3755_s10 + $0xb0] sm:$0xff] %vm590_vm3, %v2307_v2  ;;  %v2305_v31 = vadd.f32 %v3750_v63, %v2266_v18  ;;  %v2269_v46 = vadd.f32 %v2725_v62, %v1521_v29 }
 0x1ec   : > { %v2202_v57 = vpop.f32.mrf.mxu0 }
 0x1ed   : > { %2337 = vst.msk [vmem:[%s3755_s10 + $0xa0] sm:$0xff] %vm590_vm3, %v2305_v31  ;;  %v2308_v49 = vadd.f32 %v3750_v63, %v2269_v46  ;;  %v2267_v40 = vadd.f32 %v2202_v57, %v1513_v3 }
 0x1ee   : > { %v2692_v50 = vpop.f32.mrf.mxu1 }
 0x1ef   : > { %2340 = vst.msk [vmem:[%s3755_s10 + $0xb8] sm:$0xff] %vm590_vm3, %v2308_v49  ;;  %v2306_v61 = vadd.f32 %v3750_v63, %v2267_v40  ;;  %v1534_v44 = vadd.f32 %v2692_v50, %v3714_v16 }
 0x1f0   : > { %v1525_v30 = vpop.f32.mrf.mxu1 }
 0x1f1   : > { %2338 = vst.msk [vmem:[%s3755_s10 + $0xa8] sm:$0xff] %vm590_vm3, %v2306_v61  ;;  %v1526_v34 = vadd.f32 %v1525_v30, %v3716_v37 }
 0x1f2   : > { %v2693_v45 = vpop.f32.mrf.mxu1 }
 0x1f3   : > { %v1537_v48 = vadd.f32 %v2693_v45, %v3720_v32 }
 0x1f4   : > { %v1528_v53 = vpop.f32.mrf.mxu1 }
 0x1f5   : > { %v1529_v36 = vadd.f32 %v1528_v53, %v3724_v12 }
 0x1f6   : > { %v2728_v24 = vpop.f32.mrf.mxu0 }
 0x1f7   : > { %v2272_v59 = vadd.f32 %v2728_v24, %v1534_v44 }
 0x1f8   : > { %v2215_v41 = vpop.f32.mrf.mxu0 }
 0x1f9   : > { %v2311_v7 = vadd.f32 %v3750_v63, %v2272_v59  ;;  %v2270_v27 = vadd.f32 %v2215_v41, %v1526_v34 }
 0x1fa   : > { %v2729_v5 = vpop.f32.mrf.mxu0 }
 0x1fb   : > { %2343 = vst.msk [vmem:[%s3755_s10 + $0xd0] sm:$0xff] %vm590_vm3, %v2311_v7  ;;  %v2309_v16 = vadd.f32 %v3750_v63, %v2270_v27  ;;  %v2273_v60 = vadd.f32 %v2729_v5, %v1537_v48 }
 0x1fc   : > { %v2218_v54 = vpop.f32.mrf.mxu0 }
 0x1fd   : > { %2341 = vst.msk [vmem:[%s3755_s10 + $0xc0] sm:$0xff] %vm590_vm3, %v2309_v16  ;;  %v2312_v37 = vadd.f32 %v3750_v63, %v2273_v60  ;;  %v2271_v56 = vadd.f32 %v2218_v54, %v1529_v36 }
 0x1fe   : > { %v2696_v4 = vpop.f32.mrf.mxu1 }
 0x1ff   : > { %2344 = vst.msk [vmem:[%s3755_s10 + $0xd8] sm:$0xff] %vm590_vm3, %v2312_v37  ;;  %v2310_v32 = vadd.f32 %v3750_v63, %v2271_v56  ;;  %v1550_v21 = vadd.f32 %v2696_v4, %v3726_v25 }
 0x200   : > { %v1541_v19 = vpop.f32.mrf.mxu1 }
 0x201   : > { %2342 = vst.msk [vmem:[%s3755_s10 + $0xc8] sm:$0xff] %vm590_vm3, %v2310_v32  ;;  %v1542_v13 = vadd.f32 %v1541_v19, %v3730_v22 }
 0x202   : > { %v2697_v12 = vpop.f32.mrf.mxu1 }
 0x203   : > { %v1553_v14 = vadd.f32 %v2697_v12, %v3734_v20 }
 0x204   : > { %v1544_v35 = vpop.f32.mrf.mxu1 }
 0x205   : > { %v1545_v55 = vadd.f32 %v1544_v35, %v3738_v23 }
 0x206   : > { %v2732_v52 = vpop.f32.mrf.mxu0 }
 0x207   : > { %v2276_v9 = vadd.f32 %v2732_v52, %v1550_v21 }
 0x208   : > { %v2231_v6 = vpop.f32.mrf.mxu0 }
 0x209   : > { %v2315_v47 = vadd.f32 %v3750_v63, %v2276_v9  ;;  %v2274_v58 = vadd.f32 %v2231_v6, %v1542_v13 }
 0x20a   : > { %v2733_v33 = vpop.f32.mrf.mxu0 }
 0x20b   : > { %2347 = vst.msk [vmem:[%s3755_s10 + $0xf0] sm:$0xff] %vm590_vm3, %v2315_v47  ;;  %v2313_v25 = vadd.f32 %v3750_v63, %v2274_v58  ;;  %v2277_v8 = vadd.f32 %v2733_v33, %v1553_v14 }
 0x20c   : > { %v2234_v1 = vpop.f32.mrf.mxu0 }
 0x20d   : > { %2345 = vst.msk [vmem:[%s3755_s10 + $0xe0] sm:$0xff] %vm590_vm3, %v2313_v25  ;;  %v2316_v22 = vadd.f32 %v3750_v63, %v2277_v8  ;;  %v2275_v43 = vadd.f32 %v2234_v1, %v1545_v55 }
 0x20f   : > { %2348 = vst.msk [vmem:[%s3755_s10 + $0xf8] sm:$0xff] %vm590_vm3, %v2316_v22  ;;  %v2314_v20 = vadd.f32 %v3750_v63, %v2275_v43 }
 0x211   : > { %2346 = vst.msk [vmem:[%s3755_s10 + $0xe8] sm:$0xff] %vm590_vm3, %v2314_v20 }
 0x212 PF: > { %s13_s12 = sadd.s32 1, %s2765_s12  }
 0x213   : > { %p10_p4 = scmp.ge.s32.totalorder %s13_s12, 4  }
 0x215   :  { %12 = sbr.rel (!%p10_p4) target bundleno = 1 (0x1), region = 66 }

// kernel: mid_block_forward.31
= control target key start
LH: loop header
LB: loop body
LE: loop exit
PB: predicated region body
PF: predicated region fallthrough
CT: control target
= control target key end

     0   :  { %s1030_s21 = smov 0   ;;  %s1032_s22 = smov 0   ;;  %s1256_s0 = inlined_call_operand.vmem [shape: f32[2,256,8], index: 0, kind: input, shape index: {}]   ;;  %s1257_s1 = inlined_call_operand.vmem [shape: f32[2,2,4], index: 1, kind: input, shape index: {}]   ;;  %s1258_s2 = inlined_call_operand.vmem [shape: f32[1,8], index: 2, kind: input, shape index: {}]   ;;  %s1259_s3 = inlined_call_operand.vmem [shape: f32[1,8], index: 3, kind: input, shape index: {}]   ;;  %s1260_s4 = inlined_call_operand.vmem [shape: f32[4,8], index: 4, kind: input, shape index: {}]   ;;  %s1261_s5 = inlined_call_operand.vmem [shape: f32[2,256,8], index: 5, kind: input, shape index: {}]   ;;  %s1262_s6 = inlined_call_operand.vmem [shape: f32[2,256,8], index: 6, kind: output, shape index: {}]  }
   0x1   :  { %s1034_s23 = smov 0   ;;  %s1036_s24 = smov 0  }
   0x2   :  { %s1038_s25 = smov 0  }
   0x3 LB: > { %s25_s26 = sadd.s32 1, %s983_s23  ;;  %s28_s27 = sadd.s32 1, %s987_s24  ;;  %s991_s25 = sphi %s1038_s25, %s16_s25   ;;  %s987_s24 = sphi %s1036_s24, %s1266_s24   ;;  %s983_s23 = sphi %s1034_s23, %s1265_s23   ;;  %s979_s22 = sphi %s1032_s22, %s1264_s22   ;;  %s975_s21 = sphi %s1030_s21, %s1263_s21  }
   0x4   : > { %p26_p0 = scmp.ge.s32.totalorder %s25_s26, 2  ;;  %p805_p1 = scmp.ge.s32.totalorder %s991_s25, 1 }
   0x5   : > { %p259_p2 = scmp.lt.s32.totalorder %s991_s25, 5 }
   0x6   : > { %s1268_s26 = smov (%p26_p0, %s25_s26), 0  ;;  %s1270_s27 = smov (!%p26_p0, %s28_s27), %s987_s24 }
   0x7   : > { %p260_p3 = pnand %p805_p1, %p259_p2  ;;  %p30_p4 = scmp.ge.s32.totalorder %s1270_s27, 2 }
   0x8   : > { %p311_p5 = scmp.lt.s32.totalorder (!%p260_p3), %s979_s22, 1  ;;  %s806_s10 = sshll.u32 (!%p260_p3), %s975_s21, 4 }
   0x9   : > { %s1272_s27 = smov (%p30_p4, %s1270_s27), 0  ;;  %263 = sbr.rel (%p260_p3) target bundleno = 295 (0x127), region = 44 }
   0xa   : > { %p313_p6 = scmp.lt.s32.totalorder (!%p260_p3), %s806_s10, 31 }
   0xe   : > { %v345_v0 = vld [vmem:[%s1260_s4] sm:$0xf]  ;;  %vm350_vm0 = vcmask 1043456   ;;  %v993_v1 = vmov 0.0   ;;  %vm994_vm1 = vmmov 0   ;;  %s1274_s22 = smov (!%p311_p5, %s979_s22), 1  ;;  %v449_v10 = vlaneseq }
   0xf   : > { %840 = vmatprep.subr.mxu0 %v993_v1  ;;  %842 = vmatprep.mubr.msk.f32.mxu0 %vm994_vm1, %v993_v1  ;;  %s809_s30 = sshll.u32 %s1274_s22, 1  ;;  %vm346_vm2 = vcmask 31744   ;;  %s1276_s10 = smov (!%p313_p6, %s806_s10), 31  ;;  %v818_v13 = vld [vmem:[%s1258_s2] ss:$0 sm:$0xff]  ;;  %vm664_vm3 = vcmask 64512  }
  0x10   : > { %841 = vmatpush3.msk.msra.mxu0 %vm350_vm0, %v345_v0  ;;  %s323_s9 = scalar_lea.vmem %s1257_s1, %s809_s30  ;;  %s807_s11 = sshll.u32 %s1274_s22, 5  ;;  %v450_v11 = vshrl.u32 %v449_v10, 7  ;;  %v819_v39 = vld [vmem:[%s1259_s3] ss:$0 sm:$0xff] }
  0x11   : > { %v344_v2 = vld [vmem:[%s323_s9] sm:$0x3]  ;;  %s316_s12 = sadd.s32 %s807_s11, %s1276_s10 }
  0x12   : > { %843 = vmatmul.mubr.msk.f32.vlgmr.msra.gmra.mxu0 %vm346_vm2, %v344_v2  ;;  %s1069_s13 = sshll.u32 %s316_s12, 3  ;;  %v451_v12 = vsub.s32 0, %v450_v11  ;;  %v479_v15 = vsub.s32 1, %v450_v11 }
  0x13   : > { %s1075_s16 = scalar_lea.vmem %s1256_s0, %s1069_s13  ;;  %s1169_s28 = scalar_lea.vmem %s1261_s5, %s1069_s13 }
  0x14   : > { %v433_v17 = vld [vmem:[%s1075_s16] sm:$0xff]  ;;  %v434_v18 = vld [vmem:[%s1075_s16 + $0x8] sm:$0xff]  ;;  %v435_v19 = vld [vmem:[%s1075_s16 + $0x10] sm:$0xff]  ;;  %s1178_s7 = scalar_lea.vmem %s1262_s6, %s1069_s13 }
  0x15   : > { %v436_v20 = vld [vmem:[%s1075_s16 + $0x18] sm:$0xff]  ;;  %v437_v22 = vld [vmem:[%s1075_s16 + $0x20] sm:$0xff]  ;;  %v438_v23 = vld [vmem:[%s1075_s16 + $0x28] sm:$0xff] }
  0x16   : > { %v439_v28 = vld [vmem:[%s1075_s16 + $0x30] sm:$0xff]  ;;  %v440_v30 = vld [vmem:[%s1075_s16 + $0x38] sm:$0xff]  ;;  %v441_v31 = vld [vmem:[%s1075_s16 + $0x40] sm:$0xff] }
  0x17   : > { %v442_v32 = vld [vmem:[%s1075_s16 + $0x48] sm:$0xff]  ;;  %v443_v40 = vld [vmem:[%s1075_s16 + $0x50] sm:$0xff]  ;;  %v444_v41 = vld [vmem:[%s1075_s16 + $0x58] sm:$0xff] }
  0x18   : > { %v445_v44 = vld [vmem:[%s1075_s16 + $0x60] sm:$0xff]  ;;  %v446_v45 = vld [vmem:[%s1075_s16 + $0x68] sm:$0xff]  ;;  %v447_v50 = vld [vmem:[%s1075_s16 + $0x70] sm:$0xff] }
  0x19   : > { %v448_v59 = vld [vmem:[%s1075_s16 + $0x78] sm:$0xff] }
  0xd2   : > { %v420_v3 = vpop.f32.mrf.mxu0 }
  0xd3   : > { %v425_v4 = vmul.f32 0.001953125, %v420_v3 }
  0xd4   : > { %v844_v5 = vpop.f32.mrf.mxu0 }
  0xd5   : > { %v426_v6 = vmul.f32 %v425_v4, %v425_v4  ;;  %v1080_v14 = vrot.slane %v425_v4, %v451_v12 }
  0xd7   : > { %v428_v7 = vrot.slane %v426_v6, 7  ;;  %v453_v24 = vsub.f32 %v433_v17, %v1080_v14  ;;  %v454_v25 = vsub.f32 %v434_v18, %v1080_v14  ;;  %v455_v26 = vsub.f32 %v435_v19, %v1080_v14 }
  0xd8   : > { %v456_v29 = vsub.f32 %v436_v20, %v1080_v14  ;;  %v457_v33 = vsub.f32 %v437_v22, %v1080_v14  ;;  %v458_v37 = vsub.f32 %v438_v23, %v1080_v14  ;;  %v459_v42 = vsub.f32 %v439_v28, %v1080_v14 }
  0xd9   : > { %v430_v8 = vsub.f32 %v425_v4, %v428_v7  ;;  %v460_v46 = vsub.f32 %v440_v30, %v1080_v14  ;;  %v461_v47 = vsub.f32 %v441_v31, %v1080_v14  ;;  %v462_v48 = vsub.f32 %v442_v32, %v1080_v14 }
  0xda   : > { %v463_v55 = vsub.f32 %v443_v40, %v1080_v14  ;;  %v464_v56 = vsub.f32 %v444_v41, %v1080_v14  ;;  %v465_v60 = vsub.f32 %v445_v44, %v1080_v14  ;;  %v466_v61 = vsub.f32 %v446_v45, %v1080_v14 }
  0xdb   : > { %v431_v9 = vadd.f32 1e-05, %v430_v8  ;;  %v467_v0 = vsub.f32 %v447_v50, %v1080_v14  ;;  %v468_v8 = vsub.f32 %v448_v59, %v1080_v14 }
  0xdd   : > { %887 = vrsqrt.f32 %v431_v9 }
  0xea   : > { %v888_v16 = vpop.eup %887 }
  0xeb   : > { %v476_v21 = vmul.f32 %v888_v16, %v818_v13 }
  0xed   : > { %v480_v27 = vrot.slane %v476_v21, %v479_v15 }
  0xef   : > { %v481_v34 = vmul.f32 %v480_v27, %v453_v24  ;;  %v482_v35 = vmul.f32 %v480_v27, %v454_v25  ;;  %v483_v36 = vmul.f32 %v480_v27, %v455_v26  ;;  %v484_v38 = vmul.f32 %v480_v27, %v456_v29 }
  0xf0   : > { %v485_v43 = vmul.f32 %v480_v27, %v457_v33  ;;  %v486_v49 = vmul.f32 %v480_v27, %v458_v37  ;;  %v487_v51 = vmul.f32 %v480_v27, %v459_v42  ;;  %v488_v57 = vmul.f32 %v480_v27, %v460_v46 }
  0xf1   : > { %v1110_v52 = vadd.f32 %v819_v39, %v481_v34  ;;  %v1112_v53 = vadd.f32 %v819_v39, %v482_v35  ;;  %v1114_v54 = vadd.f32 %v819_v39, %v483_v36  ;;  %v1118_v58 = vadd.f32 %v819_v39, %v484_v38 }
  0xf2   : > { %v489_v62 = vmul.f32 %v480_v27, %v461_v47  ;;  %v1123_v63 = vadd.f32 %v819_v39, %v485_v43  ;;  %v490_v1 = vmul.f32 %v480_v27, %v462_v48  ;;  %v491_v2 = vmul.f32 %v480_v27, %v463_v55 }
  0xf3   : > { %v1126_v3 = vadd.f32 %v819_v39, %v486_v49  ;;  %v1128_v4 = vadd.f32 %v819_v39, %v487_v51  ;;  %v820_v5 = vmul.f32 -1.442695, %v1110_v52  ;;  %v821_v6 = vmul.f32 -1.442695, %v1112_v53 }
  0xf4   : > { %v822_v7 = vmul.f32 -1.442695, %v1114_v54  ;;  %v492_v9 = vmul.f32 %v480_v27, %v464_v56  ;;  %v1134_v10 = vadd.f32 %v819_v39, %v488_v57  ;;  %v823_v11 = vmul.f32 -1.442695, %v1118_v58 }
  0xf5   : > { %v493_v12 = vmul.f32 %v480_v27, %v465_v60  ;;  %v1137_v13 = vadd.f32 %v819_v39, %v489_v62  ;;  %889 = vpow2.f32 %v820_v5  ;;  %v824_v15 = vmul.f32 -1.442695, %v1123_v63 }
  0xf6   : > { %v494_v16 = vmul.f32 %v480_v27, %v466_v61  ;;  %v1140_v17 = vadd.f32 %v819_v39, %v490_v1  ;;  %891 = vpow2.f32 %v821_v6  ;;  %v825_v18 = vmul.f32 -1.442695, %v1126_v3 }
  0xf7   : > { %v495_v19 = vmul.f32 %v480_v27, %v467_v0  ;;  %v1143_v20 = vadd.f32 %v819_v39, %v491_v2  ;;  %893 = vpow2.f32 %v822_v7  ;;  %v826_v14 = vmul.f32 -1.442695, %v1128_v4 }
  0xf8   : > { %v496_v21 = vmul.f32 %v480_v27, %v468_v8  ;;  %v1146_v22 = vadd.f32 %v819_v39, %v492_v9  ;;  %895 = vpow2.f32 %v823_v11  ;;  %v827_v23 = vmul.f32 -1.442695, %v1134_v10 }
  0xf9   : > { %v1149_v24 = vadd.f32 %v819_v39, %v493_v12  ;;  %897 = vpow2.f32 %v824_v15  ;;  %v828_v25 = vmul.f32 -1.442695, %v1137_v13  ;;  %v1152_v26 = vadd.f32 %v819_v39, %v494_v16  ;;  %v632_v12 = vld [vmem:[%s1169_s28] sm:$0xff] }
  0xfa   : > { %899 = vpow2.f32 %v825_v18  ;;  %v829_v28 = vmul.f32 -1.442695, %v1140_v17  ;;  %v1155_v29 = vadd.f32 %v819_v39, %v495_v19  ;;  %v830_v27 = vmul.f32 -1.442695, %v1143_v20  ;;  %v633_v18 = vld [vmem:[%s1169_s28 + $0x8] sm:$0xff] }
  0xfb   : > { %901 = vpow2.f32 %v826_v14  ;;  %v1158_v30 = vadd.f32 %v819_v39, %v496_v21  ;;  %v831_v31 = vmul.f32 -1.442695, %v1146_v22  ;;  %v832_v32 = vmul.f32 -1.442695, %v1149_v24  ;;  %v634_v21 = vld [vmem:[%s1169_s28 + $0x10] sm:$0xff] }
  0xfc   : > { %903 = vpow2.f32 %v827_v23  ;;  %v833_v33 = vmul.f32 -1.442695, %v1152_v26  ;;  %v834_v34 = vmul.f32 -1.442695, %v1155_v29 }
  0xfd   : > { %905 = vpow2.f32 %v828_v25  ;;  %v835_v35 = vmul.f32 -1.442695, %v1158_v30 }
  0xfe   : > { %907 = vpow2.f32 %v829_v28  ;;  %v635_v28 = vld [vmem:[%s1169_s28 + $0x18] sm:$0xff] }
  0xff   : > { %909 = vpow2.f32 %v830_v27 }
 0x100   : > { %911 = vpow2.f32 %v831_v31 }
 0x101   : > { %913 = vpow2.f32 %v832_v32  ;;  %v636_v32 = vld [vmem:[%s1169_s28 + $0x20] sm:$0xff] }
 0x102   : > { %v890_v36 = vpop.eup %889  ;;  %915 = vpow2.f32 %v833_v33 }
 0x103   : > { %v892_v37 = vpop.eup %891  ;;  %917 = vpow2.f32 %v834_v34  ;;  %v568_v38 = vadd.f32 1.0, %v890_v36  ;;  %v637_v36 = vld [vmem:[%s1169_s28 + $0x28] sm:$0xff] }
 0x104   : > { %v894_v39 = vpop.eup %893  ;;  %919 = vpow2.f32 %v835_v35  ;;  %v569_v40 = vadd.f32 1.0, %v892_v37 }
 0x105   : > { %v896_v41 = vpop.eup %895  ;;  %v570_v42 = vadd.f32 1.0, %v894_v39  ;;  %921 = vrcp.f32 %v568_v38 }
 0x106   : > { %v898_v43 = vpop.eup %897  ;;  %v571_v44 = vadd.f32 1.0, %v896_v41  ;;  %923 = vrcp.f32 %v569_v40  ;;  %v639_v41 = vld [vmem:[%s1169_s28 + $0x38] sm:$0xff] }
 0x107   : > { %v900_v45 = vpop.eup %899  ;;  %v572_v46 = vadd.f32 1.0, %v898_v43  ;;  %925 = vrcp.f32 %v570_v42 }
 0x108   : > { %v902_v47 = vpop.eup %901  ;;  %v573_v48 = vadd.f32 1.0, %v900_v45  ;;  %927 = vrcp.f32 %v571_v44  ;;  %v640_v44 = vld [vmem:[%s1169_s28 + $0x40] sm:$0xff] }
 0x109   : > { %v904_v49 = vpop.eup %903  ;;  %v574_v50 = vadd.f32 1.0, %v902_v47  ;;  %929 = vrcp.f32 %v572_v46  ;;  %v641_v47 = vld [vmem:[%s1169_s28 + $0x48] sm:$0xff] }
 0x10a   : > { %v906_v51 = vpop.eup %905  ;;  %v575_v55 = vadd.f32 1.0, %v904_v49  ;;  %931 = vrcp.f32 %v573_v48 }
 0x10b   : > { %v908_v56 = vpop.eup %907  ;;  %v576_v57 = vadd.f32 1.0, %v906_v51  ;;  %933 = vrcp.f32 %v574_v50  ;;  %v642_v50 = vld [vmem:[%s1169_s28 + $0x50] sm:$0xff] }
 0x10c   : > { %v910_v59 = vpop.eup %909  ;;  %v577_v60 = vadd.f32 1.0, %v908_v56  ;;  %935 = vrcp.f32 %v575_v55  ;;  %v643_v56 = vld [vmem:[%s1169_s28 + $0x58] sm:$0xff] }
 0x10d   : > { %v912_v61 = vpop.eup %911  ;;  %v578_v62 = vadd.f32 1.0, %v910_v59  ;;  %937 = vrcp.f32 %v576_v57 }
 0x10e   : > { %v914_v0 = vpop.eup %913  ;;  %v579_v1 = vadd.f32 1.0, %v912_v61  ;;  %939 = vrcp.f32 %v577_v60  ;;  %v644_v60 = vld [vmem:[%s1169_s28 + $0x60] sm:$0xff] }
 0x10f   : > { %v916_v2 = vpop.eup %915  ;;  %v580_v5 = vadd.f32 1.0, %v914_v0  ;;  %941 = vrcp.f32 %v578_v62  ;;  %v645_v0 = vld [vmem:[%s1169_s28 + $0x68] sm:$0xff] }
 0x110   : > { %v918_v6 = vpop.eup %917  ;;  %v581_v7 = vadd.f32 1.0, %v916_v2  ;;  %943 = vrcp.f32 %v579_v1 }
 0x111   : > { %v920_v8 = vpop.eup %919  ;;  %v582_v9 = vadd.f32 1.0, %v918_v6  ;;  %945 = vrcp.f32 %v580_v5  ;;  %v646_v5 = vld [vmem:[%s1169_s28 + $0x70] sm:$0xff] }
 0x112   : > { %v922_v11 = vpop.eup %921  ;;  %v583_v15 = vadd.f32 1.0, %v920_v8  ;;  %947 = vrcp.f32 %v581_v7  ;;  %v647_v8 = vld [vmem:[%s1169_s28 + $0x78] sm:$0xff] }
 0x113   : > { %v924_v16 = vpop.eup %923  ;;  %949 = vrcp.f32 %v582_v9  ;;  %v616_v19 = vmul.f32 %v922_v11, %v1110_v52 }
 0x114   : > { %v926_v14 = vpop.eup %925  ;;  %951 = vrcp.f32 %v583_v15  ;;  %v617_v23 = vmul.f32 %v924_v16, %v1112_v53 }
 0x115   : > { %v928_v25 = vpop.eup %927  ;;  %v618_v27 = vmul.f32 %v926_v14, %v1114_v54  ;;  %v648_v52 = vadd.f32 %v632_v12, %v616_v19  ;;  %v638_v54 = vld [vmem:[%s1169_s28 + $0x30] sm:$0xff] }
 0x116   : > { %v930_v31 = vpop.eup %929  ;;  %v619_v33 = vmul.f32 %v928_v25, %v1118_v58  ;;  %v649_v34 = vadd.f32 %v633_v18, %v617_v23 }
 0x117   : > { %v932_v35 = vpop.eup %931  ;;  %v620_v53 = vmul.f32 %v930_v31, %v1123_v63  ;;  %v650_v37 = vadd.f32 %v634_v21, %v618_v27  ;;  %665 = vst.msk [vmem:[%s1178_s7] sm:$0xff] %vm664_vm3, %v648_v52 }
 0x118   : > { %v934_v38 = vpop.eup %933  ;;  %v621_v39 = vmul.f32 %v932_v35, %v1126_v3  ;;  %v651_v40 = vadd.f32 %v635_v28, %v619_v33  ;;  %666 = vst.msk [vmem:[%s1178_s7 + $0x8] sm:$0xff] %vm664_vm3, %v649_v34 }
 0x119   : > { %v936_v58 = vpop.eup %935  ;;  %v622_v42 = vmul.f32 %v934_v38, %v1128_v4  ;;  %v652_v43 = vadd.f32 %v636_v32, %v620_v53  ;;  %667 = vst.msk [vmem:[%s1178_s7 + $0x10] sm:$0xff] %vm664_vm3, %v650_v37 }
 0x11a   : > { %v938_v63 = vpop.eup %937  ;;  %v623_v45 = vmul.f32 %v936_v58, %v1134_v10  ;;  %v653_v46 = vadd.f32 %v637_v36, %v621_v39  ;;  %668 = vst.msk [vmem:[%s1178_s7 + $0x18] sm:$0xff] %vm664_vm3, %v651_v40 }
 0x11b   : > { %v940_v3 = vpop.eup %939  ;;  %v624_v48 = vmul.f32 %v938_v63, %v1137_v13  ;;  %v654_v49 = vadd.f32 %v638_v54, %v622_v42  ;;  %669 = vst.msk [vmem:[%s1178_s7 + $0x20] sm:$0xff] %vm664_vm3, %v652_v43 }
 0x11c   : > { %v942_v4 = vpop.eup %941  ;;  %v625_v51 = vmul.f32 %v940_v3, %v1140_v17  ;;  %v655_v55 = vadd.f32 %v639_v41, %v623_v45  ;;  %670 = vst.msk [vmem:[%s1178_s7 + $0x28] sm:$0xff] %vm664_vm3, %v653_v46 }
 0x11d   : > { %v944_v10 = vpop.eup %943  ;;  %v626_v57 = vmul.f32 %v942_v4, %v1143_v20  ;;  %v656_v59 = vadd.f32 %v640_v44, %v624_v48  ;;  %671 = vst.msk [vmem:[%s1178_s7 + $0x30] sm:$0xff] %vm664_vm3, %v654_v49 }
 0x11e   : > { %v946_v13 = vpop.eup %945  ;;  %v627_v61 = vmul.f32 %v944_v10, %v1146_v22  ;;  %v657_v62 = vadd.f32 %v641_v47, %v625_v51  ;;  %672 = vst.msk [vmem:[%s1178_s7 + $0x38] sm:$0xff] %vm664_vm3, %v655_v55 }
 0x11f   : > { %v948_v17 = vpop.eup %947  ;;  %v628_v1 = vmul.f32 %v946_v13, %v1149_v24  ;;  %v658_v2 = vadd.f32 %v642_v50, %v626_v57  ;;  %673 = vst.msk [vmem:[%s1178_s7 + $0x40] sm:$0xff] %vm664_vm3, %v656_v59 }
 0x120   : > { %v950_v20 = vpop.eup %949  ;;  %v629_v6 = vmul.f32 %v948_v17, %v1152_v26  ;;  %v659_v22 = vadd.f32 %v643_v56, %v627_v61  ;;  %674 = vst.msk [vmem:[%s1178_s7 + $0x48] sm:$0xff] %vm664_vm3, %v657_v62 }
 0x121   : > { %v952_v7 = vpop.eup %951  ;;  %v630_v9 = vmul.f32 %v950_v20, %v1155_v29  ;;  %v660_v11 = vadd.f32 %v644_v60, %v628_v1  ;;  %675 = vst.msk [vmem:[%s1178_s7 + $0x50] sm:$0xff] %vm664_vm3, %v658_v2 }
 0x122   : > { %v631_v24 = vmul.f32 %v952_v7, %v1158_v30  ;;  %v661_v12 = vadd.f32 %v645_v0, %v629_v6  ;;  %676 = vst.msk [vmem:[%s1178_s7 + $0x58] sm:$0xff] %vm664_vm3, %v659_v22 }
 0x123   : > { %v662_v15 = vadd.f32 %v646_v5, %v630_v9  ;;  %677 = vst.msk [vmem:[%s1178_s7 + $0x60] sm:$0xff] %vm664_vm3, %v660_v11 }
 0x124   : > { %v663_v26 = vadd.f32 %v647_v8, %v631_v24  ;;  %678 = vst.msk [vmem:[%s1178_s7 + $0x68] sm:$0xff] %vm664_vm3, %v661_v12 }
 0x125   : > { %679 = vst.msk [vmem:[%s1178_s7 + $0x70] sm:$0xff] %vm664_vm3, %v662_v15 }
 0x126   : > { %680 = vst.msk [vmem:[%s1178_s7 + $0x78] sm:$0xff] %vm664_vm3, %v663_v26 }
 0x127 PF: > { %s16_s25 = sadd.s32 1, %s991_s25   ;;  %s1263_s21 = smov %s983_s23 }
 0x128   : > { %p13_p7 = scmp.ge.s32.totalorder %s16_s25, 6   ;;  %s1264_s22 = smov %s987_s24 }
 0x129   : > { %s1265_s23 = smov %s1268_s26  ;;  %s1266_s24 = smov %s1272_s27 }
 0x12a   :  { %15 = sbr.rel (!%p13_p7) target bundleno = 3 (0x3), region = 80 }

// kernel: mid_block_forward.24
= control target key start
LH: loop header
LB: loop body
LE: loop exit
PB: predicated region body
PF: predicated region fallthrough
CT: control target
= control target key end

     0   :  { %s1600_s30 = smov 0   ;;  %s1602_s10 = smov 0   ;;  %s1892_s0 = inlined_call_operand.vmem [shape: f32[2,256,8], index: 0, kind: input, shape index: {}]   ;;  %s1893_s1 = inlined_call_operand.vmem [shape: bf16[8,8], index: 1, kind: input, shape index: {}]   ;;  %s1894_s2 = inlined_call_operand.vmem [shape: f32[1,8], index: 2, kind: input, shape index: {}]   ;;  %s1895_s3 = inlined_call_operand.vmem [shape: bf16[8,8], index: 3, kind: input, shape index: {}]   ;;  %s1896_s4 = inlined_call_operand.vmem [shape: f32[1,8], index: 4, kind: input, shape index: {}]   ;;  %s1897_s5 = inlined_call_operand.vmem [shape: bf16[8,8], index: 5, kind: input, shape index: {}]   ;;  %s1898_s6 = inlined_call_operand.vmem [shape: f32[1,8], index: 6, kind: input, shape index: {}]   ;;  %s1899_s7 = inlined_call_operand.vmem [shape: bf16[2,256,8], index: 7, kind: output, shape index: {0}]   ;;  %s1900_s8 = inlined_call_operand.vmem [shape: bf16[2,256,8], index: 8, kind: output, shape index: {1}]   ;;  %s1901_s9 = inlined_call_operand.vmem [shape: bf16[2,256,8], index: 9, kind: output, shape index: {2}]  }
   0x1   :  { %s1604_s11 = smov 0   ;;  %s1606_s12 = smov 0  }
   0x2   :  { %s1608_s13 = smov 0  }
   0x3 LB: > { %s29_s14 = sadd.s32 1, %s1540_s11  ;;  %s32_s15 = sadd.s32 1, %s1544_s12  ;;  %s1548_s13 = sphi %s1608_s13, %s20_s13   ;;  %s1544_s12 = sphi %s1606_s12, %s1905_s12   ;;  %s1540_s11 = sphi %s1604_s11, %s1904_s11   ;;  %s1536_s10 = sphi %s1602_s10, %s1903_s10   ;;  %s1532_s30 = sphi %s1600_s30, %s1902_s30  }
   0x4   : > { %p30_p0 = scmp.ge.s32.totalorder %s29_s14, 2  ;;  %p1245_p1 = scmp.ge.s32.totalorder %s1548_s13, 1 }
   0x5   : > { %p317_p2 = scmp.lt.s32.totalorder %s1548_s13, 5 }
   0x6   : > { %s1907_s14 = smov (%p30_p0, %s29_s14), 0  ;;  %s1909_s15 = smov (!%p30_p0, %s32_s15), %s1544_s12 }
   0x7   : > { %p318_p3 = pnand %p1245_p1, %p317_p2  ;;  %p34_p4 = scmp.ge.s32.totalorder %s1909_s15, 2 }
   0x8   : > { %s1246_s18 = sshll.u32 (!%p318_p3), %s1532_s30, 4  ;;  %p380_p5 = scmp.lt.s32.totalorder (!%p318_p3), %s1536_s10, 1 }
   0x9   : > { %s1911_s15 = smov (%p34_p4, %s1909_s15), 0  ;;  %321 = sbr.rel (%p318_p3) target bundleno = 268 (0x10c), region = 48 }
   0xa   : > { %p382_p6 = scmp.lt.s32.totalorder (!%p318_p3), %s1246_s18, 31 }
   0xe   : > { %v444_v0 = vld [vmem:[%s1893_s1] sm:$0xf]  ;;  %vm477_vm0 = vcmask 1043456   ;;  %s1913_s10 = smov (!%p380_p5, %s1536_s10), 1  ;;  %s1915_s18 = smov (!%p382_p6, %s1246_s18), 31  ;;  %vm452_vm1 = vcmask 64512  }
   0xf   : > { %1466 = vmatprep.subr.msk.bf16.mxu0 %vm477_vm0, %v444_v0  ;;  %1467 = vmatprep.subr.msk.bf16.mxu1 %vm477_vm0, %v444_v0  ;;  %v479_v1 = vsel %vm477_vm0, %v444_v0, 0  ;;  %v578_v2 = vld [vmem:[%s1895_s3] sm:$0xf]  ;;  %s1247_s23 = sshll.u32 %s1913_s10, 5  ;;  %vm874_vm2 = vcmask 60416  }
  0x10   : > { %v686_v3 = vld [vmem:[%s1897_s5] sm:$0xf]  ;;  %1411 = vmatpush3.bf16.msra.mxu0 %v479_v1  ;;  %1465 = vmatpush3.bf16.msra.mxu1 %v479_v1  ;;  %s1647_s24 = sadd.s32 %s1247_s23, %s1915_s18  ;;  %v587_v18 = vsel %vm477_vm0, %v578_v2, 0 }
  0x11   : > { %1468 = vmatprep.subr.msk.bf16.mxu1 %vm477_vm0, %v578_v2  ;;  %1469 = vmatprep.subr.msk.bf16.mxu0 %vm477_vm0, %v686_v3  ;;  %s1248_s25 = sshll.u32 %s1647_s24, 3  ;;  %v695_v15 = vsel %vm477_vm0, %v686_v3, 0  ;;  %v1700_v30 = vld [vmem:[%s1894_s2] ss:$0 sm:$0xff]  ;;  %s1703_s10 = sshll.u32 %s1647_s24, 2 }
  0x12   : > { %s1653_s28 = scalar_lea.vmem %s1892_s0, %s1248_s25  ;;  %s1712_s18 = scalar_lea.vmem %s1899_s7, %s1703_s10 }
  0x13   : > { %v420_v4 = vld [vmem:[%s1653_s28] sm:$0xff]  ;;  %v421_v5 = vld [vmem:[%s1653_s28 + $0x8] sm:$0xff]  ;;  %v422_v9 = vld [vmem:[%s1653_s28 + $0x10] sm:$0xff]  ;;  %s1767_s25 = scalar_lea.vmem %s1901_s9, %s1703_s10 }
  0x14   : > { %v428_v6 = vld [vmem:[%s1653_s28 + $0x40] sm:$0xff]  ;;  %v436_v7 = vpack.c.bf16 %v421_v5, %v420_v4  ;;  %v429_v8 = vld [vmem:[%s1653_s28 + $0x48] sm:$0xff]  ;;  %v423_v10 = vld [vmem:[%s1653_s28 + $0x18] sm:$0xff] }
  0x15   : > { %v440_v11 = vpack.c.bf16 %v429_v8, %v428_v6  ;;  %v437_v12 = vpack.c.bf16 %v423_v10, %v422_v9  ;;  %v430_v13 = vld [vmem:[%s1653_s28 + $0x50] sm:$0xff]  ;;  %v431_v14 = vld [vmem:[%s1653_s28 + $0x58] sm:$0xff]  ;;  %v424_v16 = vld [vmem:[%s1653_s28 + $0x20] sm:$0xff] }
  0x16   : > { %1412 = vmatprep.mubr.msk.bf16.mxu0 %vm452_vm1, %v436_v7  ;;  %v441_v17 = vpack.c.bf16 %v431_v14, %v430_v13  ;;  %v425_v19 = vld [vmem:[%s1653_s28 + $0x28] sm:$0xff]  ;;  %v432_v20 = vld [vmem:[%s1653_s28 + $0x60] sm:$0xff]  ;;  %v426_v24 = vld [vmem:[%s1653_s28 + $0x30] sm:$0xff] }
  0x17   : > { %v433_v21 = vld [vmem:[%s1653_s28 + $0x68] sm:$0xff]  ;;  %1420 = vmatprep.mubr.msk.bf16.mxu1 %vm452_vm1, %v440_v11  ;;  %1413 = vmatmul.mubr.msk.bf16.vlgmr.msra.gmra.mxu0 %vm452_vm1, %v437_v12  ;;  %v438_v22 = vpack.c.bf16 %v425_v19, %v424_v16  ;;  %v427_v25 = vld [vmem:[%s1653_s28 + $0x38] sm:$0xff]  ;;  %v434_v26 = vld [vmem:[%s1653_s28 + $0x70] sm:$0xff] }
  0x18   : > { %v442_v23 = vpack.c.bf16 %v433_v21, %v432_v20  ;;  %1421 = vmatmul.mubr.msk.bf16.vlgmr.msra.gmra.mxu1 %vm452_vm1, %v441_v17  ;;  %1447 = vmatpush3.bf16.msra.mxu0 %v695_v15  ;;  %v435_v27 = vld [vmem:[%s1653_s28 + $0x78] sm:$0xff]  ;;  %v439_v28 = vpack.c.bf16 %v427_v25, %v426_v24  ;;  %s1775_s28 = scalar_lea.vmem %s1900_s8, %s1703_s10 }
  0x19   : > { %1429 = vmatpush3.bf16.msra.mxu1 %v587_v18  ;;  %1416 = vmatprep.mubr.msk.bf16.mxu0 %vm452_vm1, %v438_v22  ;;  %v443_v29 = vpack.c.bf16 %v435_v27, %v434_v26  ;;  %v1744_v18 = vld [vmem:[%s1898_s6] ss:$0 sm:$0xff] }
  0x1a   : > { %1424 = vmatprep.mubr.msk.bf16.mxu1 %vm452_vm1, %v442_v23 }
  0x1f   : > { %1417 = vmatmul.mubr.msk.bf16.gmra.mxu0 %vm452_vm1, %v439_v28 }
  0x20   : > { %1425 = vmatmul.mubr.msk.bf16.gmra.mxu1 %vm452_vm1, %v443_v29  ;;  %1448 = vmatprep.mubr.msk.bf16.mxu0 %vm452_vm1, %v436_v7 }
  0x21   : > { %1430 = vmatprep.mubr.msk.bf16.mxu1 %vm452_vm1, %v436_v7 }
  0x27   : > { %1449 = vmatmul.mubr.msk.bf16.vlgmr.msra.gmra.mxu0 %vm452_vm1, %v437_v12 }
  0x28   : > { %1431 = vmatmul.mubr.msk.bf16.vlgmr.msra.gmra.mxu1 %vm452_vm1, %v437_v12  ;;  %1452 = vmatprep.mubr.msk.bf16.mxu0 %vm452_vm1, %v438_v22 }
  0x29   : > { %1434 = vmatprep.mubr.msk.bf16.mxu1 %vm452_vm1, %v438_v22 }
  0x2f   : > { %1453 = vmatmul.mubr.msk.bf16.gmra.mxu0 %vm452_vm1, %v439_v28 }
  0x30   : > { %1435 = vmatmul.mubr.msk.bf16.gmra.mxu1 %vm452_vm1, %v439_v28  ;;  %1456 = vmatprep.mubr.msk.bf16.mxu0 %vm452_vm1, %v440_v11 }
  0x31   : > { %1438 = vmatprep.mubr.msk.bf16.mxu1 %vm452_vm1, %v440_v11 }
  0x37   : > { %1457 = vmatmul.mubr.msk.bf16.gmra.mxu0 %vm452_vm1, %v441_v17 }
  0x38   : > { %1439 = vmatmul.mubr.msk.bf16.gmra.mxu1 %vm452_vm1, %v441_v17  ;;  %1460 = vmatprep.mubr.msk.bf16.mxu0 %vm452_vm1, %v442_v23 }
  0x39   : > { %1442 = vmatprep.mubr.msk.bf16.mxu1 %vm452_vm1, %v442_v23  ;;  %v1752_v23 = vld [vmem:[%s1896_s4] ss:$0 sm:$0xff] }
  0x3f   : > { %1461 = vmatmul.mubr.msk.bf16.gmra.mxu0 %vm452_vm1, %v443_v29 }
  0x40   : > { %1443 = vmatmul.mubr.msk.bf16.gmra.mxu1 %vm452_vm1, %v443_v29 }
  0xd7   : > { %v1414_v31 = vpop.f32.mrf.mxu0 }
  0xd8   : > { %v524_v32 = vadd.f32 %v1414_v31, %v1700_v30  ;;  %v1422_v33 = vpop.f32.mrf.mxu1 }
  0xd9   : > { %v556_v34 = vadd.f32 %v1422_v33, %v1700_v30  ;;  %v515_v35 = vpop.f32.mrf.mxu0 }
  0xda   : > { %v796_v36 = vmul.f32 0.35355338, %v524_v32  ;;  %v516_v37 = vadd.f32 %v1700_v30, %v515_v35  ;;  %v547_v38 = vpop.f32.mrf.mxu1 }
  0xdb   : > { %v804_v39 = vmul.f32 0.35355338, %v556_v34  ;;  %v548_v40 = vadd.f32 %v1700_v30, %v547_v38  ;;  %v1415_v41 = vpop.f32.mrf.mxu0 }
  0xdc   : > { %v1337_v42 = vpack.c.bf16 %v796_v36, %v796_v36  ;;  %v794_v43 = vmul.f32 0.35355338, %v516_v37  ;;  %v527_v44 = vadd.f32 %v1415_v41, %v1700_v30  ;;  %v1423_v45 = vpop.f32.mrf.mxu1 }
  0xdd   : > { %v1345_v46 = vpack.c.bf16 %v804_v39, %v804_v39  ;;  %v802_v47 = vmul.f32 0.35355338, %v548_v40  ;;  %v559_v48 = vadd.f32 %v1423_v45, %v1700_v30  ;;  %v518_v49 = vpop.f32.mrf.mxu0 }
  0xde   : > { %877 = vst.msk [vmem:[%s1712_s18 + $0x8] sm:$0xf] %vm874_vm2, %v1337_v42  ;;  %v1335_v50 = vpack.c.bf16 %v794_v43, %v794_v43  ;;  %v797_v51 = vmul.f32 0.35355338, %v527_v44  ;;  %v519_v52 = vadd.f32 %v1700_v30, %v518_v49  ;;  %v550_v53 = vpop.f32.mrf.mxu1 }
  0xdf   : > { %885 = vst.msk [vmem:[%s1712_s18 + $0x28] sm:$0xf] %vm874_vm2, %v1345_v46  ;;  %v1343_v54 = vpack.c.bf16 %v802_v47, %v802_v47  ;;  %v805_v55 = vmul.f32 0.35355338, %v559_v48  ;;  %v551_v56 = vadd.f32 %v1700_v30, %v550_v53  ;;  %v1418_v57 = vpop.f32.mrf.mxu0 }
  0xe0   : > { %875 = vst.msk [vmem:[%s1712_s18] sm:$0xf] %vm874_vm2, %v1335_v50  ;;  %v1338_v58 = vpack.c.bf16 %v797_v51, %v797_v51  ;;  %v795_v59 = vmul.f32 0.35355338, %v519_v52  ;;  %v540_v60 = vadd.f32 %v1418_v57, %v1700_v30  ;;  %v1426_v61 = vpop.f32.mrf.mxu1 }
  0xe1   : > { %883 = vst.msk [vmem:[%s1712_s18 + $0x20] sm:$0xf] %vm874_vm2, %v1343_v54  ;;  %v1346_v62 = vpack.c.bf16 %v805_v55, %v805_v55  ;;  %v803_v63 = vmul.f32 0.35355338, %v551_v56  ;;  %v572_v0 = vadd.f32 %v1426_v61, %v1700_v30  ;;  %v531_v1 = vpop.f32.mrf.mxu0 }
  0xe2   : > { %878 = vst.msk [vmem:[%s1712_s18 + $0xc] sm:$0xf] %vm874_vm2, %v1338_v58  ;;  %v1336_v2 = vpack.c.bf16 %v795_v59, %v795_v59  ;;  %v800_v3 = vmul.f32 0.35355338, %v540_v60  ;;  %v532_v4 = vadd.f32 %v1700_v30, %v531_v1  ;;  %v563_v5 = vpop.f32.mrf.mxu1 }
  0xe3   : > { %886 = vst.msk [vmem:[%s1712_s18 + $0x2c] sm:$0xf] %vm874_vm2, %v1346_v62  ;;  %v1344_v6 = vpack.c.bf16 %v803_v63, %v803_v63  ;;  %v808_v7 = vmul.f32 0.35355338, %v572_v0  ;;  %v564_v8 = vadd.f32 %v1700_v30, %v563_v5  ;;  %v1419_v9 = vpop.f32.mrf.mxu0 }
  0xe4   : > { %876 = vst.msk [vmem:[%s1712_s18 + $0x4] sm:$0xf] %vm874_vm2, %v1336_v2  ;;  %v1341_v10 = vpack.c.bf16 %v800_v3, %v800_v3  ;;  %v798_v11 = vmul.f32 0.35355338, %v532_v4  ;;  %v543_v12 = vadd.f32 %v1419_v9, %v1700_v30  ;;  %v1427_v13 = vpop.f32.mrf.mxu1 }
  0xe5   : > { %884 = vst.msk [vmem:[%s1712_s18 + $0x24] sm:$0xf] %vm874_vm2, %v1344_v6  ;;  %v1349_v14 = vpack.c.bf16 %v808_v7, %v808_v7  ;;  %v806_v15 = vmul.f32 0.35355338, %v564_v8  ;;  %v575_v16 = vadd.f32 %v1427_v13, %v1700_v30  ;;  %v534_v17 = vpop.f32.mrf.mxu0 }
  0xe6   : > { %881 = vst.msk [vmem:[%s1712_s18 + $0x18] sm:$0xf] %vm874_vm2, %v1341_v10  ;;  %v1339_v19 = vpack.c.bf16 %v798_v11, %v798_v11  ;;  %v801_v20 = vmul.f32 0.35355338, %v543_v12  ;;  %v535_v21 = vadd.f32 %v1700_v30, %v534_v17  ;;  %v566_v22 = vpop.f32.mrf.mxu1 }
  0xe7   : > { %889 = vst.msk [vmem:[%s1712_s18 + $0x38] sm:$0xf] %vm874_vm2, %v1349_v14  ;;  %v1347_v24 = vpack.c.bf16 %v806_v15, %v806_v15  ;;  %v809_v25 = vmul.f32 0.35355338, %v575_v16  ;;  %v567_v26 = vadd.f32 %v1700_v30, %v566_v22  ;;  %v1450_v27 = vpop.f32.mrf.mxu0 }
  0xe8   : > { %879 = vst.msk [vmem:[%s1712_s18 + $0x10] sm:$0xf] %vm874_vm2, %v1339_v19  ;;  %v1342_v28 = vpack.c.bf16 %v801_v20, %v801_v20  ;;  %v799_v29 = vmul.f32 0.35355338, %v535_v21  ;;  %v1432_v31 = vpop.f32.mrf.mxu1  ;;  %v740_v32 = vadd.f32 %v1450_v27, %v1744_v18 }
  0xe9   : > { %887 = vst.msk [vmem:[%s1712_s18 + $0x30] sm:$0xf] %vm874_vm2, %v1347_v24  ;;  %v1350_v33 = vpack.c.bf16 %v809_v25, %v809_v25  ;;  %v807_v34 = vmul.f32 0.35355338, %v567_v26  ;;  %v632_v35 = vadd.f32 %v1432_v31, %v1752_v23  ;;  %v731_v30 = vpop.f32.mrf.mxu0 }
  0xea   : > { %882 = vst.msk [vmem:[%s1712_s18 + $0x1c] sm:$0xf] %vm874_vm2, %v1342_v28  ;;  %v1340_v36 = vpack.c.bf16 %v799_v29, %v799_v29  ;;  %v1369_v37 = vpack.c.bf16 %v740_v32, %v740_v32  ;;  %v623_v38 = vpop.f32.mrf.mxu1  ;;  %v732_v39 = vadd.f32 %v1744_v18, %v731_v30 }
  0xeb   : > { %890 = vst.msk [vmem:[%s1712_s18 + $0x3c] sm:$0xf] %vm874_vm2, %v1350_v33  ;;  %v1348_v40 = vpack.c.bf16 %v807_v34, %v807_v34  ;;  %v1353_v41 = vpack.c.bf16 %v632_v35, %v632_v35  ;;  %v624_v42 = vadd.f32 %v1752_v23, %v623_v38  ;;  %v1451_v43 = vpop.f32.mrf.mxu0 }
  0xec   : > { %880 = vst.msk [vmem:[%s1712_s18 + $0x14] sm:$0xf] %vm874_vm2, %v1340_v36  ;;  %1037 = vst.msk [vmem:[%s1767_s25 + $0x8] sm:$0xf] %vm874_vm2, %v1369_v37  ;;  %v1367_v44 = vpack.c.bf16 %v732_v39, %v732_v39  ;;  %v1433_v45 = vpop.f32.mrf.mxu1  ;;  %v743_v46 = vadd.f32 %v1451_v43, %v1744_v18 }
  0xed   : > { %888 = vst.msk [vmem:[%s1712_s18 + $0x34] sm:$0xf] %vm874_vm2, %v1348_v40  ;;  %957 = vst.msk [vmem:[%s1775_s28 + $0x8] sm:$0xf] %vm874_vm2, %v1353_v41  ;;  %v1351_v47 = vpack.c.bf16 %v624_v42, %v624_v42  ;;  %v635_v48 = vadd.f32 %v1433_v45, %v1752_v23  ;;  %v734_v49 = vpop.f32.mrf.mxu0 }
  0xee   : > { %1035 = vst.msk [vmem:[%s1767_s25] sm:$0xf] %vm874_vm2, %v1367_v44  ;;  %v1370_v50 = vpack.c.bf16 %v743_v46, %v743_v46  ;;  %v626_v51 = vpop.f32.mrf.mxu1  ;;  %v735_v52 = vadd.f32 %v1744_v18, %v734_v49 }
  0xef   : > { %955 = vst.msk [vmem:[%s1775_s28] sm:$0xf] %vm874_vm2, %v1351_v47  ;;  %v1354_v53 = vpack.c.bf16 %v635_v48, %v635_v48  ;;  %v627_v54 = vadd.f32 %v1752_v23, %v626_v51  ;;  %v1454_v55 = vpop.f32.mrf.mxu0 }
  0xf0   : > { %1038 = vst.msk [vmem:[%s1767_s25 + $0xc] sm:$0xf] %vm874_vm2, %v1370_v50  ;;  %v1368_v56 = vpack.c.bf16 %v735_v52, %v735_v52  ;;  %v1436_v57 = vpop.f32.mrf.mxu1  ;;  %v756_v58 = vadd.f32 %v1454_v55, %v1744_v18 }
  0xf1   : > { %958 = vst.msk [vmem:[%s1775_s28 + $0xc] sm:$0xf] %vm874_vm2, %v1354_v53  ;;  %v1352_v59 = vpack.c.bf16 %v627_v54, %v627_v54  ;;  %v648_v60 = vadd.f32 %v1436_v57, %v1752_v23  ;;  %v747_v61 = vpop.f32.mrf.mxu0 }
  0xf2   : > { %1036 = vst.msk [vmem:[%s1767_s25 + $0x4] sm:$0xf] %vm874_vm2, %v1368_v56  ;;  %v1373_v62 = vpack.c.bf16 %v756_v58, %v756_v58  ;;  %v639_v63 = vpop.f32.mrf.mxu1  ;;  %v748_v0 = vadd.f32 %v1744_v18, %v747_v61 }
  0xf3   : > { %956 = vst.msk [vmem:[%s1775_s28 + $0x4] sm:$0xf] %vm874_vm2, %v1352_v59  ;;  %v1357_v1 = vpack.c.bf16 %v648_v60, %v648_v60  ;;  %v640_v2 = vadd.f32 %v1752_v23, %v639_v63  ;;  %v1455_v3 = vpop.f32.mrf.mxu0 }
  0xf4   : > { %1041 = vst.msk [vmem:[%s1767_s25 + $0x18] sm:$0xf] %vm874_vm2, %v1373_v62  ;;  %v1371_v4 = vpack.c.bf16 %v748_v0, %v748_v0  ;;  %v1437_v5 = vpop.f32.mrf.mxu1  ;;  %v759_v6 = vadd.f32 %v1455_v3, %v1744_v18 }
  0xf5   : > { %961 = vst.msk [vmem:[%s1775_s28 + $0x18] sm:$0xf] %vm874_vm2, %v1357_v1  ;;  %v1355_v7 = vpack.c.bf16 %v640_v2, %v640_v2  ;;  %v651_v8 = vadd.f32 %v1437_v5, %v1752_v23  ;;  %v750_v9 = vpop.f32.mrf.mxu0 }
  0xf6   : > { %1039 = vst.msk [vmem:[%s1767_s25 + $0x10] sm:$0xf] %vm874_vm2, %v1371_v4  ;;  %v1374_v10 = vpack.c.bf16 %v759_v6, %v759_v6  ;;  %v642_v11 = vpop.f32.mrf.mxu1  ;;  %v751_v12 = vadd.f32 %v1744_v18, %v750_v9 }
  0xf7   : > { %959 = vst.msk [vmem:[%s1775_s28 + $0x10] sm:$0xf] %vm874_vm2, %v1355_v7  ;;  %v1358_v13 = vpack.c.bf16 %v651_v8, %v651_v8  ;;  %v643_v14 = vadd.f32 %v1752_v23, %v642_v11  ;;  %v1458_v15 = vpop.f32.mrf.mxu0 }
  0xf8   : > { %1042 = vst.msk [vmem:[%s1767_s25 + $0x1c] sm:$0xf] %vm874_vm2, %v1374_v10  ;;  %v1372_v16 = vpack.c.bf16 %v751_v12, %v751_v12  ;;  %v1440_v17 = vpop.f32.mrf.mxu1  ;;  %v772_v19 = vadd.f32 %v1458_v15, %v1744_v18 }
  0xf9   : > { %962 = vst.msk [vmem:[%s1775_s28 + $0x1c] sm:$0xf] %vm874_vm2, %v1358_v13  ;;  %v1356_v20 = vpack.c.bf16 %v643_v14, %v643_v14  ;;  %v664_v21 = vadd.f32 %v1440_v17, %v1752_v23  ;;  %v763_v22 = vpop.f32.mrf.mxu0 }
  0xfa   : > { %1040 = vst.msk [vmem:[%s1767_s25 + $0x14] sm:$0xf] %vm874_vm2, %v1372_v16  ;;  %v1377_v24 = vpack.c.bf16 %v772_v19, %v772_v19  ;;  %v655_v25 = vpop.f32.mrf.mxu1  ;;  %v764_v26 = vadd.f32 %v1744_v18, %v763_v22 }
  0xfb   : > { %960 = vst.msk [vmem:[%s1775_s28 + $0x14] sm:$0xf] %vm874_vm2, %v1356_v20  ;;  %v1361_v27 = vpack.c.bf16 %v664_v21, %v664_v21  ;;  %v656_v28 = vadd.f32 %v1752_v23, %v655_v25  ;;  %v1459_v29 = vpop.f32.mrf.mxu0 }
  0xfc   : > { %1045 = vst.msk [vmem:[%s1767_s25 + $0x28] sm:$0xf] %vm874_vm2, %v1377_v24  ;;  %v1375_v31 = vpack.c.bf16 %v764_v26, %v764_v26  ;;  %v1441_v32 = vpop.f32.mrf.mxu1  ;;  %v775_v33 = vadd.f32 %v1459_v29, %v1744_v18 }
  0xfd   : > { %965 = vst.msk [vmem:[%s1775_s28 + $0x28] sm:$0xf] %vm874_vm2, %v1361_v27  ;;  %v1359_v34 = vpack.c.bf16 %v656_v28, %v656_v28  ;;  %v667_v35 = vadd.f32 %v1441_v32, %v1752_v23  ;;  %v766_v30 = vpop.f32.mrf.mxu0 }
  0xfe   : > { %1043 = vst.msk [vmem:[%s1767_s25 + $0x20] sm:$0xf] %vm874_vm2, %v1375_v31  ;;  %v1378_v36 = vpack.c.bf16 %v775_v33, %v775_v33  ;;  %v658_v37 = vpop.f32.mrf.mxu1  ;;  %v767_v38 = vadd.f32 %v1744_v18, %v766_v30 }
  0xff   : > { %963 = vst.msk [vmem:[%s1775_s28 + $0x20] sm:$0xf] %vm874_vm2, %v1359_v34  ;;  %v1362_v39 = vpack.c.bf16 %v667_v35, %v667_v35  ;;  %v659_v40 = vadd.f32 %v1752_v23, %v658_v37  ;;  %v1462_v41 = vpop.f32.mrf.mxu0 }
 0x100   : > { %1046 = vst.msk [vmem:[%s1767_s25 + $0x2c] sm:$0xf] %vm874_vm2, %v1378_v36  ;;  %v1376_v42 = vpack.c.bf16 %v767_v38, %v767_v38  ;;  %v1444_v43 = vpop.f32.mrf.mxu1  ;;  %v788_v44 = vadd.f32 %v1462_v41, %v1744_v18 }
 0x101   : > { %966 = vst.msk [vmem:[%s1775_s28 + $0x2c] sm:$0xf] %vm874_vm2, %v1362_v39  ;;  %v1360_v45 = vpack.c.bf16 %v659_v40, %v659_v40  ;;  %v680_v46 = vadd.f32 %v1444_v43, %v1752_v23  ;;  %v779_v47 = vpop.f32.mrf.mxu0 }
 0x102   : > { %1044 = vst.msk [vmem:[%s1767_s25 + $0x24] sm:$0xf] %vm874_vm2, %v1376_v42  ;;  %v1381_v48 = vpack.c.bf16 %v788_v44, %v788_v44  ;;  %v671_v49 = vpop.f32.mrf.mxu1  ;;  %v780_v50 = vadd.f32 %v1744_v18, %v779_v47 }
 0x103   : > { %964 = vst.msk [vmem:[%s1775_s28 + $0x24] sm:$0xf] %vm874_vm2, %v1360_v45  ;;  %v1365_v51 = vpack.c.bf16 %v680_v46, %v680_v46  ;;  %v672_v52 = vadd.f32 %v1752_v23, %v671_v49  ;;  %v1463_v53 = vpop.f32.mrf.mxu0 }
 0x104   : > { %1049 = vst.msk [vmem:[%s1767_s25 + $0x38] sm:$0xf] %vm874_vm2, %v1381_v48  ;;  %v1379_v54 = vpack.c.bf16 %v780_v50, %v780_v50  ;;  %v1445_v55 = vpop.f32.mrf.mxu1  ;;  %v791_v56 = vadd.f32 %v1463_v53, %v1744_v18 }
 0x105   : > { %969 = vst.msk [vmem:[%s1775_s28 + $0x38] sm:$0xf] %vm874_vm2, %v1365_v51  ;;  %v1363_v57 = vpack.c.bf16 %v672_v52, %v672_v52  ;;  %v683_v58 = vadd.f32 %v1445_v55, %v1752_v23  ;;  %v782_v59 = vpop.f32.mrf.mxu0 }
 0x106   : > { %1047 = vst.msk [vmem:[%s1767_s25 + $0x30] sm:$0xf] %vm874_vm2, %v1379_v54  ;;  %v1382_v60 = vpack.c.bf16 %v791_v56, %v791_v56  ;;  %v674_v61 = vpop.f32.mrf.mxu1  ;;  %v783_v62 = vadd.f32 %v1744_v18, %v782_v59 }
 0x107   : > { %967 = vst.msk [vmem:[%s1775_s28 + $0x30] sm:$0xf] %vm874_vm2, %v1363_v57  ;;  %v1366_v63 = vpack.c.bf16 %v683_v58, %v683_v58  ;;  %v675_v0 = vadd.f32 %v1752_v23, %v674_v61 }
 0x108   : > { %1050 = vst.msk [vmem:[%s1767_s25 + $0x3c] sm:$0xf] %vm874_vm2, %v1382_v60  ;;  %v1380_v1 = vpack.c.bf16 %v783_v62, %v783_v62 }
 0x109   : > { %970 = vst.msk [vmem:[%s1775_s28 + $0x3c] sm:$0xf] %vm874_vm2, %v1366_v63  ;;  %v1364_v2 = vpack.c.bf16 %v675_v0, %v675_v0 }
 0x10a   : > { %1048 = vst.msk [vmem:[%s1767_s25 + $0x34] sm:$0xf] %vm874_vm2, %v1380_v1 }
 0x10b   : > { %968 = vst.msk [vmem:[%s1775_s28 + $0x34] sm:$0xf] %vm874_vm2, %v1364_v2 }
 0x10c PF: > { %s20_s13 = sadd.s32 1, %s1548_s13   ;;  %s1902_s30 = smov %s1540_s11 }
 0x10d   : > { %p17_p7 = scmp.ge.s32.totalorder %s20_s13, 6   ;;  %s1903_s10 = smov %s1544_s12 }
 0x10e   : > { %s1904_s11 = smov %s1907_s14  ;;  %s1905_s12 = smov %s1911_s15 }
 0x10f   :  { %19 = sbr.rel (!%p17_p7) target bundleno = 3 (0x3), region = 102 }

// kernel: mid_block_forward.25
= control target key start
LH: loop header
LB: loop body
LE: loop exit
PB: predicated region body
PF: predicated region fallthrough
CT: control target
= control target key end

     0   :  { %s2351_s21 = smov 0   ;;  %s2353_s22 = smov 0   ;;  %s2969_s0 = inlined_call_operand.vmem [shape: bf16[2,256,8], index: 0, kind: input, shape index: {}]   ;;  %s2970_s1 = inlined_call_operand.vmem [shape: bf16[2,256,8], index: 1, kind: input, shape index: {}]   ;;  %s2971_s2 = inlined_call_operand.vmem [shape: bf16[2,256,8], index: 2, kind: input, shape index: {}]   ;;  %s2972_s3 = inlined_call_operand.vmem [shape: f32[2,256,8], index: 3, kind: input, shape index: {}]   ;;  %s2973_s4 = inlined_call_operand.vmem [shape: bf16[8,8], index: 4, kind: input, shape index: {}]   ;;  %s2974_s5 = inlined_call_operand.vmem [shape: f32[1,8], index: 5, kind: input, shape index: {}]   ;;  %s2975_s6 = inlined_call_operand.vmem [shape: f32[2,256,8], index: 6, kind: output, shape index: {}]  }
   0x1   :  { %s2355_s23 = smov 0   ;;  %s2357_s24 = smov 0  }
   0x2   :  { %s2359_s25 = smov 0   ;;  %s2361_s26 = smov 0  }
   0x3   :  { %s2363_s27 = smov 0  }
   0x4 LB: > { %s28_s28 = sadd.s32 1, %s2298_s24  ;;  %s31_s29 = sadd.s32 1, %s2302_s25  ;;  %s2310_s27 = sphi %s2363_s27, %s16_s27   ;;  %s2306_s26 = sphi %s2361_s26, %s2985_s26   ;;  %s2302_s25 = sphi %s2359_s25, %s2984_s25   ;;  %s2298_s24 = sphi %s2357_s24, %s2983_s24   ;;  %s2294_s23 = sphi %s2355_s23, %s2982_s23   ;;  %s2290_s22 = sphi %s2353_s22, %s2981_s22   ;;  %s2286_s21 = sphi %s2351_s21, %s2980_s21  }
   0x5   : > { %p29_p0 = scmp.ge.s32.totalorder %s28_s28, 2  ;;  %p1876_p1 = scmp.ge.s32.totalorder %s2310_s27, 1 }
   0x6   : > { %p291_p2 = scmp.lt.s32.totalorder %s2310_s27, 9  ;;  %s35_s30 = sadd.s32 1, %s2306_s26 }
   0x7   : > { %s2987_s28 = smov (%p29_p0, %s28_s28), 0  ;;  %s2989_s29 = smov (!%p29_p0, %s31_s29), %s2302_s25 }
   0x8   : > { %p292_p3 = pnand %p1876_p1, %p291_p2  ;;  %p33_p4 = scmp.ge.s32.totalorder %s2989_s29, 2 }
   0x9   : > { %s1877_s7 = sshll.u32 (!%p292_p3), %s2290_s22, 4  ;;  %p357_p6 = scmp.lt.s32.totalorder (!%p292_p3), %s2294_s23, 1 }
   0xa   : > { %s2991_s29 = smov (%p33_p4, %s2989_s29), 0  ;;  %s2993_s30 = smov (!%p33_p4, %s35_s30), %s2306_s26 }
   0xb   : > { %2976 = sst [smem:[#allocation5_spill]] %s2991_s29  ;;  %p37_p5 = scmp.ge.s32.totalorder %s2993_s30, 2 }
   0xc   : > { %295 = sbr.rel (%p292_p3) target bundleno = 1216 (0x4c0), region = 44  ;;  %p359_p7 = scmp.lt.s32.totalorder (!%p292_p3), %s1877_s7, 31 }
   0xd   : > { %s2995_s30 = smov (%p37_p5, %s2993_s30), 0  ;;  %s1880_s8 = sshll.u32 (!%p292_p3), %s2286_s21, 4 }
   0xe   : > { %2977 = sst [smem:[#allocation6_spill]] %s2995_s30  ;;  %p369_p8 = scmp.lt.s32.totalorder (!%p292_p3), %s1880_s8, 31 }
   0xf   : > { %p1892_p9 = scmp.ne.s32.totalorder (!%p292_p3), %s2286_s21, 0 }
  0x11   : > { %s2997_s23 = smov (!%p357_p6, %s2294_s23), 1  ;;  %s2999_s7 = smov (!%p359_p7, %s1877_s7), 31 }
  0x12   : > { %s1878_s9 = sshll.u32 %s2997_s23, 5  ;;  %s3001_s8 = smov (!%p369_p8, %s1880_s8), 31 }
  0x13   : > { %s362_s10 = sadd.s32 %s1878_s9, %s2999_s7  ;;  %s372_s23 = sadd.s32 %s1878_s9, %s3001_s8 }
  0x14   : > { %s1879_s11 = sshll.u32 %s362_s10, 2  ;;  %s1888_s12 = sshll.u32 %s362_s10, 3 }
  0x15   : > { %s2399_s15 = scalar_lea.vmem %s2969_s0, %s1879_s11  ;;  %s2404_s18 = scalar_lea.vmem %s2972_s3, %s1888_s12 }
  0x16   : > { %s2409_s22 = scalar_lea.vmem %s2975_s6, %s1888_s12  ;;  %s1882_s7 = sshll.u32 %s372_s23, 2 }
  0x17   : > { %s2414_s29 = scalar_lea.vmem %s2970_s1, %s1882_s7  ;;  %s2419_s14 = scalar_lea.vmem %s2971_s2, %s1882_s7 }
  0x18   : > { %410 = sbr.rel (%p1892_p9) target bundleno = 54 (0x36), region = 48 }
  0x1d   : > { %vm411_vm0 = vcmask 7168   ;;  %vm444_vm1 = vcmask 64512   ;;  %v2312_v0 = vmov -inf   ;;  %v2313_v1 = vmov 0.0  }
  0x1e   : > { %412 = vst.msk [vmem:[#allocation2] sm:$0xff] %vm411_vm0, %v2312_v0  ;;  %413 = vst.msk [vmem:[#allocation2 + $0x8] sm:$0xff] %vm411_vm0, %v2312_v0 }
  0x1f   : > { %414 = vst.msk [vmem:[#allocation2 + $0x10] sm:$0xff] %vm411_vm0, %v2312_v0  ;;  %415 = vst.msk [vmem:[#allocation2 + $0x18] sm:$0xff] %vm411_vm0, %v2312_v0 }
  0x20   : > { %416 = vst.msk [vmem:[#allocation2 + $0x20] sm:$0xff] %vm411_vm0, %v2312_v0  ;;  %417 = vst.msk [vmem:[#allocation2 + $0x28] sm:$0xff] %vm411_vm0, %v2312_v0 }
  0x21   : > { %418 = vst.msk [vmem:[#allocation2 + $0x30] sm:$0xff] %vm411_vm0, %v2312_v0  ;;  %419 = vst.msk [vmem:[#allocation2 + $0x38] sm:$0xff] %vm411_vm0, %v2312_v0 }
  0x22   : > { %420 = vst.msk [vmem:[#allocation2 + $0x40] sm:$0xff] %vm411_vm0, %v2312_v0  ;;  %421 = vst.msk [vmem:[#allocation2 + $0x48] sm:$0xff] %vm411_vm0, %v2312_v0 }
  0x23   : > { %422 = vst.msk [vmem:[#allocation2 + $0x50] sm:$0xff] %vm411_vm0, %v2312_v0  ;;  %423 = vst.msk [vmem:[#allocation2 + $0x58] sm:$0xff] %vm411_vm0, %v2312_v0 }
  0x24   : > { %424 = vst.msk [vmem:[#allocation2 + $0x60] sm:$0xff] %vm411_vm0, %v2312_v0  ;;  %425 = vst.msk [vmem:[#allocation2 + $0x68] sm:$0xff] %vm411_vm0, %v2312_v0 }
  0x25   : > { %426 = vst.msk [vmem:[#allocation2 + $0x70] sm:$0xff] %vm411_vm0, %v2312_v0  ;;  %427 = vst.msk [vmem:[#allocation2 + $0x78] sm:$0xff] %vm411_vm0, %v2312_v0 }
  0x26   : > { %428 = vst.msk [vmem:[#allocation3] sm:$0xff] %vm411_vm0, %v2313_v1  ;;  %429 = vst.msk [vmem:[#allocation3 + $0x8] sm:$0xff] %vm411_vm0, %v2313_v1 }
  0x27   : > { %430 = vst.msk [vmem:[#allocation3 + $0x10] sm:$0xff] %vm411_vm0, %v2313_v1  ;;  %431 = vst.msk [vmem:[#allocation3 + $0x18] sm:$0xff] %vm411_vm0, %v2313_v1 }
  0x28   : > { %432 = vst.msk [vmem:[#allocation3 + $0x20] sm:$0xff] %vm411_vm0, %v2313_v1  ;;  %433 = vst.msk [vmem:[#allocation3 + $0x28] sm:$0xff] %vm411_vm0, %v2313_v1 }
  0x29   : > { %434 = vst.msk [vmem:[#allocation3 + $0x30] sm:$0xff] %vm411_vm0, %v2313_v1  ;;  %435 = vst.msk [vmem:[#allocation3 + $0x38] sm:$0xff] %vm411_vm0, %v2313_v1 }
  0x2a   : > { %436 = vst.msk [vmem:[#allocation3 + $0x40] sm:$0xff] %vm411_vm0, %v2313_v1  ;;  %437 = vst.msk [vmem:[#allocation3 + $0x48] sm:$0xff] %vm411_vm0, %v2313_v1 }
  0x2b   : > { %438 = vst.msk [vmem:[#allocation3 + $0x50] sm:$0xff] %vm411_vm0, %v2313_v1  ;;  %439 = vst.msk [vmem:[#allocation3 + $0x58] sm:$0xff] %vm411_vm0, %v2313_v1 }
  0x2c   : > { %440 = vst.msk [vmem:[#allocation3 + $0x60] sm:$0xff] %vm411_vm0, %v2313_v1  ;;  %441 = vst.msk [vmem:[#allocation3 + $0x68] sm:$0xff] %vm411_vm0, %v2313_v1 }
  0x2d   : > { %442 = vst.msk [vmem:[#allocation3 + $0x70] sm:$0xff] %vm411_vm0, %v2313_v1  ;;  %443 = vst.msk [vmem:[#allocation3 + $0x78] sm:$0xff] %vm411_vm0, %v2313_v1 }
  0x2e   : > { %445 = vst.msk [vmem:[#allocation4] sm:$0xff] %vm444_vm1, %v2313_v1  ;;  %446 = vst.msk [vmem:[#allocation4 + $0x8] sm:$0xff] %vm444_vm1, %v2313_v1 }
  0x2f   : > { %447 = vst.msk [vmem:[#allocation4 + $0x10] sm:$0xff] %vm444_vm1, %v2313_v1  ;;  %448 = vst.msk [vmem:[#allocation4 + $0x18] sm:$0xff] %vm444_vm1, %v2313_v1 }
  0x30   : > { %449 = vst.msk [vmem:[#allocation4 + $0x20] sm:$0xff] %vm444_vm1, %v2313_v1  ;;  %450 = vst.msk [vmem:[#allocation4 + $0x28] sm:$0xff] %vm444_vm1, %v2313_v1 }
  0x31   : > { %451 = vst.msk [vmem:[#allocation4 + $0x30] sm:$0xff] %vm444_vm1, %v2313_v1  ;;  %452 = vst.msk [vmem:[#allocation4 + $0x38] sm:$0xff] %vm444_vm1, %v2313_v1 }
  0x32   : > { %453 = vst.msk [vmem:[#allocation4 + $0x40] sm:$0xff] %vm444_vm1, %v2313_v1  ;;  %454 = vst.msk [vmem:[#allocation4 + $0x48] sm:$0xff] %vm444_vm1, %v2313_v1 }
  0x33   : > { %455 = vst.msk [vmem:[#allocation4 + $0x50] sm:$0xff] %vm444_vm1, %v2313_v1  ;;  %456 = vst.msk [vmem:[#allocation4 + $0x58] sm:$0xff] %vm444_vm1, %v2313_v1 }
  0x34   : > { %457 = vst.msk [vmem:[#allocation4 + $0x60] sm:$0xff] %vm444_vm1, %v2313_v1  ;;  %458 = vst.msk [vmem:[#allocation4 + $0x68] sm:$0xff] %vm444_vm1, %v2313_v1 }
  0x35   : > { %459 = vst.msk [vmem:[#allocation4 + $0x70] sm:$0xff] %vm444_vm1, %v2313_v1  ;;  %460 = vst.msk [vmem:[#allocation4 + $0x78] sm:$0xff] %vm444_vm1, %v2313_v1 }
  0x36 PF: > { %v2134_v2 = vld [vmem:[%s2414_s29 + $0x38] sm:$0xff]   ;;  %vm573_vm2 = vcmask 64512   ;;  %v2135_v3 = vld [vmem:[%s2414_s29 + $0x30] sm:$0xff]   ;;  %v2136_v5 = vld [vmem:[%s2414_s29 + $0x28] sm:$0xff]   ;;  %v2314_v33 = vmov 0   ;;  %vm1039_vm3 = vcmask 7168  }
  0x37   : > { %2062 = vmatprep.subr.msk.bf16.mxu0 %vm573_vm2, %v2134_v2  ;;  %v620_v4 = vsel %vm573_vm2, %v2134_v2, 0  ;;  %v617_v6 = vsel %vm573_vm2, %v2135_v3, 0  ;;  %v2142_v7 = vld [vmem:[%s2399_s15] sm:$0xff]   ;;  %v614_v8 = vsel %vm573_vm2, %v2136_v5, 0  ;;  %v2138_v11 = vld [vmem:[%s2414_s29 + $0x18] sm:$0xff]   ;;  %v2139_v13 = vld [vmem:[%s2414_s29 + $0x10] sm:$0xff]   ;;  %2133 = vset.pattern.permute.xlu1 %v2314_v33 }
  0x38   : > { %1979 = vmatpush3.bf16.xpose.msra.mxu0 %v620_v4  ;;  %1994 = vmatprep.mubr.msk.bf16.mxu0 %vm573_vm2, %v2142_v7  ;;  %v2137_v9 = vld [vmem:[%s2414_s29 + $0x20] sm:$0xff]   ;;  %v608_v12 = vsel %vm573_vm2, %v2138_v11, 0  ;;  %v605_v14 = vsel %vm573_vm2, %v2139_v13, 0  ;;  %v2140_v15 = vld [vmem:[%s2414_s29 + $0x8] sm:$0xff]   ;;  %v2144_v20 = vld [vmem:[%s2399_s15 + $0x10] sm:$0xff]   ;;  %p1925_p10 = scmp.ne.s32.totalorder %s2286_s21, 1 }
  0x39   : > { %2063 = vmatprep.subr.msk.bf16.mxu0 %vm573_vm2, %v2135_v3  ;;  %v611_v10 = vsel %vm573_vm2, %v2137_v9, 0  ;;  %v602_v16 = vsel %vm573_vm2, %v2140_v15, 0  ;;  %v2141_v17 = vld [vmem:[%s2414_s29] sm:$0xff]   ;;  %v2143_v19 = vld [vmem:[%s2399_s15 + $0x8] sm:$0xff]   ;;  %v2145_v21 = vld [vmem:[%s2399_s15 + $0x18] sm:$0xff]   ;;  %2132 = vset.pattern.permute.xlu0 %v2314_v33 }
  0x3a   : > { %v599_v18 = vsel %vm573_vm2, %v2141_v17, 0  ;;  %v2146_v22 = vld [vmem:[%s2399_s15 + $0x20] sm:$0xff]   ;;  %v2147_v23 = vld [vmem:[%s2399_s15 + $0x28] sm:$0xff]   ;;  %v2148_v24 = vld [vmem:[%s2399_s15 + $0x30] sm:$0xff]  }
  0x3b   : > { %v2149_v25 = vld [vmem:[%s2399_s15 + $0x38] sm:$0xff]   ;;  %v2559_v44 = vld [vmem:[#allocation2 + $0x10] sm:$0xff]  ;;  %v2562_v47 = vld [vmem:[#allocation2] sm:$0xff] }
  0x3c   : > { %v2150_v43 = vld [vmem:[%s2419_s14 + $0x38] sm:$0xff]   ;;  %v2151_v45 = vld [vmem:[%s2419_s14 + $0x30] sm:$0xff]   ;;  %v2152_v51 = vld [vmem:[%s2419_s14 + $0x28] sm:$0xff]  }
  0x3d   : > { %2010 = vmatprep.subr.bf16.mxu1 %v2150_v43  ;;  %v2567_v50 = vld [vmem:[#allocation2 + $0x18] sm:$0xff]  ;;  %v2576_v54 = vld [vmem:[#allocation2 + $0x8] sm:$0xff]  ;;  %v2153_v57 = vld [vmem:[%s2419_s14 + $0x20] sm:$0xff]  }
  0x3e   : > { %2011 = vmatpush3.bf16.msra.mxu1 %v2150_v43  ;;  %v2591_v59 = vld [vmem:[#allocation2 + $0x20] sm:$0xff]  ;;  %v2595_v61 = vld [vmem:[#allocation2 + $0x38] sm:$0xff]  ;;  %v2602_v1 = vld [vmem:[#allocation2 + $0x30] sm:$0xff] }
  0x3f   : > { %2012 = vmatprep.subr.bf16.mxu1 %v2151_v45  ;;  %v2154_v62 = vld [vmem:[%s2419_s14 + $0x18] sm:$0xff]   ;;  %v2609_v4 = vld [vmem:[#allocation2 + $0x28] sm:$0xff] }
  0x40   : > { %1981 = vmatpush3.bf16.xpose.msra.mxu0 %v617_v6 }
  0x41   : > { %2064 = vmatprep.subr.msk.bf16.mxu0 %vm573_vm2, %v2136_v5  ;;  %v2155_v5 = vld [vmem:[%s2419_s14 + $0x10] sm:$0xff]  }
  0x42   : > { %2013 = vmatpush3.bf16.msra.mxu1 %v2151_v45  ;;  %v2656_v45 = vld [vmem:[#allocation2 + $0x78] sm:$0xff] }
  0x43   : > { %2014 = vmatprep.subr.bf16.mxu1 %v2152_v51 }
  0x46   : > { %2015 = vmatpush3.bf16.msra.mxu1 %v2152_v51  ;;  %v2664_v51 = vld [vmem:[#allocation2 + $0x70] sm:$0xff] }
  0x47   : > { %2016 = vmatprep.subr.bf16.mxu1 %v2153_v57 }
  0x48   : > { %1983 = vmatpush3.bf16.xpose.msra.mxu0 %v614_v8  ;;  %v2617_v8 = vld [vmem:[#allocation2 + $0x40] sm:$0xff] }
  0x49   : > { %2065 = vmatprep.subr.msk.bf16.mxu0 %vm573_vm2, %v2137_v9 }
  0x4a   : > { %2017 = vmatpush3.bf16.msra.mxu1 %v2153_v57 }
  0x4b   : > { %2018 = vmatprep.subr.bf16.mxu1 %v2154_v62 }
  0x4e   : > { %2019 = vmatpush3.bf16.msra.mxu1 %v2154_v62 }
  0x4f   : > { %2020 = vmatprep.subr.bf16.mxu1 %v2155_v5 }
  0x50   : > { %1985 = vmatpush3.bf16.xpose.msra.mxu0 %v611_v10 }
  0x51   : > { %2066 = vmatprep.subr.msk.bf16.mxu0 %vm573_vm2, %v2138_v11  ;;  %v2625_v11 = vld [vmem:[#allocation2 + $0x58] sm:$0xff] }
  0x52   : > { %2021 = vmatpush3.bf16.msra.mxu1 %v2155_v5 }
  0x58   : > { %1987 = vmatpush3.bf16.xpose.msra.mxu0 %v608_v12  ;;  %v2156_v12 = vld [vmem:[%s2419_s14 + $0x8] sm:$0xff]  }
  0x59   : > { %2067 = vmatprep.subr.msk.bf16.mxu0 %vm573_vm2, %v2139_v13  ;;  %2022 = vmatprep.subr.bf16.mxu1 %v2156_v12 }
  0x5a   : > { %2023 = vmatpush3.bf16.msra.mxu1 %v2156_v12 }
  0x60   : > { %1989 = vmatpush3.bf16.xpose.msra.mxu0 %v605_v14 }
  0x61   : > { %2068 = vmatprep.subr.msk.bf16.mxu0 %vm573_vm2, %v2140_v15  ;;  %v2633_v15 = vld [vmem:[#allocation2 + $0x50] sm:$0xff] }
  0x68   : > { %1991 = vmatpush3.bf16.xpose.msra.mxu0 %v602_v16 }
  0x69   : > { %2069 = vmatprep.subr.msk.bf16.mxu0 %vm573_vm2, %v2141_v17 }
  0x70   : > { %1993 = vmatpush3.bf16.xpose.msra.mxu0 %v599_v18 }
  0x77   : > { %1995 = vmatmul.mubr.msk.bf16.vlgmr.msra.gmra.mxu0 %vm573_vm2, %v2143_v19  ;;  %v2641_v19 = vld [vmem:[#allocation2 + $0x48] sm:$0xff] }
  0x78   : > { %1998 = vmatprep.mubr.msk.bf16.mxu0 %vm573_vm2, %v2144_v20  ;;  %v2157_v20 = vld [vmem:[%s2419_s14] sm:$0xff]  }
  0x79   : > { %2024 = vmatprep.subr.bf16.mxu1 %v2157_v20 }
  0x7a   : > { %2025 = vmatpush3.bf16.msra.mxu1 %v2157_v20 }
  0x7f   : > { %1999 = vmatmul.mubr.msk.bf16.gmra.mxu0 %vm573_vm2, %v2145_v21 }
  0x80   : > { %2002 = vmatprep.mubr.msk.bf16.mxu0 %vm573_vm2, %v2146_v22 }
  0x87   : > { %2003 = vmatmul.mubr.msk.bf16.gmra.mxu0 %vm573_vm2, %v2147_v23 }
  0x88   : > { %2006 = vmatprep.mubr.msk.bf16.mxu0 %vm573_vm2, %v2148_v24  ;;  %v2650_v24 = vld [vmem:[#allocation2 + $0x60] sm:$0xff] }
  0x8f   : > { %2007 = vmatmul.mubr.msk.bf16.gmra.mxu0 %vm573_vm2, %v2149_v25 }
 0x137   : > { %v2510_v26 = vpop.f32.mrf.mxu0 }
 0x138   : > { %739 = vmax.xlane.f32.xlu1 %v2510_v26 }
 0x139   : > { %v2513_v27 = vpop.f32.mrf.mxu0 }
 0x13a   : > { %735 = vmax.xlane.f32.xlu0 %v2513_v27 }
 0x13b   : > { %v2516_v28 = vpop.f32.mrf.mxu0 }
 0x13c   : > { %741 = vmax.xlane.f32.xlu1 %v2516_v28 }
 0x13d   : > { %v2519_v29 = vpop.f32.mrf.mxu0 }
 0x13e   : > { %737 = vmax.xlane.f32.xlu0 %v2519_v29 }
 0x13f   : > { %v2522_v30 = vpop.f32.mrf.mxu0 }
 0x141   : > { %v2524_v31 = vpop.f32.mrf.mxu0 }
 0x142   : > { %743 = vmax.xlane.f32.xlu0 %v2524_v31 }
 0x143   : > { %v2527_v32 = vpop.f32.mrf.mxu0 }
 0x144   : > { %749 = vmax.xlane.f32.xlu1 %v2527_v32 }
 0x145   : > { %v2530_v34 = vpop.f32.mrf.mxu0 }
 0x146   : > { %747 = vmax.xlane.f32.xlu0 %v2522_v30 }
 0x147   : > { %v2533_v35 = vpop.f32.mrf.mxu0 }
 0x148   : > { %745 = vmax.xlane.f32.xlu1 %v2530_v34 }
 0x149   : > { %v2536_v36 = vpop.f32.mrf.mxu0 }
 0x14a   : > { %751 = vmax.xlane.f32.xlu0 %v2536_v36 }
 0x14b   : > { %v2539_v37 = vpop.f32.mrf.mxu0 }
 0x14c   : > { %757 = vmax.xlane.f32.xlu1 %v2539_v37 }
 0x14d   : > { %v2542_v38 = vpop.f32.mrf.mxu0 }
 0x14e   : > { %755 = vmax.xlane.f32.xlu0 %v2533_v35 }
 0x14f   : > { %v2545_v39 = vpop.f32.mrf.mxu0 }
 0x150   : > { %753 = vmax.xlane.f32.xlu1 %v2542_v38 }
 0x151   : > { %v2548_v40 = vpop.f32.mrf.mxu0 }
 0x152   : > { %759 = vmax.xlane.f32.xlu0 %v2548_v40 }
 0x153   : > { %v2551_v41 = vpop.f32.mrf.mxu0 }
 0x154   : > { %765 = vmax.xlane.f32.xlu1 %v2551_v41 }
 0x155   : > { %v2555_v42 = vpop.f32.mrf.mxu0 }
 0x156   : > { %763 = vmax.xlane.f32.xlu0 %v2545_v39 }
 0x158   : > { %761 = vmax.xlane.f32.xlu1 %v2555_v42 }
 0x1c1   : > { %v740_v46 = vpop.xlane.xlu1 %739 }
 0x1c2   : > { %v2565_v48 = vmax.f32 %v2559_v44, %v740_v46 }
 0x1c3   : > { %v736_v49 = vpop.xlane.xlu0 %735 }
 0x1c4   : > { %1371 = vst.msk [vmem:[#allocation2 + $0x10] sm:$0xff] %vm1039_vm3, %v2565_v48  ;;  %v2573_v52 = vmax.f32 %v2562_v47, %v736_v49  ;;  %843 = vperm.xlu1 %2133, %v2565_v48  }
 0x1c5   : > { %v742_v53 = vpop.xlane.xlu1 %741 }
 0x1c6   : > { %1369 = vst.msk [vmem:[#allocation2] sm:$0xff] %vm1039_vm3, %v2573_v52  ;;  %v2581_v55 = vmax.f32 %v2567_v50, %v742_v53  ;;  %833 = vperm.xlu0 %2132, %v2573_v52   ;;  %v783_v16 = vsub.f32 %v2562_v47, %v2573_v52 }
 0x1c7   : > { %v738_v56 = vpop.xlane.xlu0 %737 }
 0x1c8   : > { %1372 = vst.msk [vmem:[#allocation2 + $0x18] sm:$0xff] %vm1039_vm3, %v2581_v55  ;;  %v2588_v58 = vmax.f32 %v2576_v54, %v738_v56  ;;  %848 = vperm.xlu1 %2133, %v2581_v55   ;;  %v786_v22 = vsub.f32 %v2567_v50, %v2581_v55  ;;  %v799_v25 = vmul.f32 1.442695, %v783_v16  ;;  %v732_v55 = vld [vmem:[#allocation2 + $0x68] sm:$0xff]  ;;  %v785_v56 = vsub.f32 %v2559_v44, %v2565_v48 }
 0x1ca   : > { %1370 = vst.msk [vmem:[#allocation2 + $0x8] sm:$0xff] %vm1039_vm3, %v2588_v58  ;;  %v784_v46 = vsub.f32 %v2576_v54, %v2588_v58  ;;  %v805_v49 = vmul.f32 1.442695, %v786_v22  ;;  %2158 = vpow2.f32 %v799_v25 }
 0x1cb   : > { %v744_v60 = vpop.xlane.xlu0 %743 }
 0x1cc   : > { %v2599_v63 = vmax.f32 %v2591_v59, %v744_v60  ;;  %838 = vperm.xlu1 %2133, %v2588_v58   ;;  %v801_v57 = vmul.f32 1.442695, %v784_v46  ;;  %2160 = vpow2.f32 %v805_v49 }
 0x1cd   : > { %v750_v0 = vpop.xlane.xlu1 %749 }
 0x1ce   : > { %1373 = vst.msk [vmem:[#allocation2 + $0x20] sm:$0xff] %vm1039_vm3, %v2599_v63  ;;  %v2607_v2 = vmax.f32 %v2595_v61, %v750_v0  ;;  %2162 = vpow2.f32 %v801_v57 }
 0x1cf   : > { %v748_v3 = vpop.xlane.xlu0 %747 }
 0x1d0   : > { %1376 = vst.msk [vmem:[#allocation2 + $0x38] sm:$0xff] %vm1039_vm3, %v2607_v2  ;;  %v2615_v6 = vmax.f32 %v2602_v1, %v748_v3  ;;  %v790_v52 = vsub.f32 %v2595_v61, %v2607_v2  ;;  %v787_v3 = vsub.f32 %v2591_v59, %v2599_v63 }
 0x1d1   : > { %v746_v7 = vpop.xlane.xlu1 %745 }
 0x1d2   : > { %1375 = vst.msk [vmem:[#allocation2 + $0x30] sm:$0xff] %vm1039_vm3, %v2615_v6  ;;  %v2622_v9 = vmax.f32 %v2609_v4, %v746_v7  ;;  %863 = vperm.xlu1 %2133, %v2615_v6   ;;  %v813_v62 = vmul.f32 1.442695, %v790_v52  ;;  %v807_v7 = vmul.f32 1.442695, %v787_v3 }
 0x1d3   : > { %v752_v10 = vpop.xlane.xlu0 %751 }
 0x1d4   : > { %1374 = vst.msk [vmem:[#allocation2 + $0x28] sm:$0xff] %vm1039_vm3, %v2622_v9  ;;  %v2631_v13 = vmax.f32 %v2617_v8, %v752_v10  ;;  %v788_v0 = vsub.f32 %v2609_v4, %v2622_v9  ;;  %2164 = vpow2.f32 %v813_v62 }
 0x1d5   : > { %v758_v14 = vpop.xlane.xlu1 %757 }
 0x1d6   : > { %1377 = vst.msk [vmem:[#allocation2 + $0x40] sm:$0xff] %vm1039_vm3, %v2631_v13  ;;  %v778_v17 = vmax.f32 %v2625_v11, %v758_v14  ;;  %853 = vperm.xlu1 %2133, %v2599_v63   ;;  %v809_v5 = vmul.f32 1.442695, %v788_v0  ;;  %v791_v16 = vsub.f32 %v2617_v8, %v2631_v13 }
 0x1d7   : > { %v756_v18 = vpop.xlane.xlu0 %755  ;;  %v2700_v63 = vpop.eup %2158 }
 0x1d8   : > { %1380 = vst.msk [vmem:[#allocation2 + $0x58] sm:$0xff] %vm1039_vm3, %v778_v17  ;;  %v2646_v21 = vmax.f32 %v2633_v15, %v756_v18  ;;  %v794_v4 = vsub.f32 %v2625_v11, %v778_v17  ;;  %v815_v20 = vmul.f32 1.442695, %v791_v16 }
 0x1d9   : > { %v754_v23 = vpop.xlane.xlu1 %753  ;;  %v2705_v14 = vpop.eup %2160 }
 0x1da   : > { %1379 = vst.msk [vmem:[#allocation2 + $0x50] sm:$0xff] %vm1039_vm3, %v2646_v21  ;;  %v776_v33 = vmax.f32 %v2641_v19, %v754_v23  ;;  %858 = vperm.xlu1 %2133, %v2622_v9   ;;  %v789_v9 = vsub.f32 %v2602_v1, %v2615_v6  ;;  %v821_v10 = vmul.f32 1.442695, %v794_v4  ;;  %v793_v11 = vsub.f32 %v2633_v15, %v2646_v21 }
 0x1db   : > { %v760_v43 = vpop.xlane.xlu0 %759  ;;  %v2711_v18 = vpop.eup %2162 }
 0x1dc   : > { %1378 = vst.msk [vmem:[#allocation2 + $0x48] sm:$0xff] %vm1039_vm3, %v776_v33  ;;  %v2662_v47 = vmax.f32 %v2650_v24, %v760_v43  ;;  %878 = vperm.xlu0 %2132, %v776_v33   ;;  %v792_v59 = vsub.f32 %v2641_v19, %v776_v33  ;;  %v811_v12 = vmul.f32 1.442695, %v789_v9 }
 0x1dd   : > { %v766_v50 = vpop.xlane.xlu1 %765 }
 0x1de   : > { %1381 = vst.msk [vmem:[#allocation2 + $0x60] sm:$0xff] %vm1039_vm3, %v2662_v47  ;;  %v2671_v53 = vmax.f32 %v2656_v45, %v766_v50  ;;  %868 = vperm.xlu1 %2133, %v2607_v2   ;;  %v803_v2 = vmul.f32 1.442695, %v785_v56  ;;  %v817_v1 = vmul.f32 1.442695, %v792_v59 }
 0x1df   : > { %v764_v54 = vpop.xlane.xlu0 %763 }
 0x1e0   : > { %v798_v58 = vsub.f32 %v2656_v45, %v2671_v53  ;;  %1384 = vst.msk [vmem:[#allocation2 + $0x78] sm:$0xff] %vm1039_vm3, %v2671_v53  ;;  %v2681_v60 = vmax.f32 %v2664_v51, %v764_v54  ;;  %888 = vperm.xlu0 %2132, %v778_v17   ;;  %2166 = vpow2.f32 %v803_v2  ;;  %v819_v17 = vmul.f32 1.442695, %v793_v11 }
 0x1e1   : > { %v762_v61 = vpop.xlane.xlu1 %761  ;;  %2168 = vpow2.f32 %v809_v5  ;;  %v2714_v19 = vpop.eup %2164 }
 0x1e2   : > { %v797_v44 = vsub.f32 %v2664_v51, %v2681_v60  ;;  %1383 = vst.msk [vmem:[#allocation2 + $0x70] sm:$0xff] %vm1039_vm3, %v2681_v60  ;;  %v780_v48 = vmax.f32 %v732_v55, %v762_v61  ;;  %873 = vperm.xlu1 %2133, %v2631_v13   ;;  %2170 = vpow2.f32 %v807_v7 }
 0x1e3   : > { %2172 = vpow2.f32 %v821_v10 }
 0x1e4   : > { %1382 = vst.msk [vmem:[#allocation2 + $0x68] sm:$0xff] %vm1039_vm3, %v780_v48  ;;  %898 = vperm.xlu0 %2132, %v780_v48   ;;  %v796_v6 = vsub.f32 %v732_v55, %v780_v48  ;;  %2174 = vpow2.f32 %v811_v12 }
 0x1e5   : > { %2176 = vpow2.f32 %v817_v1 }
 0x1e6   : > { %883 = vperm.xlu1 %2133, %v2646_v21   ;;  %v825_v15 = vmul.f32 1.442695, %v796_v6  ;;  %2178 = vpow2.f32 %v819_v17  ;;  %v795_v21 = vsub.f32 %v2650_v24, %v2662_v47 }
 0x1e8   : > { %908 = vperm.xlu0 %2132, %v2671_v53   ;;  %2180 = vpow2.f32 %v825_v15  ;;  %v823_v13 = vmul.f32 1.442695, %v795_v21 }
 0x1e9   : > { %2182 = vpow2.f32 %v815_v20 }
 0x1ea   : > { %893 = vperm.xlu1 %2133, %v2662_v47   ;;  %2184 = vpow2.f32 %v823_v13 }
 0x1ec   : > { %1074 = vperm.xlu0 %2132, %v2700_v63  }
 0x1ed   : > { %v2719_v22 = vpop.eup %2166 }
 0x1ee   : > { %903 = vperm.xlu1 %2133, %v2681_v60   ;;  %v2722_v8 = vpop.eup %2168 }
 0x1ef   : > { %v2725_v23 = vpop.eup %2170 }
 0x1f0   : > { %1089 = vperm.xlu0 %2132, %v2705_v14   ;;  %v2728_v25 = vpop.eup %2172 }
 0x1f1   : > { %v2731_v24 = vpop.eup %2174 }
 0x1f2   : > { %1079 = vperm.xlu1 %2133, %v2711_v18   ;;  %v2734_v33 = vpop.eup %2176 }
 0x1f3   : > { %v2737_v43 = vpop.eup %2178 }
 0x1f4   : > { %1109 = vperm.xlu0 %2132, %v2714_v19  }
 0x1f5   : > { %v2740_v46 = vpop.eup %2180 }
 0x1f6   : > { %1084 = vperm.xlu1 %2133, %v2719_v22   ;;  %v2743_v47 = vpop.eup %2182 }
 0x1f7   : > { %v2746_v49 = vpop.eup %2184 }
 0x1f8   : > { %1099 = vperm.xlu0 %2132, %v2722_v8  }
 0x1fa   : > { %1094 = vperm.xlu1 %2133, %v2725_v23  }
 0x1fc   : > { %1129 = vperm.xlu0 %2132, %v2728_v25  }
 0x1fe   : > { %1104 = vperm.xlu1 %2133, %v2731_v24  }
 0x200   : > { %1119 = vperm.xlu0 %2132, %v2734_v33  }
 0x202   : > { %1124 = vperm.xlu1 %2133, %v2737_v43  }
 0x204   : > { %1139 = vperm.xlu0 %2132, %v2740_v46  }
 0x206   : > { %1114 = vperm.xlu1 %2133, %v2743_v47  }
 0x20a   : > { %1134 = vperm.xlu1 %2133, %v2746_v49  }
 0x23f   : > { %v844_v50 = vpop.permute.xlu1 %843 }
 0x240   : > { %v913_v52 = vsub.f32 %v2510_v26, %v844_v50 }
 0x241   : > { %v834_v54 = vpop.permute.xlu0 %833 }
 0x242   : > { %v931_v55 = vmul.f32 1.442695, %v913_v52  ;;  %v911_v56 = vsub.f32 %v2513_v27, %v834_v54 }
 0x243   : > { %v849_v57 = vpop.permute.xlu1 %848 }
 0x244   : > { %2186 = vpow2.f32 %v931_v55  ;;  %v927_v61 = vmul.f32 1.442695, %v911_v56  ;;  %v914_v62 = vsub.f32 %v2516_v28, %v849_v57 }
 0x246   : > { %2188 = vpow2.f32 %v927_v61  ;;  %v933_v0 = vmul.f32 1.442695, %v914_v62 }
 0x247   : > { %v839_v48 = vpop.permute.xlu1 %838 }
 0x248   : > { %v912_v2 = vsub.f32 %v2519_v29, %v839_v48  ;;  %2190 = vpow2.f32 %v933_v0 }
 0x24a   : > { %v929_v3 = vmul.f32 1.442695, %v912_v2 }
 0x24c   : > { %2192 = vpow2.f32 %v929_v3 }
 0x24d   : > { %v864_v5 = vpop.permute.xlu1 %863 }
 0x24e   : > { %v917_v26 = vsub.f32 %v2522_v30, %v864_v5 }
 0x250   : > { %v939_v4 = vmul.f32 1.442695, %v917_v26 }
 0x251   : > { %v2187_v7 = vpop.eup %2186  ;;  %v854_v9 = vpop.permute.xlu1 %853 }
 0x252   : > { %2194 = vpow2.f32 %v939_v4  ;;  %v915_v27 = vsub.f32 %v2524_v31, %v854_v9  ;;  %995 = vadd.xlane.f32.xlu0 %v2187_v7 }
 0x253   : > { %v2189_v10 = vpop.eup %2188 }
 0x254   : > { %v935_v28 = vmul.f32 1.442695, %v915_v27  ;;  %991 = vadd.xlane.f32.xlu1 %v2189_v10 }
 0x255   : > { %v859_v59 = vpop.permute.xlu1 %858  ;;  %v2191_v12 = vpop.eup %2190 }
 0x256   : > { %2196 = vpow2.f32 %v935_v28  ;;  %v916_v29 = vsub.f32 %v2530_v34, %v859_v59  ;;  %v1169_v20 = vpack.c.bf16 %v2191_v12, %v2187_v7 }
 0x257   : > { %v879_v11 = vpop.permute.xlu0 %878 }
 0x258   : > { %v937_v1 = vmul.f32 1.442695, %v916_v29  ;;  %997 = vadd.xlane.f32.xlu1 %v2191_v12  ;;  %v920_v30 = vsub.f32 %v2542_v38, %v879_v11 }
 0x259   : > { %v2193_v6 = vpop.eup %2192  ;;  %v869_v16 = vpop.permute.xlu1 %868 }
 0x25a   : > { %2198 = vpow2.f32 %v937_v1  ;;  %v918_v17 = vsub.f32 %v2527_v32, %v869_v16  ;;  %993 = vadd.xlane.f32.xlu0 %v2193_v6  ;;  %v1168_v31 = vpack.c.bf16 %v2193_v6, %v2189_v10  ;;  %v945_v13 = vmul.f32 1.442695, %v920_v30 }
 0x25b   : > { %v889_v15 = vpop.permute.xlu0 %888 }
 0x25c   : > { %v941_v21 = vmul.f32 1.442695, %v918_v17  ;;  %2026 = vmatprep.mubr.bf16.mxu1 %v1168_v31  ;;  %v922_v34 = vsub.f32 %v2539_v37, %v889_v15  ;;  %v827_v17 = vmul.f32 1.442695, %v797_v44  ;;  %v829_v31 = vmul.f32 1.442695, %v798_v58 }
 0x25d   : > { %2027 = vmatmul.mubr.bf16.vlgmr.msra.gmra.mxu1 %v1169_v20  ;;  %v874_v50 = vpop.permute.xlu1 %873 }
 0x25e   : > { %2200 = vpow2.f32 %v941_v21  ;;  %v919_v52 = vsub.f32 %v2536_v36, %v874_v50  ;;  %v949_v32 = vmul.f32 1.442695, %v922_v34 }
 0x25f   : > { %v2195_v54 = vpop.eup %2194  ;;  %v899_v38 = vpop.permute.xlu0 %898  ;;  %2202 = vpow2.f32 %v945_v13 }
 0x260   : > { %v943_v55 = vmul.f32 1.442695, %v919_v52  ;;  %1003 = vadd.xlane.f32.xlu0 %v2195_v54  ;;  %v924_v56 = vsub.f32 %v2555_v42, %v899_v38 }
 0x261   : > { %v884_v57 = vpop.permute.xlu1 %883 }
 0x262   : > { %2204 = vpow2.f32 %v943_v55  ;;  %v921_v61 = vsub.f32 %v2533_v35, %v884_v57  ;;  %v953_v48 = vmul.f32 1.442695, %v924_v56  ;;  %v961_v55 = vld [vmem:[#allocation3 + $0x10] sm:$0xff]  ;;  %v959_v56 = vld [vmem:[#allocation3] sm:$0xff] }
 0x263   : > { %v2197_v62 = vpop.eup %2196  ;;  %v909_v0 = vpop.permute.xlu0 %908  ;;  %2206 = vpow2.f32 %v949_v32  ;;  %v977_v57 = vmul.f32 %v2719_v22, %v961_v55 }
 0x264   : > { %v947_v37 = vmul.f32 1.442695, %v921_v61  ;;  %999 = vadd.xlane.f32.xlu0 %v2197_v62  ;;  %v926_v36 = vsub.f32 %v2551_v41, %v909_v0  ;;  %v975_v0 = vmul.f32 %v2700_v63, %v959_v56 }
 0x265   : > { %v894_v2 = vpop.permute.xlu1 %893 }
 0x266   : > { %2208 = vpow2.f32 %v947_v37  ;;  %v923_v3 = vsub.f32 %v2548_v40, %v894_v2  ;;  %v957_v42 = vmul.f32 1.442695, %v926_v36  ;;  %v960_v2 = vld [vmem:[#allocation3 + $0x8] sm:$0xff] }
 0x267   : > { %v2199_v5 = vpop.eup %2198  ;;  %2210 = vpow2.f32 %v953_v48  ;;  %v2777_v21 = vpop.permute.xlu0 %1074  ;;  %v962_v48 = vld [vmem:[#allocation3 + $0x18] sm:$0xff] }
 0x268   : > { %v951_v26 = vmul.f32 1.442695, %v923_v3  ;;  %v1170_v4 = vpack.c.bf16 %v2199_v5, %v2197_v62  ;;  %v978_v3 = vmul.f32 %v2705_v14, %v962_v48 }
 0x269   : > { %v904_v7 = vpop.permute.xlu1 %903 }
 0x26a   : > { %2212 = vpow2.f32 %v951_v26  ;;  %v925_v35 = vsub.f32 %v2545_v39, %v904_v7  ;;  %2030 = vmatprep.mubr.bf16.mxu1 %v1170_v4  ;;  %v976_v4 = vmul.f32 %v2711_v18, %v960_v2  ;;  %v965_v7 = vld [vmem:[#allocation3 + $0x30] sm:$0xff]  ;;  %v966_v18 = vld [vmem:[#allocation3 + $0x38] sm:$0xff] }
 0x26b   : > { %v2201_v9 = vpop.eup %2200  ;;  %2214 = vpow2.f32 %v957_v42  ;;  %v2781_v60 = vpop.permute.xlu0 %1089  ;;  %v981_v63 = vmul.f32 %v2731_v24, %v965_v7 }
 0x26c   : > { %v955_v27 = vmul.f32 1.442695, %v925_v35  ;;  %1005 = vadd.xlane.f32.xlu1 %v2201_v9  ;;  %v1171_v10 = vpack.c.bf16 %v2201_v9, %v2195_v54  ;;  %v2203_v41 = vpop.eup %2202  ;;  %v963_v9 = vld [vmem:[#allocation3 + $0x20] sm:$0xff] }
 0x26d   : > { %v2779_v51 = vpop.permute.xlu1 %1079  ;;  %v979_v14 = vmul.f32 %v2725_v23, %v963_v9  ;;  %v1059_v9 = vld [vmem:[#allocation4 + $0x18] sm:$0xff] }
 0x26e   : > { %2216 = vpow2.f32 %v955_v27  ;;  %2031 = vmatmul.mubr.bf16.gmra.mxu1 %v1171_v10 }
 0x26f   : > { %v2205_v28 = vpop.eup %2204  ;;  %2218 = vpow2.f32 %v827_v17  ;;  %v2785_v13 = vpop.permute.xlu0 %1109  ;;  %v968_v17 = vld [vmem:[#allocation3 + $0x48] sm:$0xff] }
 0x270   : > { %1001 = vadd.xlane.f32.xlu1 %v2199_v5  ;;  %v1172_v40 = vpack.c.bf16 %v2203_v41, %v2205_v28  ;;  %v2207_v59 = vpop.eup %2206  ;;  %2220 = vpow2.f32 %v829_v31  ;;  %v984_v56 = vmul.f32 %v2734_v33, %v968_v17 }
 0x271   : > { %v2783_v44 = vpop.permute.xlu1 %1084 }
 0x272   : > { %2034 = vmatprep.mubr.bf16.mxu1 %v1172_v40 }
 0x273   : > { %v2209_v29 = vpop.eup %2208  ;;  %v2789_v53 = vpop.permute.xlu0 %1099 }
 0x274   : > { %1013 = vadd.xlane.f32.xlu1 %v2207_v59  ;;  %1011 = vadd.xlane.f32.xlu0 %v2209_v29  ;;  %v1173_v12 = vpack.c.bf16 %v2207_v59, %v2209_v29  ;;  %v2211_v11 = vpop.eup %2210  ;;  %v964_v59 = vld [vmem:[#allocation3 + $0x28] sm:$0xff] }
 0x275   : > { %v2787_v45 = vpop.permute.xlu1 %1094  ;;  %v980_v24 = vmul.f32 %v2722_v8, %v964_v59 }
 0x276   : > { %2035 = vmatmul.mubr.bf16.gmra.mxu1 %v1173_v12 }
 0x277   : > { %v2213_v39 = vpop.eup %2212  ;;  %v2793_v34 = vpop.permute.xlu0 %1129 }
 0x278   : > { %1009 = vadd.xlane.f32.xlu1 %v2203_v41  ;;  %1007 = vadd.xlane.f32.xlu0 %v2205_v28  ;;  %v1174_v1 = vpack.c.bf16 %v2211_v11, %v2213_v39  ;;  %v2215_v6 = vpop.eup %2214  ;;  %v982_v28 = vmul.f32 %v2714_v19, %v966_v18  ;;  %v967_v19 = vld [vmem:[#allocation3 + $0x40] sm:$0xff] }
 0x279   : > { %v2791_v58 = vpop.permute.xlu1 %1104  ;;  %v983_v8 = vmul.f32 %v2743_v47, %v967_v19  ;;  %v972_v47 = vld [vmem:[#allocation3 + $0x68] sm:$0xff] }
 0x27a   : > { %2038 = vmatprep.mubr.bf16.mxu1 %v1174_v1 }
 0x27b   : > { %v2217_v30 = vpop.eup %2216  ;;  %v2797_v52 = vpop.permute.xlu0 %1119 }
 0x27c   : > { %1021 = vadd.xlane.f32.xlu1 %v2215_v6  ;;  %1019 = vadd.xlane.f32.xlu0 %v2217_v30  ;;  %v1175_v16 = vpack.c.bf16 %v2215_v6, %v2217_v30  ;;  %v2771_v15 = vpop.eup %2218 }
 0x27d   : > { %v2774_v20 = vpop.eup %2220  ;;  %v2795_v50 = vpop.permute.xlu1 %1124 }
 0x27e   : > { %2039 = vmatmul.mubr.bf16.gmra.mxu1 %v1175_v16 }
 0x27f   : > { %v2801_v38 = vpop.permute.xlu0 %1139 }
 0x280   : > { %1017 = vadd.xlane.f32.xlu1 %v2211_v11  ;;  %1015 = vadd.xlane.f32.xlu0 %v2213_v39  ;;  %v969_v11 = vld [vmem:[#allocation3 + $0x50] sm:$0xff]  ;;  %v970_v39 = vld [vmem:[#allocation3 + $0x58] sm:$0xff] }
 0x281   : > { %v2799_v54 = vpop.permute.xlu1 %1114  ;;  %v985_v23 = vmul.f32 %v2737_v43, %v969_v11  ;;  %v986_v6 = vmul.f32 %v2728_v25, %v970_v39  ;;  %v974_v43 = vld [vmem:[#allocation3 + $0x78] sm:$0xff] }
 0x282   : > { %v990_v48 = vmul.f32 %v2774_v20, %v974_v43 }
 0x285   : > { %v2803_v32 = vpop.permute.xlu1 %1134 }
 0x291   : > { %1144 = vperm.xlu1 %2133, %v2771_v15  }
 0x296   : > { %1149 = vperm.xlu0 %2132, %v2774_v20   ;;  %v1058_v20 = vld [vmem:[#allocation4 + $0x10] sm:$0xff] }
 0x2db   : > { %v996_v61 = vpop.xlane.xlu0 %995 }
 0x2dc   : > { %v1025_v62 = vadd.f32 %v996_v61, %v977_v57 }
 0x2dd   : > { %v992_v37 = vpop.xlane.xlu1 %991 }
 0x2de   : > { %1042 = vst.msk [vmem:[#allocation3 + $0x10] sm:$0xff] %vm1039_vm3, %v1025_v62  ;;  %v1023_v36 = vadd.f32 %v992_v37, %v975_v0  ;;  %v973_v62 = vld [vmem:[#allocation3 + $0x70] sm:$0xff] }
 0x2df   : > { %v989_v37 = vmul.f32 %v2771_v15, %v973_v62  ;;  %v1065_v62 = vld [vmem:[#allocation4 + $0x48] sm:$0xff] }
 0x2e0   : > { %1040 = vst.msk [vmem:[#allocation3] sm:$0xff] %vm1039_vm3, %v1023_v36 }
 0x2e1   : > { %v998_v5 = vpop.xlane.xlu1 %997 }
 0x2e2   : > { %v1026_v26 = vadd.f32 %v998_v5, %v978_v3  ;;  %v971_v3 = vld [vmem:[#allocation3 + $0x60] sm:$0xff] }
 0x2e3   : > { %v994_v42 = vpop.xlane.xlu0 %993 }
 0x2e4   : > { %1043 = vst.msk [vmem:[#allocation3 + $0x18] sm:$0xff] %vm1039_vm3, %v1026_v26  ;;  %v1024_v22 = vadd.f32 %v994_v42, %v976_v4  ;;  %v987_v26 = vmul.f32 %v2746_v49, %v971_v3  ;;  %v988_v4 = vmul.f32 %v2740_v46, %v972_v47  ;;  %v1057_v49 = vld [vmem:[#allocation4 + $0x8] sm:$0xff]  ;;  %v1155_v46 = vmul.f32 %v2781_v60, %v1059_v9  ;;  %v1063_v60 = vld [vmem:[#allocation4 + $0x38] sm:$0xff] }
 0x2e6   : > { %1041 = vst.msk [vmem:[#allocation3 + $0x8] sm:$0xff] %vm1039_vm3, %v1024_v22 }
 0x2e9   : > { %v1004_v35 = vpop.xlane.xlu0 %1003 }
 0x2ea   : > { %v1029_v27 = vadd.f32 %v1004_v35, %v981_v63  ;;  %v1056_v63 = vld [vmem:[#allocation4] sm:$0xff]  ;;  %v1154_v35 = vmul.f32 %v2783_v44, %v1058_v20 }
 0x2ec   : > { %1046 = vst.msk [vmem:[#allocation3 + $0x30] sm:$0xff] %vm1039_vm3, %v1029_v27 }
 0x2ed   : > { %v1000_v10 = vpop.xlane.xlu0 %999 }
 0x2ee   : > { %v1027_v41 = vadd.f32 %v1000_v10, %v979_v14  ;;  %v1152_v14 = vmul.f32 %v2777_v21, %v1056_v63  ;;  %v1062_v21 = vld [vmem:[#allocation4 + $0x30] sm:$0xff] }
 0x2f0   : > { %1044 = vst.msk [vmem:[#allocation3 + $0x20] sm:$0xff] %vm1039_vm3, %v1027_v41 }
 0x2f5   : > { %v1006_v40 = vpop.xlane.xlu1 %1005 }
 0x2f6   : > { %v1030_v29 = vadd.f32 %v1006_v40, %v982_v28  ;;  %v1153_v40 = vmul.f32 %v2779_v51, %v1057_v49 }
 0x2f8   : > { %1047 = vst.msk [vmem:[#allocation3 + $0x38] sm:$0xff] %vm1039_vm3, %v1030_v29 }
 0x2f9   : > { %v1002_v12 = vpop.xlane.xlu1 %1001 }
 0x2fa   : > { %v1028_v1 = vadd.f32 %v1002_v12, %v980_v24  ;;  %v1060_v24 = vld [vmem:[#allocation4 + $0x20] sm:$0xff]  ;;  %v1158_v12 = vmul.f32 %v2791_v58, %v1062_v21 }
 0x2fb   : > { %v1156_v39 = vmul.f32 %v2787_v45, %v1060_v24  ;;  %v1064_v58 = vld [vmem:[#allocation4 + $0x40] sm:$0xff] }
 0x2fc   : > { %1045 = vst.msk [vmem:[#allocation3 + $0x28] sm:$0xff] %vm1039_vm3, %v1028_v1 }
 0x2fd   : > { %v1012_v30 = vpop.xlane.xlu0 %1011  ;;  %v1014_v16 = vpop.xlane.xlu1 %1013 }
 0x2fe   : > { %v1033_v31 = vadd.f32 %v1012_v30, %v985_v23  ;;  %v1034_v55 = vadd.f32 %v1014_v16, %v986_v6  ;;  %v1061_v23 = vld [vmem:[#allocation4 + $0x28] sm:$0xff]  ;;  %v1159_v6 = vmul.f32 %v2785_v13, %v1063_v60  ;;  %v1066_v16 = vld [vmem:[#allocation4 + $0x50] sm:$0xff]  ;;  %v1160_v13 = vmul.f32 %v2799_v54, %v1064_v58 }
 0x2ff   : > { %v1157_v17 = vmul.f32 %v2789_v53, %v1061_v23 }
 0x300   : > { %1050 = vst.msk [vmem:[#allocation3 + $0x50] sm:$0xff] %vm1039_vm3, %v1033_v31  ;;  %1051 = vst.msk [vmem:[#allocation3 + $0x58] sm:$0xff] %vm1039_vm3, %v1034_v55 }
 0x301   : > { %v1008_v57 = vpop.xlane.xlu0 %1007  ;;  %v1010_v61 = vpop.xlane.xlu1 %1009 }
 0x302   : > { %v1031_v0 = vadd.f32 %v1008_v57, %v983_v8  ;;  %v1032_v25 = vadd.f32 %v1010_v61, %v984_v56  ;;  %v1162_v8 = vmul.f32 %v2795_v50, %v1066_v16  ;;  %v1067_v56 = vld [vmem:[#allocation4 + $0x58] sm:$0xff] }
 0x303   : > { %v1163_v53 = vmul.f32 %v2793_v34, %v1067_v56 }
 0x304   : > { %1048 = vst.msk [vmem:[#allocation3 + $0x40] sm:$0xff] %vm1039_vm3, %v1031_v0  ;;  %1049 = vst.msk [vmem:[#allocation3 + $0x48] sm:$0xff] %vm1039_vm3, %v1032_v25  ;;  %v1070_v25 = vld [vmem:[#allocation4 + $0x70] sm:$0xff] }
 0x305   : > { %v1020_v36 = vpop.xlane.xlu0 %1019  ;;  %v1022_v2 = vpop.xlane.xlu1 %1021 }
 0x306   : > { %v1037_v5 = vadd.f32 %v1020_v36, %v989_v37  ;;  %v1038_v33 = vadd.f32 %v1022_v2, %v990_v48  ;;  %v1161_v48 = vmul.f32 %v2797_v52, %v1065_v62  ;;  %v1068_v2 = vld [vmem:[#allocation4 + $0x60] sm:$0xff] }
 0x308   : > { %1054 = vst.msk [vmem:[#allocation3 + $0x70] sm:$0xff] %vm1039_vm3, %v1037_v5  ;;  %1055 = vst.msk [vmem:[#allocation3 + $0x78] sm:$0xff] %vm1039_vm3, %v1038_v33  ;;  %v1071_v5 = vld [vmem:[#allocation4 + $0x78] sm:$0xff] }
 0x309   : > { %v1016_v42 = vpop.xlane.xlu0 %1015  ;;  %v1018_v22 = vpop.xlane.xlu1 %1017 }
 0x30a   : > { %v1035_v7 = vadd.f32 %v1016_v42, %v987_v26  ;;  %v1036_v15 = vadd.f32 %v1018_v22, %v988_v4  ;;  %v1164_v26 = vmul.f32 %v2803_v32, %v1068_v2  ;;  %v1069_v42 = vld [vmem:[#allocation4 + $0x68] sm:$0xff] }
 0x30b   : > { %v1165_v20 = vmul.f32 %v2801_v38, %v1069_v42 }
 0x30c   : > { %1052 = vst.msk [vmem:[#allocation3 + $0x60] sm:$0xff] %vm1039_vm3, %v1035_v7  ;;  %1053 = vst.msk [vmem:[#allocation3 + $0x68] sm:$0xff] %vm1039_vm3, %v1036_v15 }
 0x30d   : > { %v1145_v37 = vpop.permute.xlu1 %1144 }
 0x30e   : > { %v1166_v3 = vmul.f32 %v1145_v37, %v1070_v25 }
 0x311   : > { %v1150_v33 = vpop.permute.xlu0 %1149 }
 0x312   : > { %v1167_v52 = vmul.f32 %v1150_v33, %v1071_v5 }
 0x31d   : > { %v2028_v27 = vpop.f32.mrf.mxu1 }
 0x31e   : > { %v1339_v10 = vadd.f32 %v2028_v27, %v1154_v35 }
 0x31f   : > { %v1274_v41 = vpop.f32.mrf.mxu1 }
 0x320   : > { %1355 = vst.msk [vmem:[#allocation4 + $0x10] sm:$0xff] %vm573_vm2, %v1339_v10  ;;  %v1337_v18 = vadd.f32 %v1274_v41, %v1152_v14 }
 0x321   : > { %v2029_v28 = vpop.f32.mrf.mxu1 }
 0x322   : > { %1353 = vst.msk [vmem:[#allocation4] sm:$0xff] %vm573_vm2, %v1337_v18  ;;  %v1340_v59 = vadd.f32 %v2029_v28, %v1155_v46 }
 0x323   : > { %v1277_v29 = vpop.f32.mrf.mxu1 }
 0x324   : > { %1356 = vst.msk [vmem:[#allocation4 + $0x18] sm:$0xff] %vm573_vm2, %v1340_v59  ;;  %v1338_v44 = vadd.f32 %v1277_v29, %v1153_v40 }
 0x326   : > { %1354 = vst.msk [vmem:[#allocation4 + $0x8] sm:$0xff] %vm573_vm2, %v1338_v44 }
 0x32e   : > { %v2032_v11 = vpop.f32.mrf.mxu1 }
 0x32f   : > { %v1343_v1 = vadd.f32 %v2032_v11, %v1158_v12 }
 0x330   : > { %v1290_v51 = vpop.f32.mrf.mxu1 }
 0x331   : > { %1359 = vst.msk [vmem:[#allocation4 + $0x30] sm:$0xff] %vm573_vm2, %v1343_v1  ;;  %v1341_v30 = vadd.f32 %v1290_v51, %v1156_v39 }
 0x332   : > { %v2033_v19 = vpop.f32.mrf.mxu1 }
 0x333   : > { %1357 = vst.msk [vmem:[#allocation4 + $0x20] sm:$0xff] %vm573_vm2, %v1341_v30  ;;  %v1344_v31 = vadd.f32 %v2033_v19, %v1159_v6 }
 0x334   : > { %v1293_v55 = vpop.f32.mrf.mxu1 }
 0x335   : > { %1360 = vst.msk [vmem:[#allocation4 + $0x38] sm:$0xff] %vm573_vm2, %v1344_v31  ;;  %v1342_v45 = vadd.f32 %v1293_v55, %v1157_v17 }
 0x336   : > { %v2036_v57 = vpop.f32.mrf.mxu1 }
 0x337   : > { %1358 = vst.msk [vmem:[#allocation4 + $0x28] sm:$0xff] %vm573_vm2, %v1342_v45  ;;  %v1347_v61 = vadd.f32 %v2036_v57, %v1162_v8 }
 0x338   : > { %v1306_v43 = vpop.f32.mrf.mxu1 }
 0x339   : > { %1363 = vst.msk [vmem:[#allocation4 + $0x50] sm:$0xff] %vm573_vm2, %v1347_v61  ;;  %v1345_v0 = vadd.f32 %v1306_v43, %v1160_v13 }
 0x33a   : > { %v2037_v50 = vpop.f32.mrf.mxu1 }
 0x33b   : > { %1361 = vst.msk [vmem:[#allocation4 + $0x40] sm:$0xff] %vm573_vm2, %v1345_v0  ;;  %v1348_v36 = vadd.f32 %v2037_v50, %v1163_v53 }
 0x33c   : > { %v1309_v54 = vpop.f32.mrf.mxu1 }
 0x33d   : > { %1364 = vst.msk [vmem:[#allocation4 + $0x58] sm:$0xff] %vm573_vm2, %v1348_v36  ;;  %v1346_v47 = vadd.f32 %v1309_v54, %v1161_v48 }
 0x33e   : > { %v2040_v34 = vpop.f32.mrf.mxu1 }
 0x33f   : > { %1362 = vst.msk [vmem:[#allocation4 + $0x48] sm:$0xff] %vm573_vm2, %v1346_v47  ;;  %v1351_v4 = vadd.f32 %v2040_v34, %v1166_v3 }
 0x340   : > { %v1322_v22 = vpop.f32.mrf.mxu1 }
 0x341   : > { %1367 = vst.msk [vmem:[#allocation4 + $0x70] sm:$0xff] %vm573_vm2, %v1351_v4  ;;  %v1349_v7 = vadd.f32 %v1322_v22, %v1164_v26 }
 0x342   : > { %v2041_v15 = vpop.f32.mrf.mxu1 }
 0x343   : > { %1365 = vst.msk [vmem:[#allocation4 + $0x60] sm:$0xff] %vm573_vm2, %v1349_v7  ;;  %v1352_v63 = vadd.f32 %v2041_v15, %v1167_v52  ;;  %1388 = sbr.rel (%p1925_p10) target bundleno = 1216 (0x4c0), region = 52 }
 0x344   : > { %v1325_v35 = vpop.f32.mrf.mxu1 }
 0x345   : > { %1368 = vst.msk [vmem:[#allocation4 + $0x78] sm:$0xff] %vm573_vm2, %v1352_v63  ;;  %v1350_v9 = vadd.f32 %v1325_v35, %v1165_v20 }
 0x347   : > { %1366 = vst.msk [vmem:[#allocation4 + $0x68] sm:$0xff] %vm573_vm2, %v1350_v9 }
 0x348   : > { %v1413_v32 = vld [vmem:[#allocation3 + $0x40] sm:$0xff]  ;;  %v1414_v14 = vld [vmem:[#allocation3 + $0x48] sm:$0xff]  ;;  %v2315_v10 = vmov 0   ;;  %v1408_v49 = vld [vmem:[#allocation3 + $0x18] sm:$0xff]  ;;  %vm1573_vm4 = vcmask 1043456  }
 0x349   : > { %v1405_v27 = vld [vmem:[#allocation3] sm:$0xff]  ;;  %2223 = vset.pattern.permute.xlu1 %v2315_v10  ;;  %2222 = vset.pattern.permute.xlu0 %v2315_v10  ;;  %2224 = vrcp.f32 %v1413_v32  ;;  %v1406_v38 = vld [vmem:[#allocation3 + $0x8] sm:$0xff]  ;;  %v1407_v41 = vld [vmem:[#allocation3 + $0x10] sm:$0xff] }
 0x34a   : > { %2226 = vrcp.f32 %v1405_v27  ;;  %v1416_v46 = vld [vmem:[#allocation3 + $0x58] sm:$0xff]  ;;  %v1415_v18 = vld [vmem:[#allocation3 + $0x50] sm:$0xff]  ;;  %v1410_v28 = vld [vmem:[#allocation3 + $0x28] sm:$0xff] }
 0x34b   : > { %2228 = vrcp.f32 %v1414_v14  ;;  %v1409_v40 = vld [vmem:[#allocation3 + $0x20] sm:$0xff]  ;;  %v1418_v21 = vld [vmem:[#allocation3 + $0x68] sm:$0xff]  ;;  %v1412_v39 = vld [vmem:[#allocation3 + $0x38] sm:$0xff] }
 0x34c   : > { %2230 = vrcp.f32 %v1406_v38  ;;  %v1417_v12 = vld [vmem:[#allocation3 + $0x60] sm:$0xff]  ;;  %v1411_v51 = vld [vmem:[#allocation3 + $0x30] sm:$0xff]  ;;  %v1420_v30 = vld [vmem:[#allocation3 + $0x78] sm:$0xff] }
 0x34d   : > { %2232 = vrcp.f32 %v1408_v49  ;;  %v1541_v60 = vld [vmem:[%s2973_s4] sm:$0xf]  ;;  %v1419_v19 = vld [vmem:[#allocation3 + $0x70] sm:$0xff]  ;;  %v1398_v43 = vld [vmem:[#allocation4 + $0x48] sm:$0xff] }
 0x34e   : > { %2234 = vrcp.f32 %v1407_v41  ;;  %2070 = vmatprep.subr.msk.bf16.mxu0 %vm1573_vm4, %v1541_v60  ;;  %v1575_v1 = vsel %vm1573_vm4, %v1541_v60, 0  ;;  %2071 = vmatprep.subr.msk.bf16.mxu1 %vm1573_vm4, %v1541_v60  ;;  %v1397_v62 = vld [vmem:[#allocation4 + $0x40] sm:$0xff]  ;;  %v1390_v0 = vld [vmem:[#allocation4 + $0x8] sm:$0xff]  ;;  %v1392_v54 = vld [vmem:[#allocation4 + $0x18] sm:$0xff] }
 0x34f   : > { %2236 = vrcp.f32 %v1416_v46  ;;  %2043 = vmatpush3.bf16.msra.mxu0 %v1575_v1  ;;  %2061 = vmatpush3.bf16.msra.mxu1 %v1575_v1  ;;  %v1389_v53 = vld [vmem:[#allocation4] sm:$0xff]  ;;  %v1391_v3 = vld [vmem:[#allocation4 + $0x10] sm:$0xff]  ;;  %v1400_v42 = vld [vmem:[#allocation4 + $0x58] sm:$0xff] }
 0x350   : > { %2238 = vrcp.f32 %v1415_v18  ;;  %v1399_v22 = vld [vmem:[#allocation4 + $0x50] sm:$0xff]  ;;  %v1394_v35 = vld [vmem:[#allocation4 + $0x28] sm:$0xff]  ;;  %v1393_v9 = vld [vmem:[#allocation4 + $0x20] sm:$0xff] }
 0x351   : > { %2240 = vrcp.f32 %v1410_v28  ;;  %v1402_v49 = vld [vmem:[#allocation4 + $0x68] sm:$0xff]  ;;  %v1401_v41 = vld [vmem:[#allocation4 + $0x60] sm:$0xff]  ;;  %v1403_v1 = vld [vmem:[#allocation4 + $0x70] sm:$0xff] }
 0x352   : > { %2242 = vrcp.f32 %v1409_v40 }
 0x353   : > { %2244 = vrcp.f32 %v1418_v21 }
 0x354   : > { %2246 = vrcp.f32 %v1417_v12 }
 0x355   : > { %2248 = vrcp.f32 %v1412_v39  ;;  %v1404_v39 = vld [vmem:[#allocation4 + $0x78] sm:$0xff] }
 0x356   : > { %v2225_v59 = vpop.eup %2224  ;;  %2250 = vrcp.f32 %v1411_v51 }
 0x357   : > { %v2227_v29 = vpop.eup %2226  ;;  %1479 = vperm.xlu1 %2223, %v2225_v59   ;;  %2252 = vrcp.f32 %v1420_v30 }
 0x358   : > { %v2229_v44 = vpop.eup %2228  ;;  %1439 = vperm.xlu0 %2222, %v2227_v29   ;;  %2254 = vrcp.f32 %v1419_v19  ;;  %v1396_v29 = vld [vmem:[#allocation4 + $0x38] sm:$0xff] }
 0x359   : > { %v2231_v24 = vpop.eup %2230 }
 0x35a   : > { %v2233_v11 = vpop.eup %2232 }
 0x35b   : > { %1484 = vperm.xlu1 %2223, %v2229_v44   ;;  %v2235_v23 = vpop.eup %2234  ;;  %v1395_v44 = vld [vmem:[#allocation4 + $0x30] sm:$0xff] }
 0x35c   : > { %1444 = vperm.xlu0 %2222, %v2231_v24   ;;  %v2237_v6 = vpop.eup %2236 }
 0x35d   : > { %v2239_v16 = vpop.eup %2238 }
 0x35e   : > { %v2241_v17 = vpop.eup %2240 }
 0x35f   : > { %1454 = vperm.xlu1 %2223, %v2233_v11   ;;  %v2243_v31 = vpop.eup %2242 }
 0x360   : > { %1449 = vperm.xlu0 %2222, %v2235_v23   ;;  %v2245_v58 = vpop.eup %2244 }
 0x361   : > { %v2247_v55 = vpop.eup %2246 }
 0x362   : > { %v2249_v8 = vpop.eup %2248 }
 0x363   : > { %1494 = vperm.xlu1 %2223, %v2237_v6   ;;  %v2251_v45 = vpop.eup %2250 }
 0x364   : > { %1489 = vperm.xlu0 %2222, %v2239_v16   ;;  %v2253_v56 = vpop.eup %2252 }
 0x365   : > { %v2255_v57 = vpop.eup %2254 }
 0x367   : > { %1464 = vperm.xlu1 %2223, %v2241_v17   ;;  %v2882_v17 = vld [vmem:[%s2974_s5] ss:$0 sm:$0xff] }
 0x368   : > { %1459 = vperm.xlu0 %2222, %v2243_v31  }
 0x36b   : > { %1504 = vperm.xlu1 %2223, %v2245_v58   ;;  %v1676_v58 = vld [vmem:[%s2404_s18 + $0x10] sm:$0xff] }
 0x36c   : > { %1499 = vperm.xlu0 %2222, %v2247_v55  }
 0x36f   : > { %1474 = vperm.xlu1 %2223, %v2249_v8  }
 0x370   : > { %1469 = vperm.xlu0 %2222, %v2251_v45   ;;  %v1674_v45 = vld [vmem:[%s2404_s18] sm:$0xff] }
 0x373   : > { %1514 = vperm.xlu1 %2223, %v2253_v56  }
 0x374   : > { %1509 = vperm.xlu0 %2222, %v2255_v57  }
 0x3d2   : > { %v1480_v13 = vpop.permute.xlu1 %1479 }
 0x3d3   : > { %v1440_v61 = vpop.permute.xlu0 %1439  ;;  %v1525_v37 = vmul.f32 %v1480_v13, %v1397_v62 }
 0x3d4   : > { %v1517_v36 = vmul.f32 %v1440_v61, %v1389_v53  ;;  %v1677_v61 = vld [vmem:[%s2404_s18 + $0x18] sm:$0xff] }
 0x3d6   : > { %v1485_v25 = vpop.permute.xlu1 %1484 }
 0x3d7   : > { %v1526_v50 = vmul.f32 %v1485_v25, %v1398_v43  ;;  %v1445_v48 = vpop.permute.xlu0 %1444  ;;  %v1684_v43 = vld [vmem:[%s2404_s18 + $0x50] sm:$0xff] }
 0x3d8   : > { %v1518_v2 = vmul.f32 %v1445_v48, %v1390_v0 }
 0x3d9   : > { %v1537_v47 = vpack.c.bf16 %v1526_v50, %v1525_v37  ;;  %v1675_v50 = vld [vmem:[%s2404_s18 + $0x8] sm:$0xff] }
 0x3da   : > { %v1455_v5 = vpop.permute.xlu1 %1454  ;;  %v1533_v33 = vpack.c.bf16 %v1518_v2, %v1517_v36  ;;  %v1682_v36 = vld [vmem:[%s2404_s18 + $0x40] sm:$0xff] }
 0x3db   : > { %v1520_v34 = vmul.f32 %v1455_v5, %v1392_v54  ;;  %v1450_v26 = vpop.permute.xlu0 %1449  ;;  %2052 = vmatprep.mubr.msk.bf16.mxu1 %vm573_vm2, %v1537_v47 }
 0x3dc   : > { %v1519_v4 = vmul.f32 %v1450_v26, %v1391_v3  ;;  %2044 = vmatprep.mubr.msk.bf16.mxu0 %vm573_vm2, %v1533_v33  ;;  %v1685_v33 = vld [vmem:[%s2404_s18 + $0x58] sm:$0xff] }
 0x3de   : > { %v1534_v52 = vpack.c.bf16 %v1520_v34, %v1519_v4  ;;  %v1495_v7 = vpop.permute.xlu1 %1494 }
 0x3df   : > { %v1528_v15 = vmul.f32 %v1495_v7, %v1400_v42  ;;  %v1490_v20 = vpop.permute.xlu0 %1489 }
 0x3e0   : > { %v1527_v63 = vmul.f32 %v1490_v20, %v1399_v22  ;;  %2045 = vmatmul.mubr.msk.bf16.vlgmr.msra.gmra.mxu0 %vm573_vm2, %v1534_v52  ;;  %v1683_v22 = vld [vmem:[%s2404_s18 + $0x48] sm:$0xff] }
 0x3e2   : > { %v1538_v32 = vpack.c.bf16 %v1528_v15, %v1527_v63  ;;  %v1465_v27 = vpop.permute.xlu1 %1464  ;;  %v1680_v63 = vld [vmem:[%s2404_s18 + $0x30] sm:$0xff] }
 0x3e3   : > { %v1522_v14 = vmul.f32 %v1465_v27, %v1394_v35  ;;  %v1460_v10 = vpop.permute.xlu0 %1459 }
 0x3e4   : > { %v1521_v38 = vmul.f32 %v1460_v10, %v1393_v9  ;;  %2053 = vmatmul.mubr.msk.bf16.vlgmr.msra.gmra.mxu1 %vm573_vm2, %v1538_v32  ;;  %v1678_v32 = vld [vmem:[%s2404_s18 + $0x20] sm:$0xff] }
 0x3e6   : > { %v1535_v46 = vpack.c.bf16 %v1522_v14, %v1521_v38  ;;  %v1505_v18 = vpop.permute.xlu1 %1504  ;;  %v1681_v38 = vld [vmem:[%s2404_s18 + $0x38] sm:$0xff] }
 0x3e7   : > { %v1530_v28 = vmul.f32 %v1505_v18, %v1402_v49  ;;  %v1500_v40 = vpop.permute.xlu0 %1499 }
 0x3e8   : > { %v1529_v59 = vmul.f32 %v1500_v40, %v1401_v41  ;;  %2048 = vmatprep.mubr.msk.bf16.mxu0 %vm573_vm2, %v1535_v46  ;;  %v1688_v41 = vld [vmem:[%s2404_s18 + $0x70] sm:$0xff] }
 0x3ea   : > { %v1539_v21 = vpack.c.bf16 %v1530_v28, %v1529_v59  ;;  %v1475_v24 = vpop.permute.xlu1 %1474  ;;  %v1679_v59 = vld [vmem:[%s2404_s18 + $0x28] sm:$0xff] }
 0x3eb   : > { %v1524_v12 = vmul.f32 %v1475_v24, %v1396_v29  ;;  %v1470_v60 = vpop.permute.xlu0 %1469 }
 0x3ec   : > { %v1523_v11 = vmul.f32 %v1470_v60, %v1395_v44  ;;  %2056 = vmatprep.mubr.msk.bf16.mxu1 %vm573_vm2, %v1539_v21  ;;  %v1686_v44 = vld [vmem:[%s2404_s18 + $0x60] sm:$0xff] }
 0x3ee   : > { %v1536_v23 = vpack.c.bf16 %v1524_v12, %v1523_v11  ;;  %v1515_v51 = vpop.permute.xlu1 %1514 }
 0x3ef   : > { %v1532_v6 = vmul.f32 %v1515_v51, %v1404_v39  ;;  %v1510_v30 = vpop.permute.xlu0 %1509  ;;  %v1689_v39 = vld [vmem:[%s2404_s18 + $0x78] sm:$0xff] }
 0x3f0   : > { %v1531_v16 = vmul.f32 %v1510_v30, %v1403_v1  ;;  %2049 = vmatmul.mubr.msk.bf16.gmra.mxu0 %vm573_vm2, %v1536_v23  ;;  %v1687_v30 = vld [vmem:[%s2404_s18 + $0x68] sm:$0xff] }
 0x3f2   : > { %v1540_v19 = vpack.c.bf16 %v1532_v6, %v1531_v16 }
 0x3f4   : > { %2057 = vmatmul.mubr.msk.bf16.gmra.mxu1 %vm573_vm2, %v1540_v19 }
 0x4a0   : > { %v2046_v31 = vpop.f32.mrf.mxu0 }
 0x4a1   : > { %v1620_v55 = vadd.f32 %v2046_v31, %v2882_v17 }
 0x4a2   : > { %v1611_v8 = vpop.f32.mrf.mxu0 }
 0x4a3   : > { %v1692_v56 = vadd.f32 %v1676_v58, %v1620_v55  ;;  %v1612_v57 = vadd.f32 %v2882_v17, %v1611_v8 }
 0x4a4   : > { %v2047_v13 = vpop.f32.mrf.mxu0  ;;  %v2054_v62 = vpop.f32.mrf.mxu1 }
 0x4a5   : > { %1708 = vst.msk [vmem:[%s2409_s22 + $0x10] sm:$0xff] %vm573_vm2, %v1692_v56  ;;  %v1690_v53 = vadd.f32 %v1674_v45, %v1612_v57  ;;  %v1623_v0 = vadd.f32 %v2047_v13, %v2882_v17  ;;  %v1652_v25 = vadd.f32 %v2054_v62, %v2882_v17 }
 0x4a6   : > { %v1614_v37 = vpop.f32.mrf.mxu0  ;;  %v1643_v48 = vpop.f32.mrf.mxu1 }
 0x4a7   : > { %1706 = vst.msk [vmem:[%s2409_s22] sm:$0xff] %vm573_vm2, %v1690_v53  ;;  %v1693_v2 = vadd.f32 %v1677_v61, %v1623_v0  ;;  %v1700_v54 = vadd.f32 %v1684_v43, %v1652_v25  ;;  %v1615_v3 = vadd.f32 %v2882_v17, %v1614_v37  ;;  %v1644_v47 = vadd.f32 %v2882_v17, %v1643_v48 }
 0x4a8   : > { %v2055_v5 = vpop.f32.mrf.mxu1 }
 0x4a9   : > { %1709 = vst.msk [vmem:[%s2409_s22 + $0x18] sm:$0xff] %vm573_vm2, %v1693_v2  ;;  %1716 = vst.msk [vmem:[%s2409_s22 + $0x50] sm:$0xff] %vm573_vm2, %v1700_v54  ;;  %v1691_v34 = vadd.f32 %v1675_v50, %v1615_v3  ;;  %v1698_v26 = vadd.f32 %v1682_v36, %v1644_v47  ;;  %v1655_v4 = vadd.f32 %v2055_v5, %v2882_v17 }
 0x4aa   : > { %v1646_v42 = vpop.f32.mrf.mxu1 }
 0x4ab   : > { %1707 = vst.msk [vmem:[%s2409_s22 + $0x8] sm:$0xff] %vm573_vm2, %v1691_v34  ;;  %1714 = vst.msk [vmem:[%s2409_s22 + $0x40] sm:$0xff] %vm573_vm2, %v1698_v26  ;;  %v1701_v52 = vadd.f32 %v1685_v33, %v1655_v4  ;;  %v1647_v7 = vadd.f32 %v2882_v17, %v1646_v42 }
 0x4ad   : > { %1717 = vst.msk [vmem:[%s2409_s22 + $0x58] sm:$0xff] %vm573_vm2, %v1701_v52  ;;  %v1699_v15 = vadd.f32 %v1683_v22, %v1647_v7 }
 0x4af   : > { %1715 = vst.msk [vmem:[%s2409_s22 + $0x48] sm:$0xff] %vm573_vm2, %v1699_v15 }
 0x4b0   : > { %v2050_v20 = vpop.f32.mrf.mxu0 }
 0x4b1   : > { %v1636_v35 = vadd.f32 %v2050_v20, %v2882_v17 }
 0x4b2   : > { %v1627_v9 = vpop.f32.mrf.mxu0 }
 0x4b3   : > { %v1696_v27 = vadd.f32 %v1680_v63, %v1636_v35  ;;  %v1628_v14 = vadd.f32 %v2882_v17, %v1627_v9 }
 0x4b4   : > { %v2051_v10 = vpop.f32.mrf.mxu0  ;;  %v2058_v49 = vpop.f32.mrf.mxu1 }
 0x4b5   : > { %1712 = vst.msk [vmem:[%s2409_s22 + $0x30] sm:$0xff] %vm573_vm2, %v1696_v27  ;;  %v1694_v46 = vadd.f32 %v1678_v32, %v1628_v14  ;;  %v1639_v18 = vadd.f32 %v2051_v10, %v2882_v17  ;;  %v1668_v28 = vadd.f32 %v2058_v49, %v2882_v17 }
 0x4b6   : > { %v1630_v40 = vpop.f32.mrf.mxu0  ;;  %v1659_v29 = vpop.f32.mrf.mxu1 }
 0x4b7   : > { %1710 = vst.msk [vmem:[%s2409_s22 + $0x20] sm:$0xff] %vm573_vm2, %v1694_v46  ;;  %v1697_v21 = vadd.f32 %v1681_v38, %v1639_v18  ;;  %v1704_v24 = vadd.f32 %v1688_v41, %v1668_v28  ;;  %v1631_v12 = vadd.f32 %v2882_v17, %v1630_v40  ;;  %v1660_v60 = vadd.f32 %v2882_v17, %v1659_v29 }
 0x4b8   : > { %v2059_v11 = vpop.f32.mrf.mxu1 }
 0x4b9   : > { %1713 = vst.msk [vmem:[%s2409_s22 + $0x38] sm:$0xff] %vm573_vm2, %v1697_v21  ;;  %1720 = vst.msk [vmem:[%s2409_s22 + $0x70] sm:$0xff] %vm573_vm2, %v1704_v24  ;;  %v1695_v1 = vadd.f32 %v1679_v59, %v1631_v12  ;;  %v1702_v23 = vadd.f32 %v1686_v44, %v1660_v60  ;;  %v1671_v51 = vadd.f32 %v2059_v11, %v2882_v17 }
 0x4ba   : > { %v1662_v6 = vpop.f32.mrf.mxu1 }
 0x4bb   : > { %1711 = vst.msk [vmem:[%s2409_s22 + $0x28] sm:$0xff] %vm573_vm2, %v1695_v1  ;;  %1718 = vst.msk [vmem:[%s2409_s22 + $0x60] sm:$0xff] %vm573_vm2, %v1702_v23  ;;  %v1705_v16 = vadd.f32 %v1689_v39, %v1671_v51  ;;  %v1663_v19 = vadd.f32 %v2882_v17, %v1662_v6 }
 0x4bd   : > { %1721 = vst.msk [vmem:[%s2409_s22 + $0x78] sm:$0xff] %vm573_vm2, %v1705_v16  ;;  %v1703_v31 = vadd.f32 %v1687_v30, %v1663_v19 }
 0x4bf   : > { %1719 = vst.msk [vmem:[%s2409_s22 + $0x68] sm:$0xff] %vm573_vm2, %v1703_v31 }
 0x4c0 PF: > { %s16_s27 = sadd.s32 1, %s2310_s27   ;;  %s2978_s9 = sld [smem:[#allocation5_spill]] }
 0x4c1   : > { %p13_p11 = scmp.ge.s32.totalorder %s16_s27, 10   ;;  %s2979_s12 = sld [smem:[#allocation6_spill]] }
 0x4c2   : > { %s2980_s21 = smov %s2298_s24  ;;  %s2981_s22 = smov %s2302_s25 }
 0x4c3   : > { %s2982_s23 = smov %s2306_s26  ;;  %s2983_s24 = smov %s2987_s28 }
 0x4c4   :  { %15 = sbr.rel (!%p13_p11) target bundleno = 4 (0x4), region = 91 }
 0x4c6   : > { %s2984_s25 = smov %s2978_s9 }
 0x4c7   : > { %s2985_s26 = smov %s2979_s12 }

</bundles_post_ra>
